<compile_context>
chip_gen: v6e
topology: v6e:2x2x1
jax: 0.10.0
libtpu: 0.0.40
codegen_flags: <defaults>
</compile_context>

<pallas_src>
import functools

import jax
import jax.numpy as jnp
from jax.experimental import pallas as pl
from jax.experimental.pallas import tpu as pltpu


# ----------------------------- small helpers --------------------------------

def _row_tile(M, target=256):
    """Row-tile size: full M when small, otherwise a multiple-of-8 tile."""
    return M if M <= target else target


def _erf_approx(x):
    # Abramowitz & Stegun 7.1.26 (|error| < 1.5e-7): "exact" erf-GELU quality
    # in f32 using only VPU/EUP ops that are guaranteed to lower in Mosaic.
    a1, a2, a3, a4, a5 = (0.254829592, -0.284496736, 1.421413741,
                          -1.453152027, 1.061405429)
    p = 0.3275911
    sgn = jnp.where(x >= 0.0, 1.0, -1.0)
    ax = jnp.abs(x)
    t = 1.0 / (1.0 + p * ax)
    poly = ((((a5 * t + a4) * t + a3) * t + a2) * t + a1) * t
    return sgn * (1.0 - poly * jnp.exp(-ax * ax))


def _gelu_exact(x):
    # PyTorch nn.GELU default (erf form), computed in f32.
    return 0.5 * x * (1.0 + _erf_approx(x * 0.7071067811865476))


# ----------------------------- Pallas kernels -------------------------------

def _linear_kernel(x_ref, w_ref, b_ref, o_ref):
    # o = x @ w + b   (bf16 operands, f32 accumulation)
    x = x_ref[...]
    if x.dtype != jnp.bfloat16:
        x = x.astype(jnp.bfloat16)
    acc = jnp.dot(x, w_ref[...], preferred_element_type=jnp.float32) + b_ref[...]
    o_ref[...] = acc.astype(o_ref.dtype)


def pallas_linear(x, w, b, out_dtype=jnp.float32, tm=256):
    """x: (M, K), w: (K, N) bf16, b: (N,) f32 -> (M, N) out_dtype. Row-tiled."""
    M, K = x.shape
    N = w.shape[1]
    tm = _row_tile(M, tm)
    return pl.pallas_call(
        _linear_kernel,
        out_shape=jax.ShapeDtypeStruct((M, N), out_dtype),
        grid=(pl.cdiv(M, tm),),
        in_specs=[
            pl.BlockSpec((tm, K), lambda i: (i, 0)),
            pl.BlockSpec((K, N), lambda i: (0, 0)),   # weight resident across steps
            pl.BlockSpec((1, N), lambda i: (0, 0)),
        ],
        out_specs=pl.BlockSpec((tm, N), lambda i: (i, 0)),
        compiler_params=pltpu.CompilerParams(dimension_semantics=("parallel",)),
    )(x, w, b.reshape(1, N))


def _ln_linear_kernel(x_ref, g_ref, bln_ref, w_ref, b_ref, o_ref, *, eps, gelu):
    # fused LayerNorm (f32) -> bf16 matmul (f32 acc) -> bias [-> exact GELU]
    x = x_ref[...]
    mu = jnp.mean(x, axis=-1, keepdims=True)
    var = jnp.mean(jnp.square(x - mu), axis=-1, keepdims=True)
    y = (x - mu) * jax.lax.rsqrt(var + eps)
    y = y * g_ref[...] + bln_ref[...]
    acc = jnp.dot(y.astype(jnp.bfloat16), w_ref[...],
                  preferred_element_type=jnp.float32) + b_ref[...]
    if gelu:
        acc = _gelu_exact(acc)
    o_ref[...] = acc.astype(o_ref.dtype)


def pallas_ln_linear(x, g, bln, w, b, *, gelu=False, out_dtype=jnp.bfloat16,
                     eps=1e-6, tm=256):
    """LayerNorm(x) @ w + b (optionally GELU). x: (M, D) f32, w: (D, N) bf16."""
    M, D = x.shape
    N = w.shape[1]
    tm = _row_tile(M, tm)
    return pl.pallas_call(
        functools.partial(_ln_linear_kernel, eps=eps, gelu=gelu),
        out_shape=jax.ShapeDtypeStruct((M, N), out_dtype),
        grid=(pl.cdiv(M, tm),),
        in_specs=[
            pl.BlockSpec((tm, D), lambda i: (i, 0)),
            pl.BlockSpec((1, D), lambda i: (0, 0)),
            pl.BlockSpec((1, D), lambda i: (0, 0)),
            pl.BlockSpec((D, N), lambda i: (0, 0)),
            pl.BlockSpec((1, N), lambda i: (0, 0)),
        ],
        out_specs=pl.BlockSpec((tm, N), lambda i: (i, 0)),
        compiler_params=pltpu.CompilerParams(dimension_semantics=("parallel",)),
    )(x, g.reshape(1, D), bln.reshape(1, D), w, b.reshape(1, N))


def _linear_res_kernel(x_ref, w_ref, b_ref, r_ref, o_ref):
    # o = residual + (x @ w + b)   (bf16 operands, f32 acc + f32 residual)
    x = x_ref[...]
    if x.dtype != jnp.bfloat16:
        x = x.astype(jnp.bfloat16)
    acc = jnp.dot(x, w_ref[...], preferred_element_type=jnp.float32) + b_ref[...]
    o_ref[...] = (r_ref[...] + acc).astype(o_ref.dtype)


def pallas_linear_residual(x, w, b, res, tm=256):
    """x: (M, K) bf16, w: (K, N) bf16, b: (N,) f32, res: (M, N) f32 -> f32."""
    M, K = x.shape
    N = w.shape[1]
    tm = _row_tile(M, tm)
    return pl.pallas_call(
        _linear_res_kernel,
        out_shape=jax.ShapeDtypeStruct((M, N), jnp.float32),
        grid=(pl.cdiv(M, tm),),
        in_specs=[
            pl.BlockSpec((tm, K), lambda i: (i, 0)),
            pl.BlockSpec((K, N), lambda i: (0, 0)),
            pl.BlockSpec((1, N), lambda i: (0, 0)),
            pl.BlockSpec((tm, N), lambda i: (i, 0)),
        ],
        out_specs=pl.BlockSpec((tm, N), lambda i: (i, 0)),
        compiler_params=pltpu.CompilerParams(dimension_semantics=("parallel",)),
    )(x, w, b.reshape(1, N), res)


def _attn_pair_kernel(q_ref, k_ref, v_ref, o_ref, *, dh, scale):
    # One (batch, head-pair) step: two heads packed into 128 lanes.
    q = q_ref[0]          # (S, 2*dh) bf16
    k = k_ref[0]
    v = v_ref[0]

    def one_head(h):
        # pre-scale q (S x dh) instead of the S x S score matrix
        qh = (q[:, h * dh:(h + 1) * dh].astype(jnp.float32) * scale
              ).astype(jnp.bfloat16)
        kh = k[:, h * dh:(h + 1) * dh]
        vh = v[:, h * dh:(h + 1) * dh]
        # contract last dims of q and k directly (no k.T transpose copy)
        s = jax.lax.dot_general(qh, kh, (((1,), (1,)), ((), ())),
                                preferred_element_type=jnp.float32)
        s = s - jnp.max(s, axis=-1, keepdims=True)
        p = jnp.exp(s)                                        # f32 softmax
        r = pl.reciprocal(jnp.sum(p, axis=-1, keepdims=True), approx=True)
        o = jax.lax.dot_general(p.astype(vh.dtype), vh, (((1,), (0,)), ((), ())),
                                preferred_element_type=jnp.float32)
        return o * r                                          # normalize S x dh

    o_ref[0] = jnp.concatenate([one_head(0), one_head(1)], axis=-1
                               ).astype(o_ref.dtype)


def pallas_attention(qkv, num_heads, scale):
    """qkv: (B, S, 3*D) bf16 -> (B, S, D) bf16 with heads concatenated on -1.

    q/k/v per head-pair are fetched straight from the qkv slab via
    column-sliced BlockSpecs (no reshape/transpose HBM copies).
    """
    B, S, threeD = qkv.shape
    D = threeD // 3
    dh = D // num_heads
    col = 2 * dh                         # 2 heads per grid step -> 128 lanes
    assert num_heads % 2 == 0 and col % 128 == 0 and D % col == 0
    HP = num_heads // 2

    def spec(block_off):
        return pl.BlockSpec((1, S, col), lambda b, hp: (b, 0, block_off + hp))

    # TODO(synk): for realistic sequence lengths (img 224, many frames =>
    # S in the thousands) switch to flash-style online softmax with an
    # "arbitrary" KV grid axis so the S x S scores never live in VMEM (v7x
    # 64 MiB).  At these shapes the full-S scores fit comfortably.
    return pl.pallas_call(
        functools.partial(_attn_pair_kernel, dh=dh, scale=scale),
        out_shape=jax.ShapeDtypeStruct((B, S, D), jnp.bfloat16),
        grid=(B, HP),
        in_specs=[spec(0), spec(D // col), spec(2 * (D // col))],
        out_specs=pl.BlockSpec((1, S, col), lambda b, hp: (b, 0, hp)),
        compiler_params=pltpu.CompilerParams(
            dimension_semantics=("parallel", "parallel")),
    )(qkv, qkv, qkv)


# --------------------------- parameter creation ------------------------------

def init_params(key, cfg):
    D = cfg["embed_dim"]
    depth = cfg["depth"]
    P = cfg["patch_size"]
    C = cfg["in_chans"]
    N = (cfg["img_size"] // P) ** 2
    hidden = int(D * cfg["mlp_ratio"])

    keys = jax.random.split(key, 8 + depth)

    def nrm(k, shape, s=0.02, dtype=jnp.float32):
        return (s * jax.random.normal(k, shape)).astype(dtype)

    params = {
        # Conv2d(3, D, 16, 16) weight flattened to (C*P*P, D) (im2col layout).
        "patch_w": nrm(keys[0], (C * P * P, D), dtype=jnp.bfloat16),
        "patch_b": jnp.zeros((D,), jnp.float32),
        "cls_token": nrm(keys[1], (1, 1, D)),
        "pos_embed": nrm(keys[2], (1, N + 1, D)),
        "time_embed": nrm(keys[3], (1, cfg["num_frames"], D)),
        "resPrompt_token": nrm(keys[4], (1, cfg["num_prompts"], D)),
        "norm_g": jnp.ones((D,), jnp.float32),
        "norm_b": jnp.zeros((D,), jnp.float32),
        # head_resPrompt: Linear(embed_dim, actual_num_classes); tiny -> XLA.
        "head_w": nrm(keys[5], (D, cfg["num_classes"])),
        "head_b": jnp.zeros((cfg["num_classes"],), jnp.float32),
        "blocks": [],
    }
    for i in range(depth):
        bk = jax.random.split(keys[8 + i], 4)
        params["blocks"].append(
            {
                "ln1_g": jnp.ones((D,), jnp.float32),
                "ln1_b": jnp.zeros((D,), jnp.float32),
                "qkv_w": nrm(bk[0], (D, 3 * D), dtype=jnp.bfloat16),
                "qkv_b": jnp.zeros((3 * D,), jnp.float32),
                "proj_w": nrm(bk[1], (D, D), dtype=jnp.bfloat16),
                "proj_b": jnp.zeros((D,), jnp.float32),
                "ln2_g": jnp.ones((D,), jnp.float32),
                "ln2_b": jnp.zeros((D,), jnp.float32),
                "fc1_w": nrm(bk[2], (D, hidden), dtype=jnp.bfloat16),
                "fc1_b": jnp.zeros((hidden,), jnp.float32),
                "fc2_w": nrm(bk[3], (hidden, D), dtype=jnp.bfloat16),
                "fc2_b": jnp.zeros((D,), jnp.float32),
            }
        )
    return params


# ------------------------------ forward pass ---------------------------------

def model_forward(params, x, cfg):
    """x: (B, C, T, H, W) f32 video.  Returns x_resPrompt[-1]: (B, num_classes)."""
    B, C, T, H, W = x.shape
    P = cfg["patch_size"]
    D = cfg["embed_dim"]
    Hp, Wp = H // P, W // P
    N = Hp * Wp
    num_heads = cfg["num_heads"]
    Dh = D // num_heads
    scale = Dh ** -0.5
    num_prompts = cfg["num_prompts"]

    # ---- PatchEmbed: 'b c t h w -> (b t) c h w', Conv2d(k=16,s=16) as im2col matmul
    xp = jnp.transpose(x, (0, 2, 1, 3, 4))                 # (B, T, C, H, W)
    xp = xp.reshape(B * T, C, Hp, P, Wp, P)
    xp = jnp.transpose(xp, (0, 2, 4, 1, 3, 5))             # (BT, Hp, Wp, C, P, P)
    xp = xp.reshape(B * T * N, C * P * P)
    xp = pallas_linear(xp, params["patch_w"], params["patch_b"],
                       out_dtype=jnp.float32)
    xp = xp.reshape(B * T, N, D)                           # (BT, N, D)

    # ---- cls token + spatial positional embedding
    cls = jnp.broadcast_to(params["cls_token"], (B * T, 1, D))
    xt = jnp.concatenate([cls, xp], axis=1)                # (BT, 1+N, D)
    xt = xt + params["pos_embed"]

    # ---- time embedding (joint_space_time attention type)
    # TODO(synk): 'divided_space_time' temporal-attention branch (temporal_fc etc.)
    # of TimeSformer is not reconstructed; joint_space_time is used instead.
    # cls selection matches the TimeSformer reference `cls_tokens = x[:B, 0, :]`
    # (all rows hold identical cls values at this point, so this is exact).
    cls_b = xt[:B, 0:1, :]                                 # (B, 1, D)
    xs = xt[:, 1:, :]                                      # (BT, N, D)
    xs = xs.reshape(B, T, N, D).transpose(0, 2, 1, 3)      # (B, N, T, D)
    xs = xs + params["time_embed"]                         # broadcast (1, T, D)
    xs = xs.reshape(B, N * T, D)                           # '(b n) t m -> b (n t) m'
    xt = jnp.concatenate([cls_b, xs], axis=1)              # (B, 1+N*T, D)

    # ---- prepend resPrompt token(s)
    prompt = jnp.broadcast_to(params["resPrompt_token"], (B, num_prompts, D))
    h = jnp.concatenate([prompt, xt], axis=1)              # (B, num_prompts+1+N*T, D)
    S = h.shape[1]
    h = h.reshape(B * S, D)                                # f32 residual stream

    # ---- transformer blocks (pre-LN, MHSA, MLP-GELU; drop-path = identity in eval)
    for blk in params["blocks"]:
        # fused LN1 + QKV projection  -> (B*S, 3D) bf16
        qkv = pallas_ln_linear(h, blk["ln1_g"], blk["ln1_b"],
                               blk["qkv_w"], blk["qkv_b"],
                               gelu=False, out_dtype=jnp.bfloat16)
        # multi-head attention straight off the qkv slab -> (B, S, D) bf16
        attn = pallas_attention(qkv.reshape(B, S, 3 * D), num_heads, scale)
        # fused proj + bias + residual add -> f32 residual stream
        h = pallas_linear_residual(attn.reshape(B * S, D),
                                   blk["proj_w"], blk["proj_b"], h)

        # fused LN2 + fc1 + GELU -> (B*S, 4D) bf16 (hidden never hits HBM in f32)
        hid = pallas_ln_linear(h, blk["ln2_g"], blk["ln2_b"],
                               blk["fc1_w"], blk["fc1_b"],
                               gelu=True, out_dtype=jnp.bfloat16)
        # fused fc2 + bias + residual add
        h = pallas_linear_residual(hid, blk["fc2_w"], blk["fc2_b"], h)

    # ---- final norm + resPrompt classification head.  Only the prompt token is
    # needed (LayerNorm is per-row, so restricting it to the prompt rows gives
    # the same values); this and the 10-class head are tiny -> plain XLA.
    # TODO(synk): layer_wise_tokens / attention_maps outputs are not reconstructed
    # (discarded by the outer module's forward anyway).
    h = h.reshape(B, S, D)
    pt = h[:, :num_prompts, :]                              # (B, num_prompts, D)
    mu = jnp.mean(pt, axis=-1, keepdims=True)
    var = jnp.mean(jnp.square(pt - mu), axis=-1, keepdims=True)
    pt = (pt - mu) * jax.lax.rsqrt(var + 1e-6) * params["norm_g"] + params["norm_b"]
    prompt_tok = jnp.mean(pt, axis=1)                       # (B, D)
    logits = prompt_tok @ params["head_w"] + params["head_b"]
    return logits


# ---------------------------------- main -------------------------------------

if __name__ == "__main__":
    # Small-but-faithful config: DeiT-small dims (384 / 12 / 6, mlp x4), patch 16,
    # tiny 32x32 frames (N=4 patches/frame), 2 frames, 1 prompt token, 10 classes.
    cfg = dict(
        img_size=32,
        patch_size=16,
        in_chans=3,
        embed_dim=384,
        depth=12,
        num_heads=6,
        mlp_ratio=4.0,
        num_frames=2,
        num_prompts=1,
        num_classes=10,       # cfg.MODEL.NUM_CLASSES (actual_num_classes)
    )

    key = jax.random.PRNGKey(0)
    pkey, xkey = jax.random.split(key)
    params = init_params(pkey, cfg)

    B = 2
    x = jax.random.normal(
        xkey,
        (B, cfg["in_chans"], cfg["num_frames"], cfg["img_size"], cfg["img_size"]),
        dtype=jnp.float32,
    )

    fwd = jax.jit(functools.partial(model_forward, cfg=cfg))
    out = fwd(params, x)
    out = jax.block_until_ready(out)
    assert out.shape == (B, cfg["num_classes"]), out.shape
    assert out.dtype == jnp.float32
    print("KERNEL_OK")
</pallas_src>

<mosaic_0001>
module attributes {stable_mosaic.version = 11 : i64} {
  func.func @_linear_kernel(%arg0: i32, %arg1: memref<16x768xf32, #tpu.memory_space<vmem>>, %arg2: memref<768x384xbf16, #tpu.memory_space<vmem>>, %arg3: memref<1x384xf32, #tpu.memory_space<vmem>>, %arg4: memref<16x384xf32, #tpu.memory_space<vmem>>) attributes {dimension_semantics = [#tpu.dimension_semantics<parallel>], iteration_bounds = array<i64: 1>, scalar_prefetch = 0 : i64, scratch_operands = 0 : i64, tpu.core_type = #tpu.core_type<tc>, window_params = [{transform_indices = @transform_0, window_bounds = array<i64: 16, 768>}, {pipeline_mode = #tpu.pipeline_mode<synchronous>, transform_indices = @transform_1, window_bounds = array<i64: 768, 384>}, {pipeline_mode = #tpu.pipeline_mode<synchronous>, transform_indices = @transform_2, window_bounds = array<i64: 1, 384>}, {transform_indices = @transform_3, window_bounds = array<i64: 16, 384>}]} {
    %c0 = arith.constant 0 : index
    %c0_0 = arith.constant 0 : index
    %0 = vector.load %arg1[%c0, %c0_0] : memref<16x768xf32, #tpu.memory_space<vmem>>, vector<16x768xf32>
    %1 = arith.truncf %0 : vector<16x768xf32> to vector<16x768xbf16>
    %c0_1 = arith.constant 0 : index
    %c0_2 = arith.constant 0 : index
    %2 = vector.load %arg2[%c0_1, %c0_2] : memref<768x384xbf16, #tpu.memory_space<vmem>>, vector<768x384xbf16>
    %cst = arith.constant dense<0.000000e+00> : vector<16x384xf32>
    %3 = tpu.matmul %1, %2, %cst {dimension_numbers = #tpu.dot_dimension_numbers<[1], [0], [0], [1], [0, 0, 1, 1], [], []>} : vector<16x768xbf16>, vector<768x384xbf16>, vector<16x384xf32> -> vector<16x384xf32>
    %c0_3 = arith.constant 0 : index
    %c0_4 = arith.constant 0 : index
    %4 = vector.load %arg3[%c0_3, %c0_4] : memref<1x384xf32, #tpu.memory_space<vmem>>, vector<1x384xf32>
    %5 = vector.broadcast %4 : vector<1x384xf32> to vector<16x384xf32>
    %6 = arith.addf %3, %5 : vector<16x384xf32>
    %c0_5 = arith.constant 0 : index
    %c0_6 = arith.constant 0 : index
    %7 = vector.load %arg4[%c0_5, %c0_6] : memref<16x384xf32, #tpu.memory_space<vmem>>, vector<16x384xf32>
    tpu.vector_store %arg4[%c0_5, %c0_6], %6 {strides = array<i32>} : memref<16x384xf32, #tpu.memory_space<vmem>>, vector<16x384xf32>,
    return
  }
  func.func @transform_0(%arg0: i32) -> (i32, i32) {
    %c0_i32 = arith.constant 0 : i32
    %c0_i32_0 = arith.constant 0 : i32
    return %arg0, %c0_i32 : i32, i32
  }
  func.func @transform_1(%arg0: i32) -> (i32, i32) {
    %c0_i32 = arith.constant 0 : i32
    %c0_i32_0 = arith.constant 0 : i32
    %c0_i32_1 = arith.constant 0 : i32
    return %c0_i32, %c0_i32_0 : i32, i32
  }
  func.func @transform_2(%arg0: i32) -> (i32, i32) {
    %c0_i32 = arith.constant 0 : i32
    %c0_i32_0 = arith.constant 0 : i32
    %c0_i32_1 = arith.constant 0 : i32
    return %c0_i32, %c0_i32_0 : i32, i32
  }
  func.func @transform_3(%arg0: i32) -> (i32, i32) {
    %c0_i32 = arith.constant 0 : i32
    %c0_i32_0 = arith.constant 0 : i32
    return %arg0, %c0_i32 : i32, i32
  }
}

module attributes {stable_mosaic.version = 11 : i64} {
  func.func @_ln_linear_kernel(%arg0: i32, %arg1: memref<20x384xf32, #tpu.memory_space<vmem>>, %arg2: memref<1x384xf32, #tpu.memory_space<vmem>>, %arg3: memref<1x384xf32, #tpu.memory_space<vmem>>, %arg4: memref<384x1152xbf16, #tpu.memory_space<vmem>>, %arg5: memref<1x1152xf32, #tpu.memory_space<vmem>>, %arg6: memref<20x1152xbf16, #tpu.memory_space<vmem>>) attributes {dimension_semantics = [#tpu.dimension_semantics<parallel>], iteration_bounds = array<i64: 1>, scalar_prefetch = 0 : i64, scratch_operands = 0 : i64, tpu.core_type = #tpu.core_type<tc>, window_params = [{transform_indices = @transform_0, window_bounds = array<i64: 20, 384>}, {pipeline_mode = #tpu.pipeline_mode<synchronous>, transform_indices = @transform_1, window_bounds = array<i64: 1, 384>}, {pipeline_mode = #tpu.pipeline_mode<synchronous>, transform_indices = @transform_2, window_bounds = array<i64: 1, 384>}, {pipeline_mode = #tpu.pipeline_mode<synchronous>, transform_indices = @transform_3, window_bounds = array<i64: 384, 1152>}, {pipeline_mode = #tpu.pipeline_mode<synchronous>, transform_indices = @transform_4, window_bounds = array<i64: 1, 1152>}, {transform_indices = @transform_5, window_bounds = array<i64: 20, 1152>}]} {
    %c0 = arith.constant 0 : index
    %c0_0 = arith.constant 0 : index
    %0 = vector.load %arg1[%c0, %c0_0] : memref<20x384xf32, #tpu.memory_space<vmem>>, vector<20x384xf32>
    %cst = arith.constant dense<0.000000e+00> : vector<20xf32>
    %1 = vector.multi_reduction <add>, %0, %cst [1] : vector<20x384xf32> to vector<20xf32>
    %2 = vector.shape_cast %1 : vector<20xf32> to vector<20x1xf32>
    %cst_1 = arith.constant 3.840000e+02 : f32
    %3 = vector.broadcast %cst_1 : f32 to vector<20x1xf32>
    %4 = arith.divf %2, %3 : vector<20x1xf32>
    %5 = vector.broadcast %4 : vector<20x1xf32> to vector<20x384xf32>
    %6 = arith.subf %0, %5 : vector<20x384xf32>
    %7 = arith.mulf %6, %6 : vector<20x384xf32>
    %cst_2 = arith.constant dense<0.000000e+00> : vector<20xf32>
    %8 = vector.multi_reduction <add>, %7, %cst_2 [1] : vector<20x384xf32> to vector<20xf32>
    %9 = vector.shape_cast %8 : vector<20xf32> to vector<20x1xf32>
    %cst_3 = arith.constant 3.840000e+02 : f32
    %10 = vector.broadcast %cst_3 : f32 to vector<20x1xf32>
    %11 = arith.divf %9, %10 : vector<20x1xf32>
    %12 = vector.broadcast %4 : vector<20x1xf32> to vector<20x384xf32>
    %13 = arith.subf %0, %12 : vector<20x384xf32>
    %cst_4 = arith.constant 9.99999997E-7 : f32
    %14 = vector.broadcast %cst_4 : f32 to vector<20x1xf32>
    %15 = arith.addf %11, %14 : vector<20x1xf32>
    %16 = math.rsqrt %15 : vector<20x1xf32>
    %17 = vector.broadcast %16 : vector<20x1xf32> to vector<20x384xf32>
    %18 = arith.mulf %13, %17 : vector<20x384xf32>
    %c0_5 = arith.constant 0 : index
    %c0_6 = arith.constant 0 : index
    %19 = vector.load %arg2[%c0_5, %c0_6] : memref<1x384xf32, #tpu.memory_space<vmem>>, vector<1x384xf32>
    %20 = vector.broadcast %19 : vector<1x384xf32> to vector<20x384xf32>
    %21 = arith.mulf %18, %20 : vector<20x384xf32>
    %c0_7 = arith.constant 0 : index
    %c0_8 = arith.constant 0 : index
    %22 = vector.load %arg3[%c0_7, %c0_8] : memref<1x384xf32, #tpu.memory_space<vmem>>, vector<1x384xf32>
    %23 = vector.broadcast %22 : vector<1x384xf32> to vector<20x384xf32>
    %24 = arith.addf %21, %23 : vector<20x384xf32>
    %25 = arith.truncf %24 : vector<20x384xf32> to vector<20x384xbf16>
    %c0_9 = arith.constant 0 : index
    %c0_10 = arith.constant 0 : index
    %26 = vector.load %arg4[%c0_9, %c0_10] : memref<384x1152xbf16, #tpu.memory_space<vmem>>, vector<384x1152xbf16>
    %cst_11 = arith.constant dense<0.000000e+00> : vector<20x1152xf32>
    %27 = tpu.matmul %25, %26, %cst_11 {dimension_numbers = #tpu.dot_dimension_numbers<[1], [0], [0], [1], [0, 0, 1, 1], [], []>} : vector<20x384xbf16>, vector<384x1152xbf16>, vector<20x1152xf32> -> vector<20x1152xf32>
    %c0_12 = arith.constant 0 : index
    %c0_13 = arith.constant 0 : index
    %28 = vector.load %arg5[%c0_12, %c0_13] : memref<1x1152xf32, #tpu.memory_space<vmem>>, vector<1x1152xf32>
    %29 = vector.broadcast %28 : vector<1x1152xf32> to vector<20x1152xf32>
    %30 = arith.addf %27, %29 : vector<20x1152xf32>
    %31 = arith.truncf %30 : vector<20x1152xf32> to vector<20x1152xbf16>
    %c0_14 = arith.constant 0 : index
    %c0_15 = arith.constant 0 : index
    %32 = vector.load %arg6[%c0_14, %c0_15] : memref<20x1152xbf16, #tpu.memory_space<vmem>>, vector<20x1152xbf16>
    tpu.vector_store %arg6[%c0_14, %c0_15], %31 {strides = array<i32>} : memref<20x1152xbf16, #tpu.memory_space<vmem>>, vector<20x1152xbf16>,
    return
  }
  func.func @transform_0(%arg0: i32) -> (i32, i32) {
    %c0_i32 = arith.constant 0 : i32
    %c0_i32_0 = arith.constant 0 : i32
    return %arg0, %c0_i32 : i32, i32
  }
  func.func @transform_1(%arg0: i32) -> (i32, i32) {
    %c0_i32 = arith.constant 0 : i32
    %c0_i32_0 = arith.constant 0 : i32
    %c0_i32_1 = arith.constant 0 : i32
    return %c0_i32, %c0_i32_0 : i32, i32
  }
  func.func @transform_2(%arg0: i32) -> (i32, i32) {
    %c0_i32 = arith.constant 0 : i32
    %c0_i32_0 = arith.constant 0 : i32
    %c0_i32_1 = arith.constant 0 : i32
    return %c0_i32, %c0_i32_0 : i32, i32
  }
  func.func @transform_3(%arg0: i32) -> (i32, i32) {
    %c0_i32 = arith.constant 0 : i32
    %c0_i32_0 = arith.constant 0 : i32
    %c0_i32_1 = arith.constant 0 : i32
    return %c0_i32, %c0_i32_0 : i32, i32
  }
  func.func @transform_4(%arg0: i32) -> (i32, i32) {
    %c0_i32 = arith.constant 0 : i32
    %c0_i32_0 = arith.constant 0 : i32
    %c0_i32_1 = arith.constant 0 : i32
    return %c0_i32, %c0_i32_0 : i32, i32
  }
  func.func @transform_5(%arg0: i32) -> (i32, i32) {
    %c0_i32 = arith.constant 0 : i32
    %c0_i32_0 = arith.constant 0 : i32
    return %arg0, %c0_i32 : i32, i32
  }
}

module attributes {stable_mosaic.version = 11 : i64} {
  func.func @_attn_pair_kernel(%arg0: i32, %arg1: i32, %arg2: memref<1x10x128xbf16, #tpu.memory_space<vmem>>, %arg3: memref<1x10x128xbf16, #tpu.memory_space<vmem>>, %arg4: memref<1x10x128xbf16, #tpu.memory_space<vmem>>, %arg5: memref<1x10x128xbf16, #tpu.memory_space<vmem>>) attributes {dimension_semantics = [#tpu.dimension_semantics<parallel>, #tpu.dimension_semantics<parallel>], iteration_bounds = array<i64: 2, 3>, scalar_prefetch = 0 : i64, scratch_operands = 0 : i64, tpu.core_type = #tpu.core_type<tc>, window_params = [{transform_indices = @transform_0, window_bounds = array<i64: 1, 10, 128>}, {transform_indices = @transform_1, window_bounds = array<i64: 1, 10, 128>}, {transform_indices = @transform_2, window_bounds = array<i64: 1, 10, 128>}, {transform_indices = @transform_3, window_bounds = array<i64: 1, 10, 128>}]} {
    %c0 = arith.constant 0 : index
    %c0_0 = arith.constant 0 : index
    %c0_1 = arith.constant 0 : index
    %0 = vector.load %arg2[%c0, %c0_0, %c0_1] : memref<1x10x128xbf16, #tpu.memory_space<vmem>>, vector<1x10x128xbf16>
    %1 = vector.shape_cast %0 : vector<1x10x128xbf16> to vector<10x128xbf16>
    %c0_2 = arith.constant 0 : index
    %c0_3 = arith.constant 0 : index
    %c0_4 = arith.constant 0 : index
    %2 = vector.load %arg3[%c0_2, %c0_3, %c0_4] : memref<1x10x128xbf16, #tpu.memory_space<vmem>>, vector<1x10x128xbf16>
    %3 = vector.shape_cast %2 : vector<1x10x128xbf16> to vector<10x128xbf16>
    %c0_5 = arith.constant 0 : index
    %c0_6 = arith.constant 0 : index
    %c0_7 = arith.constant 0 : index
    %4 = vector.load %arg4[%c0_5, %c0_6, %c0_7] : memref<1x10x128xbf16, #tpu.memory_space<vmem>>, vector<1x10x128xbf16>
    %5 = vector.shape_cast %4 : vector<1x10x128xbf16> to vector<10x128xbf16>
    %6 = vector.extract_strided_slice %1 {offsets = [0, 0], sizes = [10, 64], strides = [1, 1]} : vector<10x128xbf16> to vector<10x64xbf16>
    %7 = arith.extf %6 : vector<10x64xbf16> to vector<10x64xf32>
    %cst = arith.constant 1.250000e-01 : f32
    %8 = vector.broadcast %cst : f32 to vector<10x64xf32>
    %9 = arith.mulf %7, %8 : vector<10x64xf32>
    %10 = arith.truncf %9 : vector<10x64xf32> to vector<10x64xbf16>
    %11 = vector.extract_strided_slice %3 {offsets = [0, 0], sizes = [10, 64], strides = [1, 1]} : vector<10x128xbf16> to vector<10x64xbf16>
    %12 = vector.extract_strided_slice %5 {offsets = [0, 0], sizes = [10, 64], strides = [1, 1]} : vector<10x128xbf16> to vector<10x64xbf16>
    %cst_8 = arith.constant dense<0.000000e+00> : vector<10x10xf32>
    %13 = tpu.matmul %10, %11, %cst_8 {dimension_numbers = #tpu.dot_dimension_numbers<[1], [1], [0], [0], [0, 0, 1, 0], [], []>} : vector<10x64xbf16>, vector<10x64xbf16>, vector<10x10xf32> -> vector<10x10xf32>
    %cst_9 = arith.constant dense<0xFF800000> : vector<10xf32>
    %14 = vector.multi_reduction <maximumf>, %13, %cst_9 [1] : vector<10x10xf32> to vector<10xf32>
    %15 = vector.shape_cast %14 : vector<10xf32> to vector<10x1xf32>
    %16 = vector.broadcast %15 : vector<10x1xf32> to vector<10x10xf32>
    %17 = arith.subf %13, %16 : vector<10x10xf32>
    %18 = math.exp %17 : vector<10x10xf32>
    %cst_10 = arith.constant dense<0.000000e+00> : vector<10xf32>
    %19 = vector.multi_reduction <add>, %18, %cst_10 [1] : vector<10x10xf32> to vector<10xf32>
    %20 = vector.shape_cast %19 : vector<10xf32> to vector<10x1xf32>
    %21 = tpu.reciprocal %20 {approx = true} : vector<10x1xf32> -> vector<10x1xf32>
    %22 = arith.truncf %18 : vector<10x10xf32> to vector<10x10xbf16>
    %cst_11 = arith.constant dense<0.000000e+00> : vector<10x64xf32>
    %23 = tpu.matmul %22, %12, %cst_11 {dimension_numbers = #tpu.dot_dimension_numbers<[1], [0], [0], [1], [0, 0, 1, 1], [], []>} : vector<10x10xbf16>, vector<10x64xbf16>, vector<10x64xf32> -> vector<10x64xf32>
    %24 = vector.broadcast %21 : vector<10x1xf32> to vector<10x64xf32>
    %25 = arith.mulf %23, %24 : vector<10x64xf32>
    %26 = vector.extract_strided_slice %1 {offsets = [0, 64], sizes = [10, 64], strides = [1, 1]} : vector<10x128xbf16> to vector<10x64xbf16>
    %27 = arith.extf %26 : vector<10x64xbf16> to vector<10x64xf32>
    %cst_12 = arith.constant 1.250000e-01 : f32
    %28 = vector.broadcast %cst_12 : f32 to vector<10x64xf32>
    %29 = arith.mulf %27, %28 : vector<10x64xf32>
    %30 = arith.truncf %29 : vector<10x64xf32> to vector<10x64xbf16>
    %31 = vector.extract_strided_slice %3 {offsets = [0, 64], sizes = [10, 64], strides = [1, 1]} : vector<10x128xbf16> to vector<10x64xbf16>
    %32 = vector.extract_strided_slice %5 {offsets = [0, 64], sizes = [10, 64], strides = [1, 1]} : vector<10x128xbf16> to vector<10x64xbf16>
    %cst_13 = arith.constant dense<0.000000e+00> : vector<10x10xf32>
    %33 = tpu.matmul %30, %31, %cst_13 {dimension_numbers = #tpu.dot_dimension_numbers<[1], [1], [0], [0], [0, 0, 1, 0], [], []>} : vector<10x64xbf16>, vector<10x64xbf16>, vector<10x10xf32> -> vector<10x10xf32>
    %cst_14 = arith.constant dense<0xFF800000> : vector<10xf32>
    %34 = vector.multi_reduction <maximumf>, %33, %cst_14 [1] : vector<10x10xf32> to vector<10xf32>
    %35 = vector.shape_cast %34 : vector<10xf32> to vector<10x1xf32>
    %36 = vector.broadcast %35 : vector<10x1xf32> to vector<10x10xf32>
    %37 = arith.subf %33, %36 : vector<10x10xf32>
    %38 = math.exp %37 : vector<10x10xf32>
    %cst_15 = arith.constant dense<0.000000e+00> : vector<10xf32>
    %39 = vector.multi_reduction <add>, %38, %cst_15 [1] : vector<10x10xf32> to vector<10xf32>
    %40 = vector.shape_cast %39 : vector<10xf32> to vector<10x1xf32>
    %41 = tpu.reciprocal %40 {approx = true} : vector<10x1xf32> -> vector<10x1xf32>
    %42 = arith.truncf %38 : vector<10x10xf32> to vector<10x10xbf16>
    %cst_16 = arith.constant dense<0.000000e+00> : vector<10x64xf32>
    %43 = tpu.matmul %42, %32, %cst_16 {dimension_numbers = #tpu.dot_dimension_numbers<[1], [0], [0], [1], [0, 0, 1, 1], [], []>} : vector<10x10xbf16>, vector<10x64xbf16>, vector<10x64xf32> -> vector<10x64xf32>
    %44 = vector.broadcast %41 : vector<10x1xf32> to vector<10x64xf32>
    %45 = arith.mulf %43, %44 : vector<10x64xf32>
    %46 = tpu.concatenate %25, %45 in 1 : vector<10x64xf32>, vector<10x64xf32> -> vector<10x128xf32>
    %47 = arith.truncf %46 : vector<10x128xf32> to vector<10x128xbf16>
    %c0_17 = arith.constant 0 : index
    %c0_18 = arith.constant 0 : index
    %c0_19 = arith.constant 0 : index
    %48 = vector.load %arg5[%c0_17, %c0_18, %c0_19] : memref<1x10x128xbf16, #tpu.memory_space<vmem>>, vector<1x10x128xbf16>
    %49 = vector.shape_cast %48 : vector<1x10x128xbf16> to vector<10x128xbf16>
    %50 = vector.shape_cast %47 : vector<10x128xbf16> to vector<1x10x128xbf16>
    tpu.vector_store %arg5[%c0_17, %c0_18, %c0_19], %50 {strides = array<i32>} : memref<1x10x128xbf16, #tpu.memory_space<vmem>>, vector<1x10x128xbf16>,
    return
  }
  func.func @transform_0(%arg0: i32, %arg1: i32) -> (i32, i32, i32) {
    %c0_i32 = arith.constant 0 : i32
    %0 = arith.addi %c0_i32, %arg1 : i32
    %c0_i32_0 = arith.constant 0 : i32
    %c0_i32_1 = arith.constant 0 : i32
    return %arg0, %c0_i32_0, %0 : i32, i32, i32
  }
  func.func @transform_1(%arg0: i32, %arg1: i32) -> (i32, i32, i32) {
    %c3_i32 = arith.constant 3 : i32
    %0 = arith.addi %c3_i32, %arg1 : i32
    %c0_i32 = arith.constant 0 : i32
    %c0_i32_0 = arith.constant 0 : i32
    return %arg0, %c0_i32, %0 : i32, i32, i32
  }
  func.func @transform_2(%arg0: i32, %arg1: i32) -> (i32, i32, i32) {
    %c6_i32 = arith.constant 6 : i32
    %0 = arith.addi %c6_i32, %arg1 : i32
    %c0_i32 = arith.constant 0 : i32
    %c0_i32_0 = arith.constant 0 : i32
    return %arg0, %c0_i32, %0 : i32, i32, i32
  }
  func.func @transform_3(%arg0: i32, %arg1: i32) -> (i32, i32, i32) {
    %c0_i32 = arith.constant 0 : i32
    %c0_i32_0 = arith.constant 0 : i32
    return %arg0, %c0_i32, %arg1 : i32, i32, i32
  }
}

module attributes {stable_mosaic.version = 11 : i64} {
  func.func @_linear_res_kernel(%arg0: i32, %arg1: memref<20x384xbf16, #tpu.memory_space<vmem>>, %arg2: memref<384x384xbf16, #tpu.memory_space<vmem>>, %arg3: memref<1x384xf32, #tpu.memory_space<vmem>>, %arg4: memref<20x384xf32, #tpu.memory_space<vmem>>, %arg5: memref<20x384xf32, #tpu.memory_space<vmem>>) attributes {dimension_semantics = [#tpu.dimension_semantics<parallel>], iteration_bounds = array<i64: 1>, scalar_prefetch = 0 : i64, scratch_operands = 0 : i64, tpu.core_type = #tpu.core_type<tc>, window_params = [{transform_indices = @transform_0, window_bounds = array<i64: 20, 384>}, {pipeline_mode = #tpu.pipeline_mode<synchronous>, transform_indices = @transform_1, window_bounds = array<i64: 384, 384>}, {pipeline_mode = #tpu.pipeline_mode<synchronous>, transform_indices = @transform_2, window_bounds = array<i64: 1, 384>}, {transform_indices = @transform_3, window_bounds = array<i64: 20, 384>}, {transform_indices = @transform_4, window_bounds = array<i64: 20, 384>}]} {
    %c0 = arith.constant 0 : index
    %c0_0 = arith.constant 0 : index
    %0 = vector.load %arg1[%c0, %c0_0] : memref<20x384xbf16, #tpu.memory_space<vmem>>, vector<20x384xbf16>
    %c0_1 = arith.constant 0 : index
    %c0_2 = arith.constant 0 : index
    %1 = vector.load %arg2[%c0_1, %c0_2] : memref<384x384xbf16, #tpu.memory_space<vmem>>, vector<384x384xbf16>
    %cst = arith.constant dense<0.000000e+00> : vector<20x384xf32>
    %2 = tpu.matmul %0, %1, %cst {dimension_numbers = #tpu.dot_dimension_numbers<[1], [0], [0], [1], [0, 0, 1, 1], [], []>} : vector<20x384xbf16>, vector<384x384xbf16>, vector<20x384xf32> -> vector<20x384xf32>
    %c0_3 = arith.constant 0 : index
    %c0_4 = arith.constant 0 : index
    %3 = vector.load %arg3[%c0_3, %c0_4] : memref<1x384xf32, #tpu.memory_space<vmem>>, vector<1x384xf32>
    %4 = vector.broadcast %3 : vector<1x384xf32> to vector<20x384xf32>
    %5 = arith.addf %2, %4 : vector<20x384xf32>
    %c0_5 = arith.constant 0 : index
    %c0_6 = arith.constant 0 : index
    %6 = vector.load %arg4[%c0_5, %c0_6] : memref<20x384xf32, #tpu.memory_space<vmem>>, vector<20x384xf32>
    %7 = arith.addf %6, %5 : vector<20x384xf32>
    %c0_7 = arith.constant 0 : index
    %c0_8 = arith.constant 0 : index
    %8 = vector.load %arg5[%c0_7, %c0_8] : memref<20x384xf32, #tpu.memory_space<vmem>>, vector<20x384xf32>
    tpu.vector_store %arg5[%c0_7, %c0_8], %7 {strides = array<i32>} : memref<20x384xf32, #tpu.memory_space<vmem>>, vector<20x384xf32>,
    return
  }
  func.func @transform_0(%arg0: i32) -> (i32, i32) {
    %c0_i32 = arith.constant 0 : i32
    %c0_i32_0 = arith.constant 0 : i32
    return %arg0, %c0_i32 : i32, i32
  }
  func.func @transform_1(%arg0: i32) -> (i32, i32) {
    %c0_i32 = arith.constant 0 : i32
    %c0_i32_0 = arith.constant 0 : i32
    %c0_i32_1 = arith.constant 0 : i32
    return %c0_i32, %c0_i32_0 : i32, i32
  }
  func.func @transform_2(%arg0: i32) -> (i32, i32) {
    %c0_i32 = arith.constant 0 : i32
    %c0_i32_0 = arith.constant 0 : i32
    %c0_i32_1 = arith.constant 0 : i32
    return %c0_i32, %c0_i32_0 : i32, i32
  }
  func.func @transform_3(%arg0: i32) -> (i32, i32) {
    %c0_i32 = arith.constant 0 : i32
    %c0_i32_0 = arith.constant 0 : i32
    return %arg0, %c0_i32 : i32, i32
  }
  func.func @transform_4(%arg0: i32) -> (i32, i32) {
    %c0_i32 = arith.constant 0 : i32
    %c0_i32_0 = arith.constant 0 : i32
    return %arg0, %c0_i32 : i32, i32
  }
}

module attributes {stable_mosaic.version = 11 : i64} {
  func.func @_linear_res_kernel(%arg0: i32, %arg1: memref<20x1536xbf16, #tpu.memory_space<vmem>>, %arg2: memref<1536x384xbf16, #tpu.memory_space<vmem>>, %arg3: memref<1x384xf32, #tpu.memory_space<vmem>>, %arg4: memref<20x384xf32, #tpu.memory_space<vmem>>, %arg5: memref<20x384xf32, #tpu.memory_space<vmem>>) attributes {dimension_semantics = [#tpu.dimension_semantics<parallel>], iteration_bounds = array<i64: 1>, scalar_prefetch = 0 : i64, scratch_operands = 0 : i64, tpu.core_type = #tpu.core_type<tc>, window_params = [{transform_indices = @transform_0, window_bounds = array<i64: 20, 1536>}, {pipeline_mode = #tpu.pipeline_mode<synchronous>, transform_indices = @transform_1, window_bounds = array<i64: 1536, 384>}, {pipeline_mode = #tpu.pipeline_mode<synchronous>, transform_indices = @transform_2, window_bounds = array<i64: 1, 384>}, {transform_indices = @transform_3, window_bounds = array<i64: 20, 384>}, {transform_indices = @transform_4, window_bounds = array<i64: 20, 384>}]} {
    %c0 = arith.constant 0 : index
    %c0_0 = arith.constant 0 : index
    %0 = vector.load %arg1[%c0, %c0_0] : memref<20x1536xbf16, #tpu.memory_space<vmem>>, vector<20x1536xbf16>
    %c0_1 = arith.constant 0 : index
    %c0_2 = arith.constant 0 : index
    %1 = vector.load %arg2[%c0_1, %c0_2] : memref<1536x384xbf16, #tpu.memory_space<vmem>>, vector<1536x384xbf16>
    %cst = arith.constant dense<0.000000e+00> : vector<20x384xf32>
    %2 = tpu.matmul %0, %1, %cst {dimension_numbers = #tpu.dot_dimension_numbers<[1], [0], [0], [1], [0, 0, 1, 1], [], []>} : vector<20x1536xbf16>, vector<1536x384xbf16>, vector<20x384xf32> -> vector<20x384xf32>
    %c0_3 = arith.constant 0 : index
    %c0_4 = arith.constant 0 : index
    %3 = vector.load %arg3[%c0_3, %c0_4] : memref<1x384xf32, #tpu.memory_space<vmem>>, vector<1x384xf32>
    %4 = vector.broadcast %3 : vector<1x384xf32> to vector<20x384xf32>
    %5 = arith.addf %2, %4 : vector<20x384xf32>
    %c0_5 = arith.constant 0 : index
    %c0_6 = arith.constant 0 : index
    %6 = vector.load %arg4[%c0_5, %c0_6] : memref<20x384xf32, #tpu.memory_space<vmem>>, vector<20x384xf32>
    %7 = arith.addf %6, %5 : vector<20x384xf32>
    %c0_7 = arith.constant 0 : index
    %c0_8 = arith.constant 0 : index
    %8 = vector.load %arg5[%c0_7, %c0_8] : memref<20x384xf32, #tpu.memory_space<vmem>>, vector<20x384xf32>
    tpu.vector_store %arg5[%c0_7, %c0_8], %7 {strides = array<i32>} : memref<20x384xf32, #tpu.memory_space<vmem>>, vector<20x384xf32>,
    return
  }
  func.func @transform_0(%arg0: i32) -> (i32, i32) {
    %c0_i32 = arith.constant 0 : i32
    %c0_i32_0 = arith.constant 0 : i32
    return %arg0, %c0_i32 : i32, i32
  }
  func.func @transform_1(%arg0: i32) -> (i32, i32) {
    %c0_i32 = arith.constant 0 : i32
    %c0_i32_0 = arith.constant 0 : i32
    %c0_i32_1 = arith.constant 0 : i32
    return %c0_i32, %c0_i32_0 : i32, i32
  }
  func.func @transform_2(%arg0: i32) -> (i32, i32) {
    %c0_i32 = arith.constant 0 : i32
    %c0_i32_0 = arith.constant 0 : i32
    %c0_i32_1 = arith.constant 0 : i32
    return %c0_i32, %c0_i32_0 : i32, i32
  }
  func.func @transform_3(%arg0: i32) -> (i32, i32) {
    %c0_i32 = arith.constant 0 : i32
    %c0_i32_0 = arith.constant 0 : i32
    return %arg0, %c0_i32 : i32, i32
  }
  func.func @transform_4(%arg0: i32) -> (i32, i32) {
    %c0_i32 = arith.constant 0 : i32
    %c0_i32_0 = arith.constant 0 : i32
    return %arg0, %c0_i32 : i32, i32
  }
}

module attributes {stable_mosaic.version = 11 : i64} {
  func.func @_ln_linear_kernel(%arg0: i32, %arg1: memref<20x384xf32, #tpu.memory_space<vmem>>, %arg2: memref<1x384xf32, #tpu.memory_space<vmem>>, %arg3: memref<1x384xf32, #tpu.memory_space<vmem>>, %arg4: memref<384x1536xbf16, #tpu.memory_space<vmem>>, %arg5: memref<1x1536xf32, #tpu.memory_space<vmem>>, %arg6: memref<20x1536xbf16, #tpu.memory_space<vmem>>) attributes {dimension_semantics = [#tpu.dimension_semantics<parallel>], iteration_bounds = array<i64: 1>, scalar_prefetch = 0 : i64, scratch_operands = 0 : i64, tpu.core_type = #tpu.core_type<tc>, window_params = [{transform_indices = @transform_0, window_bounds = array<i64: 20, 384>}, {pipeline_mode = #tpu.pipeline_mode<synchronous>, transform_indices = @transform_1, window_bounds = array<i64: 1, 384>}, {pipeline_mode = #tpu.pipeline_mode<synchronous>, transform_indices = @transform_2, window_bounds = array<i64: 1, 384>}, {pipeline_mode = #tpu.pipeline_mode<synchronous>, transform_indices = @transform_3, window_bounds = array<i64: 384, 1536>}, {pipeline_mode = #tpu.pipeline_mode<synchronous>, transform_indices = @transform_4, window_bounds = array<i64: 1, 1536>}, {transform_indices = @transform_5, window_bounds = array<i64: 20, 1536>}]} {
    %c0 = arith.constant 0 : index
    %c0_0 = arith.constant 0 : index
    %0 = vector.load %arg1[%c0, %c0_0] : memref<20x384xf32, #tpu.memory_space<vmem>>, vector<20x384xf32>
    %cst = arith.constant dense<0.000000e+00> : vector<20xf32>
    %1 = vector.multi_reduction <add>, %0, %cst [1] : vector<20x384xf32> to vector<20xf32>
    %2 = vector.shape_cast %1 : vector<20xf32> to vector<20x1xf32>
    %cst_1 = arith.constant 3.840000e+02 : f32
    %3 = vector.broadcast %cst_1 : f32 to vector<20x1xf32>
    %4 = arith.divf %2, %3 : vector<20x1xf32>
    %5 = vector.broadcast %4 : vector<20x1xf32> to vector<20x384xf32>
    %6 = arith.subf %0, %5 : vector<20x384xf32>
    %7 = arith.mulf %6, %6 : vector<20x384xf32>
    %cst_2 = arith.constant dense<0.000000e+00> : vector<20xf32>
    %8 = vector.multi_reduction <add>, %7, %cst_2 [1] : vector<20x384xf32> to vector<20xf32>
    %9 = vector.shape_cast %8 : vector<20xf32> to vector<20x1xf32>
    %cst_3 = arith.constant 3.840000e+02 : f32
    %10 = vector.broadcast %cst_3 : f32 to vector<20x1xf32>
    %11 = arith.divf %9, %10 : vector<20x1xf32>
    %12 = vector.broadcast %4 : vector<20x1xf32> to vector<20x384xf32>
    %13 = arith.subf %0, %12 : vector<20x384xf32>
    %cst_4 = arith.constant 9.99999997E-7 : f32
    %14 = vector.broadcast %cst_4 : f32 to vector<20x1xf32>
    %15 = arith.addf %11, %14 : vector<20x1xf32>
    %16 = math.rsqrt %15 : vector<20x1xf32>
    %17 = vector.broadcast %16 : vector<20x1xf32> to vector<20x384xf32>
    %18 = arith.mulf %13, %17 : vector<20x384xf32>
    %c0_5 = arith.constant 0 : index
    %c0_6 = arith.constant 0 : index
    %19 = vector.load %arg2[%c0_5, %c0_6] : memref<1x384xf32, #tpu.memory_space<vmem>>, vector<1x384xf32>
    %20 = vector.broadcast %19 : vector<1x384xf32> to vector<20x384xf32>
    %21 = arith.mulf %18, %20 : vector<20x384xf32>
    %c0_7 = arith.constant 0 : index
    %c0_8 = arith.constant 0 : index
    %22 = vector.load %arg3[%c0_7, %c0_8] : memref<1x384xf32, #tpu.memory_space<vmem>>, vector<1x384xf32>
    %23 = vector.broadcast %22 : vector<1x384xf32> to vector<20x384xf32>
    %24 = arith.addf %21, %23 : vector<20x384xf32>
    %25 = arith.truncf %24 : vector<20x384xf32> to vector<20x384xbf16>
    %c0_9 = arith.constant 0 : index
    %c0_10 = arith.constant 0 : index
    %26 = vector.load %arg4[%c0_9, %c0_10] : memref<384x1536xbf16, #tpu.memory_space<vmem>>, vector<384x1536xbf16>
    %cst_11 = arith.constant dense<0.000000e+00> : vector<20x1536xf32>
    %27 = tpu.matmul %25, %26, %cst_11 {dimension_numbers = #tpu.dot_dimension_numbers<[1], [0], [0], [1], [0, 0, 1, 1], [], []>} : vector<20x384xbf16>, vector<384x1536xbf16>, vector<20x1536xf32> -> vector<20x1536xf32>
    %c0_12 = arith.constant 0 : index
    %c0_13 = arith.constant 0 : index
    %28 = vector.load %arg5[%c0_12, %c0_13] : memref<1x1536xf32, #tpu.memory_space<vmem>>, vector<1x1536xf32>
    %29 = vector.broadcast %28 : vector<1x1536xf32> to vector<20x1536xf32>
    %30 = arith.addf %27, %29 : vector<20x1536xf32>
    %cst_14 = arith.constant 5.000000e-01 : f32
    %31 = vector.broadcast %cst_14 : f32 to vector<20x1536xf32>
    %32 = arith.mulf %31, %30 : vector<20x1536xf32>
    %cst_15 = arith.constant 0.707106769 : f32
    %33 = vector.broadcast %cst_15 : f32 to vector<20x1536xf32>
    %34 = arith.mulf %30, %33 : vector<20x1536xf32>
    %cst_16 = arith.constant 0.000000e+00 : f32
    %35 = vector.broadcast %cst_16 : f32 to vector<20x1536xf32>
    %36 = arith.cmpf oge, %34, %35 : vector<20x1536xf32>
    %cst_17 = arith.constant 1.000000e+00 : f32
    %cst_18 = arith.constant -1.000000e+00 : f32
    %37 = vector.broadcast %cst_17 : f32 to vector<20x1536xf32>
    %38 = vector.broadcast %cst_18 : f32 to vector<20x1536xf32>
    %39 = arith.select %36, %37, %38 : vector<20x1536xi1>, vector<20x1536xf32>
    %40 = math.absf %34 : vector<20x1536xf32>
    %cst_19 = arith.constant 0.327591091 : f32
    %41 = vector.broadcast %cst_19 : f32 to vector<20x1536xf32>
    %42 = arith.mulf %41, %40 : vector<20x1536xf32>
    %cst_20 = arith.constant 1.000000e+00 : f32
    %43 = vector.broadcast %cst_20 : f32 to vector<20x1536xf32>
    %44 = arith.addf %43, %42 : vector<20x1536xf32>
    %cst_21 = arith.constant 1.000000e+00 : f32
    %45 = vector.broadcast %cst_21 : f32 to vector<20x1536xf32>
    %46 = arith.divf %45, %44 : vector<20x1536xf32>
    %cst_22 = arith.constant 1.06140542 : f32
    %47 = vector.broadcast %cst_22 : f32 to vector<20x1536xf32>
    %48 = arith.mulf %47, %46 : vector<20x1536xf32>
    %cst_23 = arith.constant -1.45315206 : f32
    %49 = vector.broadcast %cst_23 : f32 to vector<20x1536xf32>
    %50 = arith.addf %48, %49 : vector<20x1536xf32>
    %51 = arith.mulf %50, %46 : vector<20x1536xf32>
    %cst_24 = arith.constant 1.42141378 : f32
    %52 = vector.broadcast %cst_24 : f32 to vector<20x1536xf32>
    %53 = arith.addf %51, %52 : vector<20x1536xf32>
    %54 = arith.mulf %53, %46 : vector<20x1536xf32>
    %cst_25 = arith.constant -0.284496725 : f32
    %55 = vector.broadcast %cst_25 : f32 to vector<20x1536xf32>
    %56 = arith.addf %54, %55 : vector<20x1536xf32>
    %57 = arith.mulf %56, %46 : vector<20x1536xf32>
    %cst_26 = arith.constant 0.254829586 : f32
    %58 = vector.broadcast %cst_26 : f32 to vector<20x1536xf32>
    %59 = arith.addf %57, %58 : vector<20x1536xf32>
    %60 = arith.mulf %59, %46 : vector<20x1536xf32>
    %cst_27 = arith.constant 0.000000e+00 : f32
    %61 = vector.broadcast %cst_27 : f32 to vector<20x1536xf32>
    %62 = arith.subf %61, %40 : vector<20x1536xf32>
    %63 = arith.mulf %62, %40 : vector<20x1536xf32>
    %64 = math.exp %63 : vector<20x1536xf32>
    %65 = arith.mulf %60, %64 : vector<20x1536xf32>
    %cst_28 = arith.constant 1.000000e+00 : f32
    %66 = vector.broadcast %cst_28 : f32 to vector<20x1536xf32>
    %67 = arith.subf %66, %65 : vector<20x1536xf32>
    %68 = arith.mulf %39, %67 : vector<20x1536xf32>
    %cst_29 = arith.constant 1.000000e+00 : f32
    %69 = vector.broadcast %cst_29 : f32 to vector<20x1536xf32>
    %70 = arith.addf %69, %68 : vector<20x1536xf32>
    %71 = arith.mulf %32, %70 : vector<20x1536xf32>
    %72 = arith.truncf %71 : vector<20x1536xf32> to vector<20x1536xbf16>
    %c0_30 = arith.constant 0 : index
    %c0_31 = arith.constant 0 : index
    %73 = vector.load %arg6[%c0_30, %c0_31] : memref<20x1536xbf16, #tpu.memory_space<vmem>>, vector<20x1536xbf16>
    tpu.vector_store %arg6[%c0_30, %c0_31], %72 {strides = array<i32>} : memref<20x1536xbf16, #tpu.memory_space<vmem>>, vector<20x1536xbf16>,
    return
  }
  func.func @transform_0(%arg0: i32) -> (i32, i32) {
    %c0_i32 = arith.constant 0 : i32
    %c0_i32_0 = arith.constant 0 : i32
    return %arg0, %c0_i32 : i32, i32
  }
  func.func @transform_1(%arg0: i32) -> (i32, i32) {
    %c0_i32 = arith.constant 0 : i32
    %c0_i32_0 = arith.constant 0 : i32
    %c0_i32_1 = arith.constant 0 : i32
    return %c0_i32, %c0_i32_0 : i32, i32
  }
  func.func @transform_2(%arg0: i32) -> (i32, i32) {
    %c0_i32 = arith.constant 0 : i32
    %c0_i32_0 = arith.constant 0 : i32
    %c0_i32_1 = arith.constant 0 : i32
    return %c0_i32, %c0_i32_0 : i32, i32
  }
  func.func @transform_3(%arg0: i32) -> (i32, i32) {
    %c0_i32 = arith.constant 0 : i32
    %c0_i32_0 = arith.constant 0 : i32
    %c0_i32_1 = arith.constant 0 : i32
    return %c0_i32, %c0_i32_0 : i32, i32
  }
  func.func @transform_4(%arg0: i32) -> (i32, i32) {
    %c0_i32 = arith.constant 0 : i32
    %c0_i32_0 = arith.constant 0 : i32
    %c0_i32_1 = arith.constant 0 : i32
    return %c0_i32, %c0_i32_0 : i32, i32
  }
  func.func @transform_5(%arg0: i32) -> (i32, i32) {
    %c0_i32 = arith.constant 0 : i32
    %c0_i32_0 = arith.constant 0 : i32
    return %arg0, %c0_i32 : i32, i32
  }
}

</mosaic_0001>

<bundles_post_ra>
// kernel: model_forward.63
= control target key start
LH: loop header
LB: loop body
LE: loop exit
PB: predicated region body
PF: predicated region fallthrough
CT: control target
= control target key end

     0   :  { %s1349_s0 = inlined_call_operand.vmem [shape: bf16[2,10,1152], index: 0, kind: input, shape index: {}, may-alias: {0,1,2}]   ;;  %s1350_s1 = inlined_call_operand.vmem [shape: bf16[2,10,1152], index: 1, kind: input, shape index: {}, may-alias: {0,1,2}]   ;;  %s1351_s2 = inlined_call_operand.vmem [shape: bf16[2,10,1152], index: 2, kind: input, shape index: {}, may-alias: {0,1,2}]   ;;  %s1352_s3 = inlined_call_operand.vmem [shape: bf16[2,10,384], index: 3, kind: output, shape index: {}]  }
   0x1   :  { %1355 = sst [smem:[#allocation9_spill]] %s1352_s3 }
   0x2   :  { %s1129_s12 = smov 0   ;;  %s1131_s13 = smov 0  }
   0x3   :  { %s1133_s14 = smov 0   ;;  %s1135_s15 = smov 0  }
   0x4   :  { %s1137_s16 = smov 0   ;;  %s1139_s17 = smov 0  }
   0x5   :  { %s1141_s18 = smov 0   ;;  %s1143_s19 = smov 0  }
   0x6   :  { %s1145_s20 = smov 0   ;;  %s1147_s21 = smov 0  }
   0x7   :  { %s1149_s22 = smov 0  }
   0x8 LB: > { %s22_s24 = sadd.s32 1, %s1096_s20  ;;  %s25_s25 = sadd.s32 1, %s1100_s21  ;;  %s1104_s22 = sphi %s1149_s22, %s13_s22   ;;  %s1100_s21 = sphi %s1147_s21, %s1377_s21   ;;  %s1096_s20 = sphi %s1145_s20, %s1376_s20   ;;  %s1092_s19 = sphi %s1143_s19, %s1375_s19   ;;  %s1088_s18 = sphi %s1141_s18, %s1374_s18   ;;  %s1084_s17 = sphi %s1139_s17, %s1373_s17   ;;  %s1080_s16 = sphi %s1137_s16, %s1372_s16   ;;  %s1076_s15 = sphi %s1135_s15, %s1371_s15   ;;  %s1072_s14 = sphi %s1133_s14, %s1370_s14   ;;  %s1068_s13 = sphi %s1131_s13, %s1369_s13   ;;  %s1064_s12 = sphi %s1129_s12, %s1368_s12  }
   0x9   : > { %p23_p0 = scmp.ge.s32.totalorder %s22_s24, 3  ;;  %s34_s26 = sadd.s32 1, %s1084_s17 }
   0xa   : > { %p41_p1 = scmp.ne.s32.totalorder %s1084_s17, %s1080_s16  ;;  %p42_p2 = scmp.eq.s32.totalorder %s1104_s22, 0 }
   0xb   : > { %s1379_s24 = smov (%p23_p0, %s22_s24), 0  ;;  %s1381_s25 = smov (!%p23_p0, %s25_s25), %s1100_s21 }
   0xc   : > { %1356 = sst [smem:[#allocation6_spill]] %s1379_s24  ;;  %s30_s27 = ssub.s32 %s1096_s20, %s1379_s24 }
   0xd   : > { %p27_p3 = scmp.ge.s32.totalorder %s1381_s25, 2  ;;  %s57_s28 = sadd.s32 3, %s1096_s20 }
   0xe   : > { %p1202_p4 = por %p42_p2, %p41_p1  ;;  %s58_s30 = sadd.s32 3, %s1379_s24 }
   0xf   : > { %s1383_s25 = smov (%p27_p3, %s1381_s25), 0  ;;  %s60_s4 = ssub.s32 %s57_s28, %s58_s30 }
  0x10   : > { %1358 = sst [smem:[#allocation7_spill]] %s1383_s25  ;;  %s64_s5 = sadd.s32 1, %s1076_s15 }
  0x11   : > { %s29_s6 = ssub.s32 %s1100_s21, %s1383_s25  ;;  %p71_p5 = scmp.ne.s32.totalorder %s1076_s15, %s1072_s14 }
  0x12   : > { %s31_s7 = sor.u32 %s30_s27, %s29_s6  ;;  %s61_s8 = sor.u32 %s60_s4, %s29_s6 }
  0x13   : > { %p32_p6 = scmp.eq.s32.totalorder %s31_s7, 0  ;;  %p62_p7 = scmp.eq.s32.totalorder %s61_s8, 0 }
  0x14   : > { %p1216_p8 = por %p71_p5, %p42_p2  ;;  %s87_s10 = sadd.s32 6, %s1096_s20 }
  0x15   : > { %s1222_s11 = scalar_select %p32_p6, %s1084_s17, %s34_s26  }
  0x16   : > { %s1225_s28 = scalar_select %p62_p7, %s1076_s15, %s64_s5  }
  0x17   : > { %1360 = sst [smem:[#allocation8_spill]] %s1222_s11  ;;  %s88_s30 = sadd.s32 6, %s1379_s24 }
  0x18   : > { %s94_s23 = sadd.s32 1, %s1068_s13  ;;  %s90_s25 = ssub.s32 %s87_s10, %s88_s30 }
  0x19   : > { %p101_p9 = scmp.ne.s32.totalorder %s1068_s13, %s1064_s12  ;;  %s91_s27 = sor.u32 %s90_s25, %s29_s6 }
  0x1a   : > { %s1361_s3 = sadd.s32 4294967295, %s1104_s22   ;;  %p92_p11 = scmp.eq.s32.totalorder %s91_s27, 0 }
  0x1b   : > { %p133_p10 = scmp.eq.s32.totalorder %s1361_s3, 5  ;;  %p1235_p12 = por %p101_p9, %p42_p2 }
  0x1c   : > { %s1247_s26 = scalar_select %p92_p11, %s1068_s13, %s94_s23  }
  0x1d   : > { %p1242_p13 = por %p133_p10, %p41_p1  ;;  %p840_p0 = scmp.ge.s32.totalorder %s1104_s22, 6 }
  0x1f   : > { %155 = sbr.rel (%p840_p0) target bundleno = 60 (0x3c), region = 16 }
  0x24   : > { %158 = sbr.rel (!%p1202_p4) target bundleno = 44 (0x2c), region = 20  ;;  %s160_s3 = sand.u32 (%p1202_p4), 1, %s1084_s17  }
  0x25   : > { %s902_s25 = smul.u32 (%p1202_p4), 18, %s1100_s21  ;;  %s841_s5 = sshll.u32 (%p1202_p4), %s160_s3, 3 }
  0x26   : > { %s162_s23 = scalar_lea.vmem (%p1202_p4), [#allocation2], %s841_s5 }
  0x27   : > { %s164_s6 = sadd.s32 (%p1202_p4), %s1096_s20, %s902_s25 }
  0x28   : > { %s842_s8 = sshll.u32 (%p1202_p4), %s164_s6, 2 }
  0x29   : > { %s166_s27 = scalar_lea.vmem %s1349_s0, %s842_s8 }
  0x2a   : > { %v183_v0 = vld [vmem:[%s166_s27] sm:$0xf]  ;;  %v185_v1 = vld [vmem:[%s166_s27 + $0x24] sm:$0xf] }
  0x2b   : > { %184 = vst [vmem:[%s162_s23] sm:$0xf] %v183_v0  ;;  %186 = vst [vmem:[%s162_s23 + $0x4] sm:$0xf] %v185_v1 }
  0x2c PF: > { %214 = sbr.rel (!%p1216_p8) target bundleno = 52 (0x34), region = 61  ;;  %s216_s29 = sand.u32 (%p1216_p8), 1, %s1076_s15  }
  0x2d   : > { %s743_s3 = smul.u32 (%p1216_p8), 18, %s1100_s21  ;;  %s843_s25 = sshll.u32 (%p1216_p8), %s216_s29, 3 }
  0x2e   : > { %s218_s5 = scalar_lea.vmem (%p1216_p8), [#allocation3], %s843_s25 }
  0x2f   : > { %s744_s6 = sadd.s32 (%p1216_p8), %s1096_s20, %s743_s3 }
  0x30   : > { %s844_s24 = sshll.u32 (%p1216_p8), %s744_s6, 2 }
  0x31   : > { %s746_s8 = scalar_lea.vmem %s1350_s1, %s844_s24 }
  0x32   : > { %v845_v2 = vld [vmem:[%s746_s8 + $0xc] sm:$0xf]  ;;  %v846_v3 = vld [vmem:[%s746_s8 + $0x30] sm:$0xf] }
  0x33   : > { %241 = vst [vmem:[%s218_s5] sm:$0xf] %v845_v2  ;;  %243 = vst [vmem:[%s218_s5 + $0x4] sm:$0xf] %v846_v3 }
  0x34 PF: > { %271 = sbr.rel (!%p1235_p12) target bundleno = 60 (0x3c), region = 102  ;;  %s273_s9 = sand.u32 (%p1235_p12), 1, %s1068_s13  }
  0x35   : > { %s750_s30 = smul.u32 (%p1235_p12), 18, %s1100_s21  ;;  %s847_s27 = sshll.u32 (%p1235_p12), %s273_s9, 3 }
  0x36   : > { %s275_s25 = scalar_lea.vmem (%p1235_p12), [#allocation4], %s847_s27 }
  0x37   : > { %s751_s23 = sadd.s32 (%p1235_p12), %s1096_s20, %s750_s30 }
  0x38   : > { %s848_s29 = sshll.u32 (%p1235_p12), %s751_s23, 2 }
  0x39   : > { %s753_s24 = scalar_lea.vmem %s1351_s2, %s848_s29 }
  0x3a   : > { %v849_v4 = vld [vmem:[%s753_s24 + $0x18] sm:$0xf]  ;;  %v850_v5 = vld [vmem:[%s753_s24 + $0x3c] sm:$0xf] }
  0x3b   : > { %298 = vst [vmem:[%s275_s25] sm:$0xf] %v849_v4  ;;  %300 = vst [vmem:[%s275_s25 + $0x4] sm:$0xf] %v850_v5 }
  0x3c PF: > { %p851_p1 = scmp.ge.s32.totalorder %s1104_s22, 1  ;;  %p327_p2 = scmp.lt.s32.totalorder %s1104_s22, 7 }
  0x3e   : > { %p328_p3 = pnand %p851_p1, %p327_p2 }
  0x3f   : > { %s341_s4 = sand.u32 (!%p328_p3), 1, %s1072_s14   ;;  %s334_s6 = sand.u32 (!%p328_p3), 1, %s1080_s16  }
  0x40   : > { %331 = sbr.rel (%p328_p3) target bundleno = 1129 (0x469), region = 143  ;;  %s853_s10 = sshll.u32 (!%p328_p3), %s341_s4, 3 }
  0x41   : > { %s1279_s8 = sshll.u32 (!%p328_p3), %s334_s6, 3  ;;  %s343_s5 = scalar_lea.vmem (!%p328_p3), [#allocation3], %s853_s10 }
  0x42   : > { %s336_s9 = scalar_lea.vmem (!%p328_p3), [#allocation2], %s1279_s8  ;;  %s1108_s14 = smov (!%p328_p3), 64  }
  0x43   : > { %s348_s16 = sand.u32 (!%p328_p3), 1, %s1064_s12   ;;  %s377_s12 = scalar_lea.vmem (!%p328_p3), [#allocation5], %s1279_s8 }
  0x44   : > { %s854_s30 = sshll.u32 (!%p328_p3), %s348_s16, 3 }
  0x45   : > { %v1106_v6 = vmov 0.0   ;;  %vm1107_vm0 = vmmov 0   ;;  %vm397_vm1 = vcmask 523264   ;;  %v1000_v7 = vld [vmem:[%s343_s5] sm:$0x1f]   ;;  %vm445_vm2 = vcmask 80896  }
  0x46   : > { %878 = vmatprep.subr.bf16.mxu0 %v1106_v6  ;;  %880 = vmatprep.mubr.msk.bf16.mxu0 %vm1107_vm0, %v1106_v6  ;;  %v381_v8 = vld [vmem:[%s336_s9] sm:$0xf]  ;;  %v382_v9 = vld [vmem:[%s336_s9 + $0x4] sm:$0x1]  ;;  %v402_v10 = vsel %vm397_vm1, %v1000_v7, 0  ;;  %vm449_vm3 = vcmask 74752  }
  0x47   : > { %884 = vmatprep.subr.bf16.mxu1 %v1106_v6  ;;  %886 = vmatprep.mubr.msk.bf16.mxu1 %vm1107_vm0, %v1106_v6  ;;  %v387_v11 = vunpack.c.l.bf16 %v381_v8  ;;  %v388_v12 = vunpack.c.l.bf16 %v382_v9  ;;  %vm476_vm4 = vcmask 1044480   ;;  %s350_s27 = scalar_lea.vmem [#allocation4], %s854_s30  ;;  %s903_s23 = smul.u32 (%p1242_p13), 6, %s1092_s19 }
  0x48   : > { %879 = vmatpush3.bf16.xpose.msra.mxu0 %v402_v10  ;;  %526 = vrot.lane.b32.xlu1 %v1000_v7, %s1108_s14  ;;  %v1001_v22 = vld [vmem:[%s350_s27] sm:$0x1f]   ;;  %s1364_s25 = sld [smem:[#allocation9_spill]] (%p1242_p13) }
  0x49   : > { %v389_v13 = vmul.f32 0.125, %v387_v11  ;;  %v390_v14 = vmul.f32 0.125, %v388_v12  ;;  %896 = vmatprep.subr.bf16.mxu0 %v1106_v6  ;;  %v478_v23 = vsel %vm476_vm4, %v1001_v22, 0  ;;  %s675_s29 = sadd.s32 (%p1242_p13), %s1088_s18, %s903_s23 }
  0x4a   : > { %885 = vmatpush3.bf16.msra.mxu1 %v478_v23  ;;  %s865_s3 = sshll.u32 (%p1242_p13), %s675_s29, 2 }
  0x4b   : > { %v391_v15 = vpack.c.bf16 %v390_v14, %v389_v13  ;;  %890 = vmatprep.subr.bf16.mxu1 %v1106_v6 }
  0x4d   : > { %524 = vrot.lane.b32.xlu1 %v391_v15, %s1108_s14 }
  0x4e   : > { %s677_s4 = scalar_lea.vmem (%p1242_p13), %s1364_s25, %s865_s3 }
  0x4f   : > { %881 = vmatmul.mubr.msk.bf16.vlgmr.msra.gmra.mxu0 %vm397_vm1, %v391_v15 }
  0x50   : > { %898 = vmatprep.mubr.msk.bf16.mxu0 %vm1107_vm0, %v1106_v6 }
  0xba   : > { %v527_v30 = vpop.permute.xlu1 %526 }
  0xbb   : > { %v532_v33 = vsel %vm397_vm1, %v527_v30, 0 }
  0xbf   : > { %v525_v35 = vpop.permute.xlu1 %524 }
 0x10f   : > { %v438_v16 = vpop.f32.mrf.mxu0 }
 0x110   : > { %v446_v17 = vsel %vm445_vm2, %v438_v16, -inf }
 0x111   : > { %447 = vmax.xlane.f32.xlu0 %v446_v17  ;;  %v882_v18 = vpop.f32.mrf.mxu0 }
 0x113   : > { %v441_v19 = vpop.f32.mrf.mxu0 }
 0x114   : > { %v450_v20 = vsel %vm449_vm3, %v441_v19, -inf }
 0x115   : > { %451 = vmax.xlane.f32.xlu0 %v450_v20  ;;  %v883_v21 = vpop.f32.mrf.mxu0 }
 0x19a   : > { %v448_v24 = vpop.xlane.xlu0 %447 }
 0x19b   : > { %v453_v25 = vsub.f32 %v438_v16, %v448_v24 }
 0x19d   : > { %v455_v26 = vmul.f32 1.442695, %v453_v25 }
 0x19e   : > { %v452_v27 = vpop.xlane.xlu0 %451 }
 0x19f   : > { %v454_v28 = vsub.f32 %v441_v19, %v452_v27  ;;  %1002 = vpow2.f32 %v455_v26 }
 0x1a1   : > { %v457_v29 = vmul.f32 1.442695, %v454_v28 }
 0x1a3   : > { %1004 = vpow2.f32 %v457_v29 }
 0x1ac   : > { %v1003_v31 = vpop.eup %1002 }
 0x1ad   : > { %v459_v59 = vsel %vm445_vm2, %v1003_v31, 0.0 }
 0x1b0   : > { %v1005_v32 = vpop.eup %1004 }
 0x1b1   : > { %v467_v34 = vpack.c.bf16 %v1005_v32, %v1003_v31  ;;  %v462_v60 = vsel %vm449_vm3, %v1005_v32, 0.0 }
 0x1b3   : > { %887 = vmatmul.mubr.msk.bf16.vlgmr.msra.gmra.mxu1 %vm445_vm2, %v467_v34 }
 0x1b4   : > { %891 = vmatpush3.bf16.xpose.msra.mxu1 %v532_v33  ;;  %892 = vmatprep.mubr.msk.bf16.mxu1 %vm1107_vm0, %v1106_v6 }
 0x1bb   : > { %893 = vmatmul.mubr.msk.bf16.vlgmr.msra.gmra.mxu1 %vm397_vm1, %v525_v35 }
 0x273   : > { %v514_v36 = vpop.f32.mrf.mxu1 }
 0x275   : > { %v888_v37 = vpop.f32.mrf.mxu1 }
 0x277   : > { %v517_v38 = vpop.f32.mrf.mxu1 }
 0x279   : > { %v889_v39 = vpop.f32.mrf.mxu1 }
 0x27b   : > { %v568_v40 = vpop.f32.mrf.mxu1 }
 0x27c   : > { %v575_v41 = vsel %vm445_vm2, %v568_v40, -inf }
 0x27d   : > { %576 = vmax.xlane.f32.xlu0 %v575_v41  ;;  %v894_v42 = vpop.f32.mrf.mxu1 }
 0x27f   : > { %v571_v43 = vpop.f32.mrf.mxu1 }
 0x280   : > { %v578_v44 = vsel %vm449_vm3, %v571_v43, -inf }
 0x281   : > { %579 = vmax.xlane.f32.xlu1 %v578_v44  ;;  %v895_v45 = vpop.f32.mrf.mxu1 }
 0x293   : > { %596 = vrot.lane.b32.xlu0 %v1001_v22, %s1108_s14 }
 0x306   : > { %v577_v46 = vpop.xlane.xlu0 %576 }
 0x307   : > { %v581_v47 = vsub.f32 %v568_v40, %v577_v46 }
 0x309   : > { %v583_v48 = vmul.f32 1.442695, %v581_v47 }
 0x30a   : > { %v580_v49 = vpop.xlane.xlu1 %579  ;;  %v597_v50 = vpop.permute.xlu0 %596 }
 0x30b   : > { %1006 = vpow2.f32 %v583_v48  ;;  %v582_v51 = vsub.f32 %v571_v43, %v580_v49  ;;  %v602_v52 = vsel %vm476_vm4, %v597_v50, 0 }
 0x30c   : > { %897 = vmatpush3.bf16.msra.mxu0 %v602_v52 }
 0x30d   : > { %v585_v53 = vmul.f32 1.442695, %v582_v51 }
 0x30f   : > { %1008 = vpow2.f32 %v585_v53 }
 0x318   : > { %v1007_v54 = vpop.eup %1006 }
 0x319   : > { %v587_v55 = vsel %vm445_vm2, %v1007_v54, 0.0 }
 0x31a   : > { %588 = vadd.xlane.f32.xlu0 %v587_v55 }
 0x31c   : > { %v1009_v56 = vpop.eup %1008 }
 0x31d   : > { %v590_v57 = vsel %vm449_vm3, %v1009_v56, 0.0  ;;  %v595_v58 = vpack.c.bf16 %v1009_v56, %v1007_v54 }
 0x31e   : > { %591 = vadd.xlane.f32.xlu1 %v590_v57 }
 0x31f   : > { %899 = vmatmul.mubr.msk.bf16.vlgmr.msra.gmra.mxu0 %vm445_vm2, %v595_v58 }
 0x322   : > { %460 = vadd.xlane.f32.xlu1 %v459_v59 }
 0x326   : > { %463 = vadd.xlane.f32.xlu1 %v462_v60 }
 0x3a3   : > { %v589_v61 = vpop.xlane.xlu0 %588 }
 0x3a4   : > { %1010 = vrcp.f32 %v589_v61 }
 0x3a7   : > { %v592_v62 = vpop.xlane.xlu1 %591 }
 0x3a8   : > { %1012 = vrcp.f32 %v592_v62 }
 0x3ab   : > { %v461_v8 = vpop.xlane.xlu1 %460 }
 0x3ac   : > { %1014 = vrcp.f32 %v461_v8 }
 0x3af   : > { %v464_v9 = vpop.xlane.xlu1 %463 }
 0x3b0   : > { %1016 = vrcp.f32 %v464_v9 }
 0x3b1   : > { %v1011_v1 = vpop.eup %1010 }
 0x3b5   : > { %v1013_v2 = vpop.eup %1012 }
 0x3b9   : > { %v1015_v10 = vpop.eup %1014 }
 0x3ba   : > { %v521_v13 = vmul.f32 %v1015_v10, %v514_v36 }
 0x3bd   : > { %v1017_v11 = vpop.eup %1016 }
 0x3be   : > { %v522_v14 = vmul.f32 %v1017_v11, %v517_v38 }
 0x3df   : > { %v638_v63 = vpop.f32.mrf.mxu0 }
 0x3e0   : > { %v645_v4 = vmul.f32 %v1011_v1, %v638_v63 }
 0x3e1   : > { %v900_v0 = vpop.f32.mrf.mxu0 }
 0x3e3   : > { %v641_v3 = vpop.f32.mrf.mxu0 }
 0x3e4   : > { %v646_v5 = vmul.f32 %v1013_v2, %v641_v3 }
 0x3e5   : > { %v901_v6 = vpop.f32.mrf.mxu0 }
 0x3e6   : > { %v995_v7 = vpack.i.bf16 %v646_v5, %v645_v4 }
 0x3e8   : > { %996 = vrot.lane.b32.xlu1 %v995_v7, %s1108_s14 }
 0x45a   : > { %v997_v12 = vpop.permute.xlu1 %996 }
 0x45b   : > { %v999_v15 = vunpack.i.h.bf16 %v997_v12  ;;  %v998_v16 = vunpack.i.l.bf16 %v997_v12 }
 0x45c   : > { %673 = sbr.rel (!%p1242_p13) target bundleno = 1129 (0x469), region = 159 }
 0x45d   : > { %v656_v17 = vsel %vm397_vm1, %v522_v14, %v999_v15  ;;  %v655_v18 = vsel %vm397_vm1, %v521_v13, %v998_v16 }
 0x45e   : > { %v869_v19 = vpack.c.bf16 %v656_v17, %v656_v17  ;;  %v868_v20 = vpack.c.bf16 %v655_v18, %v655_v18 }
 0x460   : > { %666 = vst [vmem:[%s377_s12 + $0x4] sm:$0x1] %v869_v19  ;;  %665 = vst [vmem:[%s377_s12] sm:$0xf] %v868_v20 }
 0x467   : > { %v694_v21 = vld [vmem:[%s377_s12] sm:$0xf]  ;;  %v696_v22 = vld [vmem:[%s377_s12 + $0x4] sm:$0xf] }
 0x468   : > { %695 = vst [vmem:[%s677_s4] sm:$0xf] %v694_v21  ;;  %697 = vst [vmem:[%s677_s4 + $0xc] sm:$0xf] %v696_v22 }
 0x469 PF: > { %s13_s22 = sadd.s32 1, %s1104_s22   ;;  %s1365_s18 = sld [smem:[#allocation8_spill]] }
 0x46a   : > { %p10_p4 = scmp.ge.s32.totalorder %s13_s22, 8   ;;  %s1366_s7 = sld [smem:[#allocation6_spill]] }
 0x46b   : > { %s1367_s6 = sld [smem:[#allocation7_spill]]  ;;  %s1368_s12 = smov %s1068_s13 }
 0x46c   : > { %s1369_s13 = smov %s1247_s26  ;;  %s1370_s14 = smov %s1076_s15 }
 0x46d   : > { %s1371_s15 = smov %s1225_s28  ;;  %s1372_s16 = smov %s1084_s17 }
 0x46e   : > { %s1375_s19 = smov %s1100_s21  ;;  %12 = sbr.rel (!%p10_p4) target bundleno = 8 (0x8), region = 247 }
 0x46f   : > { %s1373_s17 = smov %s1365_s18  ;;  %s1374_s18 = smov %s1096_s20 }
 0x470   : > { %s1376_s20 = smov %s1366_s7 }
 0x471   : > { %s1377_s21 = smov %s1367_s6 }

// kernel: model_forward.61
= control target key start
LH: loop header
LB: loop body
LE: loop exit
PB: predicated region body
PF: predicated region fallthrough
CT: control target
= control target key end

     0   :  { %s2203_s1 = inlined_call_operand.vmem [shape: bf16[768,384], index: 1, kind: input, shape index: {}]   ;;  %s2204_s0 = inlined_call_operand.vmem [shape: f32[16,768], index: 0, kind: input, shape index: {}]   ;;  %s2205_s2 = inlined_call_operand.vmem [shape: f32[1,384], index: 2, kind: input, shape index: {}]   ;;  %s2206_s3 = inlined_call_operand.vmem [shape: f32[16,384], index: 3, kind: output, shape index: {}]  }
   0x1   :  { %v1482_v0 = vld [vmem:[%s2203_s1 + $0xac] ss:$12 sps:$4 sm:$0xff]   ;;  %v1486_v2 = vld [vmem:[%s2203_s1 + $0xa8] ss:$12 sps:$4 sm:$0xff]   ;;  %v1492_v6 = vld [vmem:[%s2203_s1 + $0x90] ss:$12 sps:$4 sm:$0xff]  }
   0x2   :  { %v1484_v1 = vld [vmem:[%s2203_s1 + $0x22c] ss:$12 sps:$4 sm:$0xff]   ;;  %1010 = vmatprep.subr.bf16.mxu0 %v1482_v0  ;;  %v1487_v3 = vld [vmem:[%s2203_s1 + $0x228] ss:$12 sps:$4 sm:$0xff]   ;;  %v1493_v7 = vld [vmem:[%s2203_s1 + $0x210] ss:$12 sps:$4 sm:$0xff]  }
   0x3   :  { %1053 = vmatprep.subr.bf16.mxu1 %v1484_v1  ;;  %v1488_v4 = vld [vmem:[%s2203_s1 + $0x94] ss:$12 sps:$4 sm:$0xff]   ;;  %1011 = vmatpush1.bf16.msra.mxu0 %v1486_v2  ;;  %v1494_v8 = vld [vmem:[%s2203_s1 + $0x7c] ss:$12 sps:$4 sm:$0xff]   ;;  %v1498_v10 = vld [vmem:[%s2203_s1 + $0x78] ss:$12 sps:$4 sm:$0xff]  }
   0x4   :  { %1054 = vmatpush1.bf16.msra.mxu1 %v1487_v3  ;;  %v1490_v5 = vld [vmem:[%s2203_s1 + $0x214] ss:$12 sps:$4 sm:$0xff]   ;;  %1012 = vmatprep.subr.bf16.mxu0 %v1488_v4  ;;  %v1496_v9 = vld [vmem:[%s2203_s1 + $0x1fc] ss:$12 sps:$4 sm:$0xff]   ;;  %v1499_v11 = vld [vmem:[%s2203_s1 + $0x1f8] ss:$12 sps:$4 sm:$0xff]  }
   0x5   :  { %1055 = vmatprep.subr.bf16.mxu1 %v1490_v5  ;;  %v1500_v12 = vld [vmem:[%s2203_s1 + $0x64] ss:$12 sps:$4 sm:$0xff]   ;;  %v1504_v14 = vld [vmem:[%s2203_s1 + $0x60] ss:$12 sps:$4 sm:$0xff]   ;;  %v1510_v18 = vld [vmem:[%s2203_s1 + $0x48] ss:$12 sps:$4 sm:$0xff]  }
   0x6   :  { %v1502_v13 = vld [vmem:[%s2203_s1 + $0x1e4] ss:$12 sps:$4 sm:$0xff]   ;;  %v1505_v15 = vld [vmem:[%s2203_s1 + $0x1e0] ss:$12 sps:$4 sm:$0xff]   ;;  %v1511_v19 = vld [vmem:[%s2203_s1 + $0x1c8] ss:$12 sps:$4 sm:$0xff]  }
   0x7   :  { %1013 = vmatpush1.bf16.msra.mxu0 %v1492_v6  ;;  %v1506_v16 = vld [vmem:[%s2203_s1 + $0x4c] ss:$12 sps:$4 sm:$0xff]   ;;  %v1512_v20 = vld [vmem:[%s2203_s1 + $0x34] ss:$12 sps:$4 sm:$0xff]   ;;  %v1516_v22 = vld [vmem:[%s2203_s1 + $0x30] ss:$12 sps:$4 sm:$0xff]  }
   0x8   :  { %1056 = vmatpush1.bf16.msra.mxu1 %v1493_v7  ;;  %1014 = vmatprep.subr.bf16.mxu0 %v1494_v8  ;;  %v1508_v17 = vld [vmem:[%s2203_s1 + $0x1cc] ss:$12 sps:$4 sm:$0xff]   ;;  %v1514_v21 = vld [vmem:[%s2203_s1 + $0x1b4] ss:$12 sps:$4 sm:$0xff]   ;;  %v1517_v23 = vld [vmem:[%s2203_s1 + $0x1b0] ss:$12 sps:$4 sm:$0xff]  }
   0x9   :  { %1057 = vmatprep.subr.bf16.mxu1 %v1496_v9  ;;  %v1518_v24 = vld [vmem:[%s2203_s1 + $0x1c] ss:$12 sps:$4 sm:$0xff]   ;;  %v1522_v26 = vld [vmem:[%s2203_s1 + $0x18] ss:$12 sps:$4 sm:$0xff]   ;;  %v1528_v30 = vld [vmem:[%s2203_s1] ss:$12 sps:$4 sm:$0xff]  }
   0xa   :  { %v1520_v25 = vld [vmem:[%s2203_s1 + $0x19c] ss:$12 sps:$4 sm:$0xff]   ;;  %v1523_v27 = vld [vmem:[%s2203_s1 + $0x198] ss:$12 sps:$4 sm:$0xff]   ;;  %v1529_v31 = vld [vmem:[%s2203_s1 + $0x180] ss:$12 sps:$4 sm:$0xff]  }
   0xb   :  { %1015 = vmatpush1.bf16.msra.mxu0 %v1498_v10  ;;  %v1524_v28 = vld [vmem:[%s2203_s1 + $0x4] ss:$12 sps:$4 sm:$0xff]   ;;  %v1530_v32 = vld [vmem:[%s2203_s1 + $0x16c] ss:$12 sps:$4 sm:$0xff]   ;;  %v1534_v34 = vld [vmem:[%s2203_s1 + $0x168] ss:$12 sps:$4 sm:$0xff]  }
   0xc   :  { %1058 = vmatpush1.bf16.msra.mxu1 %v1499_v11  ;;  %1016 = vmatprep.subr.bf16.mxu0 %v1500_v12  ;;  %v1526_v29 = vld [vmem:[%s2203_s1 + $0x184] ss:$12 sps:$4 sm:$0xff]   ;;  %v1532_v33 = vld [vmem:[%s2203_s1 + $0x2ec] ss:$12 sps:$4 sm:$0xff]   ;;  %v1535_v35 = vld [vmem:[%s2203_s1 + $0x2e8] ss:$12 sps:$4 sm:$0xff]  }
   0xd   :  { %1059 = vmatprep.subr.bf16.mxu1 %v1502_v13  ;;  %v1536_v36 = vld [vmem:[%s2203_s1 + $0x154] ss:$12 sps:$4 sm:$0xff]   ;;  %v1540_v38 = vld [vmem:[%s2203_s1 + $0x150] ss:$12 sps:$4 sm:$0xff]   ;;  %v1546_v42 = vld [vmem:[%s2203_s1 + $0x138] ss:$12 sps:$4 sm:$0xff]  }
   0xe   :  { %v1538_v37 = vld [vmem:[%s2203_s1 + $0x2d4] ss:$12 sps:$4 sm:$0xff]   ;;  %v1541_v39 = vld [vmem:[%s2203_s1 + $0x2d0] ss:$12 sps:$4 sm:$0xff]   ;;  %v1547_v43 = vld [vmem:[%s2203_s1 + $0x2b8] ss:$12 sps:$4 sm:$0xff]  }
   0xf   :  { %1017 = vmatpush1.bf16.msra.mxu0 %v1504_v14  ;;  %v1542_v40 = vld [vmem:[%s2203_s1 + $0x13c] ss:$12 sps:$4 sm:$0xff]   ;;  %v1548_v44 = vld [vmem:[%s2203_s1 + $0x124] ss:$12 sps:$4 sm:$0xff]   ;;  %v1552_v47 = vld [vmem:[%s2203_s1 + $0x120] ss:$12 sps:$4 sm:$0xff]  }
  0x10   :  { %1060 = vmatpush1.bf16.msra.mxu1 %v1505_v15  ;;  %1018 = vmatprep.subr.bf16.mxu0 %v1506_v16  ;;  %v1544_v41 = vld [vmem:[%s2203_s1 + $0x2bc] ss:$12 sps:$4 sm:$0xff]   ;;  %v1550_v45 = vld [vmem:[%s2203_s1 + $0x2a4] ss:$12 sps:$4 sm:$0xff]   ;;  %v1553_v48 = vld [vmem:[%s2203_s1 + $0x2a0] ss:$12 sps:$4 sm:$0xff]  }
  0x11   :  { %1061 = vmatprep.subr.bf16.mxu1 %v1508_v17  ;;  %v16_v46 = vld [vmem:[%s2204_s0 + $0x8] sm:$0xff]  ;;  %v22_v49 = vld [vmem:[%s2204_s0 + $0x38] sm:$0xff]  ;;  %v1560_v58 = vld [vmem:[%s2203_s1 + $0xf4] ss:$12 sps:$4 sm:$0xff]  }
  0x12   :  { %v1844_v50 = vpack.c.bf16 %v22_v49, %v16_v46  ;;  %v18_v51 = vld [vmem:[%s2204_s0 + $0x18] sm:$0xff]  ;;  %v24_v52 = vld [vmem:[%s2204_s0 + $0x48] sm:$0xff]  ;;  %v1562_v59 = vld [vmem:[%s2203_s1 + $0x274] ss:$12 sps:$4 sm:$0xff]  }
  0x13   :  { %1019 = vmatpush1.bf16.msra.mxu0 %v1510_v18  ;;  %v1554_v53 = vld [vmem:[%s2203_s1 + $0x10c] ss:$12 sps:$4 sm:$0xff]   ;;  %v1858_v55 = vpack.c.bf16 %v24_v52, %v18_v51  ;;  %v1558_v56 = vld [vmem:[%s2203_s1 + $0x108] ss:$12 sps:$4 sm:$0xff]   ;;  %v1564_v60 = vld [vmem:[%s2203_s1 + $0xf0] ss:$12 sps:$4 sm:$0xff]  }
  0x14   :  { %1062 = vmatpush1.bf16.msra.mxu1 %v1511_v19  ;;  %1020 = vmatprep.subr.bf16.mxu0 %v1512_v20  ;;  %v1556_v54 = vld [vmem:[%s2203_s1 + $0x28c] ss:$12 sps:$4 sm:$0xff]   ;;  %v1559_v57 = vld [vmem:[%s2203_s1 + $0x288] ss:$12 sps:$4 sm:$0xff]   ;;  %v1565_v61 = vld [vmem:[%s2203_s1 + $0x270] ss:$12 sps:$4 sm:$0xff]  }
  0x15   :  { %1063 = vmatprep.subr.bf16.mxu1 %v1514_v21  ;;  %1042 = vmatprep.mubr.bf16.mxu0 %v1844_v50  ;;  %v1566_v62 = vld [vmem:[%s2203_s1 + $0xdc] ss:$12 sps:$4 sm:$0xff]   ;;  %v1570_v0 = vld [vmem:[%s2203_s1 + $0xd8] ss:$12 sps:$4 sm:$0xff]   ;;  %v1576_v4 = vld [vmem:[%s2203_s1 + $0xc0] ss:$12 sps:$4 sm:$0xff]  }
  0x16   :  { %1085 = vmatprep.mubr.bf16.mxu1 %v1858_v55  ;;  %v1568_v63 = vld [vmem:[%s2203_s1 + $0x25c] ss:$12 sps:$4 sm:$0xff]   ;;  %v1571_v1 = vld [vmem:[%s2203_s1 + $0x258] ss:$12 sps:$4 sm:$0xff]   ;;  %v1577_v5 = vld [vmem:[%s2203_s1 + $0x240] ss:$12 sps:$4 sm:$0xff]  }
  0x17   :  { %1021 = vmatpush1.bf16.msra.mxu0 %v1516_v22  ;;  %v1572_v2 = vld [vmem:[%s2203_s1 + $0xc4] ss:$12 sps:$4 sm:$0xff]   ;;  %v1580_v8 = vld [vmem:[%s2203_s1 + $0x3ac] ss:$12 sps:$4 sm:$0xff]   ;;  %v1578_v12 = vld [vmem:[%s2203_s1 + $0x3a8] ss:$12 sps:$4 sm:$0xff]  }
  0x18   :  { %1064 = vmatpush1.bf16.msra.mxu1 %v1517_v23  ;;  %1022 = vmatprep.subr.bf16.mxu0 %v1518_v24  ;;  %v1574_v3 = vld [vmem:[%s2203_s1 + $0x244] ss:$12 sps:$4 sm:$0xff]   ;;  %v1585_v16 = vld [vmem:[%s2203_s1 + $0x394] ss:$12 sps:$4 sm:$0xff]   ;;  %v1590_v20 = vld [vmem:[%s2203_s1 + $0x37c] ss:$12 sps:$4 sm:$0xff]  }
  0x19   :  { %1065 = vmatprep.subr.bf16.mxu1 %v1520_v25  ;;  %v15_v6 = vld [vmem:[%s2204_s0] sm:$0xff]  ;;  %v21_v7 = vld [vmem:[%s2204_s0 + $0x30] sm:$0xff] }
  0x1a   :  { %v17_v9 = vld [vmem:[%s2204_s0 + $0x10] sm:$0xff]  ;;  %v23_v10 = vld [vmem:[%s2204_s0 + $0x40] sm:$0xff]  ;;  %v1925_v13 = vpack.c.bf16 %v21_v7, %v15_v6  ;;  %v1650_v7 = vld [vmem:[%s2203_s1 + $0x3dc] ss:$12 sps:$4 sm:$0xff]  }
  0x1b   :  { %1023 = vmatpush1.bf16.msra.mxu0 %v1522_v26  ;;  %v1581_v11 = vld [vmem:[%s2203_s1 + $0x170] ss:$12 sps:$4 sm:$0xff]   ;;  %v1927_v14 = vpack.c.bf16 %v23_v10, %v17_v9  ;;  %v1586_v17 = vld [vmem:[%s2203_s1 + $0x158] ss:$12 sps:$4 sm:$0xff]   ;;  %v1591_v21 = vld [vmem:[%s2203_s1 + $0x140] ss:$12 sps:$4 sm:$0xff]  }
  0x1c   :  { %1066 = vmatpush1.bf16.msra.mxu1 %v1523_v27  ;;  %1024 = vmatprep.subr.bf16.mxu0 %v1524_v28  ;;  %v1582_v15 = vld [vmem:[%s2203_s1 + $0xb0] ss:$12 sps:$4 sm:$0xff]   ;;  %v1587_v19 = vld [vmem:[%s2203_s1 + $0x98] ss:$12 sps:$4 sm:$0xff]   ;;  %v1592_v23 = vld [vmem:[%s2203_s1 + $0x80] ss:$12 sps:$4 sm:$0xff]  }
  0x1d   :  { %1067 = vmatprep.subr.bf16.mxu1 %v1526_v29  ;;  %v1583_v18 = vld [vmem:[%s2203_s1 + $0x390] ss:$12 sps:$4 sm:$0xff]   ;;  %v1588_v22 = vld [vmem:[%s2203_s1 + $0x378] ss:$12 sps:$4 sm:$0xff]   ;;  %v1596_v25 = vld [vmem:[%s2203_s1 + $0x128] ss:$12 sps:$4 sm:$0xff]  }
  0x1e   :  { %v1595_v24 = vld [vmem:[%s2203_s1 + $0x364] ss:$12 sps:$4 sm:$0xff]   ;;  %v1593_v26 = vld [vmem:[%s2203_s1 + $0x360] ss:$12 sps:$4 sm:$0xff]   ;;  %v1597_v27 = vld [vmem:[%s2203_s1 + $0x68] ss:$12 sps:$4 sm:$0xff]  }
  0x1f   :  { %1025 = vmatpush1.bf16.msra.mxu0 %v1528_v30  ;;  %v1600_v28 = vld [vmem:[%s2203_s1 + $0x34c] ss:$12 sps:$4 sm:$0xff]   ;;  %v1601_v29 = vld [vmem:[%s2203_s1 + $0x110] ss:$12 sps:$4 sm:$0xff]   ;;  %v1598_v30 = vld [vmem:[%s2203_s1 + $0x348] ss:$12 sps:$4 sm:$0xff]  }
  0x20   :  { %1068 = vmatpush1.bf16.msra.mxu1 %v1529_v31  ;;  %1026 = vmatprep.subr.bf16.mxu0 %v1530_v32  ;;  %v1602_v31 = vld [vmem:[%s2203_s1 + $0x50] ss:$12 sps:$4 sm:$0xff]   ;;  %v1605_v32 = vld [vmem:[%s2203_s1 + $0x334] ss:$12 sps:$4 sm:$0xff]   ;;  %v1626_v49 = vld [vmem:[%s2203_s1 + $0x2d8] ss:$12 sps:$4 sm:$0xff]  }
  0x21   :  { %1069 = vmatprep.subr.bf16.mxu1 %v1532_v33  ;;  %v1606_v33 = vld [vmem:[%s2203_s1 + $0xf8] ss:$12 sps:$4 sm:$0xff]   ;;  %v1618_v46 = vld [vmem:[%s2203_s1 + $0x468] ss:$12 sps:$4 sm:$0xff]   ;;  %v1623_v51 = vld [vmem:[%s2203_s1 + $0x450] ss:$12 sps:$4 sm:$0xff]  }
  0x22   :  { %v1627_v52 = vld [vmem:[%s2203_s1 + $0x218] ss:$12 sps:$4 sm:$0xff]   ;;  %v1652_v10 = vld [vmem:[%s2203_s1 + $0x1a0] ss:$12 sps:$4 sm:$0xff]  }
  0x23   :  { %1027 = vmatpush2.bf16.msra.mxu0 %v1534_v34  ;;  %v1603_v34 = vld [vmem:[%s2203_s1 + $0x330] ss:$12 sps:$4 sm:$0xff]   ;;  %v1647_v6 = vld [vmem:[%s2203_s1 + $0x1b8] ss:$12 sps:$4 sm:$0xff]  }
  0x24   :  { %1070 = vmatpush2.bf16.msra.mxu1 %v1535_v35  ;;  %1028 = vmatprep.subr.bf16.mxu0 %v1536_v36  ;;  %v1607_v35 = vld [vmem:[%s2203_s1 + $0x38] ss:$12 sps:$4 sm:$0xff]   ;;  %v1610_v36 = vld [vmem:[%s2203_s1 + $0x31c] ss:$12 sps:$4 sm:$0xff]  }
  0x25   :  { %1071 = vmatprep.subr.bf16.mxu1 %v1538_v37  ;;  %v1611_v37 = vld [vmem:[%s2203_s1 + $0xe0] ss:$12 sps:$4 sm:$0xff]   ;;  %v1648_v9 = vld [vmem:[%s2203_s1 + $0x3d8] ss:$12 sps:$4 sm:$0xff]  }
  0x27   :  { %1029 = vmatpush2.bf16.msra.mxu0 %v1540_v38  ;;  %v1608_v38 = vld [vmem:[%s2203_s1 + $0x318] ss:$12 sps:$4 sm:$0xff]  }
  0x28   :  { %1072 = vmatpush2.bf16.msra.mxu1 %v1541_v39  ;;  %1030 = vmatprep.subr.bf16.mxu0 %v1542_v40  ;;  %v1612_v39 = vld [vmem:[%s2203_s1 + $0x20] ss:$12 sps:$4 sm:$0xff]   ;;  %v1615_v40 = vld [vmem:[%s2203_s1 + $0x304] ss:$12 sps:$4 sm:$0xff]  }
  0x29   :  { %1073 = vmatprep.subr.bf16.mxu1 %v1544_v41  ;;  %v1616_v41 = vld [vmem:[%s2203_s1 + $0xc8] ss:$12 sps:$4 sm:$0xff]  }
  0x2b   :  { %1031 = vmatpush2.bf16.msra.mxu0 %v1546_v42  ;;  %v1613_v42 = vld [vmem:[%s2203_s1 + $0x300] ss:$12 sps:$4 sm:$0xff]  }
  0x2c   :  { %1074 = vmatpush2.bf16.msra.mxu1 %v1547_v43  ;;  %1032 = vmatprep.subr.bf16.mxu0 %v1548_v44  ;;  %v1617_v43 = vld [vmem:[%s2203_s1 + $0x8] ss:$12 sps:$4 sm:$0xff]   ;;  %v1620_v44 = vld [vmem:[%s2203_s1 + $0x46c] ss:$12 sps:$4 sm:$0xff]  }
  0x2d   :  { %1075 = vmatprep.subr.bf16.mxu1 %v1550_v45  ;;  %v1621_v45 = vld [vmem:[%s2203_s1 + $0x2f0] ss:$12 sps:$4 sm:$0xff]  }
  0x2f   :  { %1033 = vmatpush2.bf16.msra.mxu0 %v1552_v47  ;;  %v1622_v47 = vld [vmem:[%s2203_s1 + $0x230] ss:$12 sps:$4 sm:$0xff]  }
  0x30   :  { %1076 = vmatpush2.bf16.msra.mxu1 %v1553_v48  ;;  %1034 = vmatprep.subr.bf16.mxu0 %v1554_v53  ;;  %v1625_v48 = vld [vmem:[%s2203_s1 + $0x454] ss:$12 sps:$4 sm:$0xff]   ;;  %v26_v53 = vld [vmem:[%s2204_s0 + $0x58] sm:$0xff] }
  0x31   :  { %1077 = vmatprep.subr.bf16.mxu1 %v1556_v54  ;;  %v1630_v54 = vld [vmem:[%s2203_s1 + $0x43c] ss:$12 sps:$4 sm:$0xff]  }
  0x33   :  { %1035 = vmatpush2.bf16.msra.mxu0 %v1558_v56 }
  0x34   :  { %1078 = vmatpush2.bf16.msra.mxu1 %v1559_v57  ;;  %1036 = vmatprep.subr.bf16.mxu0 %v1560_v58  ;;  %v1631_v57 = vld [vmem:[%s2203_s1 + $0x2c0] ss:$12 sps:$4 sm:$0xff]   ;;  %v1628_v58 = vld [vmem:[%s2203_s1 + $0x438] ss:$12 sps:$4 sm:$0xff]  }
  0x35   :  { %1079 = vmatprep.subr.bf16.mxu1 %v1562_v59  ;;  %v1632_v59 = vld [vmem:[%s2203_s1 + $0x200] ss:$12 sps:$4 sm:$0xff]  }
  0x37   :  { %1037 = vmatpush2.bf16.msra.mxu0 %v1564_v60  ;;  %v1635_v60 = vld [vmem:[%s2203_s1 + $0x424] ss:$12 sps:$4 sm:$0xff]  }
  0x38   :  { %1080 = vmatpush2.bf16.msra.mxu1 %v1565_v61  ;;  %1038 = vmatprep.subr.bf16.mxu0 %v1566_v62  ;;  %v1636_v61 = vld [vmem:[%s2203_s1 + $0x2a8] ss:$12 sps:$4 sm:$0xff]  }
  0x39   :  { %1081 = vmatprep.subr.bf16.mxu1 %v1568_v63  ;;  %v1637_v62 = vld [vmem:[%s2203_s1 + $0x1e8] ss:$12 sps:$4 sm:$0xff]   ;;  %v1640_v63 = vld [vmem:[%s2203_s1 + $0x40c] ss:$12 sps:$4 sm:$0xff]  }
  0x3b   :  { %1039 = vmatpush2.bf16.msra.mxu0 %v1570_v0  ;;  %v1641_v0 = vld [vmem:[%s2203_s1 + $0x290] ss:$12 sps:$4 sm:$0xff]  }
  0x3c   :  { %1082 = vmatpush2.bf16.msra.mxu1 %v1571_v1  ;;  %1040 = vmatprep.subr.bf16.mxu0 %v1572_v2  ;;  %v1638_v1 = vld [vmem:[%s2203_s1 + $0x408] ss:$12 sps:$4 sm:$0xff]   ;;  %v1642_v2 = vld [vmem:[%s2203_s1 + $0x1d0] ss:$12 sps:$4 sm:$0xff]  }
  0x3d   :  { %1083 = vmatprep.subr.bf16.mxu1 %v1574_v3  ;;  %v1645_v3 = vld [vmem:[%s2203_s1 + $0x3f4] ss:$12 sps:$4 sm:$0xff]  }
  0x3f   :  { %1041 = vmatpush2.bf16.msra.mxu0 %v1576_v4  ;;  %v1646_v4 = vld [vmem:[%s2203_s1 + $0x278] ss:$12 sps:$4 sm:$0xff]  }
  0x40   :  { %1084 = vmatpush2.bf16.msra.mxu1 %v1577_v5  ;;  %1096 = vmatprep.subr.bf16.mxu0 %v1580_v8  ;;  %v1643_v5 = vld [vmem:[%s2203_s1 + $0x3f0] ss:$12 sps:$4 sm:$0xff]   ;;  %v1651_v8 = vld [vmem:[%s2203_s1 + $0x260] ss:$12 sps:$4 sm:$0xff]  }
  0x41   :  { %1416 = vmatprep.subr.bf16.mxu1 %v1581_v11  ;;  %v1655_v11 = vld [vmem:[%s2203_s1 + $0x3c4] ss:$12 sps:$4 sm:$0xff]  }
  0x42   :  { %1043 = vmatmul.mubr.bf16.vlgmr.msra.gmra.mxu0 %v1925_v13 }
  0x43   :  { %1086 = vmatmul.mubr.bf16.vlgmr.msra.gmra.mxu1 %v1927_v14  ;;  %1097 = vmatpush1.bf16.msra.mxu0 %v1578_v12  ;;  %v1656_v12 = vld [vmem:[%s2203_s1 + $0x248] ss:$12 sps:$4 sm:$0xff]  }
  0x44   :  { %1417 = vmatpush3.bf16.msra.mxu1 %v1582_v15  ;;  %1098 = vmatprep.subr.bf16.mxu0 %v1585_v16  ;;  %v1657_v15 = vld [vmem:[%s2203_s1 + $0x188] ss:$12 sps:$4 sm:$0xff]   ;;  %v19_v16 = vld [vmem:[%s2204_s0 + $0x20] sm:$0xff] }
  0x45   :  { %1418 = vmatprep.subr.bf16.mxu1 %v1586_v17  ;;  %1171 = vmatprep.mubr.bf16.mxu1 %v1844_v50  ;;  %v20_v50 = vld [vmem:[%s2204_s0 + $0x28] sm:$0xff]  ;;  %v25_v17 = vld [vmem:[%s2204_s0 + $0x50] sm:$0xff] }
  0x46   :  { %v2053_v56 = vpack.c.bf16 %v26_v53, %v20_v50 }
  0x47   :  { %1099 = vmatpush1.bf16.msra.mxu0 %v1583_v18  ;;  %v1658_v18 = vld [vmem:[%s2203_s1 + $0x470] ss:$12 sps:$4 sm:$0xff]  }
  0x48   :  { %1419 = vmatpush3.bf16.msra.mxu1 %v1587_v19  ;;  %1100 = vmatprep.subr.bf16.mxu0 %v1590_v20  ;;  %v31_v19 = vpack.c.bf16 %v25_v17, %v19_v16  ;;  %v1659_v20 = vld [vmem:[%s2203_s1 + $0x3b0] ss:$12 sps:$4 sm:$0xff]  }
  0x49   :  { %1420 = vmatprep.subr.bf16.mxu1 %v1591_v21  ;;  %1128 = vmatprep.mubr.bf16.mxu0 %v2053_v56  ;;  %v1660_v21 = vld [vmem:[%s2203_s1 + $0x458] ss:$12 sps:$4 sm:$0xff]  }
  0x4b   :  { %1101 = vmatpush1.bf16.msra.mxu0 %v1588_v22  ;;  %v1661_v22 = vld [vmem:[%s2203_s1 + $0x398] ss:$12 sps:$4 sm:$0xff]  }
  0x4c   :  { %1421 = vmatpush3.bf16.msra.mxu1 %v1592_v23  ;;  %1102 = vmatprep.subr.bf16.mxu0 %v1595_v24  ;;  %v1662_v23 = vld [vmem:[%s2203_s1 + $0x440] ss:$12 sps:$4 sm:$0xff]  }
  0x4d   :  { %1422 = vmatprep.subr.bf16.mxu1 %v1596_v25  ;;  %v1663_v24 = vld [vmem:[%s2203_s1 + $0x380] ss:$12 sps:$4 sm:$0xff]   ;;  %v1665_v25 = vld [vmem:[%s2203_s1 + $0x368] ss:$12 sps:$4 sm:$0xff]  }
  0x4f   :  { %1103 = vmatpush1.bf16.msra.mxu0 %v1593_v26  ;;  %v1666_v26 = vld [vmem:[%s2203_s1 + $0x410] ss:$12 sps:$4 sm:$0xff]  }
  0x50   :  { %1423 = vmatpush3.bf16.msra.mxu1 %v1597_v27  ;;  %1104 = vmatprep.subr.bf16.mxu0 %v1600_v28  ;;  %v1667_v27 = vld [vmem:[%s2203_s1 + $0x350] ss:$12 sps:$4 sm:$0xff]   ;;  %v1668_v28 = vld [vmem:[%s2203_s1 + $0x3f8] ss:$12 sps:$4 sm:$0xff]  }
  0x51   :  { %1424 = vmatprep.subr.bf16.mxu1 %v1601_v29  ;;  %v1669_v29 = vld [vmem:[%s2203_s1 + $0x338] ss:$12 sps:$4 sm:$0xff]  }
  0x53   :  { %1105 = vmatpush1.bf16.msra.mxu0 %v1598_v30  ;;  %v1670_v30 = vld [vmem:[%s2203_s1 + $0x3e0] ss:$12 sps:$4 sm:$0xff]  }
  0x54   :  { %1425 = vmatpush3.bf16.msra.mxu1 %v1602_v31  ;;  %1106 = vmatprep.subr.bf16.mxu0 %v1605_v32  ;;  %v1671_v31 = vld [vmem:[%s2203_s1 + $0x320] ss:$12 sps:$4 sm:$0xff]   ;;  %v1672_v32 = vld [vmem:[%s2203_s1 + $0x3c8] ss:$12 sps:$4 sm:$0xff]  }
  0x55   :  { %1426 = vmatprep.subr.bf16.mxu1 %v1606_v33  ;;  %v1673_v33 = vld [vmem:[%s2203_s1 + $0x308] ss:$12 sps:$4 sm:$0xff]  }
  0x57   :  { %1107 = vmatpush1.bf16.msra.mxu0 %v1603_v34  ;;  %v227_v34 = vlaneseq }
  0x58   :  { %1427 = vmatpush3.bf16.msra.mxu1 %v1607_v35  ;;  %1108 = vmatprep.subr.bf16.mxu0 %v1610_v36 }
  0x59   :  { %1428 = vmatprep.subr.bf16.mxu1 %v1611_v37  ;;  %v228_v35 = vshrl.u32 %v227_v34, 7 }
  0x5b   :  { %1109 = vmatpush1.bf16.msra.mxu0 %v1608_v38  ;;  %v229_v37 = vsub.s32 0, %v228_v35  ;;  %v225_v38 = vld [vmem:[%s2205_s2] sm:$0x7] }
  0x5c   :  { %1429 = vmatpush3.bf16.msra.mxu1 %v1612_v39  ;;  %1110 = vmatprep.subr.bf16.mxu0 %v1615_v40  ;;  %v233_v39 = vsub.s32 1, %v228_v35 }
  0x5d   :  { %1430 = vmatprep.subr.bf16.mxu1 %v1616_v41 }
  0x5f   :  { %1111 = vmatpush1.bf16.msra.mxu0 %v1613_v42  ;;  %v230_v42 = vrot.slane %v225_v38, %v229_v37 }
  0x60   :  { %1431 = vmatpush3.bf16.msra.mxu1 %v1617_v43  ;;  %1112 = vmatprep.subr.bf16.mxu0 %v1620_v44  ;;  %v234_v43 = vrot.slane %v225_v38, %v233_v39 }
  0x61   :  { %1438 = vmatprep.subr.bf16.mxu1 %v1621_v45 }
  0x63   :  { %1172 = vmatmul.mubr.bf16.vlgmr.msra.gmra.mxu1 %v1925_v13  ;;  %1113 = vmatpush2.bf16.msra.mxu0 %v1618_v46  ;;  %v1653_v13 = vld [vmem:[%s2203_s1 + $0x3c0] ss:$12 sps:$4 sm:$0xff]  }
  0x64   :  { %1439 = vmatpush3.bf16.msra.mxu1 %v1622_v47  ;;  %1114 = vmatprep.subr.bf16.mxu0 %v1625_v48 }
  0x65   :  { %1440 = vmatprep.subr.bf16.mxu1 %v1626_v49  ;;  %1212 = vmatprep.mubr.bf16.mxu1 %v1858_v55  ;;  %v1633_v55 = vld [vmem:[%s2203_s1 + $0x420] ss:$12 sps:$4 sm:$0xff]  }
  0x67   :  { %1115 = vmatpush2.bf16.msra.mxu0 %v1623_v51 }
  0x68   :  { %1441 = vmatpush3.bf16.msra.mxu1 %v1627_v52  ;;  %1116 = vmatprep.subr.bf16.mxu0 %v1630_v54 }
  0x69   :  { %1442 = vmatprep.subr.bf16.mxu1 %v1631_v57 }
  0x6b   :  { %1117 = vmatpush2.bf16.msra.mxu0 %v1628_v58 }
  0x6c   :  { %1443 = vmatpush3.bf16.msra.mxu1 %v1632_v59  ;;  %1118 = vmatprep.subr.bf16.mxu0 %v1635_v60 }
  0x6d   :  { %1444 = vmatprep.subr.bf16.mxu1 %v1636_v61 }
  0x6f   :  { %1119 = vmatpush2.bf16.msra.mxu0 %v1633_v55 }
  0x70   :  { %1445 = vmatpush3.bf16.msra.mxu1 %v1637_v62  ;;  %1120 = vmatprep.subr.bf16.mxu0 %v1640_v63 }
  0x71   :  { %1446 = vmatprep.subr.bf16.mxu1 %v1641_v0 }
  0x73   :  { %1121 = vmatpush2.bf16.msra.mxu0 %v1638_v1 }
  0x74   :  { %1447 = vmatpush3.bf16.msra.mxu1 %v1642_v2  ;;  %1122 = vmatprep.subr.bf16.mxu0 %v1645_v3 }
  0x75   :  { %1448 = vmatprep.subr.bf16.mxu1 %v1646_v4 }
  0x77   :  { %1123 = vmatpush2.bf16.msra.mxu0 %v1643_v5 }
  0x78   :  { %1449 = vmatpush3.bf16.msra.mxu1 %v1647_v6  ;;  %1124 = vmatprep.subr.bf16.mxu0 %v1650_v7  ;;  %v237_v6 = vsub.s32 2, %v228_v35 }
  0x79   :  { %1450 = vmatprep.subr.bf16.mxu1 %v1651_v8 }
  0x7a   :  { %v238_v8 = vrot.slane %v225_v38, %v237_v6 }
  0x7b   :  { %1125 = vmatpush2.bf16.msra.mxu0 %v1648_v9 }
  0x7c   :  { %1451 = vmatpush3.bf16.msra.mxu1 %v1652_v10  ;;  %1126 = vmatprep.subr.bf16.mxu0 %v1655_v11 }
  0x7d   :  { %1452 = vmatprep.subr.bf16.mxu1 %v1656_v12 }
  0x7f   :  { %1127 = vmatpush2.bf16.msra.mxu0 %v1653_v13 }
  0x80   :  { %1453 = vmatpush3.bf16.msra.mxu1 %v1657_v15  ;;  %1460 = vmatprep.subr.bf16.mxu0 %v1658_v18 }
  0x82   :  { %1129 = vmatmul.mubr.bf16.vlgmr.msra.gmra.mxu0 %v31_v19 }
  0x83   :  { %1213 = vmatmul.mubr.bf16.vlgmr.msra.gmra.mxu1 %v1927_v14  ;;  %1461 = vmatpush3.bf16.msra.mxu0 %v1659_v20  ;;  %v1664_v14 = vld [vmem:[%s2203_s1 + $0x428] ss:$12 sps:$4 sm:$0xff]  }
  0x84   :  { %1253 = vmatprep.mubr.bf16.mxu0 %v2053_v56  ;;  %1462 = vmatprep.subr.bf16.mxu0 %v1660_v21 }
  0x87   :  { %1463 = vmatpush3.bf16.msra.mxu0 %v1661_v22 }
  0x88   :  { %1464 = vmatprep.subr.bf16.mxu0 %v1662_v23 }
  0x8b   :  { %1465 = vmatpush3.bf16.msra.mxu0 %v1663_v24 }
  0x8c   :  { %1466 = vmatprep.subr.bf16.mxu0 %v1664_v14 }
  0x8f   :  { %1467 = vmatpush3.bf16.msra.mxu0 %v1665_v25 }
  0x90   :  { %1468 = vmatprep.subr.bf16.mxu0 %v1666_v26 }
  0x93   :  { %1469 = vmatpush3.bf16.msra.mxu0 %v1667_v27 }
  0x94   :  { %1470 = vmatprep.subr.bf16.mxu0 %v1668_v28 }
  0x97   :  { %1471 = vmatpush3.bf16.msra.mxu0 %v1669_v29 }
  0x98   :  { %1472 = vmatprep.subr.bf16.mxu0 %v1670_v30 }
  0x9b   :  { %1473 = vmatpush3.bf16.msra.mxu0 %v1671_v31 }
  0x9c   :  { %1474 = vmatprep.subr.bf16.mxu0 %v1672_v32 }
  0x9f   :  { %1475 = vmatpush3.bf16.msra.mxu0 %v1673_v33 }
  0xa2   :  { %1254 = vmatmul.mubr.bf16.vlgmr.msra.gmra.mxu0 %v31_v19 }
 0x102   :  { %v1044_v36 = vpop.f32.mrf.mxu0 }
 0x103   :  { %v1087_v41 = vpop.f32.mrf.mxu1  ;;  %v1045_v46 = vadd.f32 %v1044_v36, %v230_v42 }
 0x104   :  { %v1046_v40 = vpop.f32.mrf.mxu0 }
 0x105   :  { %v1089_v45 = vpop.f32.mrf.mxu1  ;;  %v1047_v47 = vadd.f32 %v1046_v40, %v234_v43  ;;  %v1088_v50 = vadd.f32 %v1087_v41, %v1045_v46 }
 0x106   :  { %v1048_v44 = vpop.f32.mrf.mxu0 }
 0x107   :  { %v1091_v49 = vpop.f32.mrf.mxu1  ;;  %v1049_v51 = vadd.f32 %v1048_v44, %v230_v42  ;;  %v1090_v53 = vadd.f32 %v1089_v45, %v1047_v47 }
 0x108   :  { %v1050_v48 = vpop.f32.mrf.mxu0 }
 0x109   :  { %v1051_v54 = vadd.f32 %v1050_v48, %v234_v43  ;;  %v1093_v57 = vpop.f32.mrf.mxu1  ;;  %v1092_v59 = vadd.f32 %v1091_v49, %v1049_v51 }
 0x10b   :  { %v1094_v62 = vadd.f32 %v1093_v57, %v1051_v54 }
 0x123   :  { %v1432_v61 = vpop.f32.mrf.mxu1 }
 0x125   :  { %v1433_v2 = vpop.f32.mrf.mxu1 }
 0x126   :  { %v1434_v9 = vadd.f32 %v1433_v2, %v1432_v61 }
 0x127   :  { %v1435_v3 = vpop.f32.mrf.mxu1 }
 0x128   :  { %v1174_v11 = vadd.f32 %v1434_v9, %v238_v8 }
 0x129   :  { %v1436_v4 = vpop.f32.mrf.mxu1 }
 0x12a   :  { %v1437_v16 = vadd.f32 %v1436_v4, %v1435_v3 }
 0x12c   :  { %v1177_v22 = vadd.f32 %v1437_v16, %v238_v8 }
 0x142   :  { %v1130_v52 = vpop.f32.mrf.mxu0 }
 0x143   :  { %v1131_v56 = vadd.f32 %v1130_v52, %v1088_v50  ;;  %v1454_v5 = vpop.f32.mrf.mxu1 }
 0x144   :  { %v1132_v58 = vpop.f32.mrf.mxu0 }
 0x145   :  { %1262 = vst [vmem:[%s2206_s3] sm:$0xff] %v1131_v56  ;;  %v1133_v60 = vadd.f32 %v1132_v58, %v1090_v53  ;;  %v1455_v7 = vpop.f32.mrf.mxu1 }
 0x146   :  { %v1134_v55 = vpop.f32.mrf.mxu0  ;;  %v1456_v12 = vadd.f32 %v1455_v7, %v1454_v5 }
 0x147   :  { %1263 = vst [vmem:[%s2206_s3 + $0x8] sm:$0xff] %v1133_v60  ;;  %v1135_v63 = vadd.f32 %v1134_v55, %v1092_v59  ;;  %v1457_v10 = vpop.f32.mrf.mxu1 }
 0x148   :  { %v1136_v0 = vpop.f32.mrf.mxu0  ;;  %v1215_v18 = vadd.f32 %v1456_v12, %v1174_v11 }
 0x149   :  { %1265 = vst [vmem:[%s2206_s3 + $0x18] sm:$0xff] %v1135_v63  ;;  %v1137_v1 = vadd.f32 %v1136_v0, %v1094_v62  ;;  %v1458_v13 = vpop.f32.mrf.mxu1 }
 0x14a   :  { %v1459_v19 = vadd.f32 %v1458_v13, %v1457_v10 }
 0x14b   :  { %1266 = vst [vmem:[%s2206_s3 + $0x20] sm:$0xff] %v1137_v1 }
 0x14c   :  { %v1218_v14 = vadd.f32 %v1459_v19, %v1177_v22 }
 0x162   :  { %v1476_v15 = vpop.f32.mrf.mxu0 }
 0x164   :  { %v1477_v17 = vpop.f32.mrf.mxu0 }
 0x165   :  { %v1478_v20 = vadd.f32 %v1477_v17, %v1476_v15 }
 0x166   :  { %v1479_v21 = vpop.f32.mrf.mxu0 }
 0x167   :  { %v1256_v23 = vadd.f32 %v1478_v20, %v1215_v18 }
 0x168   :  { %v1480_v24 = vpop.f32.mrf.mxu0 }
 0x169   :  { %1264 = vst [vmem:[%s2206_s3 + $0x10] sm:$0xff] %v1256_v23  ;;  %v1481_v25 = vadd.f32 %v1480_v24, %v1479_v21 }
 0x16b   :  { %v1259_v26 = vadd.f32 %v1481_v25, %v1218_v14 }
 0x16d   :  { %1267 = vst [vmem:[%s2206_s3 + $0x28] sm:$0xff] %v1259_v26 }

// kernel: model_forward.64
= control target key start
LH: loop header
LB: loop body
LE: loop exit
PB: predicated region body
PF: predicated region fallthrough
CT: control target
= control target key end

     0   :  { %v1017_v1 = vmov 0   ;;  %s1341_s1 = inlined_call_operand.vmem [shape: bf16[384,384], index: 1, kind: input, shape index: {}]   ;;  %s1342_s0 = inlined_call_operand.vmem [shape: bf16[20,384], index: 0, kind: input, shape index: {}]   ;;  %s1343_s2 = inlined_call_operand.vmem [shape: f32[1,384], index: 2, kind: input, shape index: {}]   ;;  %s1344_s3 = inlined_call_operand.vmem [shape: f32[20,384], index: 3, kind: input, shape index: {}]   ;;  %s1345_s4 = inlined_call_operand.vmem [shape: f32[20,384], index: 4, kind: output, shape index: {}]  }
   0x1   :  { %v914_v0 = vld [vmem:[%s1341_s1 + $0xac] ss:$12 sps:$4 sm:$0xff]   ;;  %631 = vmatprep.mubr.bf16.mxu1 %v1017_v1  ;;  %v916_v2 = vld [vmem:[%s1341_s1 + $0xa8] ss:$12 sps:$4 sm:$0xff]   ;;  %v919_v4 = vld [vmem:[%s1341_s1 + $0x90] ss:$12 sps:$4 sm:$0xff]  }
   0x2   :  { %548 = vmatprep.subr.bf16.mxu0 %v914_v0  ;;  %v917_v3 = vld [vmem:[%s1341_s1 + $0x94] ss:$12 sps:$4 sm:$0xff]   ;;  %v920_v5 = vld [vmem:[%s1341_s1 + $0x7c] ss:$12 sps:$4 sm:$0xff]   ;;  %v922_v6 = vld [vmem:[%s1341_s1 + $0x78] ss:$12 sps:$4 sm:$0xff]  }
   0x3   :  { %549 = vmatpush1.bf16.msra.mxu0 %v916_v2  ;;  %v929_v7 = vld [vmem:[%s1341_s1 + $0x22c] ss:$12 sps:$4 sm:$0xff]   ;;  %v931_v8 = vld [vmem:[%s1341_s1 + $0x228] ss:$12 sps:$4 sm:$0xff]   ;;  %v923_v9 = vld [vmem:[%s1341_s1 + $0x64] ss:$12 sps:$4 sm:$0xff]  }
   0x4   :  { %550 = vmatprep.subr.bf16.mxu0 %v917_v3  ;;  %599 = vmatprep.subr.bf16.mxu1 %v929_v7  ;;  %v935_v10 = vld [vmem:[%s1341_s1 + $0x214] ss:$12 sps:$4 sm:$0xff]   ;;  %v937_v11 = vld [vmem:[%s1341_s1 + $0x210] ss:$12 sps:$4 sm:$0xff]   ;;  %v926_v13 = vld [vmem:[%s1341_s1 + $0x4c] ss:$12 sps:$4 sm:$0xff]  }
   0x5   :  { %600 = vmatpush1.bf16.msra.mxu1 %v931_v8  ;;  %v925_v12 = vld [vmem:[%s1341_s1 + $0x60] ss:$12 sps:$4 sm:$0xff]   ;;  %v941_v14 = vld [vmem:[%s1341_s1 + $0x1fc] ss:$12 sps:$4 sm:$0xff]   ;;  %v943_v15 = vld [vmem:[%s1341_s1 + $0x1f8] ss:$12 sps:$4 sm:$0xff]  }
   0x6   :  { %601 = vmatprep.subr.bf16.mxu1 %v935_v10  ;;  %v928_v16 = vld [vmem:[%s1341_s1 + $0x48] ss:$12 sps:$4 sm:$0xff]   ;;  %v947_v17 = vld [vmem:[%s1341_s1 + $0x1e4] ss:$12 sps:$4 sm:$0xff]   ;;  %v949_v19 = vld [vmem:[%s1341_s1 + $0x1e0] ss:$12 sps:$4 sm:$0xff]  }
   0x7   :  { %551 = vmatpush1.bf16.msra.mxu0 %v919_v4  ;;  %v932_v18 = vld [vmem:[%s1341_s1 + $0x34] ss:$12 sps:$4 sm:$0xff]   ;;  %v934_v20 = vld [vmem:[%s1341_s1 + $0x30] ss:$12 sps:$4 sm:$0xff]   ;;  %v953_v21 = vld [vmem:[%s1341_s1 + $0x1cc] ss:$12 sps:$4 sm:$0xff]  }
   0x8   :  { %552 = vmatprep.subr.bf16.mxu0 %v920_v5  ;;  %v938_v22 = vld [vmem:[%s1341_s1 + $0x1c] ss:$12 sps:$4 sm:$0xff]   ;;  %v940_v24 = vld [vmem:[%s1341_s1 + $0x18] ss:$12 sps:$4 sm:$0xff]   ;;  %v959_v25 = vld [vmem:[%s1341_s1 + $0x1b4] ss:$12 sps:$4 sm:$0xff]  }
   0x9   :  { %602 = vmatpush1.bf16.msra.mxu1 %v937_v11  ;;  %v955_v23 = vld [vmem:[%s1341_s1 + $0x1c8] ss:$12 sps:$4 sm:$0xff]   ;;  %v944_v26 = vld [vmem:[%s1341_s1 + $0x4] ss:$12 sps:$4 sm:$0xff]   ;;  %v946_v28 = vld [vmem:[%s1341_s1] ss:$12 sps:$4 sm:$0xff]  }
   0xa   :  { %603 = vmatprep.subr.bf16.mxu1 %v941_v14  ;;  %v961_v27 = vld [vmem:[%s1341_s1 + $0x1b0] ss:$12 sps:$4 sm:$0xff]   ;;  %v950_v30 = vld [vmem:[%s1341_s1 + $0x16c] ss:$12 sps:$4 sm:$0xff]   ;;  %v952_v31 = vld [vmem:[%s1341_s1 + $0x168] ss:$12 sps:$4 sm:$0xff]  }
   0xb   :  { %553 = vmatpush1.bf16.msra.mxu0 %v922_v6  ;;  %v965_v29 = vld [vmem:[%s1341_s1 + $0x19c] ss:$12 sps:$4 sm:$0xff]   ;;  %v967_v32 = vld [vmem:[%s1341_s1 + $0x198] ss:$12 sps:$4 sm:$0xff]   ;;  %v956_v34 = vld [vmem:[%s1341_s1 + $0x154] ss:$12 sps:$4 sm:$0xff]  }
   0xc   :  { %554 = vmatprep.subr.bf16.mxu0 %v923_v9  ;;  %v971_v33 = vld [vmem:[%s1341_s1 + $0x184] ss:$12 sps:$4 sm:$0xff]   ;;  %v973_v35 = vld [vmem:[%s1341_s1 + $0x180] ss:$12 sps:$4 sm:$0xff]   ;;  %v962_v38 = vld [vmem:[%s1341_s1 + $0x13c] ss:$12 sps:$4 sm:$0xff]  }
   0xd   :  { %604 = vmatpush1.bf16.msra.mxu1 %v943_v15  ;;  %v958_v36 = vld [vmem:[%s1341_s1 + $0x150] ss:$12 sps:$4 sm:$0xff]   ;;  %v1161_v39 = vld [vmem:[%s1342_s0 + $0x8] ss:$12 sps:$4 sm:$0xff]   ;;  %v964_v40 = vld [vmem:[%s1341_s1 + $0x138] ss:$12 sps:$4 sm:$0xff]  }
   0xe   :  { %605 = vmatprep.subr.bf16.mxu1 %v947_v17  ;;  %v977_v37 = vld [vmem:[%s1341_s1 + $0x170] ss:$12 sps:$4 sm:$0xff]   ;;  %v983_v42 = vld [vmem:[%s1341_s1 + $0x158] ss:$12 sps:$4 sm:$0xff]   ;;  %v970_v44 = vld [vmem:[%s1341_s1 + $0x120] ss:$12 sps:$4 sm:$0xff]  }
   0xf   :  { %555 = vmatpush1.bf16.msra.mxu0 %v925_v12  ;;  %v979_v41 = vld [vmem:[%s1341_s1 + $0xb0] ss:$12 sps:$4 sm:$0xff]   ;;  %v984_v46 = vld [vmem:[%s1341_s1 + $0x98] ss:$12 sps:$4 sm:$0xff]   ;;  %v988_v47 = vld [vmem:[%s1341_s1 + $0x140] ss:$12 sps:$4 sm:$0xff]  }
  0x10   :  { %556 = vmatprep.subr.bf16.mxu0 %v926_v13  ;;  %v968_v43 = vld [vmem:[%s1341_s1 + $0x124] ss:$12 sps:$4 sm:$0xff]   ;;  %v974_v48 = vld [vmem:[%s1341_s1 + $0x10c] ss:$12 sps:$4 sm:$0xff]   ;;  %v976_v49 = vld [vmem:[%s1341_s1 + $0x108] ss:$12 sps:$4 sm:$0xff]  }
  0x11   :  { %606 = vmatpush1.bf16.msra.mxu1 %v949_v19  ;;  %v996_v45 = vld [vmem:[%s1342_s0 + $0x4] ss:$12 sps:$4 sm:$0xff]   ;;  %v989_v50 = vld [vmem:[%s1341_s1 + $0x80] ss:$12 sps:$4 sm:$0xff]   ;;  %v993_v51 = vld [vmem:[%s1341_s1 + $0x128] ss:$12 sps:$4 sm:$0xff]  }
  0x12   :  { %607 = vmatprep.subr.bf16.mxu1 %v953_v21  ;;  %580 = vmatprep.mubr.bf16.mxu0 %v996_v45  ;;  %v980_v52 = vld [vmem:[%s1341_s1 + $0xf4] ss:$12 sps:$4 sm:$0xff]   ;;  %v982_v55 = vld [vmem:[%s1341_s1 + $0xf0] ss:$12 sps:$4 sm:$0xff]   ;;  %v987_v58 = vld [vmem:[%s1341_s1 + $0xd8] ss:$12 sps:$4 sm:$0xff]  }
  0x13   :  { %557 = vmatpush1.bf16.msra.mxu0 %v928_v16  ;;  %v997_v53 = vld [vmem:[%s1341_s1 + $0x68] ss:$12 sps:$4 sm:$0xff]   ;;  %v1210_v54 = vld [vmem:[%s1342_s0 + $0x20] ss:$0 sps:$4 sm:$0x33]  }
  0x14   :  { %558 = vmatprep.subr.bf16.mxu0 %v932_v18  ;;  %v999_v56 = vld [vmem:[%s1341_s1 + $0x110] ss:$12 sps:$4 sm:$0xff]   ;;  %v1002_v60 = vld [vmem:[%s1341_s1 + $0xf8] ss:$12 sps:$4 sm:$0xff]   ;;  %v992_v63 = vld [vmem:[%s1341_s1 + $0xc0] ss:$12 sps:$4 sm:$0xff]  }
  0x15   :  { %608 = vmatpush1.bf16.msra.mxu1 %v955_v23  ;;  %v985_v57 = vld [vmem:[%s1341_s1 + $0xdc] ss:$12 sps:$4 sm:$0xff]   ;;  %v990_v61 = vld [vmem:[%s1341_s1 + $0xc4] ss:$12 sps:$4 sm:$0xff]   ;;  %v1006_v0 = vld [vmem:[%s1341_s1 + $0xe0] ss:$12 sps:$4 sm:$0xff]  }
  0x16   :  { %609 = vmatprep.subr.bf16.mxu1 %v959_v25  ;;  %v1000_v59 = vld [vmem:[%s1341_s1 + $0x50] ss:$12 sps:$4 sm:$0xff]   ;;  %v1003_v62 = vld [vmem:[%s1341_s1 + $0x38] ss:$12 sps:$4 sm:$0xff]   ;;  %v994_v3 = vld [vmem:[%s1342_s0] ss:$12 sps:$4 sm:$0xff]  }
  0x17   :  { %559 = vmatpush1.bf16.msra.mxu0 %v934_v20  ;;  %v22_v2 = vld [vmem:[%s1342_s0 + $0x18] sm:$0x33]  ;;  %v1008_v4 = vld [vmem:[%s1341_s1 + $0x20] ss:$12 sps:$4 sm:$0xff]   ;;  %v1011_v7 = vld [vmem:[%s1341_s1 + $0xc8] ss:$12 sps:$4 sm:$0xff]   ;;  %v122_v20 = vlaneseq }
  0x18   :  { %560 = vmatprep.subr.bf16.mxu0 %v938_v22  ;;  %v781_v5 = vcombine.high %v22_v2, %v22_v2  ;;  %v1001_v6 = vld [vmem:[%s1341_s1 + $0x218] ss:$12 sps:$4 sm:$0xff]   ;;  %v1012_v8 = vld [vmem:[%s1341_s1 + $0x8] ss:$12 sps:$4 sm:$0xff]   ;;  %v1004_v9 = vld [vmem:[%s1341_s1 + $0x200] ss:$12 sps:$4 sm:$0xff]   ;;  %v780_v10 = vcombine.low %v22_v2, %v22_v2 }
  0x19   :  { %610 = vmatpush1.bf16.msra.mxu1 %v961_v27  ;;  %v1010_v11 = vld [vmem:[%s1341_s1 + $0x1e8] ss:$12 sps:$4 sm:$0xff]   ;;  %v1013_v12 = vld [vmem:[%s1341_s1 + $0x1d0] ss:$12 sps:$4 sm:$0xff]   ;;  %v1014_v13 = vld [vmem:[%s1341_s1 + $0x1b8] ss:$12 sps:$4 sm:$0xff]  }
  0x1a   :  { %611 = vmatprep.subr.bf16.mxu1 %v965_v29  ;;  %v1015_v14 = vld [vmem:[%s1341_s1 + $0x1a0] ss:$12 sps:$4 sm:$0xff]   ;;  %v1016_v15 = vld [vmem:[%s1341_s1 + $0x188] ss:$12 sps:$4 sm:$0xff]   ;;  %v123_v23 = vshrl.u32 %v122_v20, 7 }
  0x1b   :  { %561 = vmatpush1.bf16.msra.mxu0 %v940_v24  ;;  %v120_v27 = vld [vmem:[%s1343_s2] sm:$0x7] }
  0x1c   :  { %562 = vmatprep.subr.bf16.mxu0 %v944_v26  ;;  %v124_v26 = vsub.s32 0, %v123_v23 }
  0x1d   :  { %612 = vmatpush1.bf16.msra.mxu1 %v967_v32 }
  0x1e   :  { %613 = vmatprep.subr.bf16.mxu1 %v971_v33  ;;  %v125_v29 = vrot.slane %v120_v27, %v124_v26  ;;  %v746_v33 = vld [vmem:[%s1344_s3] sm:$0xff] }
  0x1f   :  { %563 = vmatpush1.bf16.msra.mxu0 %v946_v28  ;;  %v128_v28 = vsub.s32 1, %v123_v23 }
  0x20   :  { %564 = vmatprep.subr.bf16.mxu0 %v950_v30 }
  0x21   :  { %614 = vmatpush1.bf16.msra.mxu1 %v973_v35  ;;  %v129_v30 = vrot.slane %v120_v27, %v128_v28 }
  0x22   :  { %855 = vmatprep.subr.bf16.mxu1 %v977_v37  ;;  %v747_v37 = vld [vmem:[%s1344_s3 + $0x8] sm:$0xff] }
  0x23   :  { %565 = vmatpush2.bf16.msra.mxu0 %v952_v31 }
  0x24   :  { %566 = vmatprep.subr.bf16.mxu0 %v956_v34  ;;  %632 = vmatmul.mubr.bf16.vlgmr.msra.gmra.mxu1 %v1161_v39 }
  0x25   :  { %856 = vmatpush3.bf16.msra.mxu1 %v979_v41  ;;  %641 = vmatprep.mubr.bf16.mxu1 %v1017_v1  ;;  %v998_v1 = vld [vmem:[%s1341_s1 + $0x230] ss:$12 sps:$4 sm:$0xff]  }
  0x26   :  { %857 = vmatprep.subr.bf16.mxu1 %v983_v42  ;;  %v749_v42 = vld [vmem:[%s1344_s3 + $0x18] sm:$0xff] }
  0x27   :  { %567 = vmatpush2.bf16.msra.mxu0 %v958_v36 }
  0x28   :  { %568 = vmatprep.subr.bf16.mxu0 %v962_v38 }
  0x29   :  { %858 = vmatpush3.bf16.msra.mxu1 %v984_v46 }
  0x2a   :  { %859 = vmatprep.subr.bf16.mxu1 %v988_v47 }
  0x2b   :  { %569 = vmatpush2.bf16.msra.mxu0 %v964_v40 }
  0x2c   :  { %570 = vmatprep.subr.bf16.mxu0 %v968_v43  ;;  %642 = vmatmul.mubr.bf16.gmra.mxu1 %v1210_v54 }
  0x2d   :  { %860 = vmatpush3.bf16.msra.mxu1 %v989_v50  ;;  %682 = vmatprep.mubr.bf16.mxu1 %v996_v45 }
  0x2e   :  { %861 = vmatprep.subr.bf16.mxu1 %v993_v51 }
  0x2f   :  { %571 = vmatpush2.bf16.msra.mxu0 %v970_v44 }
  0x30   :  { %572 = vmatprep.subr.bf16.mxu0 %v974_v48  ;;  %v750_v48 = vld [vmem:[%s1344_s3 + $0x20] sm:$0xff] }
  0x31   :  { %862 = vmatpush3.bf16.msra.mxu1 %v997_v53 }
  0x32   :  { %863 = vmatprep.subr.bf16.mxu1 %v999_v56 }
  0x33   :  { %573 = vmatpush2.bf16.msra.mxu0 %v976_v49 }
  0x34   :  { %574 = vmatprep.subr.bf16.mxu0 %v980_v52 }
  0x35   :  { %864 = vmatpush3.bf16.msra.mxu1 %v1000_v59 }
  0x36   :  { %865 = vmatprep.subr.bf16.mxu1 %v1002_v60  ;;  %v753_v60 = vld [vmem:[%s1344_s3 + $0x38] sm:$0xf] }
  0x37   :  { %575 = vmatpush2.bf16.msra.mxu0 %v982_v55 }
  0x38   :  { %576 = vmatprep.subr.bf16.mxu0 %v985_v57 }
  0x39   :  { %866 = vmatpush3.bf16.msra.mxu1 %v1003_v62 }
  0x3a   :  { %867 = vmatprep.subr.bf16.mxu1 %v1006_v0 }
  0x3b   :  { %577 = vmatpush2.bf16.msra.mxu0 %v987_v58 }
  0x3c   :  { %578 = vmatprep.subr.bf16.mxu0 %v990_v61 }
  0x3d   :  { %868 = vmatpush3.bf16.msra.mxu1 %v1008_v4 }
  0x3e   :  { %869 = vmatprep.subr.bf16.mxu1 %v1011_v7  ;;  %v132_v7 = vsub.s32 2, %v123_v23 }
  0x3f   :  { %579 = vmatpush2.bf16.msra.mxu0 %v992_v63 }
  0x40   :  { %893 = vmatprep.subr.bf16.mxu0 %v998_v1 }
  0x41   :  { %870 = vmatpush3.bf16.msra.mxu1 %v1012_v8 }
  0x42   :  { %581 = vmatmul.mubr.bf16.vlgmr.msra.gmra.mxu0 %v994_v3 }
  0x43   :  { %894 = vmatpush3.bf16.msra.mxu0 %v998_v1  ;;  %590 = vmatprep.mubr.bf16.mxu0 %v781_v5 }
  0x44   :  { %895 = vmatprep.subr.bf16.mxu0 %v1001_v6  ;;  %683 = vmatmul.mubr.bf16.vlgmr.msra.gmra.mxu1 %v994_v3 }
  0x45   :  { %690 = vmatprep.mubr.bf16.mxu1 %v781_v5 }
  0x47   :  { %896 = vmatpush3.bf16.msra.mxu0 %v1001_v6 }
  0x48   :  { %897 = vmatprep.subr.bf16.mxu0 %v1004_v9 }
  0x4a   :  { %591 = vmatmul.mubr.bf16.gmra.mxu0 %v780_v10 }
  0x4b   :  { %898 = vmatpush3.bf16.msra.mxu0 %v1004_v9  ;;  %909 = vmatprep.mubr.bf16.mxu0 %v1161_v39  ;;  %v133_v9 = vrot.slane %v120_v27, %v132_v7 }
  0x4c   :  { %899 = vmatprep.subr.bf16.mxu0 %v1010_v11  ;;  %691 = vmatmul.mubr.bf16.gmra.mxu1 %v780_v10 }
  0x4f   :  { %900 = vmatpush3.bf16.msra.mxu0 %v1010_v11 }
  0x50   :  { %901 = vmatprep.subr.bf16.mxu0 %v1013_v12 }
  0x53   :  { %902 = vmatpush3.bf16.msra.mxu0 %v1013_v12 }
  0x54   :  { %903 = vmatprep.subr.bf16.mxu0 %v1014_v13 }
  0x57   :  { %904 = vmatpush3.bf16.msra.mxu0 %v1014_v13  ;;  %v754_v13 = vld [vmem:[%s1344_s3 + $0x40] sm:$0xf] }
  0x58   :  { %905 = vmatprep.subr.bf16.mxu0 %v1015_v14 }
  0x5b   :  { %906 = vmatpush3.bf16.msra.mxu0 %v1015_v14 }
  0x5c   :  { %907 = vmatprep.subr.bf16.mxu0 %v1016_v15 }
  0x5f   :  { %908 = vmatpush3.bf16.msra.mxu0 %v1016_v15 }
  0x62   :  { %910 = vmatmul.mubr.bf16.vlgmr.msra.gmra.mxu0 %v1210_v54  ;;  %v752_v54 = vld [vmem:[%s1344_s3 + $0x30] sm:$0xf] }
  0xe4   :  { %v633_v16 = vpop.f32.mrf.mxu1 }
  0xe6   :  { %v635_v17 = vpop.f32.mrf.mxu1 }
  0xe8   :  { %v637_v18 = vpop.f32.mrf.mxu1 }
  0xea   :  { %v639_v19 = vpop.f32.mrf.mxu1 }
  0xec   :  { %v643_v21 = vpop.f32.mrf.mxu1 }
  0xee   :  { %v645_v22 = vpop.f32.mrf.mxu1 }
  0xf0   :  { %v647_v24 = vpop.f32.mrf.mxu1 }
  0xf2   :  { %v648_v25 = vpop.f32.mrf.mxu1 }
  0xf3   :  { %v751_v25 = vld [vmem:[%s1344_s3 + $0x28] sm:$0xff] }
 0x102   :  { %v582_v31 = vpop.f32.mrf.mxu0 }
 0x103   :  { %v583_v32 = vadd.f32 %v582_v31, %v125_v29 }
 0x104   :  { %v584_v34 = vpop.f32.mrf.mxu0  ;;  %v871_v47 = vpop.f32.mrf.mxu1 }
 0x105   :  { %v634_v35 = vadd.f32 %v633_v16, %v583_v32  ;;  %v585_v36 = vadd.f32 %v584_v34, %v129_v30 }
 0x106   :  { %v586_v38 = vpop.f32.mrf.mxu0  ;;  %v872_v53 = vpop.f32.mrf.mxu1 }
 0x107   :  { %v755_v39 = vadd.f32 %v746_v33, %v634_v35  ;;  %v636_v40 = vadd.f32 %v635_v17, %v585_v36  ;;  %v587_v41 = vadd.f32 %v586_v38, %v125_v29  ;;  %v873_v10 = vadd.f32 %v872_v53, %v871_v47 }
 0x108   :  { %v588_v43 = vpop.f32.mrf.mxu0  ;;  %v874_v59 = vpop.f32.mrf.mxu1 }
 0x109   :  { %764 = vst [vmem:[%s1345_s4] sm:$0xff] %v755_v39  ;;  %v756_v44 = vadd.f32 %v747_v37, %v636_v40  ;;  %v638_v45 = vadd.f32 %v637_v18, %v587_v41  ;;  %v589_v46 = vadd.f32 %v588_v43, %v129_v30  ;;  %v685_v16 = vadd.f32 %v873_v10, %v133_v9  ;;  %v748_v18 = vld [vmem:[%s1344_s3 + $0x10] sm:$0xff] }
 0x10a   :  { %v592_v49 = vpop.f32.mrf.mxu0  ;;  %v875_v0 = vpop.f32.mrf.mxu1 }
 0x10b   :  { %765 = vst [vmem:[%s1345_s4 + $0x8] sm:$0xff] %v756_v44  ;;  %v758_v50 = vadd.f32 %v749_v42, %v638_v45  ;;  %v640_v51 = vadd.f32 %v639_v19, %v589_v46  ;;  %v593_v52 = vadd.f32 %v592_v49, %v125_v29  ;;  %v876_v14 = vadd.f32 %v875_v0, %v874_v59 }
 0x10c   :  { %v594_v55 = vpop.f32.mrf.mxu0  ;;  %v877_v3 = vpop.f32.mrf.mxu1 }
 0x10d   :  { %767 = vst [vmem:[%s1345_s4 + $0x18] sm:$0xff] %v758_v50  ;;  %v759_v56 = vadd.f32 %v750_v48, %v640_v51  ;;  %v644_v57 = vadd.f32 %v643_v21, %v593_v52  ;;  %v595_v58 = vadd.f32 %v594_v55, %v129_v30  ;;  %v688_v23 = vadd.f32 %v876_v14, %v133_v9 }
 0x10e   :  { %v596_v61 = vpop.f32.mrf.mxu0  ;;  %v878_v4 = vpop.f32.mrf.mxu1 }
 0x10f   :  { %768 = vst [vmem:[%s1345_s4 + $0x20] sm:$0xff] %v759_v56  ;;  %v761_v62 = vadd.f32 %v752_v54, %v644_v57  ;;  %v646_v63 = vadd.f32 %v645_v22, %v595_v58  ;;  %v879_v8 = vadd.f32 %v878_v4, %v877_v3 }
 0x110   :  { %v597_v1 = vpop.f32.mrf.mxu0  ;;  %v880_v5 = vpop.f32.mrf.mxu1 }
 0x111   :  { %770 = vst [vmem:[%s1345_s4 + $0x30] sm:$0xf] %v761_v62  ;;  %v762_v2 = vadd.f32 %v753_v60, %v646_v63  ;;  %v693_v11 = vadd.f32 %v879_v8, %v133_v9 }
 0x112   :  { %v881_v6 = vpop.f32.mrf.mxu1 }
 0x113   :  { %771 = vst [vmem:[%s1345_s4 + $0x38] sm:$0xf] %v762_v2 }
 0x122   :  { %v911_v12 = vpop.f32.mrf.mxu0 }
 0x123   :  { %v741_v15 = vadd.f32 %v911_v12, %v693_v11 }
 0x124   :  { %v732_v17 = vpop.f32.mrf.mxu0 }
 0x125   :  { %v763_v19 = vadd.f32 %v754_v13, %v741_v15  ;;  %v733_v20 = vadd.f32 %v732_v17, %v685_v16 }
 0x126   :  { %v912_v21 = vpop.f32.mrf.mxu0 }
 0x127   :  { %772 = vst [vmem:[%s1345_s4 + $0x40] sm:$0xf] %v763_v19  ;;  %v757_v22 = vadd.f32 %v748_v18, %v733_v20 }
 0x128   :  { %v735_v24 = vpop.f32.mrf.mxu0 }
 0x129   :  { %766 = vst [vmem:[%s1345_s4 + $0x10] sm:$0xff] %v757_v22  ;;  %v736_v26 = vadd.f32 %v735_v24, %v688_v23 }
 0x12b   :  { %v760_v27 = vadd.f32 %v751_v25, %v736_v26 }
 0x12d   :  { %769 = vst [vmem:[%s1345_s4 + $0x28] sm:$0xff] %v760_v27 }

// kernel: model_forward.62
= control target key start
LH: loop header
LB: loop body
LE: loop exit
PB: predicated region body
PF: predicated region fallthrough
CT: control target
= control target key end

     0   :  { %vm38_vm0 = vcmask 1043456   ;;  %s3727_s0 = inlined_call_operand.vmem [shape: f32[20,384], index: 0, kind: input, shape index: {}]   ;;  %s3728_s3 = inlined_call_operand.vmem [shape: bf16[384,1152], index: 3, kind: input, shape index: {}]   ;;  %s3729_s1 = inlined_call_operand.vmem [shape: f32[1,384], index: 1, kind: input, shape index: {}]   ;;  %s3730_s2 = inlined_call_operand.vmem [shape: f32[1,384], index: 2, kind: input, shape index: {}]   ;;  %s3731_s4 = inlined_call_operand.vmem [shape: f32[1,1152], index: 4, kind: input, shape index: {}]   ;;  %s3732_s5 = inlined_call_operand.vmem [shape: bf16[20,1152], index: 5, kind: output, shape index: {}]  }
   0x1   :  { %v2826_v0 = vld [vmem:[%s3727_s0] sm:$0xff]  ;;  %v2831_v1 = vld [vmem:[%s3727_s0 + $0x8] sm:$0xff]  ;;  %v2836_v2 = vld [vmem:[%s3727_s0 + $0x10] sm:$0xff] }
   0x2   :  { %v30_v3 = vadd.f32 %v2831_v1, %v2826_v0  ;;  %v2843_v4 = vld [vmem:[%s3727_s0 + $0x30] sm:$0xf]  ;;  %v2848_v5 = vld [vmem:[%s3727_s0 + $0x38] sm:$0xf]  ;;  %v2853_v6 = vld [vmem:[%s3727_s0 + $0x40] sm:$0xf] }
   0x3   :  { %v39_v7 = vsel %vm38_vm0, %v2843_v4, 0.0  ;;  %v40_v8 = vsel %vm38_vm0, %v2848_v5, 0.0  ;;  %v42_v9 = vsel %vm38_vm0, %v2853_v6, 0.0  ;;  %v2864_v10 = vld [vmem:[%s3727_s0 + $0x18] sm:$0xff]  ;;  %v2869_v11 = vld [vmem:[%s3727_s0 + $0x20] sm:$0xff]  ;;  %v2874_v12 = vld [vmem:[%s3727_s0 + $0x28] sm:$0xff] }
   0x4   :  { %v31_v13 = vadd.f32 %v30_v3, %v2836_v2  ;;  %v41_v14 = vadd.f32 %v40_v8, %v39_v7  ;;  %v34_v15 = vadd.f32 %v2869_v11, %v2864_v10  ;;  %v2474_v18 = vld [vmem:[%s3728_s3 + $0x1fc] ss:$36 sps:$4 sm:$0xff]   ;;  %v2477_v20 = vld [vmem:[%s3728_s3 + $0x1b4] ss:$36 sps:$4 sm:$0xff]   ;;  %v2480_v22 = vld [vmem:[%s3728_s3 + $0x16c] ss:$36 sps:$4 sm:$0xff]  }
   0x5   :  { %v2476_v19 = vld [vmem:[%s3728_s3 + $0x1f8] ss:$36 sps:$4 sm:$0xff]   ;;  %1552 = vmatprep.subr.bf16.mxu0 %v2474_v18  ;;  %v2479_v21 = vld [vmem:[%s3728_s3 + $0x1b0] ss:$36 sps:$4 sm:$0xff]   ;;  %v2482_v23 = vld [vmem:[%s3728_s3 + $0x168] ss:$36 sps:$4 sm:$0xff]  }
   0x6   :  { %32 = vadd.xlane.f32.xlu0 %v31_v13  ;;  %v43_v16 = vadd.f32 %v42_v9, %v41_v14  ;;  %v35_v17 = vadd.f32 %v34_v15, %v2874_v12  ;;  %1553 = vmatpush1.bf16.msra.mxu0 %v2476_v19  ;;  %v2483_v24 = vld [vmem:[%s3728_s3 + $0x124] ss:$36 sps:$4 sm:$0xff]   ;;  %v2498_v26 = vld [vmem:[%s3728_s3 + $0x67c] ss:$36 sps:$4 sm:$0xff]   ;;  %v2489_v30 = vld [vmem:[%s3728_s3 + $0x94] ss:$36 sps:$4 sm:$0xff]  }
   0x7   :  { %1554 = vmatprep.subr.bf16.mxu0 %v2477_v20  ;;  %v2485_v25 = vld [vmem:[%s3728_s3 + $0x120] ss:$36 sps:$4 sm:$0xff]   ;;  %v2502_v28 = vld [vmem:[%s3728_s3 + $0x678] ss:$36 sps:$4 sm:$0xff]   ;;  %1603 = vmatprep.subr.bf16.mxu1 %v2498_v26  ;;  %v2491_v31 = vld [vmem:[%s3728_s3 + $0x90] ss:$36 sps:$4 sm:$0xff]  }
   0x8   :  { %44 = vadd.xlane.f32.xlu1 %v43_v16  ;;  %v2486_v27 = vld [vmem:[%s3728_s3 + $0xdc] ss:$36 sps:$4 sm:$0xff]   ;;  %1604 = vmatpush1.bf16.msra.mxu1 %v2502_v28  ;;  %v2492_v32 = vld [vmem:[%s3728_s3 + $0x4c] ss:$36 sps:$4 sm:$0xff]   ;;  %v2495_v34 = vld [vmem:[%s3728_s3 + $0x4] ss:$36 sps:$4 sm:$0xff]  }
   0x9   :  { %v2488_v29 = vld [vmem:[%s3728_s3 + $0xd8] ss:$36 sps:$4 sm:$0xff]   ;;  %v2494_v33 = vld [vmem:[%s3728_s3 + $0x48] ss:$36 sps:$4 sm:$0xff]   ;;  %v2497_v35 = vld [vmem:[%s3728_s3] ss:$36 sps:$4 sm:$0xff]  }
   0xa   :  { %36 = vadd.xlane.f32.xlu0 %v35_v17  ;;  %1555 = vmatpush1.bf16.msra.mxu0 %v2479_v21  ;;  %v2500_v36 = vld [vmem:[%s3728_s3 + $0x43c] ss:$36 sps:$4 sm:$0xff]   ;;  %v2504_v7 = vld [vmem:[%s3728_s3 + $0x634] ss:$36 sps:$4 sm:$0xff]   ;;  %v2514_v13 = vld [vmem:[%s3728_s3 + $0x5e8] ss:$36 sps:$4 sm:$0xff]  }
   0xb   :  { %1556 = vmatprep.subr.bf16.mxu0 %v2480_v22  ;;  %v2503_v37 = vld [vmem:[%s3728_s3 + $0x438] ss:$36 sps:$4 sm:$0xff]   ;;  %v2508_v9 = vld [vmem:[%s3728_s3 + $0x630] ss:$36 sps:$4 sm:$0xff]   ;;  %1605 = vmatprep.subr.bf16.mxu1 %v2504_v7  ;;  %v2515_v14 = vld [vmem:[%s3728_s3 + $0x3a8] ss:$36 sps:$4 sm:$0xff]  }
   0xc   :  { %v2506_v8 = vld [vmem:[%s3728_s3 + $0x3f4] ss:$36 sps:$4 sm:$0xff]   ;;  %1606 = vmatpush1.bf16.msra.mxu1 %v2508_v9  ;;  %v2516_v15 = vld [vmem:[%s3728_s3 + $0x5a4] ss:$36 sps:$4 sm:$0xff]   ;;  %v2522_v19 = vld [vmem:[%s3728_s3 + $0x55c] ss:$36 sps:$4 sm:$0xff]  }
   0xd   :  { %v2518_v16 = vld [vmem:[%s3728_s3 + $0x364] ss:$36 sps:$4 sm:$0xff]   ;;  %v2524_v20 = vld [vmem:[%s3728_s3 + $0x31c] ss:$36 sps:$4 sm:$0xff]   ;;  %v2533_v26 = vld [vmem:[%s3728_s3 + $0x2d0] ss:$36 sps:$4 sm:$0xff]  }
   0xe   :  { %1557 = vmatpush1.bf16.msra.mxu0 %v2482_v23  ;;  %v2520_v17 = vld [vmem:[%s3728_s3 + $0x5a0] ss:$36 sps:$4 sm:$0xff]   ;;  %v2526_v21 = vld [vmem:[%s3728_s3 + $0x558] ss:$36 sps:$4 sm:$0xff]   ;;  %v2536_v28 = vld [vmem:[%s3728_s3 + $0x28c] ss:$36 sps:$4 sm:$0xff]  }
   0xf   :  { %1558 = vmatprep.subr.bf16.mxu0 %v2483_v24  ;;  %v2521_v18 = vld [vmem:[%s3728_s3 + $0x360] ss:$36 sps:$4 sm:$0xff]   ;;  %v2527_v22 = vld [vmem:[%s3728_s3 + $0x318] ss:$36 sps:$4 sm:$0xff]  }
  0x10   :  { %v2528_v23 = vld [vmem:[%s3728_s3 + $0x514] ss:$36 sps:$4 sm:$0xff]  }
  0x11   :  { %v2530_v24 = vld [vmem:[%s3728_s3 + $0x2d4] ss:$36 sps:$4 sm:$0xff]  }
  0x12   :  { %1559 = vmatpush1.bf16.msra.mxu0 %v2485_v25  ;;  %v2532_v25 = vld [vmem:[%s3728_s3 + $0x510] ss:$36 sps:$4 sm:$0xff]  }
  0x13   :  { %1560 = vmatprep.subr.bf16.mxu0 %v2486_v27  ;;  %v2534_v27 = vld [vmem:[%s3728_s3 + $0x4cc] ss:$36 sps:$4 sm:$0xff]  }
  0x16   :  { %1561 = vmatpush1.bf16.msra.mxu0 %v2488_v29  ;;  %v2792_v29 = vmov 0  }
  0x17   :  { %1562 = vmatprep.subr.bf16.mxu0 %v2489_v30  ;;  %1635 = vmatprep.mubr.bf16.mxu1 %v2792_v29  ;;  %v2538_v30 = vld [vmem:[%s3728_s3 + $0x4c8] ss:$36 sps:$4 sm:$0xff]  }
  0x1a   :  { %1563 = vmatpush1.bf16.msra.mxu0 %v2491_v31  ;;  %v2539_v31 = vld [vmem:[%s3728_s3 + $0x288] ss:$36 sps:$4 sm:$0xff]  }
  0x1b   :  { %1564 = vmatprep.subr.bf16.mxu0 %v2492_v32  ;;  %v2540_v32 = vld [vmem:[%s3728_s3 + $0x484] ss:$36 sps:$4 sm:$0xff]  }
  0x1e   :  { %1565 = vmatpush1.bf16.msra.mxu0 %v2494_v33  ;;  %v2542_v33 = vld [vmem:[%s3728_s3 + $0x244] ss:$36 sps:$4 sm:$0xff]  }
  0x1f   :  { %1566 = vmatprep.subr.bf16.mxu0 %v2495_v34  ;;  %v2544_v34 = vld [vmem:[%s3728_s3 + $0x480] ss:$36 sps:$4 sm:$0xff]  }
  0x22   :  { %1567 = vmatpush1.bf16.msra.mxu0 %v2497_v35  ;;  %v2545_v35 = vld [vmem:[%s3728_s3 + $0x240] ss:$36 sps:$4 sm:$0xff]  }
  0x23   :  { %1568 = vmatprep.subr.bf16.mxu0 %v2500_v36  ;;  %v2548_v36 = vld [vmem:[%s3728_s3 + $0x204] ss:$36 sps:$4 sm:$0xff]  }
  0x26   :  { %1569 = vmatpush2.bf16.msra.mxu0 %v2503_v37  ;;  %v2551_v37 = vld [vmem:[%s3728_s3 + $0x684] ss:$36 sps:$4 sm:$0xff]  }
  0x27   :  { %1570 = vmatprep.subr.bf16.mxu0 %v2506_v8 }
  0x8f   :  { %v33_v38 = vpop.xlane.xlu0 %32 }
  0x90   :  { %v47_v39 = vmul.f32 0.0026041667, %v33_v38 }
  0x91   :  { %v45_v40 = vpop.xlane.xlu1 %44 }
  0x92   :  { %v2941_v41 = vsub.f32 %v2826_v0, %v47_v39  ;;  %v2944_v42 = vsub.f32 %v2831_v1, %v47_v39  ;;  %v49_v43 = vmul.f32 0.0026041667, %v45_v40  ;;  %v2947_v44 = vsub.f32 %v2836_v2, %v47_v39 }
  0x93   :  { %v37_v45 = vpop.xlane.xlu0 %36 }
  0x94   :  { %v2950_v46 = vsub.f32 %v2843_v4, %v49_v43  ;;  %v2953_v47 = vsub.f32 %v2848_v5, %v49_v43  ;;  %v2956_v48 = vsub.f32 %v2853_v6, %v49_v43  ;;  %v48_v49 = vmul.f32 0.0026041667, %v37_v45 }
  0x95   :  { %v59_v50 = vmul.f32 %v2941_v41, %v2941_v41  ;;  %v60_v51 = vmul.f32 %v2944_v42, %v2944_v42  ;;  %v61_v56 = vmul.f32 %v2947_v44, %v2947_v44 }
  0x96   :  { %v2963_v52 = vsub.f32 %v2864_v10, %v48_v49  ;;  %v2966_v53 = vsub.f32 %v2869_v11, %v48_v49  ;;  %v2969_v54 = vsub.f32 %v2874_v12, %v48_v49  ;;  %v65_v55 = vmul.f32 %v2950_v46, %v2950_v46  ;;  %v2509_v10 = vld [vmem:[%s3728_s3 + $0x3f0] ss:$36 sps:$4 sm:$0xff]  }
  0x97   :  { %v68_v57 = vadd.f32 %v60_v51, %v59_v50  ;;  %v66_v58 = vmul.f32 %v2953_v47, %v2953_v47  ;;  %v67_v59 = vmul.f32 %v2956_v48, %v2956_v48  ;;  %1571 = vmatpush2.bf16.msra.mxu0 %v2509_v10  ;;  %v2510_v11 = vld [vmem:[%s3728_s3 + $0x5ec] ss:$36 sps:$4 sm:$0xff]   ;;  %v103_v51 = vlaneseq }
  0x98   :  { %v76_v60 = vsel %vm38_vm0, %v65_v55, 0.0  ;;  %v62_v61 = vmul.f32 %v2963_v52, %v2963_v52  ;;  %v63_v62 = vmul.f32 %v2966_v53, %v2966_v53  ;;  %v64_v3 = vmul.f32 %v2969_v54, %v2969_v54  ;;  %v2512_v12 = vld [vmem:[%s3728_s3 + $0x3ac] ss:$36 sps:$4 sm:$0xff]   ;;  %1607 = vmatprep.subr.bf16.mxu1 %v2510_v11 }
  0x99   :  { %v69_v63 = vadd.f32 %v68_v57, %v61_v56  ;;  %v77_v0 = vsel %vm38_vm0, %v66_v58, 0.0  ;;  %v79_v1 = vsel %vm38_vm0, %v67_v59, 0.0  ;;  %1572 = vmatprep.subr.bf16.mxu0 %v2512_v12  ;;  %1608 = vmatpush1.bf16.msra.mxu1 %v2514_v13  ;;  %v3079_v57 = vshrl.u32 %v103_v51, 7  ;;  %v2564_v51 = vld [vmem:[%s3728_s3 + $0x128] ss:$36 sps:$4 sm:$0xff]  }
  0x9a   :  { %v78_v2 = vadd.f32 %v77_v0, %v76_v60  ;;  %v72_v4 = vadd.f32 %v63_v62, %v62_v61  ;;  %1609 = vmatprep.subr.bf16.mxu1 %v2516_v15  ;;  %v101_v60 = vld [vmem:[%s3729_s1] sm:$0x7] }
  0x9b   :  { %70 = vadd.xlane.f32.xlu1 %v69_v63  ;;  %1573 = vmatpush2.bf16.msra.mxu0 %v2515_v14  ;;  %v3082_v58 = vsub.s32 1, %v3079_v57  ;;  %v3085_v59 = vsub.s32 2, %v3079_v57  ;;  %v3091_v61 = vsub.s32 0, %v3079_v57  ;;  %v127_v63 = vld [vmem:[%s3730_s2] sm:$0x7] }
  0x9c   :  { %v80_v5 = vadd.f32 %v79_v1, %v78_v2  ;;  %v73_v6 = vadd.f32 %v72_v4, %v64_v3  ;;  %1574 = vmatprep.subr.bf16.mxu0 %v2518_v16 }
  0x9d   :  { %1610 = vmatpush1.bf16.msra.mxu1 %v2520_v17  ;;  %v110_v62 = vrot.slane %v101_v60, %v3082_v58  ;;  %v114_v0 = vrot.slane %v101_v60, %v3085_v59  ;;  %v106_v2 = vrot.slane %v101_v60, %v3091_v61  ;;  %v140_v10 = vrot.slane %v127_v63, %v3085_v59  ;;  %v2575_v60 = vld [vmem:[%s3728_s3 + $0x564] ss:$36 sps:$4 sm:$0xff]  }
  0x9e   :  { %74 = vadd.xlane.f32.xlu0 %v73_v6  ;;  %1611 = vmatprep.subr.bf16.mxu1 %v2522_v19  ;;  %v136_v6 = vrot.slane %v127_v63, %v3082_v58  ;;  %v132_v11 = vrot.slane %v127_v63, %v3091_v61  ;;  %v2573_v63 = vld [vmem:[%s3728_s3 + $0x560] ss:$36 sps:$4 sm:$0xff]  }
  0x9f   :  { %81 = vadd.xlane.f32.xlu1 %v80_v5  ;;  %1575 = vmatpush2.bf16.msra.mxu0 %v2521_v18 }
  0xa0   :  { %1576 = vmatprep.subr.bf16.mxu0 %v2524_v20 }
  0xa1   :  { %1612 = vmatpush1.bf16.msra.mxu1 %v2526_v21 }
  0xa2   :  { %1613 = vmatprep.subr.bf16.mxu1 %v2528_v23 }
  0xa3   :  { %1577 = vmatpush2.bf16.msra.mxu0 %v2527_v22 }
  0xa4   :  { %1578 = vmatprep.subr.bf16.mxu0 %v2530_v24 }
  0xa5   :  { %1614 = vmatpush1.bf16.msra.mxu1 %v2532_v25 }
  0xa6   :  { %1615 = vmatprep.subr.bf16.mxu1 %v2534_v27 }
  0xa7   :  { %1579 = vmatpush2.bf16.msra.mxu0 %v2533_v26 }
  0xa8   :  { %1580 = vmatprep.subr.bf16.mxu0 %v2536_v28  ;;  %v2554_v28 = vld [vmem:[%s3728_s3 + $0x1bc] ss:$36 sps:$4 sm:$0xff]  }
  0xa9   :  { %1616 = vmatpush1.bf16.msra.mxu1 %v2538_v30  ;;  %v2557_v30 = vld [vmem:[%s3728_s3 + $0x63c] ss:$36 sps:$4 sm:$0xff]  }
  0xaa   :  { %1617 = vmatprep.subr.bf16.mxu1 %v2540_v32 }
  0xab   :  { %1581 = vmatpush2.bf16.msra.mxu0 %v2539_v31 }
  0xac   :  { %1582 = vmatprep.subr.bf16.mxu0 %v2542_v33  ;;  %v2552_v33 = vld [vmem:[%s3728_s3 + $0x1b8] ss:$36 sps:$4 sm:$0xff]  }
  0xad   :  { %1618 = vmatpush1.bf16.msra.mxu1 %v2544_v34  ;;  %v2555_v34 = vld [vmem:[%s3728_s3 + $0x638] ss:$36 sps:$4 sm:$0xff]  }
  0xae   :  { %1654 = vmatprep.subr.bf16.mxu1 %v2548_v36 }
  0xaf   :  { %1583 = vmatpush2.bf16.msra.mxu0 %v2545_v35  ;;  %v2560_v35 = vld [vmem:[%s3728_s3 + $0x174] ss:$36 sps:$4 sm:$0xff]  }
  0xb0   :  { %1705 = vmatprep.subr.bf16.mxu0 %v2551_v37  ;;  %v2563_v37 = vld [vmem:[%s3728_s3 + $0x5f4] ss:$36 sps:$4 sm:$0xff]  }
 0x124   :  { %v71_v38 = vpop.xlane.xlu1 %70 }
 0x125   :  { %v83_v39 = vmul.f32 0.0026041667, %v71_v38 }
 0x127   :  { %v86_v40 = vadd.f32 1e-06, %v83_v39  ;;  %v75_v43 = vpop.xlane.xlu0 %74  ;;  %v2558_v39 = vld [vmem:[%s3728_s3 + $0x170] ss:$36 sps:$4 sm:$0xff]  }
 0x128   :  { %v82_v45 = vpop.xlane.xlu1 %81  ;;  %v84_v49 = vmul.f32 0.0026041667, %v75_v43  ;;  %v2561_v43 = vld [vmem:[%s3728_s3 + $0x5f0] ss:$36 sps:$4 sm:$0xff]  }
 0x129   :  { %2786 = vrsqrt.f32 %v86_v40  ;;  %v85_v50 = vmul.f32 0.0026041667, %v82_v45 }
 0x12a   :  { %v87_v55 = vadd.f32 1e-06, %v84_v49  ;;  %v2566_v49 = vld [vmem:[%s3728_s3 + $0x12c] ss:$36 sps:$4 sm:$0xff]  }
 0x12b   :  { %v88_v56 = vadd.f32 1e-06, %v85_v50  ;;  %v2569_v50 = vld [vmem:[%s3728_s3 + $0x5ac] ss:$36 sps:$4 sm:$0xff]  }
 0x12c   :  { %2788 = vrsqrt.f32 %v87_v55  ;;  %v2567_v55 = vld [vmem:[%s3728_s3 + $0x5a8] ss:$36 sps:$4 sm:$0xff]  }
 0x12d   :  { %2790 = vrsqrt.f32 %v88_v56  ;;  %v2572_v56 = vld [vmem:[%s3728_s3 + $0xe4] ss:$36 sps:$4 sm:$0xff]  }
 0x136   :  { %v2787_v1 = vpop.eup %2786 }
 0x137   :  { %v93_v3 = vmul.f32 %v2787_v1, %v2944_v42  ;;  %v94_v4 = vmul.f32 %v2787_v1, %v2947_v44  ;;  %v92_v5 = vmul.f32 %v2787_v1, %v2941_v41  ;;  %v2581_v1 = vld [vmem:[%s3728_s3 + $0x51c] ss:$36 sps:$4 sm:$0xff]  }
 0x139   :  { %v2789_v7 = vpop.eup %2788  ;;  %v119_v8 = vmul.f32 %v110_v62, %v93_v3  ;;  %v120_v9 = vmul.f32 %v114_v0, %v94_v4  ;;  %v118_v15 = vmul.f32 %v106_v2, %v92_v5  ;;  %v2579_v3 = vld [vmem:[%s3728_s3 + $0x518] ss:$36 sps:$4 sm:$0xff]  }
 0x13a   :  { %v2791_v12 = vpop.eup %2790  ;;  %v96_v13 = vmul.f32 %v2789_v7, %v2966_v53  ;;  %v97_v14 = vmul.f32 %v2789_v7, %v2969_v54  ;;  %v95_v42 = vmul.f32 %v2789_v7, %v2963_v52  ;;  %v2546_v52 = vld [vmem:[%s3728_s3 + $0x200] ss:$36 sps:$4 sm:$0xff]   ;;  %v2584_v4 = vld [vmem:[%s3728_s3 + $0x54] ss:$36 sps:$4 sm:$0xff]  }
 0x13b   :  { %v99_v44 = vmul.f32 %v2791_v12, %v2953_v47  ;;  %v100_v18 = vmul.f32 %v2791_v12, %v2956_v48  ;;  %v145_v19 = vadd.f32 %v136_v6, %v119_v8  ;;  %v146_v20 = vadd.f32 %v140_v10, %v120_v9  ;;  %v2549_v48 = vld [vmem:[%s3728_s3 + $0x680] ss:$36 sps:$4 sm:$0xff]   ;;  %v2587_v5 = vld [vmem:[%s3728_s3 + $0x4d4] ss:$36 sps:$4 sm:$0xff]   ;;  %v2590_v8 = vld [vmem:[%s3728_s3 + $0xc] ss:$36 sps:$4 sm:$0xff]  }
 0x13c   :  { %v122_v41 = vmul.f32 %v110_v62, %v96_v13  ;;  %v123_v16 = vmul.f32 %v114_v0, %v97_v14  ;;  %v121_v17 = vmul.f32 %v106_v2, %v95_v42  ;;  %v98_v22 = vmul.f32 %v2791_v12, %v2950_v46  ;;  %v2585_v7 = vld [vmem:[%s3728_s3 + $0x4d0] ss:$36 sps:$4 sm:$0xff]   ;;  %v2596_v12 = vld [vmem:[%s3728_s3 + $0x444] ss:$36 sps:$4 sm:$0xff]  }
 0x13d   :  { %v125_v21 = vmul.f32 %v110_v62, %v99_v44  ;;  %v144_v53 = vadd.f32 %v132_v11, %v118_v15  ;;  %v126_v46 = vmul.f32 %v114_v0, %v100_v18  ;;  %v2570_v62 = vld [vmem:[%s3728_s3 + $0xe0] ss:$36 sps:$4 sm:$0xff]   ;;  %v2593_v9 = vld [vmem:[%s3728_s3 + $0x48c] ss:$36 sps:$4 sm:$0xff]  }
 0x13e   :  { %v148_v23 = vadd.f32 %v136_v6, %v122_v41  ;;  %v149_v24 = vadd.f32 %v140_v10, %v123_v16  ;;  %v147_v25 = vadd.f32 %v132_v11, %v121_v17  ;;  %v124_v31 = vmul.f32 %v106_v2, %v98_v22  ;;  %v2578_v0 = vld [vmem:[%s3728_s3 + $0x9c] ss:$36 sps:$4 sm:$0xff]   ;;  %v2599_v13 = vld [vmem:[%s3728_s3 + $0x20c] ss:$36 sps:$4 sm:$0xff]   ;;  %v2605_v44 = vld [vmem:[%s3728_s3 + $0x1c4] ss:$36 sps:$4 sm:$0xff]  }
 0x13f   :  { %v151_v54 = vadd.f32 %v136_v6, %v125_v21  ;;  %v152_v36 = vadd.f32 %v140_v10, %v126_v46  ;;  %v2576_v2 = vld [vmem:[%s3728_s3 + $0x98] ss:$36 sps:$4 sm:$0xff]   ;;  %v2582_v6 = vld [vmem:[%s3728_s3 + $0x50] ss:$36 sps:$4 sm:$0xff]   ;;  %v2588_v10 = vld [vmem:[%s3728_s3 + $0x8] ss:$36 sps:$4 sm:$0xff]  }
 0x140   :  { %v3114_v47 = vpack.c.bf16 %v148_v23, %v145_v19  ;;  %v3116_v26 = vpack.c.bf16 %v149_v24, %v146_v20  ;;  %v3121_v27 = vpack.c.bf16 %v147_v25, %v144_v53  ;;  %v150_v38 = vadd.f32 %v132_v11, %v124_v31  ;;  %v2591_v11 = vld [vmem:[%s3728_s3 + $0x488] ss:$36 sps:$4 sm:$0xff]   ;;  %v2594_v14 = vld [vmem:[%s3728_s3 + $0x440] ss:$36 sps:$4 sm:$0xff]   ;;  %v2600_v41 = vld [vmem:[%s3728_s3 + $0x3f8] ss:$36 sps:$4 sm:$0xff]  }
 0x141   :  { %v3131_v32 = vpack.c.bf16 %v151_v54, %v151_v54  ;;  %v3151_v40 = vpack.c.bf16 %v152_v36, %v152_v36  ;;  %v2597_v42 = vld [vmem:[%s3728_s3 + $0x208] ss:$36 sps:$4 sm:$0xff]   ;;  %v2602_v15 = vld [vmem:[%s3728_s3 + $0x3fc] ss:$36 sps:$4 sm:$0xff]   ;;  %v2608_v17 = vld [vmem:[%s3728_s3 + $0x3b4] ss:$36 sps:$4 sm:$0xff]  }
 0x142   :  { %1584 = vmatprep.mubr.bf16.mxu0 %v3114_v47  ;;  %1636 = vmatmul.mubr.bf16.vlgmr.msra.gmra.mxu1 %v3116_v26  ;;  %v3156_v45 = vpack.c.bf16 %v150_v38, %v150_v38  ;;  %v2603_v16 = vld [vmem:[%s3728_s3 + $0x1c0] ss:$36 sps:$4 sm:$0xff]   ;;  %v2606_v19 = vld [vmem:[%s3728_s3 + $0x3b0] ss:$36 sps:$4 sm:$0xff]   ;;  %v2609_v20 = vld [vmem:[%s3728_s3 + $0x178] ss:$36 sps:$4 sm:$0xff]  }
 0x143   :  { %1655 = vmatpush1.bf16.msra.mxu1 %v2546_v52  ;;  %1585 = vmatmul.mubr.bf16.vlgmr.msra.gmra.mxu0 %v3121_v27  ;;  %v2611_v18 = vld [vmem:[%s3728_s3 + $0x17c] ss:$36 sps:$4 sm:$0xff]   ;;  %v2614_v21 = vld [vmem:[%s3728_s3 + $0x36c] ss:$36 sps:$4 sm:$0xff]   ;;  %v2617_v22 = vld [vmem:[%s3728_s3 + $0x134] ss:$36 sps:$4 sm:$0xff]  }
 0x144   :  { %1706 = vmatpush1.bf16.msra.mxu0 %v2549_v48  ;;  %1594 = vmatprep.mubr.bf16.mxu0 %v3131_v32  ;;  %v2612_v23 = vld [vmem:[%s3728_s3 + $0x368] ss:$36 sps:$4 sm:$0xff]   ;;  %v2615_v24 = vld [vmem:[%s3728_s3 + $0x130] ss:$36 sps:$4 sm:$0xff]   ;;  %v2618_v52 = vld [vmem:[%s3728_s3 + $0x320] ss:$36 sps:$4 sm:$0xff]  }
 0x145   :  { %1656 = vmatprep.subr.bf16.mxu1 %v2554_v28  ;;  %1707 = vmatprep.subr.bf16.mxu0 %v2557_v30  ;;  %v2620_v53 = vld [vmem:[%s3728_s3 + $0x324] ss:$36 sps:$4 sm:$0xff]   ;;  %v2623_v25 = vld [vmem:[%s3728_s3 + $0xec] ss:$36 sps:$4 sm:$0xff]   ;;  %v2626_v48 = vld [vmem:[%s3728_s3 + $0x2dc] ss:$36 sps:$4 sm:$0xff]  }
 0x146   :  { %1645 = vmatprep.mubr.bf16.mxu1 %v2792_v29  ;;  %v2621_v54 = vld [vmem:[%s3728_s3 + $0xe8] ss:$36 sps:$4 sm:$0xff]   ;;  %v2624_v28 = vld [vmem:[%s3728_s3 + $0x2d8] ss:$36 sps:$4 sm:$0xff]   ;;  %v2627_v30 = vld [vmem:[%s3728_s3 + $0xa0] ss:$36 sps:$4 sm:$0xff]  }
 0x147   :  { %1657 = vmatpush1.bf16.msra.mxu1 %v2552_v33  ;;  %v2629_v46 = vld [vmem:[%s3728_s3 + $0xa4] ss:$36 sps:$4 sm:$0xff]   ;;  %v2632_v31 = vld [vmem:[%s3728_s3 + $0x294] ss:$36 sps:$4 sm:$0xff]   ;;  %v2635_v33 = vld [vmem:[%s3728_s3 + $0x5c] ss:$36 sps:$4 sm:$0xff]  }
 0x148   :  { %1708 = vmatpush1.bf16.msra.mxu0 %v2555_v34  ;;  %1658 = vmatprep.subr.bf16.mxu1 %v2560_v35  ;;  %v2630_v34 = vld [vmem:[%s3728_s3 + $0x290] ss:$36 sps:$4 sm:$0xff]   ;;  %v2633_v35 = vld [vmem:[%s3728_s3 + $0x58] ss:$36 sps:$4 sm:$0xff]   ;;  %v2636_v38 = vld [vmem:[%s3728_s3 + $0x248] ss:$36 sps:$4 sm:$0xff]  }
 0x149   :  { %1709 = vmatprep.subr.bf16.mxu0 %v2563_v37  ;;  %v2638_v36 = vld [vmem:[%s3728_s3 + $0x24c] ss:$36 sps:$4 sm:$0xff]   ;;  %v2641_v37 = vld [vmem:[%s3728_s3 + $0x14] ss:$36 sps:$4 sm:$0xff]  }
 0x14a   :  { %1646 = vmatmul.mubr.bf16.gmra.mxu1 %v3151_v40 }
 0x14b   :  { %1659 = vmatpush1.bf16.msra.mxu1 %v2558_v39  ;;  %1595 = vmatmul.mubr.bf16.gmra.mxu0 %v3156_v45  ;;  %v2639_v39 = vld [vmem:[%s3728_s3 + $0x10] ss:$36 sps:$4 sm:$0xff]  }
 0x14c   :  { %1686 = vmatprep.mubr.bf16.mxu1 %v3114_v47  ;;  %1710 = vmatpush1.bf16.msra.mxu0 %v2561_v43  ;;  %v2644_v43 = vld [vmem:[%s3728_s3 + $0x68c] ss:$36 sps:$4 sm:$0xff]  }
 0x14d   :  { %1660 = vmatprep.subr.bf16.mxu1 %v2566_v49  ;;  %1711 = vmatprep.subr.bf16.mxu0 %v2569_v50  ;;  %v2647_v49 = vld [vmem:[%s3728_s3 + $0x44c] ss:$36 sps:$4 sm:$0xff]  }
 0x14e   :  { %1737 = vmatprep.mubr.bf16.mxu0 %v2792_v29  ;;  %v2642_v50 = vld [vmem:[%s3728_s3 + $0x688] ss:$36 sps:$4 sm:$0xff]  }
 0x14f   :  { %1661 = vmatpush1.bf16.msra.mxu1 %v2564_v51  ;;  %v2645_v51 = vld [vmem:[%s3728_s3 + $0x448] ss:$36 sps:$4 sm:$0xff]  }
 0x150   :  { %1712 = vmatpush1.bf16.msra.mxu0 %v2567_v55  ;;  %1662 = vmatprep.subr.bf16.mxu1 %v2572_v56  ;;  %v2650_v55 = vld [vmem:[%s3728_s3 + $0x644] ss:$36 sps:$4 sm:$0xff]  }
 0x151   :  { %1713 = vmatprep.subr.bf16.mxu0 %v2575_v60  ;;  %v2653_v56 = vld [vmem:[%s3728_s3 + $0x404] ss:$36 sps:$4 sm:$0xff]  }
 0x152   :  { %v2648_v60 = vld [vmem:[%s3728_s3 + $0x640] ss:$36 sps:$4 sm:$0xff]  }
 0x153   :  { %1663 = vmatpush1.bf16.msra.mxu1 %v2570_v62  ;;  %v2651_v62 = vld [vmem:[%s3728_s3 + $0x400] ss:$36 sps:$4 sm:$0xff]  }
 0x154   :  { %1714 = vmatpush1.bf16.msra.mxu0 %v2573_v63  ;;  %1664 = vmatprep.subr.bf16.mxu1 %v2578_v0  ;;  %v2656_v63 = vld [vmem:[%s3728_s3 + $0x5fc] ss:$36 sps:$4 sm:$0xff]  }
 0x155   :  { %1715 = vmatprep.subr.bf16.mxu0 %v2581_v1  ;;  %v2659_v0 = vld [vmem:[%s3728_s3 + $0x3bc] ss:$36 sps:$4 sm:$0xff]  }
 0x156   :  { %v2654_v1 = vld [vmem:[%s3728_s3 + $0x5f8] ss:$36 sps:$4 sm:$0xff]  }
 0x157   :  { %1665 = vmatpush1.bf16.msra.mxu1 %v2576_v2  ;;  %v2657_v2 = vld [vmem:[%s3728_s3 + $0x3b8] ss:$36 sps:$4 sm:$0xff]  }
 0x158   :  { %1716 = vmatpush1.bf16.msra.mxu0 %v2579_v3  ;;  %1666 = vmatprep.subr.bf16.mxu1 %v2584_v4  ;;  %v2662_v3 = vld [vmem:[%s3728_s3 + $0x5b4] ss:$36 sps:$4 sm:$0xff]  }
 0x159   :  { %1717 = vmatprep.subr.bf16.mxu0 %v2587_v5  ;;  %v2665_v4 = vld [vmem:[%s3728_s3 + $0x374] ss:$36 sps:$4 sm:$0xff]  }
 0x15a   :  { %v2660_v5 = vld [vmem:[%s3728_s3 + $0x5b0] ss:$36 sps:$4 sm:$0xff]  }
 0x15b   :  { %1667 = vmatpush1.bf16.msra.mxu1 %v2582_v6  ;;  %v2663_v6 = vld [vmem:[%s3728_s3 + $0x370] ss:$36 sps:$4 sm:$0xff]  }
 0x15c   :  { %1718 = vmatpush1.bf16.msra.mxu0 %v2585_v7  ;;  %1668 = vmatprep.subr.bf16.mxu1 %v2590_v8  ;;  %v2668_v7 = vld [vmem:[%s3728_s3 + $0x56c] ss:$36 sps:$4 sm:$0xff]  }
 0x15d   :  { %1719 = vmatprep.subr.bf16.mxu0 %v2593_v9  ;;  %v2671_v8 = vld [vmem:[%s3728_s3 + $0x32c] ss:$36 sps:$4 sm:$0xff]  }
 0x15e   :  { %v2666_v9 = vld [vmem:[%s3728_s3 + $0x568] ss:$36 sps:$4 sm:$0xff]  }
 0x15f   :  { %1669 = vmatpush1.bf16.msra.mxu1 %v2588_v10  ;;  %v2669_v10 = vld [vmem:[%s3728_s3 + $0x328] ss:$36 sps:$4 sm:$0xff]  }
 0x160   :  { %1720 = vmatpush1.bf16.msra.mxu0 %v2591_v11  ;;  %1670 = vmatprep.subr.bf16.mxu1 %v2596_v12  ;;  %v2674_v11 = vld [vmem:[%s3728_s3 + $0x524] ss:$36 sps:$4 sm:$0xff]  }
 0x161   :  { %1756 = vmatprep.subr.bf16.mxu0 %v2599_v13  ;;  %v2677_v12 = vld [vmem:[%s3728_s3 + $0x2e4] ss:$36 sps:$4 sm:$0xff]  }
 0x162   :  { %v2672_v13 = vld [vmem:[%s3728_s3 + $0x520] ss:$36 sps:$4 sm:$0xff]  }
 0x163   :  { %1671 = vmatpush2.bf16.msra.mxu1 %v2594_v14  ;;  %1738 = vmatmul.mubr.bf16.vlgmr.msra.gmra.mxu0 %v3116_v26  ;;  %v2675_v14 = vld [vmem:[%s3728_s3 + $0x2e0] ss:$36 sps:$4 sm:$0xff]  }
 0x164   :  { %1757 = vmatpush1.bf16.msra.mxu0 %v2597_v42  ;;  %1672 = vmatprep.subr.bf16.mxu1 %v2602_v15  ;;  %v2680_v42 = vld [vmem:[%s3728_s3 + $0x4dc] ss:$36 sps:$4 sm:$0xff]  }
 0x165   :  { %1758 = vmatprep.subr.bf16.mxu0 %v2605_v44  ;;  %1747 = vmatprep.mubr.bf16.mxu0 %v2792_v29  ;;  %v2683_v15 = vld [vmem:[%s3728_s3 + $0x29c] ss:$36 sps:$4 sm:$0xff]  }
 0x166   :  { %v2678_v44 = vld [vmem:[%s3728_s3 + $0x4d8] ss:$36 sps:$4 sm:$0xff]  }
 0x167   :  { %1673 = vmatpush2.bf16.msra.mxu1 %v2600_v41  ;;  %v2681_v41 = vld [vmem:[%s3728_s3 + $0x298] ss:$36 sps:$4 sm:$0xff]  }
 0x168   :  { %1759 = vmatpush1.bf16.msra.mxu0 %v2603_v16  ;;  %1674 = vmatprep.subr.bf16.mxu1 %v2608_v17  ;;  %v2686_v16 = vld [vmem:[%s3728_s3 + $0x494] ss:$36 sps:$4 sm:$0xff]  }
 0x169   :  { %1760 = vmatprep.subr.bf16.mxu0 %v2611_v18  ;;  %v2689_v17 = vld [vmem:[%s3728_s3 + $0x254] ss:$36 sps:$4 sm:$0xff]  }
 0x16a   :  { %v2684_v18 = vld [vmem:[%s3728_s3 + $0x490] ss:$36 sps:$4 sm:$0xff]  }
 0x16b   :  { %1675 = vmatpush2.bf16.msra.mxu1 %v2606_v19  ;;  %1748 = vmatmul.mubr.bf16.gmra.mxu0 %v3151_v40  ;;  %v2687_v19 = vld [vmem:[%s3728_s3 + $0x250] ss:$36 sps:$4 sm:$0xff]  }
 0x16c   :  { %1761 = vmatpush1.bf16.msra.mxu0 %v2609_v20  ;;  %1788 = vmatprep.mubr.bf16.mxu0 %v3114_v47  ;;  %v2692_v20 = vld [vmem:[%s3728_s3 + $0x214] ss:$36 sps:$4 sm:$0xff]  }
 0x16d   :  { %1676 = vmatprep.subr.bf16.mxu1 %v2614_v21  ;;  %1762 = vmatprep.subr.bf16.mxu0 %v2617_v22  ;;  %v2695_v21 = vld [vmem:[%s3728_s3 + $0x694] ss:$36 sps:$4 sm:$0xff]  }
 0x16e   :  { %v2690_v22 = vld [vmem:[%s3728_s3 + $0x210] ss:$36 sps:$4 sm:$0xff]  }
 0x16f   :  { %1677 = vmatpush2.bf16.msra.mxu1 %v2612_v23  ;;  %v2693_v23 = vld [vmem:[%s3728_s3 + $0x690] ss:$36 sps:$4 sm:$0xff]  }
 0x170   :  { %1763 = vmatpush1.bf16.msra.mxu0 %v2615_v24  ;;  %1678 = vmatprep.subr.bf16.mxu1 %v2620_v53  ;;  %v2698_v24 = vld [vmem:[%s3728_s3 + $0x1cc] ss:$36 sps:$4 sm:$0xff]  }
 0x171   :  { %1764 = vmatprep.subr.bf16.mxu0 %v2623_v25  ;;  %v2701_v53 = vld [vmem:[%s3728_s3 + $0x64c] ss:$36 sps:$4 sm:$0xff]  }
 0x172   :  { %v2696_v25 = vld [vmem:[%s3728_s3 + $0x1c8] ss:$36 sps:$4 sm:$0xff]  }
 0x173   :  { %1679 = vmatpush2.bf16.msra.mxu1 %v2618_v52  ;;  %v2699_v52 = vld [vmem:[%s3728_s3 + $0x648] ss:$36 sps:$4 sm:$0xff]  }
 0x174   :  { %1765 = vmatpush1.bf16.msra.mxu0 %v2621_v54  ;;  %1680 = vmatprep.subr.bf16.mxu1 %v2626_v48  ;;  %v2704_v54 = vld [vmem:[%s3728_s3 + $0x184] ss:$36 sps:$4 sm:$0xff]  }
 0x175   :  { %1766 = vmatprep.subr.bf16.mxu0 %v2629_v46  ;;  %v2707_v48 = vld [vmem:[%s3728_s3 + $0x604] ss:$36 sps:$4 sm:$0xff]  }
 0x176   :  { %v2702_v46 = vld [vmem:[%s3728_s3 + $0x180] ss:$36 sps:$4 sm:$0xff]  }
 0x177   :  { %1681 = vmatpush2.bf16.msra.mxu1 %v2624_v28  ;;  %v2705_v28 = vld [vmem:[%s3728_s3 + $0x600] ss:$36 sps:$4 sm:$0xff]  }
 0x178   :  { %1767 = vmatpush1.bf16.msra.mxu0 %v2627_v30  ;;  %1682 = vmatprep.subr.bf16.mxu1 %v2632_v31  ;;  %v2710_v30 = vld [vmem:[%s3728_s3 + $0x13c] ss:$36 sps:$4 sm:$0xff]  }
 0x179   :  { %1768 = vmatprep.subr.bf16.mxu0 %v2635_v33  ;;  %v2713_v31 = vld [vmem:[%s3728_s3 + $0x5bc] ss:$36 sps:$4 sm:$0xff]  }
 0x17a   :  { %v2708_v33 = vld [vmem:[%s3728_s3 + $0x138] ss:$36 sps:$4 sm:$0xff]  }
 0x17b   :  { %1683 = vmatpush2.bf16.msra.mxu1 %v2630_v34  ;;  %v2711_v34 = vld [vmem:[%s3728_s3 + $0x5b8] ss:$36 sps:$4 sm:$0xff]  }
 0x17c   :  { %1769 = vmatpush1.bf16.msra.mxu0 %v2633_v35  ;;  %1684 = vmatprep.subr.bf16.mxu1 %v2638_v36  ;;  %v2716_v35 = vld [vmem:[%s3728_s3 + $0xf4] ss:$36 sps:$4 sm:$0xff]  }
 0x17d   :  { %1770 = vmatprep.subr.bf16.mxu0 %v2641_v37  ;;  %v2719_v36 = vld [vmem:[%s3728_s3 + $0x574] ss:$36 sps:$4 sm:$0xff]  }
 0x17e   :  { %v2714_v37 = vld [vmem:[%s3728_s3 + $0xf0] ss:$36 sps:$4 sm:$0xff]  }
 0x17f   :  { %1685 = vmatpush2.bf16.msra.mxu1 %v2636_v38  ;;  %v2717_v38 = vld [vmem:[%s3728_s3 + $0x570] ss:$36 sps:$4 sm:$0xff]  }
 0x180   :  { %1771 = vmatpush1.bf16.msra.mxu0 %v2639_v39  ;;  %1807 = vmatprep.subr.bf16.mxu1 %v2644_v43  ;;  %v2722_v39 = vld [vmem:[%s3728_s3 + $0xac] ss:$36 sps:$4 sm:$0xff]  }
 0x181   :  { %1772 = vmatprep.subr.bf16.mxu0 %v2647_v49  ;;  %v2725_v43 = vld [vmem:[%s3728_s3 + $0x52c] ss:$36 sps:$4 sm:$0xff]  }
 0x182   :  { %1687 = vmatmul.mubr.bf16.vlgmr.msra.gmra.mxu1 %v3121_v27  ;;  %v2720_v49 = vld [vmem:[%s3728_s3 + $0xa8] ss:$36 sps:$4 sm:$0xff]  }
 0x183   :  { %1696 = vmatprep.mubr.bf16.mxu1 %v3131_v32  ;;  %1808 = vmatpush1.bf16.msra.mxu1 %v2642_v50  ;;  %v2723_v50 = vld [vmem:[%s3728_s3 + $0x528] ss:$36 sps:$4 sm:$0xff]  }
 0x184   :  { %1773 = vmatpush2.bf16.msra.mxu0 %v2645_v51  ;;  %1809 = vmatprep.subr.bf16.mxu1 %v2650_v55  ;;  %v2728_v51 = vld [vmem:[%s3728_s3 + $0x64] ss:$36 sps:$4 sm:$0xff]  }
 0x185   :  { %1774 = vmatprep.subr.bf16.mxu0 %v2653_v56  ;;  %v2731_v55 = vld [vmem:[%s3728_s3 + $0x4e4] ss:$36 sps:$4 sm:$0xff]  }
 0x186   :  { %v2726_v56 = vld [vmem:[%s3728_s3 + $0x60] ss:$36 sps:$4 sm:$0xff]  }
 0x187   :  { %1810 = vmatpush1.bf16.msra.mxu1 %v2648_v60  ;;  %v2729_v60 = vld [vmem:[%s3728_s3 + $0x4e0] ss:$36 sps:$4 sm:$0xff]  }
 0x188   :  { %1775 = vmatpush2.bf16.msra.mxu0 %v2651_v62  ;;  %1811 = vmatprep.subr.bf16.mxu1 %v2656_v63  ;;  %v2734_v62 = vld [vmem:[%s3728_s3 + $0x1c] ss:$36 sps:$4 sm:$0xff]  }
 0x189   :  { %1776 = vmatprep.subr.bf16.mxu0 %v2659_v0  ;;  %v2737_v63 = vld [vmem:[%s3728_s3 + $0x49c] ss:$36 sps:$4 sm:$0xff]  }
 0x18a   :  { %1697 = vmatmul.mubr.bf16.gmra.mxu1 %v3156_v45  ;;  %v2732_v0 = vld [vmem:[%s3728_s3 + $0x18] ss:$36 sps:$4 sm:$0xff]  }
 0x18b   :  { %1812 = vmatpush1.bf16.msra.mxu1 %v2654_v1  ;;  %1839 = vmatprep.mubr.bf16.mxu1 %v2792_v29  ;;  %v2735_v1 = vld [vmem:[%s3728_s3 + $0x498] ss:$36 sps:$4 sm:$0xff]  }
 0x18c   :  { %1777 = vmatpush2.bf16.msra.mxu0 %v2657_v2  ;;  %1813 = vmatprep.subr.bf16.mxu1 %v2662_v3  ;;  %v2740_v2 = vld [vmem:[%s3728_s3 + $0x454] ss:$36 sps:$4 sm:$0xff]  }
 0x18d   :  { %1778 = vmatprep.subr.bf16.mxu0 %v2665_v4  ;;  %v2741_v3 = vld [vmem:[%s3728_s3 + $0x458] ss:$36 sps:$4 sm:$0xff]   ;;  %v2738_v4 = vld [vmem:[%s3728_s3 + $0x450] ss:$36 sps:$4 sm:$0xff]  }
 0x18f   :  { %1814 = vmatpush1.bf16.msra.mxu1 %v2660_v5  ;;  %v2742_v5 = vld [vmem:[%s3728_s3 + $0x218] ss:$36 sps:$4 sm:$0xff]  }
 0x190   :  { %1779 = vmatpush2.bf16.msra.mxu0 %v2663_v6  ;;  %1815 = vmatprep.subr.bf16.mxu1 %v2668_v7  ;;  %v2745_v6 = vld [vmem:[%s3728_s3 + $0x40c] ss:$36 sps:$4 sm:$0xff]  }
 0x191   :  { %1780 = vmatprep.subr.bf16.mxu0 %v2671_v8  ;;  %v2746_v7 = vld [vmem:[%s3728_s3 + $0x410] ss:$36 sps:$4 sm:$0xff]   ;;  %v2743_v8 = vld [vmem:[%s3728_s3 + $0x408] ss:$36 sps:$4 sm:$0xff]  }
 0x193   :  { %1816 = vmatpush1.bf16.msra.mxu1 %v2666_v9  ;;  %v2747_v9 = vld [vmem:[%s3728_s3 + $0x1d0] ss:$36 sps:$4 sm:$0xff]  }
 0x194   :  { %1781 = vmatpush2.bf16.msra.mxu0 %v2669_v10  ;;  %1817 = vmatprep.subr.bf16.mxu1 %v2674_v11  ;;  %v2750_v10 = vld [vmem:[%s3728_s3 + $0x3c4] ss:$36 sps:$4 sm:$0xff]  }
 0x195   :  { %1782 = vmatprep.subr.bf16.mxu0 %v2677_v12  ;;  %v2751_v11 = vld [vmem:[%s3728_s3 + $0x3c8] ss:$36 sps:$4 sm:$0xff]   ;;  %v2748_v12 = vld [vmem:[%s3728_s3 + $0x3c0] ss:$36 sps:$4 sm:$0xff]  }
 0x197   :  { %1818 = vmatpush1.bf16.msra.mxu1 %v2672_v13  ;;  %v2752_v13 = vld [vmem:[%s3728_s3 + $0x188] ss:$36 sps:$4 sm:$0xff]  }
 0x198   :  { %1783 = vmatpush2.bf16.msra.mxu0 %v2675_v14  ;;  %1819 = vmatprep.subr.bf16.mxu1 %v2680_v42  ;;  %v2756_v14 = vld [vmem:[%s3728_s3 + $0x380] ss:$36 sps:$4 sm:$0xff]   ;;  %v2753_v42 = vld [vmem:[%s3728_s3 + $0x378] ss:$36 sps:$4 sm:$0xff]  }
 0x199   :  { %1784 = vmatprep.subr.bf16.mxu0 %v2683_v15  ;;  %v2757_v15 = vld [vmem:[%s3728_s3 + $0x140] ss:$36 sps:$4 sm:$0xff]  }
 0x19b   :  { %1820 = vmatpush1.bf16.msra.mxu1 %v2678_v44  ;;  %v2760_v44 = vld [vmem:[%s3728_s3 + $0x334] ss:$36 sps:$4 sm:$0xff]  }
 0x19c   :  { %1785 = vmatpush2.bf16.msra.mxu0 %v2681_v41  ;;  %1821 = vmatprep.subr.bf16.mxu1 %v2686_v16  ;;  %v2761_v41 = vld [vmem:[%s3728_s3 + $0x338] ss:$36 sps:$4 sm:$0xff]   ;;  %v2758_v16 = vld [vmem:[%s3728_s3 + $0x330] ss:$36 sps:$4 sm:$0xff]  }
 0x19d   :  { %1786 = vmatprep.subr.bf16.mxu0 %v2689_v17  ;;  %v2765_v17 = vld [vmem:[%s3728_s3 + $0x2ec] ss:$36 sps:$4 sm:$0xff]  }
 0x19f   :  { %1822 = vmatpush1.bf16.msra.mxu1 %v2684_v18  ;;  %v2766_v18 = vld [vmem:[%s3728_s3 + $0x2f0] ss:$36 sps:$4 sm:$0xff]  }
 0x1a0   :  { %1787 = vmatpush2.bf16.msra.mxu0 %v2687_v19  ;;  %1858 = vmatprep.subr.bf16.mxu1 %v2692_v20  ;;  %v2763_v19 = vld [vmem:[%s3728_s3 + $0x2e8] ss:$36 sps:$4 sm:$0xff]   ;;  %v2767_v20 = vld [vmem:[%s3728_s3 + $0xb0] ss:$36 sps:$4 sm:$0xff]  }
 0x1a1   :  { %1909 = vmatprep.subr.bf16.mxu0 %v2695_v21  ;;  %v2770_v21 = vld [vmem:[%s3728_s3 + $0x2a4] ss:$36 sps:$4 sm:$0xff]  }
 0x1a2   :  { %1840 = vmatmul.mubr.bf16.vlgmr.msra.gmra.mxu1 %v3116_v26 }
 0x1a3   :  { %1789 = vmatmul.mubr.bf16.vlgmr.msra.gmra.mxu0 %v3121_v27  ;;  %1859 = vmatpush1.bf16.msra.mxu1 %v2690_v22  ;;  %v2771_v22 = vld [vmem:[%s3728_s3 + $0x2a8] ss:$36 sps:$4 sm:$0xff]  }
 0x1a4   :  { %1798 = vmatprep.mubr.bf16.mxu0 %v3131_v32  ;;  %1910 = vmatpush1.bf16.msra.mxu0 %v2693_v23  ;;  %v2768_v23 = vld [vmem:[%s3728_s3 + $0x2a0] ss:$36 sps:$4 sm:$0xff]  }
 0x1a5   :  { %1860 = vmatprep.subr.bf16.mxu1 %v2698_v24  ;;  %1911 = vmatprep.subr.bf16.mxu0 %v2701_v53  ;;  %v2772_v24 = vld [vmem:[%s3728_s3 + $0x68] ss:$36 sps:$4 sm:$0xff]   ;;  %v2775_v53 = vld [vmem:[%s3728_s3 + $0x25c] ss:$36 sps:$4 sm:$0xff]  }
 0x1a6   :  { %1849 = vmatprep.mubr.bf16.mxu1 %v2792_v29 }
 0x1a7   :  { %1861 = vmatpush1.bf16.msra.mxu1 %v2696_v25  ;;  %v2776_v25 = vld [vmem:[%s3728_s3 + $0x260] ss:$36 sps:$4 sm:$0xff]  }
 0x1a8   :  { %1912 = vmatpush1.bf16.msra.mxu0 %v2699_v52  ;;  %1862 = vmatprep.subr.bf16.mxu1 %v2704_v54  ;;  %v2773_v52 = vld [vmem:[%s3728_s3 + $0x258] ss:$36 sps:$4 sm:$0xff]   ;;  %v2777_v54 = vld [vmem:[%s3728_s3 + $0x20] ss:$36 sps:$4 sm:$0xff]  }
 0x1a9   :  { %1913 = vmatprep.subr.bf16.mxu0 %v2707_v48  ;;  %v2778_v48 = vld [vmem:[%s3728_s3 + $0x698] ss:$36 sps:$4 sm:$0xff]  }
 0x1aa   :  { %1850 = vmatmul.mubr.bf16.gmra.mxu1 %v3151_v40 }
 0x1ab   :  { %1799 = vmatmul.mubr.bf16.gmra.mxu0 %v3156_v45  ;;  %1863 = vmatpush1.bf16.msra.mxu1 %v2702_v46  ;;  %v2779_v46 = vld [vmem:[%s3728_s3 + $0x650] ss:$36 sps:$4 sm:$0xff]  }
 0x1ac   :  { %1890 = vmatprep.mubr.bf16.mxu1 %v3114_v47  ;;  %1914 = vmatpush1.bf16.msra.mxu0 %v2705_v28  ;;  %v2780_v28 = vld [vmem:[%s3728_s3 + $0x608] ss:$36 sps:$4 sm:$0xff]  }
 0x1ad   :  { %1864 = vmatprep.subr.bf16.mxu1 %v2710_v30  ;;  %1915 = vmatprep.subr.bf16.mxu0 %v2713_v31  ;;  %v2781_v30 = vld [vmem:[%s3728_s3 + $0x5c0] ss:$36 sps:$4 sm:$0xff]  }
 0x1ae   :  { %1941 = vmatprep.mubr.bf16.mxu0 %v2792_v29  ;;  %v3660_v31 = vld [vmem:[%s3731_s4] sm:$0xff] }
 0x1af   :  { %1865 = vmatpush1.bf16.msra.mxu1 %v2708_v33  ;;  %v406_v33 = vrot.slane %v3660_v31, %v3091_v61 }
 0x1b0   :  { %1916 = vmatpush1.bf16.msra.mxu0 %v2711_v34  ;;  %1866 = vmatprep.subr.bf16.mxu1 %v2716_v35  ;;  %v410_v35 = vrot.slane %v3660_v31, %v3082_v58 }
 0x1b1   :  { %1917 = vmatprep.subr.bf16.mxu0 %v2719_v36 }
 0x1b3   :  { %1867 = vmatpush1.bf16.msra.mxu1 %v2714_v37 }
 0x1b4   :  { %1918 = vmatpush1.bf16.msra.mxu0 %v2717_v38  ;;  %1868 = vmatprep.subr.bf16.mxu1 %v2722_v39 }
 0x1b5   :  { %1919 = vmatprep.subr.bf16.mxu0 %v2725_v43 }
 0x1b7   :  { %1869 = vmatpush1.bf16.msra.mxu1 %v2720_v49 }
 0x1b8   :  { %1920 = vmatpush1.bf16.msra.mxu0 %v2723_v50  ;;  %1870 = vmatprep.subr.bf16.mxu1 %v2728_v51 }
 0x1b9   :  { %1921 = vmatprep.subr.bf16.mxu0 %v2731_v55 }
 0x1bb   :  { %1871 = vmatpush1.bf16.msra.mxu1 %v2726_v56 }
 0x1bc   :  { %1922 = vmatpush1.bf16.msra.mxu0 %v2729_v60  ;;  %1872 = vmatprep.subr.bf16.mxu1 %v2734_v62 }
 0x1bd   :  { %1923 = vmatprep.subr.bf16.mxu0 %v2737_v63 }
 0x1bf   :  { %1873 = vmatpush1.bf16.msra.mxu1 %v2732_v0 }
 0x1c0   :  { %1924 = vmatpush1.bf16.msra.mxu0 %v2735_v1  ;;  %1874 = vmatprep.subr.bf16.mxu1 %v2740_v2 }
 0x1c1   :  { %2415 = vmatprep.subr.bf16.mxu0 %v2741_v3 }
 0x1c3   :  { %1875 = vmatpush2.bf16.msra.mxu1 %v2738_v4  ;;  %1942 = vmatmul.mubr.bf16.vlgmr.msra.gmra.mxu0 %v3116_v26 }
 0x1c4   :  { %2416 = vmatpush3.bf16.msra.mxu0 %v2742_v5  ;;  %1876 = vmatprep.subr.bf16.mxu1 %v2745_v6 }
 0x1c5   :  { %2417 = vmatprep.subr.bf16.mxu0 %v2746_v7  ;;  %1951 = vmatprep.mubr.bf16.mxu0 %v2792_v29  ;;  %v2755_v29 = vld [vmem:[%s3728_s3 + $0x37c] ss:$36 sps:$4 sm:$0xff]  }
 0x1c7   :  { %1877 = vmatpush2.bf16.msra.mxu1 %v2743_v8 }
 0x1c8   :  { %2418 = vmatpush3.bf16.msra.mxu0 %v2747_v9  ;;  %1878 = vmatprep.subr.bf16.mxu1 %v2750_v10 }
 0x1c9   :  { %2419 = vmatprep.subr.bf16.mxu0 %v2751_v11 }
 0x1cb   :  { %1879 = vmatpush2.bf16.msra.mxu1 %v2748_v12  ;;  %1952 = vmatmul.mubr.bf16.gmra.mxu0 %v3151_v40 }
 0x1cc   :  { %2420 = vmatpush3.bf16.msra.mxu0 %v2752_v13  ;;  %1992 = vmatprep.mubr.bf16.mxu0 %v3114_v47  ;;  %v2762_v47 = vld [vmem:[%s3728_s3 + $0xf8] ss:$36 sps:$4 sm:$0xff]  }
 0x1cd   :  { %1880 = vmatprep.subr.bf16.mxu1 %v2755_v29  ;;  %2421 = vmatprep.subr.bf16.mxu0 %v2756_v14 }
 0x1cf   :  { %1881 = vmatpush2.bf16.msra.mxu1 %v2753_v42 }
 0x1d0   :  { %2422 = vmatpush3.bf16.msra.mxu0 %v2757_v15  ;;  %1882 = vmatprep.subr.bf16.mxu1 %v2760_v44 }
 0x1d1   :  { %2423 = vmatprep.subr.bf16.mxu0 %v2761_v41 }
 0x1d3   :  { %1883 = vmatpush2.bf16.msra.mxu1 %v2758_v16 }
 0x1d4   :  { %2424 = vmatpush3.bf16.msra.mxu0 %v2762_v47  ;;  %1884 = vmatprep.subr.bf16.mxu1 %v2765_v17  ;;  %v417_v17 = vsub.s32 3, %v3079_v57 }
 0x1d5   :  { %2425 = vmatprep.subr.bf16.mxu0 %v2766_v18  ;;  %v414_v18 = vrot.slane %v3660_v31, %v3085_v59 }
 0x1d7   :  { %1885 = vmatpush2.bf16.msra.mxu1 %v2763_v19  ;;  %v418_v19 = vrot.slane %v3660_v31, %v417_v17 }
 0x1d8   :  { %2426 = vmatpush3.bf16.msra.mxu0 %v2767_v20  ;;  %1886 = vmatprep.subr.bf16.mxu1 %v2770_v21 }
 0x1d9   :  { %2427 = vmatprep.subr.bf16.mxu0 %v2771_v22 }
 0x1db   :  { %1887 = vmatpush2.bf16.msra.mxu1 %v2768_v23 }
 0x1dc   :  { %2428 = vmatpush3.bf16.msra.mxu0 %v2772_v24  ;;  %1888 = vmatprep.subr.bf16.mxu1 %v2775_v53 }
 0x1dd   :  { %2429 = vmatprep.subr.bf16.mxu0 %v2776_v25 }
 0x1df   :  { %1889 = vmatpush2.bf16.msra.mxu1 %v2773_v52 }
 0x1e0   :  { %2430 = vmatpush3.bf16.msra.mxu0 %v2777_v54  ;;  %2453 = vmatprep.subr.bf16.mxu1 %v2778_v48 }
 0x1e2   :  { %1891 = vmatmul.mubr.bf16.vlgmr.msra.gmra.mxu1 %v3121_v27 }
 0x1e3   :  { %1900 = vmatprep.mubr.bf16.mxu1 %v3131_v32  ;;  %1993 = vmatmul.mubr.bf16.vlgmr.msra.gmra.mxu0 %v3121_v27  ;;  %v2782_v27 = vld [vmem:[%s3728_s3 + $0x578] ss:$36 sps:$4 sm:$0xff]  }
 0x1e4   :  { %2454 = vmatpush3.bf16.msra.mxu1 %v2778_v48  ;;  %2000 = vmatprep.mubr.bf16.mxu0 %v3131_v32  ;;  %v2783_v32 = vld [vmem:[%s3728_s3 + $0x530] ss:$36 sps:$4 sm:$0xff]  }
 0x1e5   :  { %2455 = vmatprep.subr.bf16.mxu1 %v2779_v46 }
 0x1e8   :  { %2456 = vmatpush3.bf16.msra.mxu1 %v2779_v46 }
 0x1e9   :  { %2457 = vmatprep.subr.bf16.mxu1 %v2780_v28 }
 0x1ea   :  { %1901 = vmatmul.mubr.bf16.gmra.mxu1 %v3156_v45 }
 0x1eb   :  { %2001 = vmatmul.mubr.bf16.gmra.mxu0 %v3156_v45  ;;  %2469 = vmatprep.mubr.bf16.mxu1 %v3116_v26  ;;  %v2784_v45 = vld [vmem:[%s3728_s3 + $0x4e8] ss:$36 sps:$4 sm:$0xff]   ;;  %v2785_v26 = vld [vmem:[%s3728_s3 + $0x4a0] ss:$36 sps:$4 sm:$0xff]  }
 0x1ec   :  { %2458 = vmatpush3.bf16.msra.mxu1 %v2780_v28 }
 0x1ed   :  { %2459 = vmatprep.subr.bf16.mxu1 %v2781_v30 }
 0x1f0   :  { %2460 = vmatpush3.bf16.msra.mxu1 %v2781_v30 }
 0x1f1   :  { %2461 = vmatprep.subr.bf16.mxu1 %v2782_v27 }
 0x1f4   :  { %2462 = vmatpush3.bf16.msra.mxu1 %v2782_v27 }
 0x1f5   :  { %2463 = vmatprep.subr.bf16.mxu1 %v2783_v32 }
 0x1f8   :  { %2464 = vmatpush3.bf16.msra.mxu1 %v2783_v32 }
 0x1f9   :  { %2465 = vmatprep.subr.bf16.mxu1 %v2784_v45 }
 0x1fc   :  { %2466 = vmatpush3.bf16.msra.mxu1 %v2784_v45 }
 0x1fd   :  { %2467 = vmatprep.subr.bf16.mxu1 %v2785_v26 }
 0x200   :  { %2468 = vmatpush3.bf16.msra.mxu1 %v2785_v26 }
 0x202   :  { %v1637_v34 = vpop.f32.mrf.mxu1 }
 0x203   :  { %2470 = vmatmul.mubr.bf16.vlgmr.msra.gmra.mxu1 %v3151_v40  ;;  %v1586_v36 = vpop.f32.mrf.mxu0 }
 0x204   :  { %v1587_v37 = vadd.f32 %v1586_v36, %v406_v33  ;;  %v1639_v38 = vpop.f32.mrf.mxu1 }
 0x205   :  { %v1588_v39 = vpop.f32.mrf.mxu0 }
 0x206   :  { %v1589_v43 = vadd.f32 %v1588_v39, %v410_v35  ;;  %v1641_v49 = vpop.f32.mrf.mxu1  ;;  %v1638_v51 = vadd.f32 %v1637_v34, %v1587_v37  ;;  %v425_v39 = vsub.s32 5, %v3079_v57 }
 0x207   :  { %v1590_v50 = vpop.f32.mrf.mxu0 }
 0x208   :  { %v1640_v55 = vadd.f32 %v1639_v38, %v1589_v43  ;;  %v1591_v56 = vadd.f32 %v1590_v50, %v406_v33  ;;  %v1643_v60 = vpop.f32.mrf.mxu1  ;;  %v421_v38 = vsub.s32 4, %v3079_v57  ;;  %v426_v50 = vrot.slane %v3660_v31, %v425_v39 }
 0x209   :  { %v1592_v62 = vpop.f32.mrf.mxu0 }
 0x20a   :  { %v2400_v63 = vpack.c.bf16 %v1640_v55, %v1638_v51  ;;  %v1593_v61 = vadd.f32 %v1592_v62, %v410_v35  ;;  %v1647_v0 = vpop.f32.mrf.mxu1  ;;  %v1642_v58 = vadd.f32 %v1641_v49, %v1591_v56  ;;  %v422_v43 = vrot.slane %v3660_v31, %v421_v38 }
 0x20b   :  { %v1596_v1 = vpop.f32.mrf.mxu0 }
 0x20c   :  { %2149 = vst [vmem:[%s3732_s5] sm:$0xff] %v2400_v63  ;;  %v1644_v40 = vadd.f32 %v1643_v60, %v1593_v61  ;;  %v1597_v2 = vadd.f32 %v1596_v1, %v406_v33  ;;  %v1649_v3 = vpop.f32.mrf.mxu1 }
 0x20d   :  { %v1598_v4 = vpop.f32.mrf.mxu0 }
 0x20e   :  { %v2405_v5 = vpack.c.bf16 %v1644_v40, %v1642_v58  ;;  %v1599_v6 = vadd.f32 %v1598_v4, %v410_v35  ;;  %v1651_v7 = vpop.f32.mrf.mxu1  ;;  %v1648_v9 = vadd.f32 %v1647_v0, %v1597_v2 }
 0x20f   :  { %v1600_v8 = vpop.f32.mrf.mxu0 }
 0x210   :  { %2154 = vst [vmem:[%s3732_s5 + $0x24] sm:$0xff] %v2405_v5  ;;  %v1650_v10 = vadd.f32 %v1649_v3, %v1599_v6  ;;  %v1652_v11 = vpop.f32.mrf.mxu1 }
 0x211   :  { %v1601_v12 = vpop.f32.mrf.mxu0 }
 0x212   :  { %v2410_v13 = vpack.c.bf16 %v1650_v10, %v1648_v9 }
 0x214   :  { %2159 = vst [vmem:[%s3732_s5 + $0x48] sm:$0x33] %v2410_v13 }
 0x223   :  { %v1739_v29 = vpop.f32.mrf.mxu0 }
 0x225   :  { %v1741_v14 = vpop.f32.mrf.mxu0 }
 0x227   :  { %v1743_v42 = vpop.f32.mrf.mxu0 }
 0x229   :  { %v1745_v15 = vpop.f32.mrf.mxu0 }
 0x22b   :  { %v1749_v44 = vpop.f32.mrf.mxu0 }
 0x22d   :  { %v1751_v41 = vpop.f32.mrf.mxu0 }
 0x22f   :  { %v1753_v16 = vpop.f32.mrf.mxu0 }
 0x231   :  { %v1754_v47 = vpop.f32.mrf.mxu0 }
 0x242   :  { %v1688_v20 = vpop.f32.mrf.mxu1 }
 0x243   :  { %v1689_v21 = vadd.f32 %v1688_v20, %v414_v18 }
 0x244   :  { %v1690_v22 = vpop.f32.mrf.mxu1 }
 0x245   :  { %v1691_v23 = vadd.f32 %v1690_v22, %v418_v19  ;;  %v1740_v53 = vadd.f32 %v1739_v29, %v1689_v21 }
 0x246   :  { %v1692_v24 = vpop.f32.mrf.mxu1 }
 0x247   :  { %v1742_v25 = vadd.f32 %v1741_v14, %v1691_v23  ;;  %v1693_v52 = vadd.f32 %v1692_v24, %v414_v18  ;;  %v429_v24 = vsub.s32 6, %v3079_v57 }
 0x248   :  { %v1694_v54 = vpop.f32.mrf.mxu1 }
 0x249   :  { %v2401_v48 = vpack.c.bf16 %v1742_v25, %v1740_v53  ;;  %v1695_v46 = vadd.f32 %v1694_v54, %v418_v19  ;;  %v1744_v30 = vadd.f32 %v1743_v42, %v1693_v52  ;;  %v433_v53 = vsub.s32 7, %v3079_v57 }
 0x24a   :  { %v1698_v28 = vpop.f32.mrf.mxu1  ;;  %v430_v25 = vrot.slane %v3660_v31, %v429_v24 }
 0x24b   :  { %2150 = vst [vmem:[%s3732_s5 + $0x8] sm:$0xff] %v2401_v48  ;;  %v1746_v59 = vadd.f32 %v1745_v15, %v1695_v46  ;;  %v1699_v27 = vadd.f32 %v1698_v28, %v414_v18  ;;  %v434_v52 = vrot.slane %v3660_v31, %v433_v53 }
 0x24c   :  { %v1700_v32 = vpop.f32.mrf.mxu1 }
 0x24d   :  { %v2406_v45 = vpack.c.bf16 %v1746_v59, %v1744_v30  ;;  %v1701_v26 = vadd.f32 %v1700_v32, %v418_v19  ;;  %v1750_v34 = vadd.f32 %v1749_v44, %v1699_v27 }
 0x24e   :  { %v1702_v33 = vpop.f32.mrf.mxu1 }
 0x24f   :  { %2155 = vst [vmem:[%s3732_s5 + $0x2c] sm:$0xff] %v2406_v45  ;;  %v1752_v35 = vadd.f32 %v1751_v41, %v1701_v26 }
 0x250   :  { %v1703_v36 = vpop.f32.mrf.mxu1 }
 0x251   :  { %v2411_v37 = vpack.c.bf16 %v1752_v35, %v1750_v34 }
 0x253   :  { %2160 = vst [vmem:[%s3732_s5 + $0x50] sm:$0x33] %v2411_v37 }
 0x262   :  { %v1841_v49 = vpop.f32.mrf.mxu1 }
 0x263   :  { %v1790_v51 = vpop.f32.mrf.mxu0 }
 0x264   :  { %v1791_v55 = vadd.f32 %v1790_v51, %v422_v43  ;;  %v1843_v56 = vpop.f32.mrf.mxu1 }
 0x265   :  { %v1792_v60 = vpop.f32.mrf.mxu0 }
 0x266   :  { %v1793_v62 = vadd.f32 %v1792_v60, %v426_v50  ;;  %v1845_v63 = vpop.f32.mrf.mxu1  ;;  %v1842_v0 = vadd.f32 %v1841_v49, %v1791_v55 }
 0x267   :  { %v1794_v61 = vpop.f32.mrf.mxu0 }
 0x268   :  { %v1844_v1 = vadd.f32 %v1843_v56, %v1793_v62  ;;  %v1795_v58 = vadd.f32 %v1794_v61, %v422_v43  ;;  %v1847_v40 = vpop.f32.mrf.mxu1 }
 0x269   :  { %v1796_v2 = vpop.f32.mrf.mxu0 }
 0x26a   :  { %v2402_v3 = vpack.c.bf16 %v1844_v1, %v1842_v0  ;;  %v1797_v4 = vadd.f32 %v1796_v2, %v426_v50  ;;  %v1851_v5 = vpop.f32.mrf.mxu1  ;;  %v1846_v7 = vadd.f32 %v1845_v63, %v1795_v58  ;;  %v2168_v2 = vld [vmem:[%s3731_s4 + $0x8] ss:$0 sm:$0xff] }
 0x26b   :  { %v1800_v6 = vpop.f32.mrf.mxu0 }
 0x26c   :  { %2151 = vst [vmem:[%s3732_s5 + $0x10] sm:$0xff] %v2402_v3  ;;  %v1848_v8 = vadd.f32 %v1847_v40, %v1797_v4  ;;  %v1801_v9 = vadd.f32 %v1800_v6, %v422_v43  ;;  %v1853_v10 = vpop.f32.mrf.mxu1 }
 0x26d   :  { %v1802_v11 = vpop.f32.mrf.mxu0 }
 0x26e   :  { %v2407_v12 = vpack.c.bf16 %v1848_v8, %v1846_v7  ;;  %v1803_v13 = vadd.f32 %v1802_v11, %v426_v50  ;;  %v1855_v29 = vpop.f32.mrf.mxu1  ;;  %v1852_v42 = vadd.f32 %v1851_v5, %v1801_v9 }
 0x26f   :  { %v1804_v14 = vpop.f32.mrf.mxu0 }
 0x270   :  { %2156 = vst [vmem:[%s3732_s5 + $0x34] sm:$0xff] %v2407_v12  ;;  %v1854_v15 = vadd.f32 %v1853_v10, %v1803_v13  ;;  %v1856_v44 = vpop.f32.mrf.mxu1 }
 0x271   :  { %v1805_v41 = vpop.f32.mrf.mxu0 }
 0x272   :  { %v2412_v16 = vpack.c.bf16 %v1854_v15, %v1852_v42 }
 0x274   :  { %2161 = vst [vmem:[%s3732_s5 + $0x58] sm:$0x33] %v2412_v16 }
 0x283   :  { %v1943_v47 = vpop.f32.mrf.mxu0 }
 0x285   :  { %v1945_v17 = vpop.f32.mrf.mxu0 }
 0x287   :  { %v1947_v18 = vpop.f32.mrf.mxu0 }
 0x289   :  { %v1949_v19 = vpop.f32.mrf.mxu0 }
 0x28b   :  { %v1953_v20 = vpop.f32.mrf.mxu0 }
 0x28d   :  { %v1955_v21 = vpop.f32.mrf.mxu0 }
 0x28f   :  { %v1957_v22 = vpop.f32.mrf.mxu0 }
 0x291   :  { %v1958_v23 = vpop.f32.mrf.mxu0 }
 0x2a2   :  { %v1892_v54 = vpop.f32.mrf.mxu1 }
 0x2a3   :  { %v1893_v48 = vadd.f32 %v1892_v54, %v430_v25  ;;  %v2431_v46 = vpop.f32.mrf.mxu0 }
 0x2a4   :  { %v1894_v28 = vpop.f32.mrf.mxu1 }
 0x2a5   :  { %v1895_v30 = vadd.f32 %v1894_v28, %v434_v52  ;;  %v2432_v59 = vpop.f32.mrf.mxu0  ;;  %v1944_v32 = vadd.f32 %v1943_v47, %v1893_v48 }
 0x2a6   :  { %v1896_v27 = vpop.f32.mrf.mxu1  ;;  %v2433_v40 = vadd.f32 %v2432_v59, %v2431_v46 }
 0x2a7   :  { %v1946_v45 = vadd.f32 %v1945_v17, %v1895_v30  ;;  %v1897_v26 = vadd.f32 %v1896_v27, %v430_v25  ;;  %v2434_v33 = vpop.f32.mrf.mxu0 }
 0x2a8   :  { %v1898_v34 = vpop.f32.mrf.mxu1  ;;  %v1995_v7 = vadd.f32 %v2433_v40, %v2168_v2 }
 0x2a9   :  { %v2403_v35 = vpack.c.bf16 %v1946_v45, %v1944_v32  ;;  %v1899_v36 = vadd.f32 %v1898_v34, %v434_v52  ;;  %v2435_v37 = vpop.f32.mrf.mxu0  ;;  %v1948_v31 = vadd.f32 %v1947_v18, %v1897_v26 }
 0x2aa   :  { %v1902_v57 = vpop.f32.mrf.mxu1  ;;  %v2436_v5 = vadd.f32 %v2435_v37, %v2434_v33 }
 0x2ab   :  { %2152 = vst [vmem:[%s3732_s5 + $0x18] sm:$0xff] %v2403_v35  ;;  %v1950_v38 = vadd.f32 %v1949_v19, %v1899_v36  ;;  %v1903_v39 = vadd.f32 %v1902_v57, %v430_v25  ;;  %v2437_v43 = vpop.f32.mrf.mxu0 }
 0x2ac   :  { %v1904_v49 = vpop.f32.mrf.mxu1  ;;  %v1998_v13 = vadd.f32 %v2436_v5, %v2168_v2 }
 0x2ad   :  { %v2408_v50 = vpack.c.bf16 %v1950_v38, %v1948_v31  ;;  %v1905_v51 = vadd.f32 %v1904_v49, %v434_v52  ;;  %v2438_v55 = vpop.f32.mrf.mxu0  ;;  %v1954_v60 = vadd.f32 %v1953_v20, %v1903_v39 }
 0x2ae   :  { %v1906_v56 = vpop.f32.mrf.mxu1  ;;  %v2439_v58 = vadd.f32 %v2438_v55, %v2437_v43 }
 0x2af   :  { %2157 = vst [vmem:[%s3732_s5 + $0x3c] sm:$0xff] %v2408_v50  ;;  %v1956_v62 = vadd.f32 %v1955_v21, %v1905_v51  ;;  %v2440_v63 = vpop.f32.mrf.mxu0 }
 0x2b0   :  { %v1907_v61 = vpop.f32.mrf.mxu1  ;;  %v2003_v3 = vadd.f32 %v2439_v58, %v2168_v2 }
 0x2b1   :  { %v2413_v0 = vpack.c.bf16 %v1956_v62, %v1954_v60  ;;  %v2441_v1 = vpop.f32.mrf.mxu0 }
 0x2b3   :  { %2162 = vst [vmem:[%s3732_s5 + $0x60] sm:$0x33] %v2413_v0 }
 0x2c3   :  { %v2471_v4 = vpop.f32.mrf.mxu1 }
 0x2c4   :  { %v2051_v6 = vadd.f32 %v2471_v4, %v2003_v3 }
 0x2c5   :  { %v2042_v8 = vpop.f32.mrf.mxu1 }
 0x2c6   :  { %v2414_v9 = vpack.c.bf16 %v2051_v6, %v2051_v6  ;;  %v2043_v10 = vadd.f32 %v2042_v8, %v1995_v7 }
 0x2c7   :  { %v2472_v11 = vpop.f32.mrf.mxu1 }
 0x2c8   :  { %2163 = vst [vmem:[%s3732_s5 + $0x68] sm:$0x3] %v2414_v9  ;;  %v2404_v12 = vpack.c.bf16 %v2043_v10, %v2043_v10 }
 0x2c9   :  { %v2045_v29 = vpop.f32.mrf.mxu1 }
 0x2ca   :  { %2153 = vst [vmem:[%s3732_s5 + $0x20] sm:$0xf] %v2404_v12  ;;  %v2046_v14 = vadd.f32 %v2045_v29, %v1998_v13 }
 0x2cc   :  { %v2409_v42 = vpack.c.bf16 %v2046_v14, %v2046_v14 }
 0x2ce   :  { %2158 = vst [vmem:[%s3732_s5 + $0x44] sm:$0xf] %v2409_v42 }

// kernel: model_forward.66
= control target key start
LH: loop header
LB: loop body
LE: loop exit
PB: predicated region body
PF: predicated region fallthrough
CT: control target
= control target key end

     0   :  { %s4722_s1 = inlined_call_operand.vmem [shape: bf16[1536,384], index: 1, kind: input, shape index: {}]   ;;  %s4723_s0 = inlined_call_operand.vmem [shape: bf16[20,1536], index: 0, kind: input, shape index: {}]   ;;  %s4724_s2 = inlined_call_operand.vmem [shape: f32[1,384], index: 2, kind: input, shape index: {}]   ;;  %s4725_s3 = inlined_call_operand.vmem [shape: f32[20,384], index: 3, kind: input, shape index: {}]   ;;  %s4726_s4 = inlined_call_operand.vmem [shape: f32[20,384], index: 4, kind: output, shape index: {}]  }
   0x1   :  { %v3180_v0 = vld [vmem:[%s4722_s1 + $0xac] ss:$12 sps:$4 sm:$0xff]   ;;  %v3184_v2 = vld [vmem:[%s4722_s1 + $0xa8] ss:$12 sps:$4 sm:$0xff]   ;;  %v3190_v6 = vld [vmem:[%s4722_s1 + $0x90] ss:$12 sps:$4 sm:$0xff]  }
   0x2   :  { %v3182_v1 = vld [vmem:[%s4722_s1 + $0x22c] ss:$12 sps:$4 sm:$0xff]   ;;  %2075 = vmatprep.subr.bf16.mxu0 %v3180_v0  ;;  %v3185_v3 = vld [vmem:[%s4722_s1 + $0x228] ss:$12 sps:$4 sm:$0xff]   ;;  %v3191_v7 = vld [vmem:[%s4722_s1 + $0x210] ss:$12 sps:$4 sm:$0xff]  }
   0x3   :  { %2126 = vmatprep.subr.bf16.mxu1 %v3182_v1  ;;  %v3186_v4 = vld [vmem:[%s4722_s1 + $0x94] ss:$12 sps:$4 sm:$0xff]   ;;  %2076 = vmatpush1.bf16.msra.mxu0 %v3184_v2  ;;  %v3192_v8 = vld [vmem:[%s4722_s1 + $0x7c] ss:$12 sps:$4 sm:$0xff]   ;;  %v3196_v10 = vld [vmem:[%s4722_s1 + $0x78] ss:$12 sps:$4 sm:$0xff]  }
   0x4   :  { %2127 = vmatpush1.bf16.msra.mxu1 %v3185_v3  ;;  %v3188_v5 = vld [vmem:[%s4722_s1 + $0x214] ss:$12 sps:$4 sm:$0xff]   ;;  %2077 = vmatprep.subr.bf16.mxu0 %v3186_v4  ;;  %v3194_v9 = vld [vmem:[%s4722_s1 + $0x1fc] ss:$12 sps:$4 sm:$0xff]   ;;  %v3197_v11 = vld [vmem:[%s4722_s1 + $0x1f8] ss:$12 sps:$4 sm:$0xff]  }
   0x5   :  { %2128 = vmatprep.subr.bf16.mxu1 %v3188_v5  ;;  %v3198_v12 = vld [vmem:[%s4722_s1 + $0x64] ss:$12 sps:$4 sm:$0xff]   ;;  %v3202_v14 = vld [vmem:[%s4722_s1 + $0x60] ss:$12 sps:$4 sm:$0xff]   ;;  %v3208_v18 = vld [vmem:[%s4722_s1 + $0x48] ss:$12 sps:$4 sm:$0xff]  }
   0x6   :  { %v3200_v13 = vld [vmem:[%s4722_s1 + $0x1e4] ss:$12 sps:$4 sm:$0xff]   ;;  %v3203_v15 = vld [vmem:[%s4722_s1 + $0x1e0] ss:$12 sps:$4 sm:$0xff]   ;;  %v3209_v19 = vld [vmem:[%s4722_s1 + $0x1c8] ss:$12 sps:$4 sm:$0xff]  }
   0x7   :  { %2078 = vmatpush1.bf16.msra.mxu0 %v3190_v6  ;;  %v3204_v16 = vld [vmem:[%s4722_s1 + $0x4c] ss:$12 sps:$4 sm:$0xff]   ;;  %v3210_v20 = vld [vmem:[%s4722_s1 + $0x34] ss:$12 sps:$4 sm:$0xff]   ;;  %v3214_v22 = vld [vmem:[%s4722_s1 + $0x30] ss:$12 sps:$4 sm:$0xff]  }
   0x8   :  { %2129 = vmatpush1.bf16.msra.mxu1 %v3191_v7  ;;  %2079 = vmatprep.subr.bf16.mxu0 %v3192_v8  ;;  %v3206_v17 = vld [vmem:[%s4722_s1 + $0x1cc] ss:$12 sps:$4 sm:$0xff]   ;;  %v3212_v21 = vld [vmem:[%s4722_s1 + $0x1b4] ss:$12 sps:$4 sm:$0xff]   ;;  %v3215_v23 = vld [vmem:[%s4722_s1 + $0x1b0] ss:$12 sps:$4 sm:$0xff]  }
   0x9   :  { %2130 = vmatprep.subr.bf16.mxu1 %v3194_v9  ;;  %v3216_v24 = vld [vmem:[%s4722_s1 + $0x1c] ss:$12 sps:$4 sm:$0xff]   ;;  %v3220_v26 = vld [vmem:[%s4722_s1 + $0x18] ss:$12 sps:$4 sm:$0xff]   ;;  %v3226_v30 = vld [vmem:[%s4722_s1] ss:$12 sps:$4 sm:$0xff]  }
   0xa   :  { %v3218_v25 = vld [vmem:[%s4722_s1 + $0x19c] ss:$12 sps:$4 sm:$0xff]   ;;  %v3221_v27 = vld [vmem:[%s4722_s1 + $0x198] ss:$12 sps:$4 sm:$0xff]   ;;  %v3227_v31 = vld [vmem:[%s4722_s1 + $0x180] ss:$12 sps:$4 sm:$0xff]  }
   0xb   :  { %2080 = vmatpush1.bf16.msra.mxu0 %v3196_v10  ;;  %v3222_v28 = vld [vmem:[%s4722_s1 + $0x4] ss:$12 sps:$4 sm:$0xff]   ;;  %v3228_v32 = vld [vmem:[%s4722_s1 + $0x16c] ss:$12 sps:$4 sm:$0xff]   ;;  %v3232_v34 = vld [vmem:[%s4722_s1 + $0x168] ss:$12 sps:$4 sm:$0xff]  }
   0xc   :  { %2131 = vmatpush1.bf16.msra.mxu1 %v3197_v11  ;;  %2081 = vmatprep.subr.bf16.mxu0 %v3198_v12  ;;  %v3224_v29 = vld [vmem:[%s4722_s1 + $0x184] ss:$12 sps:$4 sm:$0xff]   ;;  %v3230_v33 = vld [vmem:[%s4722_s1 + $0x2ec] ss:$12 sps:$4 sm:$0xff]   ;;  %v3233_v35 = vld [vmem:[%s4722_s1 + $0x2e8] ss:$12 sps:$4 sm:$0xff]  }
   0xd   :  { %2132 = vmatprep.subr.bf16.mxu1 %v3200_v13  ;;  %v3234_v36 = vld [vmem:[%s4722_s1 + $0x154] ss:$12 sps:$4 sm:$0xff]   ;;  %v3238_v38 = vld [vmem:[%s4722_s1 + $0x150] ss:$12 sps:$4 sm:$0xff]   ;;  %v3244_v42 = vld [vmem:[%s4722_s1 + $0x138] ss:$12 sps:$4 sm:$0xff]  }
   0xe   :  { %v3236_v37 = vld [vmem:[%s4722_s1 + $0x2d4] ss:$12 sps:$4 sm:$0xff]   ;;  %v3239_v39 = vld [vmem:[%s4722_s1 + $0x2d0] ss:$12 sps:$4 sm:$0xff]   ;;  %v3245_v43 = vld [vmem:[%s4722_s1 + $0x2b8] ss:$12 sps:$4 sm:$0xff]  }
   0xf   :  { %2082 = vmatpush1.bf16.msra.mxu0 %v3202_v14  ;;  %v3240_v40 = vld [vmem:[%s4722_s1 + $0x13c] ss:$12 sps:$4 sm:$0xff]   ;;  %v3246_v44 = vld [vmem:[%s4722_s1 + $0x124] ss:$12 sps:$4 sm:$0xff]   ;;  %v3250_v46 = vld [vmem:[%s4722_s1 + $0x120] ss:$12 sps:$4 sm:$0xff]  }
  0x10   :  { %2133 = vmatpush1.bf16.msra.mxu1 %v3203_v15  ;;  %2083 = vmatprep.subr.bf16.mxu0 %v3204_v16  ;;  %v3242_v41 = vld [vmem:[%s4722_s1 + $0x2bc] ss:$12 sps:$4 sm:$0xff]   ;;  %v3248_v45 = vld [vmem:[%s4722_s1 + $0x2a4] ss:$12 sps:$4 sm:$0xff]   ;;  %v3251_v47 = vld [vmem:[%s4722_s1 + $0x2a0] ss:$12 sps:$4 sm:$0xff]  }
  0x11   :  { %2134 = vmatprep.subr.bf16.mxu1 %v3206_v17  ;;  %v3252_v48 = vld [vmem:[%s4722_s1 + $0x10c] ss:$12 sps:$4 sm:$0xff]   ;;  %v3278_v49 = vld [vmem:[%s4723_s0 + $0x4] ss:$48 sps:$4 sm:$0xff]   ;;  %v3262_v56 = vld [vmem:[%s4722_s1 + $0xf0] ss:$12 sps:$4 sm:$0xff]  }
  0x12   :  { %v3254_v50 = vld [vmem:[%s4722_s1 + $0x28c] ss:$12 sps:$4 sm:$0xff]   ;;  %2107 = vmatprep.mubr.bf16.mxu0 %v3278_v49  ;;  %v3256_v52 = vld [vmem:[%s4722_s1 + $0x108] ss:$12 sps:$4 sm:$0xff]   ;;  %v3263_v57 = vld [vmem:[%s4722_s1 + $0x270] ss:$12 sps:$4 sm:$0xff]  }
  0x13   :  { %2084 = vmatpush1.bf16.msra.mxu0 %v3208_v18  ;;  %v3281_v51 = vld [vmem:[%s4723_s0 + $0xc] ss:$48 sps:$4 sm:$0xff]   ;;  %v3257_v53 = vld [vmem:[%s4722_s1 + $0x288] ss:$12 sps:$4 sm:$0xff]   ;;  %v3268_v60 = vld [vmem:[%s4722_s1 + $0xd8] ss:$12 sps:$4 sm:$0xff]  }
  0x14   :  { %2135 = vmatpush1.bf16.msra.mxu1 %v3209_v19  ;;  %2085 = vmatprep.subr.bf16.mxu0 %v3210_v20  ;;  %v3258_v54 = vld [vmem:[%s4722_s1 + $0xf4] ss:$12 sps:$4 sm:$0xff]   ;;  %v3264_v58 = vld [vmem:[%s4722_s1 + $0xdc] ss:$12 sps:$4 sm:$0xff]   ;;  %v3269_v61 = vld [vmem:[%s4722_s1 + $0x258] ss:$12 sps:$4 sm:$0xff]  }
  0x15   :  { %2136 = vmatprep.subr.bf16.mxu1 %v3212_v21  ;;  %2158 = vmatprep.mubr.bf16.mxu1 %v3281_v51  ;;  %v3260_v55 = vld [vmem:[%s4722_s1 + $0x274] ss:$12 sps:$4 sm:$0xff]   ;;  %v3266_v59 = vld [vmem:[%s4722_s1 + $0x25c] ss:$12 sps:$4 sm:$0xff]   ;;  %v3270_v62 = vld [vmem:[%s4722_s1 + $0xc4] ss:$12 sps:$4 sm:$0xff]  }
  0x16   :  { %v3272_v63 = vld [vmem:[%s4722_s1 + $0x244] ss:$12 sps:$4 sm:$0xff]   ;;  %v3274_v0 = vld [vmem:[%s4722_s1 + $0xc0] ss:$12 sps:$4 sm:$0xff]   ;;  %v3279_v5 = vld [vmem:[%s4723_s0 + $0x8] ss:$48 sps:$4 sm:$0xff]  }
  0x17   :  { %2086 = vmatpush1.bf16.msra.mxu0 %v3214_v22  ;;  %v3275_v1 = vld [vmem:[%s4722_s1 + $0x240] ss:$12 sps:$4 sm:$0xff]   ;;  %v3282_v6 = vld [vmem:[%s4722_s1 + $0x3a8] ss:$12 sps:$4 sm:$0xff]   ;;  %v3288_v10 = vld [vmem:[%s4722_s1 + $0x390] ss:$12 sps:$4 sm:$0xff]  }
  0x18   :  { %2137 = vmatpush1.bf16.msra.mxu1 %v3215_v23  ;;  %2087 = vmatprep.subr.bf16.mxu0 %v3216_v24  ;;  %v3284_v2 = vld [vmem:[%s4722_s1 + $0x3ac] ss:$12 sps:$4 sm:$0xff]   ;;  %v3276_v4 = vld [vmem:[%s4723_s0] ss:$48 sps:$4 sm:$0xff]   ;;  %v3285_v7 = vld [vmem:[%s4722_s1 + $0x528] ss:$12 sps:$4 sm:$0xff]  }
  0x19   :  { %2138 = vmatprep.subr.bf16.mxu1 %v3218_v25  ;;  %v3287_v3 = vld [vmem:[%s4722_s1 + $0x52c] ss:$12 sps:$4 sm:$0xff]   ;;  %v3290_v8 = vld [vmem:[%s4722_s1 + $0x394] ss:$12 sps:$4 sm:$0xff]   ;;  %v3291_v11 = vld [vmem:[%s4722_s1 + $0x510] ss:$12 sps:$4 sm:$0xff]  }
  0x1a   :  { %v3293_v9 = vld [vmem:[%s4722_s1 + $0x514] ss:$12 sps:$4 sm:$0xff]   ;;  %v3296_v12 = vld [vmem:[%s4722_s1 + $0x37c] ss:$12 sps:$4 sm:$0xff]   ;;  %v3294_v14 = vld [vmem:[%s4722_s1 + $0x378] ss:$12 sps:$4 sm:$0xff]  }
  0x1b   :  { %2088 = vmatpush1.bf16.msra.mxu0 %v3220_v26  ;;  %v3299_v13 = vld [vmem:[%s4722_s1 + $0x4fc] ss:$12 sps:$4 sm:$0xff]   ;;  %v3297_v15 = vld [vmem:[%s4722_s1 + $0x4f8] ss:$12 sps:$4 sm:$0xff]   ;;  %v3300_v18 = vld [vmem:[%s4722_s1 + $0x360] ss:$12 sps:$4 sm:$0xff]  }
  0x1c   :  { %2139 = vmatpush1.bf16.msra.mxu1 %v3221_v27  ;;  %2089 = vmatprep.subr.bf16.mxu0 %v3222_v28  ;;  %v3302_v16 = vld [vmem:[%s4722_s1 + $0x364] ss:$12 sps:$4 sm:$0xff]   ;;  %v3303_v19 = vld [vmem:[%s4722_s1 + $0x4e0] ss:$12 sps:$4 sm:$0xff]   ;;  %v3306_v22 = vld [vmem:[%s4722_s1 + $0x348] ss:$12 sps:$4 sm:$0xff]  }
  0x1d   :  { %2140 = vmatprep.subr.bf16.mxu1 %v3224_v29  ;;  %v3305_v17 = vld [vmem:[%s4722_s1 + $0x4e4] ss:$12 sps:$4 sm:$0xff]   ;;  %v3308_v20 = vld [vmem:[%s4722_s1 + $0x34c] ss:$12 sps:$4 sm:$0xff]   ;;  %v3309_v23 = vld [vmem:[%s4722_s1 + $0x4c8] ss:$12 sps:$4 sm:$0xff]  }
  0x1e   :  { %v3311_v21 = vld [vmem:[%s4722_s1 + $0x4cc] ss:$12 sps:$4 sm:$0xff]   ;;  %v30_v24 = vld [vmem:[%s4723_s0 + $0x60] sm:$0x33]  ;;  %v3339_v51 = vld [vmem:[%s4722_s1 + $0x5d0] ss:$12 sps:$4 sm:$0xff]  }
  0x1f   :  { %2090 = vmatpush1.bf16.msra.mxu0 %v3226_v30  ;;  %v31_v25 = vld [vmem:[%s4723_s0 + $0x68] sm:$0x33]  ;;  %v3314_v26 = vld [vmem:[%s4722_s1 + $0x334] ss:$12 sps:$4 sm:$0xff]   ;;  %v3905_v28 = vcombine.high %v30_v24, %v30_v24  ;;  %v3909_v30 = vcombine.low %v30_v24, %v30_v24  ;;  %v3394_v24 = vld [vmem:[%s4722_s1 + $0x690] ss:$12 sps:$4 sm:$0xff]  }
  0x20   :  { %2141 = vmatpush1.bf16.msra.mxu1 %v3227_v31  ;;  %2091 = vmatprep.subr.bf16.mxu0 %v3228_v32  ;;  %v3317_v27 = vld [vmem:[%s4722_s1 + $0x4b4] ss:$12 sps:$4 sm:$0xff]   ;;  %v3907_v29 = vcombine.high %v31_v25, %v31_v25  ;;  %v3911_v31 = vcombine.low %v31_v25, %v31_v25  ;;  %v3312_v32 = vld [vmem:[%s4722_s1 + $0x330] ss:$12 sps:$4 sm:$0xff]  }
  0x21   :  { %2142 = vmatprep.subr.bf16.mxu1 %v3230_v33  ;;  %v3315_v33 = vld [vmem:[%s4722_s1 + $0x4b0] ss:$12 sps:$4 sm:$0xff]   ;;  %v3341_v49 = vld [vmem:[%s4722_s1 + $0x5d4] ss:$12 sps:$4 sm:$0xff]  }
  0x22   :  { %v3397_v25 = vld [vmem:[%s4722_s1 + $0x810] ss:$12 sps:$4 sm:$0xff]  }
  0x23   :  { %2092 = vmatpush2.bf16.msra.mxu0 %v3232_v34  ;;  %v3320_v34 = vld [vmem:[%s4722_s1 + $0x31c] ss:$12 sps:$4 sm:$0xff]  }
  0x24   :  { %2143 = vmatpush2.bf16.msra.mxu1 %v3233_v35  ;;  %2093 = vmatprep.subr.bf16.mxu0 %v3234_v36  ;;  %v3323_v35 = vld [vmem:[%s4722_s1 + $0x49c] ss:$12 sps:$4 sm:$0xff]   ;;  %v3318_v36 = vld [vmem:[%s4722_s1 + $0x318] ss:$12 sps:$4 sm:$0xff]  }
  0x25   :  { %2144 = vmatprep.subr.bf16.mxu1 %v3236_v37  ;;  %v3321_v37 = vld [vmem:[%s4722_s1 + $0x498] ss:$12 sps:$4 sm:$0xff]  }
  0x27   :  { %2094 = vmatpush2.bf16.msra.mxu0 %v3238_v38  ;;  %v3326_v38 = vld [vmem:[%s4722_s1 + $0x304] ss:$12 sps:$4 sm:$0xff]  }
  0x28   :  { %2145 = vmatpush2.bf16.msra.mxu1 %v3239_v39  ;;  %2095 = vmatprep.subr.bf16.mxu0 %v3240_v40  ;;  %v3329_v39 = vld [vmem:[%s4722_s1 + $0x484] ss:$12 sps:$4 sm:$0xff]  }
  0x29   :  { %2146 = vmatprep.subr.bf16.mxu1 %v3242_v41  ;;  %v3384_v40 = vld [vmem:[%s4723_s0 + $0x14] ss:$48 sps:$4 sm:$0xff]   ;;  %v3387_v41 = vld [vmem:[%s4723_s0 + $0x1c] ss:$48 sps:$4 sm:$0xff]  }
  0x2b   :  { %2096 = vmatpush2.bf16.msra.mxu0 %v3244_v42  ;;  %v3324_v42 = vld [vmem:[%s4722_s1 + $0x300] ss:$12 sps:$4 sm:$0xff]  }
  0x2c   :  { %2147 = vmatpush2.bf16.msra.mxu1 %v3245_v43  ;;  %2097 = vmatprep.subr.bf16.mxu0 %v3246_v44  ;;  %v3327_v43 = vld [vmem:[%s4722_s1 + $0x480] ss:$12 sps:$4 sm:$0xff]  }
  0x2d   :  { %2148 = vmatprep.subr.bf16.mxu1 %v3248_v45  ;;  %v3332_v44 = vld [vmem:[%s4722_s1 + $0x46c] ss:$12 sps:$4 sm:$0xff]  }
  0x2e   :  { %v3335_v45 = vld [vmem:[%s4722_s1 + $0x5ec] ss:$12 sps:$4 sm:$0xff]  }
  0x2f   :  { %2098 = vmatpush2.bf16.msra.mxu0 %v3250_v46  ;;  %v3330_v46 = vld [vmem:[%s4722_s1 + $0x468] ss:$12 sps:$4 sm:$0xff]  }
  0x30   :  { %2149 = vmatpush2.bf16.msra.mxu1 %v3251_v47  ;;  %2099 = vmatprep.subr.bf16.mxu0 %v3252_v48  ;;  %v3333_v47 = vld [vmem:[%s4722_s1 + $0x5e8] ss:$12 sps:$4 sm:$0xff]  }
  0x31   :  { %2150 = vmatprep.subr.bf16.mxu1 %v3254_v50  ;;  %v3338_v48 = vld [vmem:[%s4722_s1 + $0x454] ss:$12 sps:$4 sm:$0xff]   ;;  %v3336_v50 = vld [vmem:[%s4722_s1 + $0x450] ss:$12 sps:$4 sm:$0xff]  }
  0x33   :  { %2100 = vmatpush2.bf16.msra.mxu0 %v3256_v52  ;;  %v3344_v52 = vld [vmem:[%s4722_s1 + $0x43c] ss:$12 sps:$4 sm:$0xff]  }
  0x34   :  { %2151 = vmatpush2.bf16.msra.mxu1 %v3257_v53  ;;  %2101 = vmatprep.subr.bf16.mxu0 %v3258_v54  ;;  %v3347_v53 = vld [vmem:[%s4722_s1 + $0x5bc] ss:$12 sps:$4 sm:$0xff]   ;;  %v3342_v54 = vld [vmem:[%s4722_s1 + $0x438] ss:$12 sps:$4 sm:$0xff]  }
  0x35   :  { %2152 = vmatprep.subr.bf16.mxu1 %v3260_v55  ;;  %v3345_v55 = vld [vmem:[%s4722_s1 + $0x5b8] ss:$12 sps:$4 sm:$0xff]  }
  0x37   :  { %2102 = vmatpush2.bf16.msra.mxu0 %v3262_v56  ;;  %v3350_v56 = vld [vmem:[%s4722_s1 + $0x424] ss:$12 sps:$4 sm:$0xff]  }
  0x38   :  { %2153 = vmatpush2.bf16.msra.mxu1 %v3263_v57  ;;  %2103 = vmatprep.subr.bf16.mxu0 %v3264_v58  ;;  %v3353_v57 = vld [vmem:[%s4722_s1 + $0x5a4] ss:$12 sps:$4 sm:$0xff]   ;;  %v3348_v58 = vld [vmem:[%s4722_s1 + $0x420] ss:$12 sps:$4 sm:$0xff]  }
  0x39   :  { %2154 = vmatprep.subr.bf16.mxu1 %v3266_v59  ;;  %v3351_v59 = vld [vmem:[%s4722_s1 + $0x5a0] ss:$12 sps:$4 sm:$0xff]  }
  0x3b   :  { %2104 = vmatpush2.bf16.msra.mxu0 %v3268_v60  ;;  %v3356_v60 = vld [vmem:[%s4722_s1 + $0x40c] ss:$12 sps:$4 sm:$0xff]  }
  0x3c   :  { %2155 = vmatpush2.bf16.msra.mxu1 %v3269_v61  ;;  %2105 = vmatprep.subr.bf16.mxu0 %v3270_v62  ;;  %v3359_v61 = vld [vmem:[%s4722_s1 + $0x58c] ss:$12 sps:$4 sm:$0xff]   ;;  %v3354_v62 = vld [vmem:[%s4722_s1 + $0x408] ss:$12 sps:$4 sm:$0xff]  }
  0x3d   :  { %2156 = vmatprep.subr.bf16.mxu1 %v3272_v63  ;;  %v3357_v63 = vld [vmem:[%s4722_s1 + $0x588] ss:$12 sps:$4 sm:$0xff]  }
  0x3f   :  { %2106 = vmatpush2.bf16.msra.mxu0 %v3274_v0  ;;  %v3365_v0 = vld [vmem:[%s4722_s1 + $0x3f4] ss:$12 sps:$4 sm:$0xff]  }
  0x40   :  { %2157 = vmatpush2.bf16.msra.mxu1 %v3275_v1  ;;  %2177 = vmatprep.subr.bf16.mxu0 %v3284_v2  ;;  %v3368_v1 = vld [vmem:[%s4722_s1 + $0x574] ss:$12 sps:$4 sm:$0xff]   ;;  %v3363_v2 = vld [vmem:[%s4722_s1 + $0x3f0] ss:$12 sps:$4 sm:$0xff]  }
  0x41   :  { %2228 = vmatprep.subr.bf16.mxu1 %v3287_v3  ;;  %v3366_v3 = vld [vmem:[%s4722_s1 + $0x570] ss:$12 sps:$4 sm:$0xff]  }
  0x42   :  { %2108 = vmatmul.mubr.bf16.vlgmr.msra.gmra.mxu0 %v3276_v4  ;;  %v3372_v4 = vld [vmem:[%s4722_s1 + $0x3dc] ss:$12 sps:$4 sm:$0xff]  }
  0x43   :  { %2159 = vmatmul.mubr.bf16.vlgmr.msra.gmra.mxu1 %v3279_v5  ;;  %2178 = vmatpush1.bf16.msra.mxu0 %v3282_v6  ;;  %v3375_v5 = vld [vmem:[%s4722_s1 + $0x55c] ss:$12 sps:$4 sm:$0xff]   ;;  %v3370_v6 = vld [vmem:[%s4722_s1 + $0x3d8] ss:$12 sps:$4 sm:$0xff]  }
  0x44   :  { %2229 = vmatpush1.bf16.msra.mxu1 %v3285_v7  ;;  %2179 = vmatprep.subr.bf16.mxu0 %v3290_v8  ;;  %v3373_v7 = vld [vmem:[%s4722_s1 + $0x558] ss:$12 sps:$4 sm:$0xff]  }
  0x45   :  { %2230 = vmatprep.subr.bf16.mxu1 %v3293_v9  ;;  %2117 = vmatprep.mubr.bf16.mxu0 %v3905_v28  ;;  %v3378_v8 = vld [vmem:[%s4722_s1 + $0x3c4] ss:$12 sps:$4 sm:$0xff]  }
  0x46   :  { %2168 = vmatprep.mubr.bf16.mxu1 %v3907_v29  ;;  %v3381_v9 = vld [vmem:[%s4722_s1 + $0x544] ss:$12 sps:$4 sm:$0xff]  }
  0x47   :  { %2180 = vmatpush1.bf16.msra.mxu0 %v3288_v10  ;;  %v3376_v10 = vld [vmem:[%s4722_s1 + $0x3c0] ss:$12 sps:$4 sm:$0xff]  }
  0x48   :  { %2231 = vmatpush1.bf16.msra.mxu1 %v3291_v11  ;;  %2181 = vmatprep.subr.bf16.mxu0 %v3296_v12  ;;  %v3379_v11 = vld [vmem:[%s4722_s1 + $0x540] ss:$12 sps:$4 sm:$0xff]  }
  0x49   :  { %2232 = vmatprep.subr.bf16.mxu1 %v3299_v13  ;;  %v3390_v12 = vld [vmem:[%s4722_s1 + $0x6ac] ss:$12 sps:$4 sm:$0xff]   ;;  %v3382_v13 = vld [vmem:[%s4723_s0 + $0x10] ss:$48 sps:$4 sm:$0xff]  }
  0x4a   :  { %2118 = vmatmul.mubr.bf16.gmra.mxu0 %v3909_v30 }
  0x4b   :  { %2182 = vmatpush1.bf16.msra.mxu0 %v3294_v14  ;;  %2169 = vmatmul.mubr.bf16.gmra.mxu1 %v3911_v31  ;;  %v3385_v14 = vld [vmem:[%s4723_s0 + $0x18] ss:$48 sps:$4 sm:$0xff]  }
  0x4c   :  { %2233 = vmatpush1.bf16.msra.mxu1 %v3297_v15  ;;  %2183 = vmatprep.subr.bf16.mxu0 %v3302_v16  ;;  %v3393_v15 = vld [vmem:[%s4722_s1 + $0x82c] ss:$12 sps:$4 sm:$0xff]   ;;  %v3388_v16 = vld [vmem:[%s4722_s1 + $0x6a8] ss:$12 sps:$4 sm:$0xff]  }
  0x4d   :  { %2234 = vmatprep.subr.bf16.mxu1 %v3305_v17  ;;  %2209 = vmatprep.mubr.bf16.mxu0 %v3384_v40  ;;  %v3391_v17 = vld [vmem:[%s4722_s1 + $0x828] ss:$12 sps:$4 sm:$0xff]   ;;  %v3493_v40 = vld [vmem:[%s4723_s0 + $0x2c] ss:$48 sps:$4 sm:$0xff]  }
  0x4e   :  { %2260 = vmatprep.mubr.bf16.mxu1 %v3387_v41  ;;  %v3413_v41 = vld [vmem:[%s4722_s1 + $0x7e0] ss:$12 sps:$4 sm:$0xff]  }
  0x4f   :  { %2184 = vmatpush1.bf16.msra.mxu0 %v3300_v18  ;;  %v32_v18 = vld [vmem:[%s4723_s0 + $0x70] sm:$0x33] }
  0x50   :  { %2235 = vmatpush1.bf16.msra.mxu1 %v3303_v19  ;;  %2185 = vmatprep.subr.bf16.mxu0 %v3308_v20  ;;  %v33_v19 = vld [vmem:[%s4723_s0 + $0x78] sm:$0x33]  ;;  %v3396_v20 = vld [vmem:[%s4722_s1 + $0x694] ss:$12 sps:$4 sm:$0xff]  }
  0x51   :  { %2236 = vmatprep.subr.bf16.mxu1 %v3311_v21  ;;  %v3399_v21 = vld [vmem:[%s4722_s1 + $0x814] ss:$12 sps:$4 sm:$0xff]  }
  0x53   :  { %2186 = vmatpush1.bf16.msra.mxu0 %v3306_v22  ;;  %v4079_v22 = vcombine.high %v32_v18, %v32_v18 }
  0x54   :  { %2237 = vmatpush1.bf16.msra.mxu1 %v3309_v23  ;;  %2187 = vmatprep.subr.bf16.mxu0 %v3314_v26  ;;  %v4081_v23 = vcombine.high %v33_v19, %v33_v19  ;;  %v3404_v26 = vld [vmem:[%s4722_s1 + $0x67c] ss:$12 sps:$4 sm:$0xff]  }
  0x55   :  { %2238 = vmatprep.subr.bf16.mxu1 %v3317_v27  ;;  %v3407_v27 = vld [vmem:[%s4722_s1 + $0x7fc] ss:$12 sps:$4 sm:$0xff]  }
  0x57   :  { %2188 = vmatpush1.bf16.msra.mxu0 %v3312_v32  ;;  %v3402_v32 = vld [vmem:[%s4722_s1 + $0x678] ss:$12 sps:$4 sm:$0xff]  }
  0x58   :  { %2239 = vmatpush1.bf16.msra.mxu1 %v3315_v33  ;;  %2189 = vmatprep.subr.bf16.mxu0 %v3320_v34  ;;  %v4100_v33 = vcombine.low %v32_v18, %v32_v18  ;;  %v3405_v34 = vld [vmem:[%s4722_s1 + $0x7f8] ss:$12 sps:$4 sm:$0xff]   ;;  %v3478_v18 = vld [vmem:[%s4722_s1 + $0x6dc] ss:$12 sps:$4 sm:$0xff]  }
  0x59   :  { %2240 = vmatprep.subr.bf16.mxu1 %v3323_v35  ;;  %v4105_v35 = vcombine.low %v33_v19, %v33_v19  ;;  %v3481_v19 = vld [vmem:[%s4722_s1 + $0x85c] ss:$12 sps:$4 sm:$0xff]  }
  0x5b   :  { %2190 = vmatpush1.bf16.msra.mxu0 %v3318_v36  ;;  %v3412_v36 = vld [vmem:[%s4722_s1 + $0x664] ss:$12 sps:$4 sm:$0xff]  }
  0x5c   :  { %2241 = vmatpush1.bf16.msra.mxu1 %v3321_v37  ;;  %2191 = vmatprep.subr.bf16.mxu0 %v3326_v38  ;;  %v3415_v37 = vld [vmem:[%s4722_s1 + $0x7e4] ss:$12 sps:$4 sm:$0xff]  }
  0x5d   :  { %2242 = vmatprep.subr.bf16.mxu1 %v3329_v39  ;;  %v3490_v38 = vld [vmem:[%s4723_s0 + $0x24] ss:$48 sps:$4 sm:$0xff]   ;;  %v3410_v39 = vld [vmem:[%s4722_s1 + $0x660] ss:$12 sps:$4 sm:$0xff]  }
  0x5f   :  { %2192 = vmatpush1.bf16.msra.mxu0 %v3324_v42  ;;  %v3418_v42 = vld [vmem:[%s4722_s1 + $0x64c] ss:$12 sps:$4 sm:$0xff]  }
  0x60   :  { %2243 = vmatpush1.bf16.msra.mxu1 %v3327_v43  ;;  %2193 = vmatprep.subr.bf16.mxu0 %v3332_v44  ;;  %v3421_v43 = vld [vmem:[%s4722_s1 + $0x7cc] ss:$12 sps:$4 sm:$0xff]   ;;  %v3416_v44 = vld [vmem:[%s4722_s1 + $0x648] ss:$12 sps:$4 sm:$0xff]  }
  0x61   :  { %2244 = vmatprep.subr.bf16.mxu1 %v3335_v45  ;;  %v3419_v45 = vld [vmem:[%s4722_s1 + $0x7c8] ss:$12 sps:$4 sm:$0xff]  }
  0x63   :  { %2194 = vmatpush2.bf16.msra.mxu0 %v3330_v46  ;;  %v3424_v46 = vld [vmem:[%s4722_s1 + $0x634] ss:$12 sps:$4 sm:$0xff]  }
  0x64   :  { %2245 = vmatpush2.bf16.msra.mxu1 %v3333_v47  ;;  %2195 = vmatprep.subr.bf16.mxu0 %v3338_v48  ;;  %v3427_v47 = vld [vmem:[%s4722_s1 + $0x7b4] ss:$12 sps:$4 sm:$0xff]   ;;  %v3422_v48 = vld [vmem:[%s4722_s1 + $0x630] ss:$12 sps:$4 sm:$0xff]  }
  0x65   :  { %2246 = vmatprep.subr.bf16.mxu1 %v3341_v49  ;;  %v3425_v49 = vld [vmem:[%s4722_s1 + $0x7b0] ss:$12 sps:$4 sm:$0xff]  }
  0x67   :  { %2196 = vmatpush2.bf16.msra.mxu0 %v3336_v50  ;;  %v3430_v50 = vld [vmem:[%s4722_s1 + $0x61c] ss:$12 sps:$4 sm:$0xff]  }
  0x68   :  { %2247 = vmatpush2.bf16.msra.mxu1 %v3339_v51  ;;  %2197 = vmatprep.subr.bf16.mxu0 %v3344_v52  ;;  %v3433_v51 = vld [vmem:[%s4722_s1 + $0x79c] ss:$12 sps:$4 sm:$0xff]   ;;  %v3428_v52 = vld [vmem:[%s4722_s1 + $0x618] ss:$12 sps:$4 sm:$0xff]  }
  0x69   :  { %2248 = vmatprep.subr.bf16.mxu1 %v3347_v53  ;;  %v3431_v53 = vld [vmem:[%s4722_s1 + $0x798] ss:$12 sps:$4 sm:$0xff]  }
  0x6b   :  { %2198 = vmatpush2.bf16.msra.mxu0 %v3342_v54  ;;  %v3436_v54 = vld [vmem:[%s4722_s1 + $0x604] ss:$12 sps:$4 sm:$0xff]  }
  0x6c   :  { %2249 = vmatpush2.bf16.msra.mxu1 %v3345_v55  ;;  %2199 = vmatprep.subr.bf16.mxu0 %v3350_v56  ;;  %v3439_v55 = vld [vmem:[%s4722_s1 + $0x784] ss:$12 sps:$4 sm:$0xff]   ;;  %v3434_v56 = vld [vmem:[%s4722_s1 + $0x600] ss:$12 sps:$4 sm:$0xff]  }
  0x6d   :  { %2250 = vmatprep.subr.bf16.mxu1 %v3353_v57  ;;  %v3437_v57 = vld [vmem:[%s4722_s1 + $0x780] ss:$12 sps:$4 sm:$0xff]  }
  0x6f   :  { %2200 = vmatpush2.bf16.msra.mxu0 %v3348_v58  ;;  %v3442_v58 = vld [vmem:[%s4722_s1 + $0x76c] ss:$12 sps:$4 sm:$0xff]  }
  0x70   :  { %2251 = vmatpush2.bf16.msra.mxu1 %v3351_v59  ;;  %2201 = vmatprep.subr.bf16.mxu0 %v3356_v60  ;;  %v3445_v59 = vld [vmem:[%s4722_s1 + $0x8ec] ss:$12 sps:$4 sm:$0xff]   ;;  %v3440_v60 = vld [vmem:[%s4722_s1 + $0x768] ss:$12 sps:$4 sm:$0xff]  }
  0x71   :  { %2252 = vmatprep.subr.bf16.mxu1 %v3359_v61  ;;  %v3443_v61 = vld [vmem:[%s4722_s1 + $0x8e8] ss:$12 sps:$4 sm:$0xff]  }
  0x73   :  { %2202 = vmatpush2.bf16.msra.mxu0 %v3354_v62  ;;  %v3448_v62 = vld [vmem:[%s4722_s1 + $0x754] ss:$12 sps:$4 sm:$0xff]  }
  0x74   :  { %2253 = vmatpush2.bf16.msra.mxu1 %v3357_v63  ;;  %2203 = vmatprep.subr.bf16.mxu0 %v3365_v0  ;;  %v3451_v63 = vld [vmem:[%s4722_s1 + $0x8d4] ss:$12 sps:$4 sm:$0xff]   ;;  %v3446_v0 = vld [vmem:[%s4722_s1 + $0x750] ss:$12 sps:$4 sm:$0xff]  }
  0x75   :  { %2254 = vmatprep.subr.bf16.mxu1 %v3368_v1  ;;  %v3449_v1 = vld [vmem:[%s4722_s1 + $0x8d0] ss:$12 sps:$4 sm:$0xff]  }
  0x77   :  { %2204 = vmatpush2.bf16.msra.mxu0 %v3363_v2  ;;  %v3454_v2 = vld [vmem:[%s4722_s1 + $0x73c] ss:$12 sps:$4 sm:$0xff]  }
  0x78   :  { %2255 = vmatpush2.bf16.msra.mxu1 %v3366_v3  ;;  %2205 = vmatprep.subr.bf16.mxu0 %v3372_v4  ;;  %v3457_v3 = vld [vmem:[%s4722_s1 + $0x8bc] ss:$12 sps:$4 sm:$0xff]   ;;  %v3452_v4 = vld [vmem:[%s4722_s1 + $0x738] ss:$12 sps:$4 sm:$0xff]  }
  0x79   :  { %2256 = vmatprep.subr.bf16.mxu1 %v3375_v5  ;;  %v3455_v5 = vld [vmem:[%s4722_s1 + $0x8b8] ss:$12 sps:$4 sm:$0xff]  }
  0x7b   :  { %2206 = vmatpush2.bf16.msra.mxu0 %v3370_v6  ;;  %v3460_v6 = vld [vmem:[%s4722_s1 + $0x724] ss:$12 sps:$4 sm:$0xff]  }
  0x7c   :  { %2257 = vmatpush2.bf16.msra.mxu1 %v3373_v7  ;;  %2207 = vmatprep.subr.bf16.mxu0 %v3378_v8  ;;  %v3463_v7 = vld [vmem:[%s4722_s1 + $0x8a4] ss:$12 sps:$4 sm:$0xff]   ;;  %v3458_v8 = vld [vmem:[%s4722_s1 + $0x720] ss:$12 sps:$4 sm:$0xff]  }
  0x7d   :  { %2258 = vmatprep.subr.bf16.mxu1 %v3381_v9  ;;  %v3461_v9 = vld [vmem:[%s4722_s1 + $0x8a0] ss:$12 sps:$4 sm:$0xff]  }
  0x7f   :  { %2208 = vmatpush2.bf16.msra.mxu0 %v3376_v10  ;;  %v3466_v10 = vld [vmem:[%s4722_s1 + $0x70c] ss:$12 sps:$4 sm:$0xff]  }
  0x80   :  { %2259 = vmatpush2.bf16.msra.mxu1 %v3379_v11  ;;  %2279 = vmatprep.subr.bf16.mxu0 %v3390_v12  ;;  %v3469_v11 = vld [vmem:[%s4722_s1 + $0x88c] ss:$12 sps:$4 sm:$0xff]   ;;  %v3464_v12 = vld [vmem:[%s4722_s1 + $0x708] ss:$12 sps:$4 sm:$0xff]  }
  0x81   :  { %2330 = vmatprep.subr.bf16.mxu1 %v3393_v15  ;;  %v3475_v15 = vld [vmem:[%s4722_s1 + $0x874] ss:$12 sps:$4 sm:$0xff]  }
  0x82   :  { %2210 = vmatmul.mubr.bf16.vlgmr.msra.gmra.mxu0 %v3382_v13  ;;  %v3467_v13 = vld [vmem:[%s4722_s1 + $0x888] ss:$12 sps:$4 sm:$0xff]  }
  0x83   :  { %2261 = vmatmul.mubr.bf16.vlgmr.msra.gmra.mxu1 %v3385_v14  ;;  %2280 = vmatpush1.bf16.msra.mxu0 %v3388_v16  ;;  %v3472_v14 = vld [vmem:[%s4722_s1 + $0x6f4] ss:$12 sps:$4 sm:$0xff]   ;;  %v3470_v16 = vld [vmem:[%s4722_s1 + $0x6f0] ss:$12 sps:$4 sm:$0xff]  }
  0x84   :  { %2331 = vmatpush1.bf16.msra.mxu1 %v3391_v17  ;;  %2281 = vmatprep.subr.bf16.mxu0 %v3396_v20  ;;  %v3473_v17 = vld [vmem:[%s4722_s1 + $0x870] ss:$12 sps:$4 sm:$0xff]   ;;  %v3476_v20 = vld [vmem:[%s4722_s1 + $0x6d8] ss:$12 sps:$4 sm:$0xff]  }
  0x85   :  { %2332 = vmatprep.subr.bf16.mxu1 %v3399_v21  ;;  %2219 = vmatprep.mubr.bf16.mxu0 %v4079_v22  ;;  %v3479_v21 = vld [vmem:[%s4722_s1 + $0x858] ss:$12 sps:$4 sm:$0xff]  }
  0x86   :  { %2270 = vmatprep.mubr.bf16.mxu1 %v4081_v23 }
  0x87   :  { %2282 = vmatpush1.bf16.msra.mxu0 %v3394_v24  ;;  %v3484_v24 = vld [vmem:[%s4722_s1 + $0x6c4] ss:$12 sps:$4 sm:$0xff]  }
  0x88   :  { %2333 = vmatpush1.bf16.msra.mxu1 %v3397_v25  ;;  %2283 = vmatprep.subr.bf16.mxu0 %v3404_v26  ;;  %v3487_v25 = vld [vmem:[%s4722_s1 + $0x844] ss:$12 sps:$4 sm:$0xff]   ;;  %v3482_v26 = vld [vmem:[%s4722_s1 + $0x6c0] ss:$12 sps:$4 sm:$0xff]  }
  0x89   :  { %2334 = vmatprep.subr.bf16.mxu1 %v3407_v27  ;;  %v3485_v27 = vld [vmem:[%s4722_s1 + $0x840] ss:$12 sps:$4 sm:$0xff]  }
  0x8a   :  { %2220 = vmatmul.mubr.bf16.gmra.mxu0 %v4100_v33 }
  0x8b   :  { %2271 = vmatmul.mubr.bf16.gmra.mxu1 %v4105_v35  ;;  %2284 = vmatpush1.bf16.msra.mxu0 %v3402_v32  ;;  %v3494_v32 = vld [vmem:[%s4722_s1 + $0x170] ss:$12 sps:$4 sm:$0xff]  }
  0x8c   :  { %2335 = vmatpush1.bf16.msra.mxu1 %v3405_v34  ;;  %2285 = vmatprep.subr.bf16.mxu0 %v3412_v36  ;;  %v4277_v34 = vld [vmem:[%s4723_s0 + $0x20] ss:$48 sps:$4 sm:$0xff]   ;;  %v4282_v36 = vld [vmem:[%s4723_s0 + $0x28] ss:$48 sps:$4 sm:$0xff]  }
  0x8d   :  { %2336 = vmatprep.subr.bf16.mxu1 %v3415_v37  ;;  %2311 = vmatprep.mubr.bf16.mxu0 %v3490_v38  ;;  %v3495_v37 = vld [vmem:[%s4722_s1 + $0x2f0] ss:$12 sps:$4 sm:$0xff]  }
  0x8e   :  { %2362 = vmatprep.mubr.bf16.mxu1 %v3493_v40  ;;  %v3496_v38 = vld [vmem:[%s4722_s1 + $0xb0] ss:$12 sps:$4 sm:$0xff]   ;;  %v34_v40 = vld [vmem:[%s4723_s0 + $0x80] sm:$0x33] }
  0x8f   :  { %2286 = vmatpush1.bf16.msra.mxu0 %v3410_v39  ;;  %v3497_v39 = vld [vmem:[%s4722_s1 + $0x230] ss:$12 sps:$4 sm:$0xff]  }
  0x90   :  { %2337 = vmatpush1.bf16.msra.mxu1 %v3413_v41  ;;  %2287 = vmatprep.subr.bf16.mxu0 %v3418_v42  ;;  %v35_v41 = vld [vmem:[%s4723_s0 + $0x88] sm:$0x33]  ;;  %v3498_v42 = vld [vmem:[%s4722_s1 + $0x158] ss:$12 sps:$4 sm:$0xff]  }
  0x91   :  { %2338 = vmatprep.subr.bf16.mxu1 %v3421_v43  ;;  %v3499_v43 = vld [vmem:[%s4722_s1 + $0x2d8] ss:$12 sps:$4 sm:$0xff]  }
  0x93   :  { %2288 = vmatpush1.bf16.msra.mxu0 %v3416_v44  ;;  %v3500_v44 = vld [vmem:[%s4722_s1 + $0x98] ss:$12 sps:$4 sm:$0xff]  }
  0x94   :  { %2339 = vmatpush1.bf16.msra.mxu1 %v3419_v45  ;;  %2289 = vmatprep.subr.bf16.mxu0 %v3424_v46  ;;  %v4308_v45 = vcombine.high %v34_v40, %v34_v40  ;;  %v4310_v46 = vcombine.high %v35_v41, %v35_v41 }
  0x95   :  { %2340 = vmatprep.subr.bf16.mxu1 %v3427_v47  ;;  %v3501_v47 = vld [vmem:[%s4722_s1 + $0x218] ss:$12 sps:$4 sm:$0xff]  }
  0x97   :  { %2290 = vmatpush1.bf16.msra.mxu0 %v3422_v48  ;;  %v3504_v48 = vld [vmem:[%s4722_s1 + $0x140] ss:$12 sps:$4 sm:$0xff]  }
  0x98   :  { %2341 = vmatpush1.bf16.msra.mxu1 %v3425_v49  ;;  %2291 = vmatprep.subr.bf16.mxu0 %v3430_v50  ;;  %v3505_v49 = vld [vmem:[%s4722_s1 + $0x2c0] ss:$12 sps:$4 sm:$0xff]  }
  0x99   :  { %2342 = vmatprep.subr.bf16.mxu1 %v3433_v51  ;;  %v3507_v50 = vld [vmem:[%s4722_s1 + $0x80] ss:$12 sps:$4 sm:$0xff]   ;;  %v4328_v51 = vcombine.low %v34_v40, %v34_v40  ;;  %v3548_v40 = vld [vmem:[%s4722_s1 + $0x350] ss:$12 sps:$4 sm:$0xff]  }
  0x9b   :  { %2292 = vmatpush1.bf16.msra.mxu0 %v3428_v52  ;;  %v3508_v52 = vld [vmem:[%s4722_s1 + $0x200] ss:$12 sps:$4 sm:$0xff]  }
  0x9c   :  { %2343 = vmatpush1.bf16.msra.mxu1 %v3431_v53  ;;  %2293 = vmatprep.subr.bf16.mxu0 %v3436_v54  ;;  %v4333_v53 = vcombine.low %v35_v41, %v35_v41  ;;  %v3510_v54 = vld [vmem:[%s4722_s1 + $0x128] ss:$12 sps:$4 sm:$0xff]   ;;  %v3549_v41 = vld [vmem:[%s4722_s1 + $0x4d0] ss:$12 sps:$4 sm:$0xff]  }
  0x9d   :  { %2344 = vmatprep.subr.bf16.mxu1 %v3439_v55  ;;  %v3511_v55 = vld [vmem:[%s4722_s1 + $0x2a8] ss:$12 sps:$4 sm:$0xff]  }
  0x9f   :  { %2294 = vmatpush1.bf16.msra.mxu0 %v3434_v56  ;;  %v3512_v56 = vld [vmem:[%s4722_s1 + $0x68] ss:$12 sps:$4 sm:$0xff]  }
  0xa0   :  { %2345 = vmatpush1.bf16.msra.mxu1 %v3437_v57  ;;  %2295 = vmatprep.subr.bf16.mxu0 %v3442_v58  ;;  %v3513_v57 = vld [vmem:[%s4722_s1 + $0x1e8] ss:$12 sps:$4 sm:$0xff]   ;;  %v3514_v58 = vld [vmem:[%s4722_s1 + $0x110] ss:$12 sps:$4 sm:$0xff]  }
  0xa1   :  { %2346 = vmatprep.subr.bf16.mxu1 %v3445_v59  ;;  %v3515_v59 = vld [vmem:[%s4722_s1 + $0x290] ss:$12 sps:$4 sm:$0xff]  }
  0xa3   :  { %2296 = vmatpush2.bf16.msra.mxu0 %v3440_v60  ;;  %v3516_v60 = vld [vmem:[%s4722_s1 + $0x50] ss:$12 sps:$4 sm:$0xff]  }
  0xa4   :  { %2347 = vmatpush2.bf16.msra.mxu1 %v3443_v61  ;;  %2297 = vmatprep.subr.bf16.mxu0 %v3448_v62  ;;  %v3594_v61 = vld [vmem:[%s4723_s0 + $0x4] ss:$48 sps:$4 sm:$0xff]   ;;  %v3595_v62 = vld [vmem:[%s4723_s0 + $0xc] ss:$48 sps:$4 sm:$0xff]  }
  0xa5   :  { %2348 = vmatprep.subr.bf16.mxu1 %v3451_v63  ;;  %v3517_v63 = vld [vmem:[%s4722_s1 + $0x1d0] ss:$12 sps:$4 sm:$0xff]  }
  0xa7   :  { %2298 = vmatpush2.bf16.msra.mxu0 %v3446_v0  ;;  %v3518_v0 = vld [vmem:[%s4722_s1 + $0xf8] ss:$12 sps:$4 sm:$0xff]  }
  0xa8   :  { %2349 = vmatpush2.bf16.msra.mxu1 %v3449_v1  ;;  %2299 = vmatprep.subr.bf16.mxu0 %v3454_v2  ;;  %v3519_v1 = vld [vmem:[%s4722_s1 + $0x278] ss:$12 sps:$4 sm:$0xff]  }
  0xa9   :  { %2350 = vmatprep.subr.bf16.mxu1 %v3457_v3  ;;  %v3520_v2 = vld [vmem:[%s4722_s1 + $0x38] ss:$12 sps:$4 sm:$0xff]  }
  0xaa   :  { %v3521_v3 = vld [vmem:[%s4722_s1 + $0x1b8] ss:$12 sps:$4 sm:$0xff]  }
  0xab   :  { %2300 = vmatpush2.bf16.msra.mxu0 %v3452_v4  ;;  %v3522_v4 = vld [vmem:[%s4722_s1 + $0xe0] ss:$12 sps:$4 sm:$0xff]  }
  0xac   :  { %2351 = vmatpush2.bf16.msra.mxu1 %v3455_v5  ;;  %2301 = vmatprep.subr.bf16.mxu0 %v3460_v6  ;;  %v3523_v5 = vld [vmem:[%s4722_s1 + $0x260] ss:$12 sps:$4 sm:$0xff]  }
  0xad   :  { %2352 = vmatprep.subr.bf16.mxu1 %v3463_v7  ;;  %v3524_v6 = vld [vmem:[%s4722_s1 + $0x20] ss:$12 sps:$4 sm:$0xff]  }
  0xae   :  { %v3525_v7 = vld [vmem:[%s4722_s1 + $0x1a0] ss:$12 sps:$4 sm:$0xff]  }
  0xaf   :  { %2302 = vmatpush2.bf16.msra.mxu0 %v3458_v8  ;;  %v3526_v8 = vld [vmem:[%s4722_s1 + $0xc8] ss:$12 sps:$4 sm:$0xff]  }
  0xb0   :  { %2353 = vmatpush2.bf16.msra.mxu1 %v3461_v9  ;;  %2303 = vmatprep.subr.bf16.mxu0 %v3466_v10  ;;  %v3527_v9 = vld [vmem:[%s4722_s1 + $0x248] ss:$12 sps:$4 sm:$0xff]  }
  0xb1   :  { %2354 = vmatprep.subr.bf16.mxu1 %v3469_v11  ;;  %v3528_v10 = vld [vmem:[%s4722_s1 + $0x8] ss:$12 sps:$4 sm:$0xff]  }
  0xb2   :  { %v3529_v11 = vld [vmem:[%s4722_s1 + $0x188] ss:$12 sps:$4 sm:$0xff]  }
  0xb3   :  { %2304 = vmatpush2.bf16.msra.mxu0 %v3464_v12  ;;  %v3530_v12 = vld [vmem:[%s4722_s1 + $0x470] ss:$12 sps:$4 sm:$0xff]  }
  0xb4   :  { %2355 = vmatpush2.bf16.msra.mxu1 %v3467_v13  ;;  %2305 = vmatprep.subr.bf16.mxu0 %v3472_v14  ;;  %v3531_v13 = vld [vmem:[%s4722_s1 + $0x5f0] ss:$12 sps:$4 sm:$0xff]  }
  0xb5   :  { %2356 = vmatprep.subr.bf16.mxu1 %v3475_v15  ;;  %v3532_v14 = vld [vmem:[%s4722_s1 + $0x3b0] ss:$12 sps:$4 sm:$0xff]  }
  0xb6   :  { %v3533_v15 = vld [vmem:[%s4722_s1 + $0x530] ss:$12 sps:$4 sm:$0xff]  }
  0xb7   :  { %2306 = vmatpush2.bf16.msra.mxu0 %v3470_v16  ;;  %v3534_v16 = vld [vmem:[%s4722_s1 + $0x458] ss:$12 sps:$4 sm:$0xff]  }
  0xb8   :  { %2357 = vmatpush2.bf16.msra.mxu1 %v3473_v17  ;;  %2307 = vmatprep.subr.bf16.mxu0 %v3478_v18  ;;  %v3535_v17 = vld [vmem:[%s4722_s1 + $0x5d8] ss:$12 sps:$4 sm:$0xff]  }
  0xb9   :  { %2358 = vmatprep.subr.bf16.mxu1 %v3481_v19  ;;  %v3536_v18 = vld [vmem:[%s4722_s1 + $0x398] ss:$12 sps:$4 sm:$0xff]   ;;  %v3596_v19 = vld [vmem:[%s4723_s0] ss:$48 sps:$4 sm:$0xff]  }
  0xbb   :  { %2308 = vmatpush2.bf16.msra.mxu0 %v3476_v20  ;;  %v3597_v20 = vld [vmem:[%s4723_s0 + $0x8] ss:$48 sps:$4 sm:$0xff]  }
  0xbc   :  { %2359 = vmatpush2.bf16.msra.mxu1 %v3479_v21  ;;  %2309 = vmatprep.subr.bf16.mxu0 %v3484_v24  ;;  %v3537_v21 = vld [vmem:[%s4722_s1 + $0x518] ss:$12 sps:$4 sm:$0xff]   ;;  %v3538_v24 = vld [vmem:[%s4722_s1 + $0x440] ss:$12 sps:$4 sm:$0xff]  }
  0xbd   :  { %2360 = vmatprep.subr.bf16.mxu1 %v3487_v25  ;;  %v3539_v25 = vld [vmem:[%s4722_s1 + $0x5c0] ss:$12 sps:$4 sm:$0xff]  }
  0xbf   :  { %2310 = vmatpush2.bf16.msra.mxu0 %v3482_v26  ;;  %v3540_v26 = vld [vmem:[%s4722_s1 + $0x380] ss:$12 sps:$4 sm:$0xff]  }
  0xc0   :  { %2361 = vmatpush2.bf16.msra.mxu1 %v3485_v27  ;;  %3012 = vmatprep.subr.bf16.mxu0 %v3494_v32  ;;  %v3541_v27 = vld [vmem:[%s4722_s1 + $0x500] ss:$12 sps:$4 sm:$0xff]   ;;  %v3542_v32 = vld [vmem:[%s4722_s1 + $0x428] ss:$12 sps:$4 sm:$0xff]  }
  0xc1   :  { %3040 = vmatprep.subr.bf16.mxu1 %v3495_v37  ;;  %v3543_v37 = vld [vmem:[%s4722_s1 + $0x5a8] ss:$12 sps:$4 sm:$0xff]  }
  0xc2   :  { %2312 = vmatmul.mubr.bf16.vlgmr.msra.gmra.mxu0 %v4277_v34 }
  0xc3   :  { %2363 = vmatmul.mubr.bf16.vlgmr.msra.gmra.mxu1 %v4282_v36  ;;  %3013 = vmatpush3.bf16.msra.mxu0 %v3496_v38  ;;  %v3546_v38 = vld [vmem:[%s4722_s1 + $0x410] ss:$12 sps:$4 sm:$0xff]  }
  0xc4   :  { %3041 = vmatpush3.bf16.msra.mxu1 %v3497_v39  ;;  %3014 = vmatprep.subr.bf16.mxu0 %v3498_v42  ;;  %v3599_v39 = vld [vmem:[%s4723_s0 + $0x1c] ss:$48 sps:$4 sm:$0xff]   ;;  %v3550_v42 = vld [vmem:[%s4722_s1 + $0x3f8] ss:$12 sps:$4 sm:$0xff]  }
  0xc5   :  { %3042 = vmatprep.subr.bf16.mxu1 %v3499_v43  ;;  %2321 = vmatprep.mubr.bf16.mxu0 %v4308_v45  ;;  %v3551_v43 = vld [vmem:[%s4722_s1 + $0x578] ss:$12 sps:$4 sm:$0xff]  }
  0xc6   :  { %2372 = vmatprep.mubr.bf16.mxu1 %v4310_v46 }
  0xc7   :  { %3015 = vmatpush3.bf16.msra.mxu0 %v3500_v44  ;;  %v3552_v44 = vld [vmem:[%s4722_s1 + $0x338] ss:$12 sps:$4 sm:$0xff]  }
  0xc8   :  { %3043 = vmatpush3.bf16.msra.mxu1 %v3501_v47  ;;  %3016 = vmatprep.subr.bf16.mxu0 %v3504_v48  ;;  %v3553_v47 = vld [vmem:[%s4722_s1 + $0x4b8] ss:$12 sps:$4 sm:$0xff]   ;;  %v422_v48 = vlaneseq }
  0xc9   :  { %3044 = vmatprep.subr.bf16.mxu1 %v3505_v49  ;;  %v3554_v49 = vld [vmem:[%s4722_s1 + $0x3e0] ss:$12 sps:$4 sm:$0xff]  }
  0xca   :  { %2322 = vmatmul.mubr.bf16.gmra.mxu0 %v4328_v51 }
  0xcb   :  { %2373 = vmatmul.mubr.bf16.gmra.mxu1 %v4333_v53  ;;  %3017 = vmatpush3.bf16.msra.mxu0 %v3507_v50  ;;  %v3555_v50 = vld [vmem:[%s4722_s1 + $0x560] ss:$12 sps:$4 sm:$0xff]  }
  0xcc   :  { %3045 = vmatpush3.bf16.msra.mxu1 %v3508_v52  ;;  %3018 = vmatprep.subr.bf16.mxu0 %v3510_v54  ;;  %v3556_v52 = vld [vmem:[%s4722_s1 + $0x320] ss:$12 sps:$4 sm:$0xff]  }
  0xcd   :  { %3046 = vmatprep.subr.bf16.mxu1 %v3511_v55  ;;  %2413 = vmatprep.mubr.bf16.mxu0 %v3594_v61  ;;  %v3557_v54 = vld [vmem:[%s4722_s1 + $0x4a0] ss:$12 sps:$4 sm:$0xff]   ;;  %v4503_v55 = vshrl.u32 %v422_v48, 7  ;;  %v3585_v48 = vld [vmem:[%s4722_s1 + $0x7b8] ss:$12 sps:$4 sm:$0xff]  }
  0xce   :  { %2461 = vmatprep.mubr.bf16.mxu1 %v3595_v62  ;;  %v4521_v61 = vld [vmem:[%s4724_s2] sm:$0x7]  ;;  %v3562_v62 = vld [vmem:[%s4722_s1 + $0x770] ss:$12 sps:$4 sm:$0xff]  }
  0xcf   :  { %3019 = vmatpush3.bf16.msra.mxu0 %v3512_v56  ;;  %v3558_v56 = vld [vmem:[%s4722_s1 + $0x3c8] ss:$12 sps:$4 sm:$0xff]  }
  0xd0   :  { %3047 = vmatpush3.bf16.msra.mxu1 %v3513_v57  ;;  %3020 = vmatprep.subr.bf16.mxu0 %v3514_v58  ;;  %v3559_v57 = vld [vmem:[%s4722_s1 + $0x548] ss:$12 sps:$4 sm:$0xff]  }
  0xd1   :  { %3048 = vmatprep.subr.bf16.mxu1 %v3515_v59  ;;  %v3560_v58 = vld [vmem:[%s4722_s1 + $0x308] ss:$12 sps:$4 sm:$0xff]  }
  0xd2   :  { %v3561_v59 = vld [vmem:[%s4722_s1 + $0x488] ss:$12 sps:$4 sm:$0xff]  }
  0xd3   :  { %3021 = vmatpush3.bf16.msra.mxu0 %v3516_v60  ;;  %v424_v60 = vsub.s32 0, %v4503_v55 }
  0xd4   :  { %3049 = vmatpush3.bf16.msra.mxu1 %v3517_v63  ;;  %3022 = vmatprep.subr.bf16.mxu0 %v3518_v0  ;;  %v3563_v63 = vld [vmem:[%s4722_s1 + $0x8f0] ss:$12 sps:$4 sm:$0xff]   ;;  %v428_v0 = vsub.s32 1, %v4503_v55 }
  0xd5   :  { %3050 = vmatprep.subr.bf16.mxu1 %v3519_v1  ;;  %v4531_v1 = vrot.slane %v4521_v61, %v424_v60 }
  0xd7   :  { %3023 = vmatpush3.bf16.msra.mxu0 %v3520_v2  ;;  %v3564_v2 = vld [vmem:[%s4722_s1 + $0x6b0] ss:$12 sps:$4 sm:$0xff]  }
  0xd8   :  { %3051 = vmatpush3.bf16.msra.mxu1 %v3521_v3  ;;  %3024 = vmatprep.subr.bf16.mxu0 %v3522_v4  ;;  %v3565_v3 = vld [vmem:[%s4722_s1 + $0x830] ss:$12 sps:$4 sm:$0xff]   ;;  %v3566_v4 = vld [vmem:[%s4722_s1 + $0x758] ss:$12 sps:$4 sm:$0xff]  }
  0xd9   :  { %3052 = vmatprep.subr.bf16.mxu1 %v3523_v5  ;;  %v3567_v5 = vld [vmem:[%s4722_s1 + $0x8d8] ss:$12 sps:$4 sm:$0xff]  }
  0xdb   :  { %3025 = vmatpush3.bf16.msra.mxu0 %v3524_v6  ;;  %v4546_v6 = vrot.slane %v4521_v61, %v428_v0 }
  0xdc   :  { %3053 = vmatpush3.bf16.msra.mxu1 %v3525_v7  ;;  %3026 = vmatprep.subr.bf16.mxu0 %v3526_v8 }
  0xdd   :  { %3054 = vmatprep.subr.bf16.mxu1 %v3527_v9  ;;  %v3600_v9 = vld [vmem:[%s4723_s0 + $0x10] ss:$48 sps:$4 sm:$0xff]  }
  0xdf   :  { %3027 = vmatpush3.bf16.msra.mxu0 %v3528_v10  ;;  %v3601_v10 = vld [vmem:[%s4723_s0 + $0x18] ss:$48 sps:$4 sm:$0xff]  }
  0xe0   :  { %3055 = vmatpush3.bf16.msra.mxu1 %v3529_v11  ;;  %3068 = vmatprep.subr.bf16.mxu0 %v3530_v12  ;;  %v3568_v12 = vld [vmem:[%s4722_s1 + $0x698] ss:$12 sps:$4 sm:$0xff]  }
  0xe1   :  { %3096 = vmatprep.subr.bf16.mxu1 %v3531_v13  ;;  %v3569_v13 = vld [vmem:[%s4722_s1 + $0x818] ss:$12 sps:$4 sm:$0xff]  }
  0xe2   :  { %2414 = vmatmul.mubr.bf16.vlgmr.msra.gmra.mxu0 %v3596_v19 }
  0xe3   :  { %2462 = vmatmul.mubr.bf16.vlgmr.msra.gmra.mxu1 %v3597_v20  ;;  %3069 = vmatpush3.bf16.msra.mxu0 %v3532_v14 }
  0xe4   :  { %3097 = vmatpush3.bf16.msra.mxu1 %v3533_v15  ;;  %3070 = vmatprep.subr.bf16.mxu0 %v3534_v16  ;;  %v3570_v16 = vld [vmem:[%s4722_s1 + $0x740] ss:$12 sps:$4 sm:$0xff]  }
  0xe5   :  { %3098 = vmatprep.subr.bf16.mxu1 %v3535_v17  ;;  %2421 = vmatprep.mubr.bf16.mxu0 %v3905_v28  ;;  %v3544_v28 = vld [vmem:[%s4722_s1 + $0x368] ss:$12 sps:$4 sm:$0xff]   ;;  %v3571_v17 = vld [vmem:[%s4722_s1 + $0x8c0] ss:$12 sps:$4 sm:$0xff]  }
  0xe6   :  { %2469 = vmatprep.mubr.bf16.mxu1 %v3907_v29  ;;  %v3545_v29 = vld [vmem:[%s4722_s1 + $0x4e8] ss:$12 sps:$4 sm:$0xff]  }
  0xe7   :  { %3071 = vmatpush3.bf16.msra.mxu0 %v3536_v18 }
  0xe8   :  { %3099 = vmatpush3.bf16.msra.mxu1 %v3537_v21  ;;  %3072 = vmatprep.subr.bf16.mxu0 %v3538_v24 }
  0xe9   :  { %3100 = vmatprep.subr.bf16.mxu1 %v3539_v25 }
  0xea   :  { %2422 = vmatmul.mubr.bf16.gmra.mxu0 %v3909_v30  ;;  %v3547_v30 = vld [vmem:[%s4722_s1 + $0x590] ss:$12 sps:$4 sm:$0xff]  }
  0xeb   :  { %2470 = vmatmul.mubr.bf16.gmra.mxu1 %v3911_v31  ;;  %3073 = vmatpush3.bf16.msra.mxu0 %v3540_v26  ;;  %v3598_v31 = vld [vmem:[%s4723_s0 + $0x14] ss:$48 sps:$4 sm:$0xff]   ;;  %v3572_v26 = vld [vmem:[%s4722_s1 + $0x680] ss:$12 sps:$4 sm:$0xff]  }
  0xec   :  { %3101 = vmatpush3.bf16.msra.mxu1 %v3541_v27  ;;  %3074 = vmatprep.subr.bf16.mxu0 %v3542_v32  ;;  %v3573_v27 = vld [vmem:[%s4722_s1 + $0x800] ss:$12 sps:$4 sm:$0xff]  }
  0xed   :  { %3102 = vmatprep.subr.bf16.mxu1 %v3543_v37  ;;  %2509 = vmatprep.mubr.bf16.mxu0 %v3598_v31  ;;  %v3577_v31 = vld [vmem:[%s4722_s1 + $0x7e8] ss:$12 sps:$4 sm:$0xff]  }
  0xee   :  { %2557 = vmatprep.mubr.bf16.mxu1 %v3599_v39  ;;  %v3602_v39 = vld [vmem:[%s4723_s0 + $0x24] ss:$48 sps:$4 sm:$0xff]  }
  0xef   :  { %3075 = vmatpush3.bf16.msra.mxu0 %v3544_v28 }
  0xf0   :  { %3103 = vmatpush3.bf16.msra.mxu1 %v3545_v29  ;;  %3076 = vmatprep.subr.bf16.mxu0 %v3546_v38 }
  0xf1   :  { %3104 = vmatprep.subr.bf16.mxu1 %v3547_v30  ;;  %v3576_v30 = vld [vmem:[%s4722_s1 + $0x668] ss:$12 sps:$4 sm:$0xff]  }
  0xf3   :  { %3077 = vmatpush3.bf16.msra.mxu0 %v3548_v40  ;;  %v3603_v40 = vld [vmem:[%s4723_s0 + $0x2c] ss:$48 sps:$4 sm:$0xff]  }
  0xf4   :  { %3105 = vmatpush3.bf16.msra.mxu1 %v3549_v41  ;;  %3078 = vmatprep.subr.bf16.mxu0 %v3550_v42  ;;  %v3580_v41 = vld [vmem:[%s4722_s1 + $0x650] ss:$12 sps:$4 sm:$0xff]  }
  0xf5   :  { %3106 = vmatprep.subr.bf16.mxu1 %v3551_v43  ;;  %v3581_v42 = vld [vmem:[%s4722_s1 + $0x7d0] ss:$12 sps:$4 sm:$0xff]   ;;  %v3582_v43 = vld [vmem:[%s4722_s1 + $0x6f8] ss:$12 sps:$4 sm:$0xff]  }
  0xf7   :  { %3079 = vmatpush3.bf16.msra.mxu0 %v3552_v44  ;;  %v3583_v44 = vld [vmem:[%s4722_s1 + $0x878] ss:$12 sps:$4 sm:$0xff]  }
  0xf8   :  { %3107 = vmatpush3.bf16.msra.mxu1 %v3553_v47  ;;  %3080 = vmatprep.subr.bf16.mxu0 %v3554_v49  ;;  %v3584_v47 = vld [vmem:[%s4722_s1 + $0x638] ss:$12 sps:$4 sm:$0xff]   ;;  %v3586_v49 = vld [vmem:[%s4722_s1 + $0x6e0] ss:$12 sps:$4 sm:$0xff]  }
  0xf9   :  { %3108 = vmatprep.subr.bf16.mxu1 %v3555_v50  ;;  %v3587_v50 = vld [vmem:[%s4722_s1 + $0x860] ss:$12 sps:$4 sm:$0xff]  }
  0xfb   :  { %3081 = vmatpush3.bf16.msra.mxu0 %v3556_v52 }
  0xfc   :  { %3109 = vmatpush3.bf16.msra.mxu1 %v3557_v54  ;;  %3082 = vmatprep.subr.bf16.mxu0 %v3558_v56 }
  0xfd   :  { %3110 = vmatprep.subr.bf16.mxu1 %v3559_v57  ;;  %v3588_v57 = vld [vmem:[%s4722_s1 + $0x620] ss:$12 sps:$4 sm:$0xff]  }
  0xff   :  { %3083 = vmatpush3.bf16.msra.mxu0 %v3560_v58  ;;  %v3589_v58 = vld [vmem:[%s4722_s1 + $0x7a0] ss:$12 sps:$4 sm:$0xff]  }
 0x100   :  { %3111 = vmatpush3.bf16.msra.mxu1 %v3561_v59  ;;  %3124 = vmatprep.subr.bf16.mxu0 %v3562_v62  ;;  %v3590_v62 = vld [vmem:[%s4722_s1 + $0x6c8] ss:$12 sps:$4 sm:$0xff]  }
 0x101   :  { %3152 = vmatprep.subr.bf16.mxu1 %v3563_v63  ;;  %v3591_v63 = vld [vmem:[%s4722_s1 + $0x848] ss:$12 sps:$4 sm:$0xff]  }
 0x102   :  { %v2109_v7 = vpop.f32.mrf.mxu0  ;;  %2510 = vmatmul.mubr.bf16.vlgmr.msra.gmra.mxu0 %v3600_v9 }
 0x103   :  { %v2160_v8 = vpop.f32.mrf.mxu1  ;;  %2558 = vmatmul.mubr.bf16.vlgmr.msra.gmra.mxu1 %v3601_v10  ;;  %v2110_v11 = vadd.f32 %v2109_v7, %v4531_v1  ;;  %3125 = vmatpush3.bf16.msra.mxu0 %v3564_v2  ;;  %v3593_v7 = vld [vmem:[%s4722_s1 + $0x788] ss:$12 sps:$4 sm:$0xff]  }
 0x104   :  { %3153 = vmatpush3.bf16.msra.mxu1 %v3565_v3  ;;  %v2111_v14 = vpop.f32.mrf.mxu0  ;;  %3126 = vmatprep.subr.bf16.mxu0 %v3566_v4 }
 0x105   :  { %v2162_v15 = vpop.f32.mrf.mxu1  ;;  %3154 = vmatprep.subr.bf16.mxu1 %v3567_v5  ;;  %v4567_v18 = vadd.f32 %v2160_v8, %v2110_v11  ;;  %v2112_v19 = vadd.f32 %v2111_v14, %v4546_v6  ;;  %2517 = vmatprep.mubr.bf16.mxu0 %v4079_v22  ;;  %v3574_v22 = vld [vmem:[%s4722_s1 + $0x728] ss:$12 sps:$4 sm:$0xff]  }
 0x106   :  { %2565 = vmatprep.mubr.bf16.mxu1 %v4081_v23  ;;  %v2113_v20 = vpop.f32.mrf.mxu0  ;;  %v3575_v23 = vld [vmem:[%s4722_s1 + $0x8a8] ss:$12 sps:$4 sm:$0xff]  }
 0x107   :  { %v2164_v21 = vpop.f32.mrf.mxu1  ;;  %v4572_v24 = vadd.f32 %v2162_v15, %v2112_v19  ;;  %v2114_v25 = vadd.f32 %v2113_v20, %v4531_v1  ;;  %3127 = vmatpush3.bf16.msra.mxu0 %v3568_v12  ;;  %v3592_v5 = vld [vmem:[%s4722_s1 + $0x608] ss:$12 sps:$4 sm:$0xff]  }
 0x108   :  { %3155 = vmatpush3.bf16.msra.mxu1 %v3569_v13  ;;  %v2115_v32 = vpop.f32.mrf.mxu0  ;;  %3128 = vmatprep.subr.bf16.mxu0 %v3570_v16 }
 0x109   :  { %3156 = vmatprep.subr.bf16.mxu1 %v3571_v17  ;;  %v4587_v37 = vadd.f32 %v2164_v21, %v2114_v25  ;;  %v2116_v28 = vadd.f32 %v2115_v32, %v4546_v6  ;;  %v2166_v29 = vpop.f32.mrf.mxu1 }
 0x10a   :  { %2518 = vmatmul.mubr.bf16.gmra.mxu0 %v4100_v33  ;;  %v3578_v33 = vld [vmem:[%s4722_s1 + $0x710] ss:$12 sps:$4 sm:$0xff]   ;;  %v2119_v52 = vpop.f32.mrf.mxu0 }
 0x10b   :  { %2566 = vmatmul.mubr.bf16.gmra.mxu1 %v4105_v35  ;;  %v4592_v38 = vadd.f32 %v2166_v29, %v2116_v28  ;;  %3129 = vmatpush3.bf16.msra.mxu0 %v3572_v26  ;;  %v3579_v35 = vld [vmem:[%s4722_s1 + $0x890] ss:$12 sps:$4 sm:$0xff]   ;;  %v2170_v54 = vpop.f32.mrf.mxu1  ;;  %v2120_v56 = vadd.f32 %v2119_v52, %v4531_v1  ;;  %v2669_v29 = vld [vmem:[%s4725_s3] sm:$0xff] }
 0x10c   :  { %3157 = vmatpush3.bf16.msra.mxu1 %v3573_v27  ;;  %3130 = vmatprep.subr.bf16.mxu0 %v3574_v22  ;;  %v2121_v59 = vpop.f32.mrf.mxu0 }
 0x10d   :  { %3158 = vmatprep.subr.bf16.mxu1 %v3575_v23  ;;  %2605 = vmatprep.mubr.bf16.mxu0 %v3602_v39  ;;  %v2172_v60 = vpop.f32.mrf.mxu1  ;;  %v2122_v0 = vadd.f32 %v2121_v59, %v4546_v6  ;;  %v2171_v1 = vadd.f32 %v2170_v54, %v2120_v56 }
 0x10e   :  { %2653 = vmatprep.mubr.bf16.mxu1 %v3603_v40  ;;  %v2123_v2 = vpop.f32.mrf.mxu0 }
 0x10f   :  { %3131 = vmatpush3.bf16.msra.mxu0 %v3576_v30  ;;  %v2174_v3 = vpop.f32.mrf.mxu1  ;;  %v2173_v4 = vadd.f32 %v2172_v60, %v2122_v0  ;;  %v2675_v2 = vld [vmem:[%s4725_s3 + $0x30] sm:$0xf] }
 0x110   :  { %3159 = vmatpush3.bf16.msra.mxu1 %v3577_v31  ;;  %3132 = vmatprep.subr.bf16.mxu0 %v3578_v33  ;;  %v2124_v8 = vpop.f32.mrf.mxu0 }
 0x111   :  { %3160 = vmatprep.subr.bf16.mxu1 %v3579_v35  ;;  %v2175_v9 = vpop.f32.mrf.mxu1  ;;  %v2676_v8 = vld [vmem:[%s4725_s3 + $0x38] sm:$0xf] }
 0x113   :  { %3133 = vmatpush3.bf16.msra.mxu0 %v3580_v41 }
 0x114   :  { %3161 = vmatpush3.bf16.msra.mxu1 %v3581_v42  ;;  %3134 = vmatprep.subr.bf16.mxu0 %v3582_v43 }
 0x115   :  { %3162 = vmatprep.subr.bf16.mxu1 %v3583_v44 }
 0x117   :  { %3135 = vmatpush3.bf16.msra.mxu0 %v3584_v47  ;;  %v2672_v47 = vld [vmem:[%s4725_s3 + $0x18] sm:$0xff] }
 0x118   :  { %3163 = vmatpush3.bf16.msra.mxu1 %v3585_v48  ;;  %3136 = vmatprep.subr.bf16.mxu0 %v3586_v49 }
 0x119   :  { %3164 = vmatprep.subr.bf16.mxu1 %v3587_v50 }
 0x11b   :  { %3137 = vmatpush3.bf16.msra.mxu0 %v3588_v57  ;;  %v2673_v57 = vld [vmem:[%s4725_s3 + $0x20] sm:$0xff] }
 0x11c   :  { %3165 = vmatpush3.bf16.msra.mxu1 %v3589_v58  ;;  %3138 = vmatprep.subr.bf16.mxu0 %v3590_v62 }
 0x11d   :  { %3166 = vmatprep.subr.bf16.mxu1 %v3591_v63 }
 0x11f   :  { %3139 = vmatpush3.bf16.msra.mxu0 %v3592_v5 }
 0x120   :  { %3167 = vmatpush3.bf16.msra.mxu1 %v3593_v7 }
 0x122   :  { %2606 = vmatmul.mubr.bf16.vlgmr.msra.gmra.mxu0 %v4277_v34 }
 0x123   :  { %2654 = vmatmul.mubr.bf16.vlgmr.msra.gmra.mxu1 %v4282_v36  ;;  %2613 = vmatprep.mubr.bf16.mxu0 %v4308_v45 }
 0x124   :  { %2661 = vmatprep.mubr.bf16.mxu1 %v4310_v46 }
 0x12a   :  { %2614 = vmatmul.mubr.bf16.gmra.mxu0 %v4328_v51 }
 0x12b   :  { %2662 = vmatmul.mubr.bf16.gmra.mxu1 %v4333_v53 }
 0x142   :  { %v2211_v6 = vpop.f32.mrf.mxu0 }
 0x143   :  { %v2262_v10 = vpop.f32.mrf.mxu1  ;;  %v2212_v51 = vadd.f32 %v2211_v6, %v4567_v18 }
 0x144   :  { %v2213_v11 = vpop.f32.mrf.mxu0 }
 0x145   :  { %v2264_v12 = vpop.f32.mrf.mxu1  ;;  %v2214_v53 = vadd.f32 %v2213_v11, %v4572_v24  ;;  %v2263_v25 = vadd.f32 %v2262_v10, %v2212_v51 }
 0x146   :  { %v2215_v13 = vpop.f32.mrf.mxu0 }
 0x147   :  { %v2266_v14 = vpop.f32.mrf.mxu1  ;;  %v2216_v26 = vadd.f32 %v2215_v13, %v4587_v37  ;;  %v2265_v23 = vadd.f32 %v2264_v12, %v2214_v53  ;;  %v2670_v37 = vld [vmem:[%s4725_s3 + $0x8] sm:$0xff] }
 0x148   :  { %v2217_v15 = vpop.f32.mrf.mxu0 }
 0x149   :  { %v2268_v16 = vpop.f32.mrf.mxu1  ;;  %v2218_v27 = vadd.f32 %v2217_v15, %v4592_v38  ;;  %v2267_v33 = vadd.f32 %v2266_v14, %v2216_v26 }
 0x14a   :  { %v2221_v17 = vpop.f32.mrf.mxu0 }
 0x14b   :  { %v2272_v34 = vpop.f32.mrf.mxu1  ;;  %v2222_v35 = vadd.f32 %v2221_v17, %v2171_v1  ;;  %v2269_v24 = vadd.f32 %v2268_v16, %v2218_v27 }
 0x14c   :  { %v2223_v19 = vpop.f32.mrf.mxu0 }
 0x14d   :  { %v2274_v36 = vpop.f32.mrf.mxu1  ;;  %v2224_v41 = vadd.f32 %v2223_v19, %v2173_v4  ;;  %v2273_v50 = vadd.f32 %v2272_v34, %v2222_v35 }
 0x14e   :  { %v2225_v20 = vpop.f32.mrf.mxu0 }
 0x14f   :  { %v2276_v45 = vpop.f32.mrf.mxu1  ;;  %v2275_v60 = vadd.f32 %v2274_v36, %v2224_v41 }
 0x150   :  { %v2226_v21 = vpop.f32.mrf.mxu0 }
 0x151   :  { %v2277_v46 = vpop.f32.mrf.mxu1 }
 0x182   :  { %v2313_v32 = vpop.f32.mrf.mxu0 }
 0x183   :  { %v2364_v22 = vpop.f32.mrf.mxu1  ;;  %v2314_v28 = vadd.f32 %v2313_v32, %v2263_v25 }
 0x184   :  { %v2315_v30 = vpop.f32.mrf.mxu0 }
 0x185   :  { %v2366_v31 = vpop.f32.mrf.mxu1  ;;  %v2365_v18 = vadd.f32 %v2364_v22, %v2314_v28  ;;  %v2316_v39 = vadd.f32 %v2315_v30, %v2265_v23 }
 0x186   :  { %v2317_v38 = vpop.f32.mrf.mxu0 }
 0x187   :  { %v2368_v40 = vpop.f32.mrf.mxu1  ;;  %v2678_v42 = vadd.f32 %v2669_v29, %v2365_v18  ;;  %v2367_v43 = vadd.f32 %v2366_v31, %v2316_v39  ;;  %v2318_v44 = vadd.f32 %v2317_v38, %v2267_v33 }
 0x188   :  { %v2319_v48 = vpop.f32.mrf.mxu0 }
 0x189   :  { %v2370_v49 = vpop.f32.mrf.mxu1  ;;  %2687 = vst [vmem:[%s4726_s4] sm:$0xff] %v2678_v42  ;;  %v2679_v52 = vadd.f32 %v2670_v37, %v2367_v43  ;;  %v2369_v54 = vadd.f32 %v2368_v40, %v2318_v44  ;;  %v2320_v56 = vadd.f32 %v2319_v48, %v2269_v24  ;;  %v432_v43 = vsub.s32 2, %v4503_v55 }
 0x18a   :  { %v2323_v58 = vpop.f32.mrf.mxu0 }
 0x18b   :  { %v2374_v59 = vpop.f32.mrf.mxu1  ;;  %2688 = vst [vmem:[%s4726_s4 + $0x8] sm:$0xff] %v2679_v52  ;;  %v2681_v62 = vadd.f32 %v2672_v47, %v2369_v54  ;;  %v2371_v63 = vadd.f32 %v2370_v49, %v2320_v56  ;;  %v2324_v0 = vadd.f32 %v2323_v58, %v2273_v50  ;;  %v433_v44 = vrot.slane %v4521_v61, %v432_v43 }
 0x18c   :  { %v2325_v1 = vpop.f32.mrf.mxu0 }
 0x18d   :  { %v2376_v3 = vpop.f32.mrf.mxu1  ;;  %2690 = vst [vmem:[%s4726_s4 + $0x18] sm:$0xff] %v2681_v62  ;;  %v2682_v4 = vadd.f32 %v2673_v57, %v2371_v63  ;;  %v2326_v5 = vadd.f32 %v2325_v1, %v2275_v60  ;;  %v2375_v7 = vadd.f32 %v2374_v59, %v2324_v0 }
 0x18e   :  { %v2327_v9 = vpop.f32.mrf.mxu0 }
 0x18f   :  { %v2378_v6 = vpop.f32.mrf.mxu1  ;;  %2691 = vst [vmem:[%s4726_s4 + $0x20] sm:$0xff] %v2682_v4  ;;  %v2684_v10 = vadd.f32 %v2675_v2, %v2375_v7  ;;  %v2377_v11 = vadd.f32 %v2376_v3, %v2326_v5 }
 0x190   :  { %v2328_v12 = vpop.f32.mrf.mxu0 }
 0x191   :  { %v2379_v13 = vpop.f32.mrf.mxu1  ;;  %2693 = vst [vmem:[%s4726_s4 + $0x30] sm:$0xf] %v2684_v10  ;;  %v2685_v14 = vadd.f32 %v2676_v8, %v2377_v11 }
 0x193   :  { %2694 = vst [vmem:[%s4726_s4 + $0x38] sm:$0xf] %v2685_v14 }
 0x1a2   :  { %v3028_v15 = vpop.f32.mrf.mxu0 }
 0x1a3   :  { %v3056_v16 = vpop.f32.mrf.mxu1 }
 0x1a4   :  { %v3029_v17 = vpop.f32.mrf.mxu0 }
 0x1a5   :  { %v3057_v34 = vpop.f32.mrf.mxu1  ;;  %v3030_v47 = vadd.f32 %v3029_v17, %v3028_v15  ;;  %v2671_v15 = vld [vmem:[%s4725_s3 + $0x10] sm:$0xff] }
 0x1a6   :  { %v3031_v19 = vpop.f32.mrf.mxu0  ;;  %v3058_v50 = vadd.f32 %v3057_v34, %v3056_v16 }
 0x1a7   :  { %v3059_v36 = vpop.f32.mrf.mxu1  ;;  %v2416_v49 = vadd.f32 %v3030_v47, %v433_v44 }
 0x1a8   :  { %v3032_v20 = vpop.f32.mrf.mxu0 }
 0x1a9   :  { %v3060_v45 = vpop.f32.mrf.mxu1  ;;  %v3033_v48 = vadd.f32 %v3032_v20, %v3031_v19  ;;  %v2464_v56 = vadd.f32 %v3058_v50, %v2416_v49 }
 0x1aa   :  { %v3034_v21 = vpop.f32.mrf.mxu0  ;;  %v3061_v58 = vadd.f32 %v3060_v45, %v3059_v36 }
 0x1ab   :  { %v3062_v46 = vpop.f32.mrf.mxu1  ;;  %v2419_v54 = vadd.f32 %v3033_v48, %v433_v44 }
 0x1ac   :  { %v3035_v51 = vpop.f32.mrf.mxu0 }
 0x1ad   :  { %v3063_v53 = vpop.f32.mrf.mxu1  ;;  %v3036_v57 = vadd.f32 %v3035_v51, %v3034_v21  ;;  %v2467_v63 = vadd.f32 %v3061_v58, %v2419_v54 }
 0x1ae   :  { %v3037_v25 = vpop.f32.mrf.mxu0  ;;  %v3064_v3 = vadd.f32 %v3063_v53, %v3062_v46 }
 0x1af   :  { %v3065_v26 = vpop.f32.mrf.mxu1  ;;  %v2424_v2 = vadd.f32 %v3036_v57, %v433_v44  ;;  %v2674_v25 = vld [vmem:[%s4725_s3 + $0x28] sm:$0xff] }
 0x1b0   :  { %v3038_v27 = vpop.f32.mrf.mxu0 }
 0x1b1   :  { %v3066_v32 = vpop.f32.mrf.mxu1  ;;  %v2472_v11 = vadd.f32 %v3064_v3, %v2424_v2 }
 0x1c2   :  { %v3084_v22 = vpop.f32.mrf.mxu0 }
 0x1c3   :  { %v3112_v23 = vpop.f32.mrf.mxu1 }
 0x1c4   :  { %v3085_v28 = vpop.f32.mrf.mxu0 }
 0x1c5   :  { %v3113_v29 = vpop.f32.mrf.mxu1  ;;  %v3086_v52 = vadd.f32 %v3085_v28, %v3084_v22 }
 0x1c6   :  { %v3087_v30 = vpop.f32.mrf.mxu0  ;;  %v3114_v62 = vadd.f32 %v3113_v29, %v3112_v23 }
 0x1c7   :  { %v3115_v31 = vpop.f32.mrf.mxu1  ;;  %v2512_v60 = vadd.f32 %v3086_v52, %v2464_v56 }
 0x1c8   :  { %v3088_v33 = vpop.f32.mrf.mxu0 }
 0x1c9   :  { %v3116_v35 = vpop.f32.mrf.mxu1  ;;  %v3089_v59 = vadd.f32 %v3088_v33, %v3087_v30  ;;  %v2560_v5 = vadd.f32 %v3114_v62, %v2512_v60 }
 0x1ca   :  { %v3090_v18 = vpop.f32.mrf.mxu0  ;;  %v3117_v9 = vadd.f32 %v3116_v35, %v3115_v31  ;;  %v2677_v35 = vld [vmem:[%s4725_s3 + $0x40] sm:$0xf] }
 0x1cb   :  { %v3118_v39 = vpop.f32.mrf.mxu1  ;;  %v2515_v55 = vadd.f32 %v3089_v59, %v2467_v63 }
 0x1cc   :  { %v3091_v24 = vpop.f32.mrf.mxu0 }
 0x1cd   :  { %v3119_v37 = vpop.f32.mrf.mxu1  ;;  %v3092_v7 = vadd.f32 %v3091_v24, %v3090_v18  ;;  %v2563_v14 = vadd.f32 %v3117_v9, %v2515_v55 }
 0x1ce   :  { %v3093_v38 = vpop.f32.mrf.mxu0  ;;  %v3120_v19 = vadd.f32 %v3119_v37, %v3118_v39 }
 0x1cf   :  { %v3121_v40 = vpop.f32.mrf.mxu1  ;;  %v2520_v34 = vadd.f32 %v3092_v7, %v2472_v11 }
 0x1d0   :  { %v3094_v41 = vpop.f32.mrf.mxu0 }
 0x1d1   :  { %v3122_v42 = vpop.f32.mrf.mxu1  ;;  %v2568_v32 = vadd.f32 %v3120_v19, %v2520_v34 }
 0x1e2   :  { %v3140_v0 = vpop.f32.mrf.mxu0 }
 0x1e3   :  { %v3168_v1 = vpop.f32.mrf.mxu1 }
 0x1e4   :  { %v3141_v4 = vpop.f32.mrf.mxu0 }
 0x1e5   :  { %v3169_v61 = vpop.f32.mrf.mxu1  ;;  %v3142_v8 = vadd.f32 %v3141_v4, %v3140_v0 }
 0x1e6   :  { %v3143_v6 = vpop.f32.mrf.mxu0  ;;  %v3170_v13 = vadd.f32 %v3169_v61, %v3168_v1 }
 0x1e7   :  { %v3171_v10 = vpop.f32.mrf.mxu1  ;;  %v2608_v12 = vadd.f32 %v3142_v8, %v2560_v5 }
 0x1e8   :  { %v3144_v16 = vpop.f32.mrf.mxu0 }
 0x1e9   :  { %v3172_v17 = vpop.f32.mrf.mxu1  ;;  %v2656_v36 = vadd.f32 %v3170_v13, %v2608_v12  ;;  %v3145_v20 = vadd.f32 %v3144_v16, %v3143_v6 }
 0x1ea   :  { %v3146_v45 = vpop.f32.mrf.mxu0  ;;  %v3173_v53 = vadd.f32 %v3172_v17, %v3171_v10 }
 0x1eb   :  { %v3174_v21 = vpop.f32.mrf.mxu1  ;;  %v2680_v46 = vadd.f32 %v2671_v15, %v2656_v36  ;;  %v2611_v51 = vadd.f32 %v3145_v20, %v2563_v14 }
 0x1ec   :  { %v3147_v26 = vpop.f32.mrf.mxu0 }
 0x1ed   :  { %v3175_v27 = vpop.f32.mrf.mxu1  ;;  %2689 = vst [vmem:[%s4726_s4 + $0x10] sm:$0xff] %v2680_v46  ;;  %v2659_v22 = vadd.f32 %v3173_v53, %v2611_v51  ;;  %v3148_v23 = vadd.f32 %v3147_v26, %v3146_v45 }
 0x1ee   :  { %v3149_v28 = vpop.f32.mrf.mxu0  ;;  %v3176_v33 = vadd.f32 %v3175_v27, %v3174_v21 }
 0x1ef   :  { %v3177_v29 = vpop.f32.mrf.mxu1  ;;  %v2683_v30 = vadd.f32 %v2674_v25, %v2659_v22  ;;  %v2616_v31 = vadd.f32 %v3148_v23, %v2568_v32 }
 0x1f0   :  { %v3150_v18 = vpop.f32.mrf.mxu0 }
 0x1f1   :  { %v3178_v39 = vpop.f32.mrf.mxu1  ;;  %2692 = vst [vmem:[%s4726_s4 + $0x28] sm:$0xff] %v2683_v30  ;;  %v2664_v24 = vadd.f32 %v3176_v33, %v2616_v31 }
 0x1f3   :  { %v2686_v37 = vadd.f32 %v2677_v35, %v2664_v24 }
 0x1f5   :  { %2695 = vst [vmem:[%s4726_s4 + $0x40] sm:$0xf] %v2686_v37 }

// kernel: model_forward.65
= control target key start
LH: loop header
LB: loop body
LE: loop exit
PB: predicated region body
PF: predicated region fallthrough
CT: control target
= control target key end

     0   :  { %vm38_vm0 = vcmask 1043456   ;;  %s6576_s0 = inlined_call_operand.vmem [shape: f32[20,384], index: 0, kind: input, shape index: {}]   ;;  %s6577_s3 = inlined_call_operand.vmem [shape: bf16[384,1536], index: 3, kind: input, shape index: {}]   ;;  %s6578_s1 = inlined_call_operand.vmem [shape: f32[1,384], index: 1, kind: input, shape index: {}]   ;;  %s6579_s2 = inlined_call_operand.vmem [shape: f32[1,384], index: 2, kind: input, shape index: {}]   ;;  %s6580_s4 = inlined_call_operand.vmem [shape: f32[1,1536], index: 4, kind: input, shape index: {}]   ;;  %s6581_s5 = inlined_call_operand.vmem [shape: bf16[20,1536], index: 5, kind: output, shape index: {}]  }
   0x1   :  { %v4621_v0 = vld [vmem:[%s6576_s0] sm:$0xff]  ;;  %v4626_v1 = vld [vmem:[%s6576_s0 + $0x8] sm:$0xff]  ;;  %v4631_v2 = vld [vmem:[%s6576_s0 + $0x10] sm:$0xff] }
   0x2   :  { %v30_v3 = vadd.f32 %v4626_v1, %v4621_v0  ;;  %v4638_v4 = vld [vmem:[%s6576_s0 + $0x30] sm:$0xf]  ;;  %v4643_v5 = vld [vmem:[%s6576_s0 + $0x38] sm:$0xf]  ;;  %v4648_v6 = vld [vmem:[%s6576_s0 + $0x40] sm:$0xf] }
   0x3   :  { %v39_v7 = vsel %vm38_vm0, %v4638_v4, 0.0  ;;  %v40_v8 = vsel %vm38_vm0, %v4643_v5, 0.0  ;;  %v42_v9 = vsel %vm38_vm0, %v4648_v6, 0.0  ;;  %v4659_v10 = vld [vmem:[%s6576_s0 + $0x18] sm:$0xff]  ;;  %v4664_v11 = vld [vmem:[%s6576_s0 + $0x20] sm:$0xff]  ;;  %v4669_v12 = vld [vmem:[%s6576_s0 + $0x28] sm:$0xff] }
   0x4   :  { %v31_v13 = vadd.f32 %v30_v3, %v4631_v2  ;;  %v41_v14 = vadd.f32 %v40_v8, %v39_v7  ;;  %v34_v15 = vadd.f32 %v4664_v11, %v4659_v10  ;;  %v4003_v18 = vld [vmem:[%s6577_s3 + $0x2a4] ss:$48 sps:$4 sm:$0xff]   ;;  %v4005_v19 = vld [vmem:[%s6577_s3 + $0x2a0] ss:$48 sps:$4 sm:$0xff]  }
   0x5   :  { %1951 = vmatprep.subr.bf16.mxu0 %v4003_v18  ;;  %v4006_v20 = vld [vmem:[%s6577_s3 + $0x244] ss:$48 sps:$4 sm:$0xff]   ;;  %v4008_v21 = vld [vmem:[%s6577_s3 + $0x240] ss:$48 sps:$4 sm:$0xff]  }
   0x6   :  { %32 = vadd.xlane.f32.xlu0 %v31_v13  ;;  %v43_v16 = vadd.f32 %v42_v9, %v41_v14  ;;  %v35_v17 = vadd.f32 %v34_v15, %v4669_v12  ;;  %1952 = vmatpush1.bf16.msra.mxu0 %v4005_v19  ;;  %v4009_v22 = vld [vmem:[%s6577_s3 + $0x1e4] ss:$48 sps:$4 sm:$0xff]   ;;  %v4011_v23 = vld [vmem:[%s6577_s3 + $0x1e0] ss:$48 sps:$4 sm:$0xff]  }
   0x7   :  { %1953 = vmatprep.subr.bf16.mxu0 %v4006_v20  ;;  %v4012_v24 = vld [vmem:[%s6577_s3 + $0x184] ss:$48 sps:$4 sm:$0xff]   ;;  %v4014_v25 = vld [vmem:[%s6577_s3 + $0x180] ss:$48 sps:$4 sm:$0xff]  }
   0x8   :  { %44 = vadd.xlane.f32.xlu1 %v43_v16  ;;  %v4027_v26 = vld [vmem:[%s6577_s3 + $0x8a4] ss:$48 sps:$4 sm:$0xff]   ;;  %v4031_v28 = vld [vmem:[%s6577_s3 + $0x8a0] ss:$48 sps:$4 sm:$0xff]  }
   0x9   :  { %v4015_v27 = vld [vmem:[%s6577_s3 + $0x124] ss:$48 sps:$4 sm:$0xff]   ;;  %v4017_v29 = vld [vmem:[%s6577_s3 + $0x120] ss:$48 sps:$4 sm:$0xff]   ;;  %2002 = vmatprep.subr.bf16.mxu1 %v4027_v26 }
   0xa   :  { %36 = vadd.xlane.f32.xlu0 %v35_v17  ;;  %1954 = vmatpush1.bf16.msra.mxu0 %v4008_v21  ;;  %v4018_v30 = vld [vmem:[%s6577_s3 + $0xc4] ss:$48 sps:$4 sm:$0xff]   ;;  %v4020_v31 = vld [vmem:[%s6577_s3 + $0xc0] ss:$48 sps:$4 sm:$0xff]  }
   0xb   :  { %1955 = vmatprep.subr.bf16.mxu0 %v4009_v22  ;;  %2003 = vmatpush1.bf16.msra.mxu1 %v4031_v28  ;;  %v4021_v32 = vld [vmem:[%s6577_s3 + $0x64] ss:$48 sps:$4 sm:$0xff]   ;;  %v4023_v33 = vld [vmem:[%s6577_s3 + $0x60] ss:$48 sps:$4 sm:$0xff]  }
   0xc   :  { %v4024_v34 = vld [vmem:[%s6577_s3 + $0x4] ss:$48 sps:$4 sm:$0xff]   ;;  %v4026_v35 = vld [vmem:[%s6577_s3] ss:$48 sps:$4 sm:$0xff]  }
   0xd   :  { %v4029_v36 = vld [vmem:[%s6577_s3 + $0x5a4] ss:$48 sps:$4 sm:$0xff]   ;;  %v4032_v37 = vld [vmem:[%s6577_s3 + $0x5a0] ss:$48 sps:$4 sm:$0xff]  }
   0xe   :  { %1956 = vmatpush1.bf16.msra.mxu0 %v4011_v23  ;;  %v4033_v7 = vld [vmem:[%s6577_s3 + $0x844] ss:$48 sps:$4 sm:$0xff]   ;;  %v4037_v9 = vld [vmem:[%s6577_s3 + $0x840] ss:$48 sps:$4 sm:$0xff]  }
   0xf   :  { %1957 = vmatprep.subr.bf16.mxu0 %v4012_v24  ;;  %v4035_v8 = vld [vmem:[%s6577_s3 + $0x544] ss:$48 sps:$4 sm:$0xff]   ;;  %2004 = vmatprep.subr.bf16.mxu1 %v4033_v7  ;;  %v4043_v13 = vld [vmem:[%s6577_s3 + $0x7e0] ss:$48 sps:$4 sm:$0xff]  }
  0x10   :  { %2005 = vmatpush1.bf16.msra.mxu1 %v4037_v9  ;;  %v4044_v14 = vld [vmem:[%s6577_s3 + $0x4e0] ss:$48 sps:$4 sm:$0xff]   ;;  %v4045_v15 = vld [vmem:[%s6577_s3 + $0x784] ss:$48 sps:$4 sm:$0xff]  }
  0x11   :  { %v4047_v16 = vld [vmem:[%s6577_s3 + $0x484] ss:$48 sps:$4 sm:$0xff]   ;;  %v4049_v17 = vld [vmem:[%s6577_s3 + $0x780] ss:$48 sps:$4 sm:$0xff]  }
  0x12   :  { %1958 = vmatpush1.bf16.msra.mxu0 %v4014_v25  ;;  %v4050_v18 = vld [vmem:[%s6577_s3 + $0x480] ss:$48 sps:$4 sm:$0xff]   ;;  %v4051_v19 = vld [vmem:[%s6577_s3 + $0x724] ss:$48 sps:$4 sm:$0xff]  }
  0x13   :  { %1959 = vmatprep.subr.bf16.mxu0 %v4015_v27  ;;  %v4053_v20 = vld [vmem:[%s6577_s3 + $0x424] ss:$48 sps:$4 sm:$0xff]   ;;  %v4055_v21 = vld [vmem:[%s6577_s3 + $0x720] ss:$48 sps:$4 sm:$0xff]  }
  0x14   :  { %v4056_v22 = vld [vmem:[%s6577_s3 + $0x420] ss:$48 sps:$4 sm:$0xff]   ;;  %v4057_v23 = vld [vmem:[%s6577_s3 + $0x6c4] ss:$48 sps:$4 sm:$0xff]  }
  0x15   :  { %v4059_v24 = vld [vmem:[%s6577_s3 + $0x3c4] ss:$48 sps:$4 sm:$0xff]   ;;  %v4061_v25 = vld [vmem:[%s6577_s3 + $0x6c0] ss:$48 sps:$4 sm:$0xff]  }
  0x16   :  { %1960 = vmatpush1.bf16.msra.mxu0 %v4017_v29  ;;  %v4062_v26 = vld [vmem:[%s6577_s3 + $0x3c0] ss:$48 sps:$4 sm:$0xff]   ;;  %v4063_v27 = vld [vmem:[%s6577_s3 + $0x664] ss:$48 sps:$4 sm:$0xff]   ;;  %v4586_v29 = vmov 0  }
  0x17   :  { %1961 = vmatprep.subr.bf16.mxu0 %v4018_v30  ;;  %v4065_v28 = vld [vmem:[%s6577_s3 + $0x364] ss:$48 sps:$4 sm:$0xff]   ;;  %2034 = vmatprep.mubr.bf16.mxu1 %v4586_v29  ;;  %v4067_v30 = vld [vmem:[%s6577_s3 + $0x660] ss:$48 sps:$4 sm:$0xff]  }
  0x1a   :  { %1962 = vmatpush1.bf16.msra.mxu0 %v4020_v31  ;;  %v4068_v31 = vld [vmem:[%s6577_s3 + $0x360] ss:$48 sps:$4 sm:$0xff]  }
  0x1b   :  { %1963 = vmatprep.subr.bf16.mxu0 %v4021_v32  ;;  %v4069_v32 = vld [vmem:[%s6577_s3 + $0x604] ss:$48 sps:$4 sm:$0xff]  }
  0x1e   :  { %1964 = vmatpush1.bf16.msra.mxu0 %v4023_v33  ;;  %v4071_v33 = vld [vmem:[%s6577_s3 + $0x304] ss:$48 sps:$4 sm:$0xff]  }
  0x1f   :  { %1965 = vmatprep.subr.bf16.mxu0 %v4024_v34  ;;  %v4073_v34 = vld [vmem:[%s6577_s3 + $0x600] ss:$48 sps:$4 sm:$0xff]  }
  0x22   :  { %1966 = vmatpush1.bf16.msra.mxu0 %v4026_v35  ;;  %v4074_v35 = vld [vmem:[%s6577_s3 + $0x300] ss:$48 sps:$4 sm:$0xff]  }
  0x23   :  { %1967 = vmatprep.subr.bf16.mxu0 %v4029_v36  ;;  %v4077_v36 = vld [vmem:[%s6577_s3 + $0x2ac] ss:$48 sps:$4 sm:$0xff]  }
  0x26   :  { %1968 = vmatpush2.bf16.msra.mxu0 %v4032_v37  ;;  %v4080_v37 = vld [vmem:[%s6577_s3 + $0x8ac] ss:$48 sps:$4 sm:$0xff]  }
  0x27   :  { %1969 = vmatprep.subr.bf16.mxu0 %v4035_v8 }
  0x8f   :  { %v33_v38 = vpop.xlane.xlu0 %32 }
  0x90   :  { %v47_v39 = vmul.f32 0.0026041667, %v33_v38 }
  0x91   :  { %v45_v40 = vpop.xlane.xlu1 %44 }
  0x92   :  { %v4736_v41 = vsub.f32 %v4621_v0, %v47_v39  ;;  %v4739_v42 = vsub.f32 %v4626_v1, %v47_v39  ;;  %v49_v43 = vmul.f32 0.0026041667, %v45_v40  ;;  %v4742_v44 = vsub.f32 %v4631_v2, %v47_v39 }
  0x93   :  { %v37_v45 = vpop.xlane.xlu0 %36 }
  0x94   :  { %v4745_v46 = vsub.f32 %v4638_v4, %v49_v43  ;;  %v4748_v47 = vsub.f32 %v4643_v5, %v49_v43  ;;  %v4751_v48 = vsub.f32 %v4648_v6, %v49_v43  ;;  %v48_v49 = vmul.f32 0.0026041667, %v37_v45 }
  0x95   :  { %v59_v50 = vmul.f32 %v4736_v41, %v4736_v41  ;;  %v60_v51 = vmul.f32 %v4739_v42, %v4739_v42  ;;  %v61_v56 = vmul.f32 %v4742_v44, %v4742_v44 }
  0x96   :  { %v4758_v52 = vsub.f32 %v4659_v10, %v48_v49  ;;  %v4761_v53 = vsub.f32 %v4664_v11, %v48_v49  ;;  %v4764_v54 = vsub.f32 %v4669_v12, %v48_v49  ;;  %v65_v55 = vmul.f32 %v4745_v46, %v4745_v46  ;;  %v4038_v10 = vld [vmem:[%s6577_s3 + $0x540] ss:$48 sps:$4 sm:$0xff]   ;;  %v4039_v11 = vld [vmem:[%s6577_s3 + $0x7e4] ss:$48 sps:$4 sm:$0xff]  }
  0x97   :  { %v68_v57 = vadd.f32 %v60_v51, %v59_v50  ;;  %v66_v58 = vmul.f32 %v4748_v47, %v4748_v47  ;;  %v67_v59 = vmul.f32 %v4751_v48, %v4751_v48  ;;  %1970 = vmatpush2.bf16.msra.mxu0 %v4038_v10  ;;  %v4041_v12 = vld [vmem:[%s6577_s3 + $0x4e4] ss:$48 sps:$4 sm:$0xff]   ;;  %2006 = vmatprep.subr.bf16.mxu1 %v4039_v11  ;;  %v103_v51 = vlaneseq }
  0x98   :  { %v76_v60 = vsel %vm38_vm0, %v65_v55, 0.0  ;;  %v62_v61 = vmul.f32 %v4758_v52, %v4758_v52  ;;  %v63_v62 = vmul.f32 %v4761_v53, %v4761_v53  ;;  %v64_v3 = vmul.f32 %v4764_v54, %v4764_v54  ;;  %1971 = vmatprep.subr.bf16.mxu0 %v4041_v12  ;;  %2007 = vmatpush1.bf16.msra.mxu1 %v4043_v13 }
  0x99   :  { %v69_v63 = vadd.f32 %v68_v57, %v61_v56  ;;  %v77_v0 = vsel %vm38_vm0, %v66_v58, 0.0  ;;  %v79_v1 = vsel %vm38_vm0, %v67_v59, 0.0  ;;  %2008 = vmatprep.subr.bf16.mxu1 %v4045_v15  ;;  %v4874_v57 = vshrl.u32 %v103_v51, 7  ;;  %v4093_v51 = vld [vmem:[%s6577_s3 + $0x188] ss:$48 sps:$4 sm:$0xff]  }
  0x9a   :  { %v78_v2 = vadd.f32 %v77_v0, %v76_v60  ;;  %v72_v4 = vadd.f32 %v63_v62, %v62_v61  ;;  %v101_v60 = vld [vmem:[%s6578_s1] sm:$0x7] }
  0x9b   :  { %70 = vadd.xlane.f32.xlu1 %v69_v63  ;;  %1972 = vmatpush2.bf16.msra.mxu0 %v4044_v14  ;;  %v4877_v58 = vsub.s32 1, %v4874_v57  ;;  %v4880_v59 = vsub.s32 2, %v4874_v57  ;;  %v4886_v61 = vsub.s32 0, %v4874_v57  ;;  %v127_v63 = vld [vmem:[%s6579_s2] sm:$0x7] }
  0x9c   :  { %v80_v5 = vadd.f32 %v79_v1, %v78_v2  ;;  %v73_v6 = vadd.f32 %v72_v4, %v64_v3  ;;  %1973 = vmatprep.subr.bf16.mxu0 %v4047_v16  ;;  %2009 = vmatpush1.bf16.msra.mxu1 %v4049_v17 }
  0x9d   :  { %2010 = vmatprep.subr.bf16.mxu1 %v4051_v19  ;;  %v110_v62 = vrot.slane %v101_v60, %v4877_v58  ;;  %v114_v0 = vrot.slane %v101_v60, %v4880_v59  ;;  %v106_v2 = vrot.slane %v101_v60, %v4886_v61  ;;  %v140_v10 = vrot.slane %v127_v63, %v4880_v59  ;;  %v4104_v60 = vld [vmem:[%s6577_s3 + $0x72c] ss:$48 sps:$4 sm:$0xff]  }
  0x9e   :  { %74 = vadd.xlane.f32.xlu0 %v73_v6  ;;  %v136_v6 = vrot.slane %v127_v63, %v4877_v58  ;;  %v132_v11 = vrot.slane %v127_v63, %v4886_v61  ;;  %v4102_v63 = vld [vmem:[%s6577_s3 + $0x728] ss:$48 sps:$4 sm:$0xff]  }
  0x9f   :  { %81 = vadd.xlane.f32.xlu1 %v80_v5  ;;  %1974 = vmatpush2.bf16.msra.mxu0 %v4050_v18 }
  0xa0   :  { %1975 = vmatprep.subr.bf16.mxu0 %v4053_v20  ;;  %2011 = vmatpush1.bf16.msra.mxu1 %v4055_v21 }
  0xa1   :  { %2012 = vmatprep.subr.bf16.mxu1 %v4057_v23 }
  0xa3   :  { %1976 = vmatpush2.bf16.msra.mxu0 %v4056_v22 }
  0xa4   :  { %1977 = vmatprep.subr.bf16.mxu0 %v4059_v24  ;;  %2013 = vmatpush1.bf16.msra.mxu1 %v4061_v25 }
  0xa5   :  { %2014 = vmatprep.subr.bf16.mxu1 %v4063_v27 }
  0xa7   :  { %1978 = vmatpush2.bf16.msra.mxu0 %v4062_v26 }
  0xa8   :  { %1979 = vmatprep.subr.bf16.mxu0 %v4065_v28  ;;  %2015 = vmatpush1.bf16.msra.mxu1 %v4067_v30  ;;  %v4083_v28 = vld [vmem:[%s6577_s3 + $0x24c] ss:$48 sps:$4 sm:$0xff]  }
  0xa9   :  { %2016 = vmatprep.subr.bf16.mxu1 %v4069_v32  ;;  %v4086_v30 = vld [vmem:[%s6577_s3 + $0x84c] ss:$48 sps:$4 sm:$0xff]  }
  0xab   :  { %1980 = vmatpush2.bf16.msra.mxu0 %v4068_v31 }
  0xac   :  { %1981 = vmatprep.subr.bf16.mxu0 %v4071_v33  ;;  %2017 = vmatpush1.bf16.msra.mxu1 %v4073_v34  ;;  %v4081_v33 = vld [vmem:[%s6577_s3 + $0x248] ss:$48 sps:$4 sm:$0xff]  }
  0xad   :  { %2053 = vmatprep.subr.bf16.mxu1 %v4077_v36  ;;  %v4084_v34 = vld [vmem:[%s6577_s3 + $0x848] ss:$48 sps:$4 sm:$0xff]  }
  0xaf   :  { %1982 = vmatpush2.bf16.msra.mxu0 %v4074_v35  ;;  %v4089_v35 = vld [vmem:[%s6577_s3 + $0x1ec] ss:$48 sps:$4 sm:$0xff]  }
  0xb0   :  { %2104 = vmatprep.subr.bf16.mxu0 %v4080_v37  ;;  %v4092_v37 = vld [vmem:[%s6577_s3 + $0x7ec] ss:$48 sps:$4 sm:$0xff]  }
 0x124   :  { %v71_v38 = vpop.xlane.xlu1 %70 }
 0x125   :  { %v83_v39 = vmul.f32 0.0026041667, %v71_v38 }
 0x127   :  { %v86_v40 = vadd.f32 1e-06, %v83_v39  ;;  %v75_v43 = vpop.xlane.xlu0 %74  ;;  %v4087_v39 = vld [vmem:[%s6577_s3 + $0x1e8] ss:$48 sps:$4 sm:$0xff]  }
 0x128   :  { %v82_v45 = vpop.xlane.xlu1 %81  ;;  %v84_v49 = vmul.f32 0.0026041667, %v75_v43  ;;  %v4090_v43 = vld [vmem:[%s6577_s3 + $0x7e8] ss:$48 sps:$4 sm:$0xff]  }
 0x129   :  { %4435 = vrsqrt.f32 %v86_v40  ;;  %v85_v50 = vmul.f32 0.0026041667, %v82_v45 }
 0x12a   :  { %v87_v55 = vadd.f32 1e-06, %v84_v49  ;;  %v4095_v49 = vld [vmem:[%s6577_s3 + $0x18c] ss:$48 sps:$4 sm:$0xff]  }
 0x12b   :  { %v88_v56 = vadd.f32 1e-06, %v85_v50  ;;  %v4098_v50 = vld [vmem:[%s6577_s3 + $0x78c] ss:$48 sps:$4 sm:$0xff]  }
 0x12c   :  { %4437 = vrsqrt.f32 %v87_v55  ;;  %v4096_v55 = vld [vmem:[%s6577_s3 + $0x788] ss:$48 sps:$4 sm:$0xff]  }
 0x12d   :  { %4439 = vrsqrt.f32 %v88_v56  ;;  %v4101_v56 = vld [vmem:[%s6577_s3 + $0x12c] ss:$48 sps:$4 sm:$0xff]  }
 0x136   :  { %v4436_v1 = vpop.eup %4435 }
 0x137   :  { %v93_v3 = vmul.f32 %v4436_v1, %v4739_v42  ;;  %v94_v4 = vmul.f32 %v4436_v1, %v4742_v44  ;;  %v92_v5 = vmul.f32 %v4436_v1, %v4736_v41  ;;  %v4110_v1 = vld [vmem:[%s6577_s3 + $0x6cc] ss:$48 sps:$4 sm:$0xff]  }
 0x139   :  { %v4438_v7 = vpop.eup %4437  ;;  %v119_v8 = vmul.f32 %v110_v62, %v93_v3  ;;  %v120_v9 = vmul.f32 %v114_v0, %v94_v4  ;;  %v118_v15 = vmul.f32 %v106_v2, %v92_v5  ;;  %v4108_v3 = vld [vmem:[%s6577_s3 + $0x6c8] ss:$48 sps:$4 sm:$0xff]   ;;  %v4113_v4 = vld [vmem:[%s6577_s3 + $0x6c] ss:$48 sps:$4 sm:$0xff]  }
 0x13a   :  { %v4440_v12 = vpop.eup %4439  ;;  %v96_v13 = vmul.f32 %v4438_v7, %v4761_v53  ;;  %v97_v14 = vmul.f32 %v4438_v7, %v4764_v54  ;;  %v95_v42 = vmul.f32 %v4438_v7, %v4758_v52  ;;  %v4075_v52 = vld [vmem:[%s6577_s3 + $0x2a8] ss:$48 sps:$4 sm:$0xff]   ;;  %v4116_v5 = vld [vmem:[%s6577_s3 + $0x66c] ss:$48 sps:$4 sm:$0xff]  }
 0x13b   :  { %v99_v44 = vmul.f32 %v4440_v12, %v4748_v47  ;;  %v100_v18 = vmul.f32 %v4440_v12, %v4751_v48  ;;  %v145_v19 = vadd.f32 %v136_v6, %v119_v8  ;;  %v146_v20 = vadd.f32 %v140_v10, %v120_v9  ;;  %v4078_v48 = vld [vmem:[%s6577_s3 + $0x8a8] ss:$48 sps:$4 sm:$0xff]   ;;  %v4119_v8 = vld [vmem:[%s6577_s3 + $0xc] ss:$48 sps:$4 sm:$0xff]  }
 0x13c   :  { %v122_v41 = vmul.f32 %v110_v62, %v96_v13  ;;  %v123_v16 = vmul.f32 %v114_v0, %v97_v14  ;;  %v121_v17 = vmul.f32 %v106_v2, %v95_v42  ;;  %v98_v22 = vmul.f32 %v4440_v12, %v4745_v46  ;;  %v4114_v7 = vld [vmem:[%s6577_s3 + $0x668] ss:$48 sps:$4 sm:$0xff]   ;;  %v4122_v9 = vld [vmem:[%s6577_s3 + $0x60c] ss:$48 sps:$4 sm:$0xff]   ;;  %v4128_v13 = vld [vmem:[%s6577_s3 + $0x2b4] ss:$48 sps:$4 sm:$0xff]  }
 0x13d   :  { %v125_v21 = vmul.f32 %v110_v62, %v99_v44  ;;  %v144_v53 = vadd.f32 %v132_v11, %v118_v15  ;;  %v126_v46 = vmul.f32 %v114_v0, %v100_v18  ;;  %v4099_v62 = vld [vmem:[%s6577_s3 + $0x128] ss:$48 sps:$4 sm:$0xff]   ;;  %v4107_v0 = vld [vmem:[%s6577_s3 + $0xcc] ss:$48 sps:$4 sm:$0xff]   ;;  %v4126_v42 = vld [vmem:[%s6577_s3 + $0x2b0] ss:$48 sps:$4 sm:$0xff]  }
 0x13e   :  { %v148_v23 = vadd.f32 %v136_v6, %v122_v41  ;;  %v149_v24 = vadd.f32 %v140_v10, %v123_v16  ;;  %v147_v25 = vadd.f32 %v132_v11, %v121_v17  ;;  %v124_v31 = vmul.f32 %v106_v2, %v98_v22  ;;  %v4105_v2 = vld [vmem:[%s6577_s3 + $0xc8] ss:$48 sps:$4 sm:$0xff]   ;;  %v4125_v12 = vld [vmem:[%s6577_s3 + $0x5ac] ss:$48 sps:$4 sm:$0xff]   ;;  %v4134_v44 = vld [vmem:[%s6577_s3 + $0x254] ss:$48 sps:$4 sm:$0xff]  }
 0x13f   :  { %v151_v54 = vadd.f32 %v136_v6, %v125_v21  ;;  %v152_v36 = vadd.f32 %v140_v10, %v126_v46  ;;  %v4111_v6 = vld [vmem:[%s6577_s3 + $0x68] ss:$48 sps:$4 sm:$0xff]   ;;  %v4131_v15 = vld [vmem:[%s6577_s3 + $0x54c] ss:$48 sps:$4 sm:$0xff]   ;;  %v4132_v16 = vld [vmem:[%s6577_s3 + $0x250] ss:$48 sps:$4 sm:$0xff]  }
 0x140   :  { %v4909_v47 = vpack.c.bf16 %v148_v23, %v145_v19  ;;  %v4911_v26 = vpack.c.bf16 %v149_v24, %v146_v20  ;;  %v4916_v27 = vpack.c.bf16 %v147_v25, %v144_v53  ;;  %v150_v38 = vadd.f32 %v132_v11, %v124_v31  ;;  %v4117_v10 = vld [vmem:[%s6577_s3 + $0x8] ss:$48 sps:$4 sm:$0xff]   ;;  %v4137_v17 = vld [vmem:[%s6577_s3 + $0x4ec] ss:$48 sps:$4 sm:$0xff]   ;;  %v4140_v18 = vld [vmem:[%s6577_s3 + $0x1f4] ss:$48 sps:$4 sm:$0xff]  }
 0x141   :  { %v4926_v32 = vpack.c.bf16 %v151_v54, %v151_v54  ;;  %v4946_v40 = vpack.c.bf16 %v152_v36, %v152_v36  ;;  %v4120_v11 = vld [vmem:[%s6577_s3 + $0x608] ss:$48 sps:$4 sm:$0xff]   ;;  %v4138_v20 = vld [vmem:[%s6577_s3 + $0x1f0] ss:$48 sps:$4 sm:$0xff]   ;;  %v4143_v21 = vld [vmem:[%s6577_s3 + $0x48c] ss:$48 sps:$4 sm:$0xff]  }
 0x142   :  { %1983 = vmatprep.mubr.bf16.mxu0 %v4909_v47  ;;  %2035 = vmatmul.mubr.bf16.vlgmr.msra.gmra.mxu1 %v4911_v26  ;;  %v4951_v45 = vpack.c.bf16 %v150_v38, %v150_v38  ;;  %v4123_v14 = vld [vmem:[%s6577_s3 + $0x5a8] ss:$48 sps:$4 sm:$0xff]   ;;  %v4146_v22 = vld [vmem:[%s6577_s3 + $0x194] ss:$48 sps:$4 sm:$0xff]   ;;  %v4144_v24 = vld [vmem:[%s6577_s3 + $0x190] ss:$48 sps:$4 sm:$0xff]  }
 0x143   :  { %2054 = vmatpush1.bf16.msra.mxu1 %v4075_v52  ;;  %1984 = vmatmul.mubr.bf16.vlgmr.msra.gmra.mxu0 %v4916_v27  ;;  %v4129_v41 = vld [vmem:[%s6577_s3 + $0x548] ss:$48 sps:$4 sm:$0xff]   ;;  %v4149_v53 = vld [vmem:[%s6577_s3 + $0x42c] ss:$48 sps:$4 sm:$0xff]   ;;  %v4152_v25 = vld [vmem:[%s6577_s3 + $0x134] ss:$48 sps:$4 sm:$0xff]  }
 0x144   :  { %2105 = vmatpush1.bf16.msra.mxu0 %v4078_v48  ;;  %1993 = vmatprep.mubr.bf16.mxu0 %v4926_v32  ;;  %v4135_v19 = vld [vmem:[%s6577_s3 + $0x4e8] ss:$48 sps:$4 sm:$0xff]   ;;  %v4150_v54 = vld [vmem:[%s6577_s3 + $0x130] ss:$48 sps:$4 sm:$0xff]   ;;  %v4155_v48 = vld [vmem:[%s6577_s3 + $0x3cc] ss:$48 sps:$4 sm:$0xff]  }
 0x145   :  { %2055 = vmatprep.subr.bf16.mxu1 %v4083_v28  ;;  %2106 = vmatprep.subr.bf16.mxu0 %v4086_v30  ;;  %v4141_v23 = vld [vmem:[%s6577_s3 + $0x488] ss:$48 sps:$4 sm:$0xff]   ;;  %v4158_v46 = vld [vmem:[%s6577_s3 + $0xd4] ss:$48 sps:$4 sm:$0xff]   ;;  %v4156_v30 = vld [vmem:[%s6577_s3 + $0xd0] ss:$48 sps:$4 sm:$0xff]  }
 0x146   :  { %2044 = vmatprep.mubr.bf16.mxu1 %v4586_v29  ;;  %v4147_v52 = vld [vmem:[%s6577_s3 + $0x428] ss:$48 sps:$4 sm:$0xff]   ;;  %v4161_v31 = vld [vmem:[%s6577_s3 + $0x36c] ss:$48 sps:$4 sm:$0xff]  }
 0x147   :  { %2056 = vmatpush1.bf16.msra.mxu1 %v4081_v33  ;;  %v4153_v28 = vld [vmem:[%s6577_s3 + $0x3c8] ss:$48 sps:$4 sm:$0xff]   ;;  %v4164_v33 = vld [vmem:[%s6577_s3 + $0x74] ss:$48 sps:$4 sm:$0xff]   ;;  %v4167_v36 = vld [vmem:[%s6577_s3 + $0x30c] ss:$48 sps:$4 sm:$0xff]  }
 0x148   :  { %2107 = vmatpush1.bf16.msra.mxu0 %v4084_v34  ;;  %2057 = vmatprep.subr.bf16.mxu1 %v4089_v35  ;;  %v4159_v34 = vld [vmem:[%s6577_s3 + $0x368] ss:$48 sps:$4 sm:$0xff]   ;;  %v4162_v35 = vld [vmem:[%s6577_s3 + $0x70] ss:$48 sps:$4 sm:$0xff]  }
 0x149   :  { %2108 = vmatprep.subr.bf16.mxu0 %v4092_v37  ;;  %v4170_v37 = vld [vmem:[%s6577_s3 + $0x14] ss:$48 sps:$4 sm:$0xff]   ;;  %v4165_v38 = vld [vmem:[%s6577_s3 + $0x308] ss:$48 sps:$4 sm:$0xff]  }
 0x14a   :  { %2045 = vmatmul.mubr.bf16.gmra.mxu1 %v4946_v40 }
 0x14b   :  { %2058 = vmatpush1.bf16.msra.mxu1 %v4087_v39  ;;  %1994 = vmatmul.mubr.bf16.gmra.mxu0 %v4951_v45  ;;  %v4168_v39 = vld [vmem:[%s6577_s3 + $0x10] ss:$48 sps:$4 sm:$0xff]  }
 0x14c   :  { %2085 = vmatprep.mubr.bf16.mxu1 %v4909_v47  ;;  %2109 = vmatpush1.bf16.msra.mxu0 %v4090_v43  ;;  %v4173_v43 = vld [vmem:[%s6577_s3 + $0x8b4] ss:$48 sps:$4 sm:$0xff]  }
 0x14d   :  { %2059 = vmatprep.subr.bf16.mxu1 %v4095_v49  ;;  %2110 = vmatprep.subr.bf16.mxu0 %v4098_v50  ;;  %v4176_v49 = vld [vmem:[%s6577_s3 + $0x5b4] ss:$48 sps:$4 sm:$0xff]   ;;  %v4171_v50 = vld [vmem:[%s6577_s3 + $0x8b0] ss:$48 sps:$4 sm:$0xff]  }
 0x14e   :  { %2136 = vmatprep.mubr.bf16.mxu0 %v4586_v29 }
 0x14f   :  { %2060 = vmatpush1.bf16.msra.mxu1 %v4093_v51  ;;  %v4174_v51 = vld [vmem:[%s6577_s3 + $0x5b0] ss:$48 sps:$4 sm:$0xff]  }
 0x150   :  { %2111 = vmatpush1.bf16.msra.mxu0 %v4096_v55  ;;  %2061 = vmatprep.subr.bf16.mxu1 %v4101_v56  ;;  %v4179_v55 = vld [vmem:[%s6577_s3 + $0x854] ss:$48 sps:$4 sm:$0xff]  }
 0x151   :  { %2112 = vmatprep.subr.bf16.mxu0 %v4104_v60  ;;  %v4182_v56 = vld [vmem:[%s6577_s3 + $0x554] ss:$48 sps:$4 sm:$0xff]   ;;  %v4177_v60 = vld [vmem:[%s6577_s3 + $0x850] ss:$48 sps:$4 sm:$0xff]  }
 0x153   :  { %2062 = vmatpush1.bf16.msra.mxu1 %v4099_v62  ;;  %v4180_v62 = vld [vmem:[%s6577_s3 + $0x550] ss:$48 sps:$4 sm:$0xff]  }
 0x154   :  { %2113 = vmatpush1.bf16.msra.mxu0 %v4102_v63  ;;  %2063 = vmatprep.subr.bf16.mxu1 %v4107_v0  ;;  %v4185_v63 = vld [vmem:[%s6577_s3 + $0x7f4] ss:$48 sps:$4 sm:$0xff]  }
 0x155   :  { %2114 = vmatprep.subr.bf16.mxu0 %v4110_v1  ;;  %v4188_v0 = vld [vmem:[%s6577_s3 + $0x4f4] ss:$48 sps:$4 sm:$0xff]   ;;  %v4183_v1 = vld [vmem:[%s6577_s3 + $0x7f0] ss:$48 sps:$4 sm:$0xff]  }
 0x157   :  { %2064 = vmatpush1.bf16.msra.mxu1 %v4105_v2  ;;  %v4186_v2 = vld [vmem:[%s6577_s3 + $0x4f0] ss:$48 sps:$4 sm:$0xff]  }
 0x158   :  { %2115 = vmatpush1.bf16.msra.mxu0 %v4108_v3  ;;  %2065 = vmatprep.subr.bf16.mxu1 %v4113_v4  ;;  %v4191_v3 = vld [vmem:[%s6577_s3 + $0x794] ss:$48 sps:$4 sm:$0xff]  }
 0x159   :  { %2116 = vmatprep.subr.bf16.mxu0 %v4116_v5  ;;  %v4194_v4 = vld [vmem:[%s6577_s3 + $0x494] ss:$48 sps:$4 sm:$0xff]   ;;  %v4189_v5 = vld [vmem:[%s6577_s3 + $0x790] ss:$48 sps:$4 sm:$0xff]  }
 0x15b   :  { %2066 = vmatpush1.bf16.msra.mxu1 %v4111_v6  ;;  %v4192_v6 = vld [vmem:[%s6577_s3 + $0x490] ss:$48 sps:$4 sm:$0xff]  }
 0x15c   :  { %2117 = vmatpush1.bf16.msra.mxu0 %v4114_v7  ;;  %2067 = vmatprep.subr.bf16.mxu1 %v4119_v8  ;;  %v4197_v7 = vld [vmem:[%s6577_s3 + $0x734] ss:$48 sps:$4 sm:$0xff]  }
 0x15d   :  { %2118 = vmatprep.subr.bf16.mxu0 %v4122_v9  ;;  %v4200_v8 = vld [vmem:[%s6577_s3 + $0x434] ss:$48 sps:$4 sm:$0xff]   ;;  %v4195_v9 = vld [vmem:[%s6577_s3 + $0x730] ss:$48 sps:$4 sm:$0xff]  }
 0x15f   :  { %2068 = vmatpush1.bf16.msra.mxu1 %v4117_v10  ;;  %v4198_v10 = vld [vmem:[%s6577_s3 + $0x430] ss:$48 sps:$4 sm:$0xff]  }
 0x160   :  { %2119 = vmatpush1.bf16.msra.mxu0 %v4120_v11  ;;  %2069 = vmatprep.subr.bf16.mxu1 %v4125_v12  ;;  %v4203_v11 = vld [vmem:[%s6577_s3 + $0x6d4] ss:$48 sps:$4 sm:$0xff]  }
 0x161   :  { %2155 = vmatprep.subr.bf16.mxu0 %v4128_v13  ;;  %v4206_v12 = vld [vmem:[%s6577_s3 + $0x3d4] ss:$48 sps:$4 sm:$0xff]   ;;  %v4201_v13 = vld [vmem:[%s6577_s3 + $0x6d0] ss:$48 sps:$4 sm:$0xff]  }
 0x163   :  { %2070 = vmatpush2.bf16.msra.mxu1 %v4123_v14  ;;  %2137 = vmatmul.mubr.bf16.vlgmr.msra.gmra.mxu0 %v4911_v26  ;;  %v4204_v14 = vld [vmem:[%s6577_s3 + $0x3d0] ss:$48 sps:$4 sm:$0xff]  }
 0x164   :  { %2156 = vmatpush1.bf16.msra.mxu0 %v4126_v42  ;;  %2071 = vmatprep.subr.bf16.mxu1 %v4131_v15  ;;  %v4209_v42 = vld [vmem:[%s6577_s3 + $0x674] ss:$48 sps:$4 sm:$0xff]  }
 0x165   :  { %2157 = vmatprep.subr.bf16.mxu0 %v4134_v44  ;;  %2146 = vmatprep.mubr.bf16.mxu0 %v4586_v29  ;;  %v4212_v15 = vld [vmem:[%s6577_s3 + $0x374] ss:$48 sps:$4 sm:$0xff]   ;;  %v4207_v44 = vld [vmem:[%s6577_s3 + $0x670] ss:$48 sps:$4 sm:$0xff]  }
 0x167   :  { %2072 = vmatpush2.bf16.msra.mxu1 %v4129_v41  ;;  %v4210_v41 = vld [vmem:[%s6577_s3 + $0x370] ss:$48 sps:$4 sm:$0xff]  }
 0x168   :  { %2158 = vmatpush1.bf16.msra.mxu0 %v4132_v16  ;;  %2073 = vmatprep.subr.bf16.mxu1 %v4137_v17  ;;  %v4215_v16 = vld [vmem:[%s6577_s3 + $0x614] ss:$48 sps:$4 sm:$0xff]  }
 0x169   :  { %2159 = vmatprep.subr.bf16.mxu0 %v4140_v18  ;;  %v4218_v17 = vld [vmem:[%s6577_s3 + $0x314] ss:$48 sps:$4 sm:$0xff]   ;;  %v4213_v18 = vld [vmem:[%s6577_s3 + $0x610] ss:$48 sps:$4 sm:$0xff]  }
 0x16b   :  { %2074 = vmatpush2.bf16.msra.mxu1 %v4135_v19  ;;  %2147 = vmatmul.mubr.bf16.gmra.mxu0 %v4946_v40  ;;  %v4216_v19 = vld [vmem:[%s6577_s3 + $0x310] ss:$48 sps:$4 sm:$0xff]  }
 0x16c   :  { %2160 = vmatpush1.bf16.msra.mxu0 %v4138_v20  ;;  %2187 = vmatprep.mubr.bf16.mxu0 %v4909_v47  ;;  %v4221_v20 = vld [vmem:[%s6577_s3 + $0x2bc] ss:$48 sps:$4 sm:$0xff]  }
 0x16d   :  { %2075 = vmatprep.subr.bf16.mxu1 %v4143_v21  ;;  %2161 = vmatprep.subr.bf16.mxu0 %v4146_v22  ;;  %v4224_v21 = vld [vmem:[%s6577_s3 + $0x8bc] ss:$48 sps:$4 sm:$0xff]   ;;  %v4219_v22 = vld [vmem:[%s6577_s3 + $0x2b8] ss:$48 sps:$4 sm:$0xff]  }
 0x16f   :  { %2076 = vmatpush2.bf16.msra.mxu1 %v4141_v23  ;;  %v4222_v23 = vld [vmem:[%s6577_s3 + $0x8b8] ss:$48 sps:$4 sm:$0xff]  }
 0x170   :  { %2162 = vmatpush1.bf16.msra.mxu0 %v4144_v24  ;;  %2077 = vmatprep.subr.bf16.mxu1 %v4149_v53  ;;  %v4227_v24 = vld [vmem:[%s6577_s3 + $0x25c] ss:$48 sps:$4 sm:$0xff]  }
 0x171   :  { %2163 = vmatprep.subr.bf16.mxu0 %v4152_v25  ;;  %v4230_v53 = vld [vmem:[%s6577_s3 + $0x85c] ss:$48 sps:$4 sm:$0xff]   ;;  %v4225_v25 = vld [vmem:[%s6577_s3 + $0x258] ss:$48 sps:$4 sm:$0xff]  }
 0x173   :  { %2078 = vmatpush2.bf16.msra.mxu1 %v4147_v52  ;;  %v4228_v52 = vld [vmem:[%s6577_s3 + $0x858] ss:$48 sps:$4 sm:$0xff]  }
 0x174   :  { %2164 = vmatpush1.bf16.msra.mxu0 %v4150_v54  ;;  %2079 = vmatprep.subr.bf16.mxu1 %v4155_v48  ;;  %v4233_v54 = vld [vmem:[%s6577_s3 + $0x1fc] ss:$48 sps:$4 sm:$0xff]  }
 0x175   :  { %2165 = vmatprep.subr.bf16.mxu0 %v4158_v46  ;;  %v4236_v48 = vld [vmem:[%s6577_s3 + $0x7fc] ss:$48 sps:$4 sm:$0xff]   ;;  %v4231_v46 = vld [vmem:[%s6577_s3 + $0x1f8] ss:$48 sps:$4 sm:$0xff]  }
 0x177   :  { %2080 = vmatpush2.bf16.msra.mxu1 %v4153_v28  ;;  %v4234_v28 = vld [vmem:[%s6577_s3 + $0x7f8] ss:$48 sps:$4 sm:$0xff]  }
 0x178   :  { %2166 = vmatpush1.bf16.msra.mxu0 %v4156_v30  ;;  %2081 = vmatprep.subr.bf16.mxu1 %v4161_v31  ;;  %v4239_v30 = vld [vmem:[%s6577_s3 + $0x19c] ss:$48 sps:$4 sm:$0xff]  }
 0x179   :  { %2167 = vmatprep.subr.bf16.mxu0 %v4164_v33  ;;  %v4242_v31 = vld [vmem:[%s6577_s3 + $0x79c] ss:$48 sps:$4 sm:$0xff]   ;;  %v4237_v33 = vld [vmem:[%s6577_s3 + $0x198] ss:$48 sps:$4 sm:$0xff]  }
 0x17b   :  { %2082 = vmatpush2.bf16.msra.mxu1 %v4159_v34  ;;  %v4240_v34 = vld [vmem:[%s6577_s3 + $0x798] ss:$48 sps:$4 sm:$0xff]  }
 0x17c   :  { %2168 = vmatpush1.bf16.msra.mxu0 %v4162_v35  ;;  %2083 = vmatprep.subr.bf16.mxu1 %v4167_v36  ;;  %v4245_v35 = vld [vmem:[%s6577_s3 + $0x13c] ss:$48 sps:$4 sm:$0xff]  }
 0x17d   :  { %2169 = vmatprep.subr.bf16.mxu0 %v4170_v37  ;;  %v4248_v36 = vld [vmem:[%s6577_s3 + $0x73c] ss:$48 sps:$4 sm:$0xff]   ;;  %v4243_v37 = vld [vmem:[%s6577_s3 + $0x138] ss:$48 sps:$4 sm:$0xff]  }
 0x17f   :  { %2084 = vmatpush2.bf16.msra.mxu1 %v4165_v38  ;;  %v4246_v38 = vld [vmem:[%s6577_s3 + $0x738] ss:$48 sps:$4 sm:$0xff]  }
 0x180   :  { %2170 = vmatpush1.bf16.msra.mxu0 %v4168_v39  ;;  %2206 = vmatprep.subr.bf16.mxu1 %v4173_v43  ;;  %v4251_v39 = vld [vmem:[%s6577_s3 + $0xdc] ss:$48 sps:$4 sm:$0xff]  }
 0x181   :  { %2171 = vmatprep.subr.bf16.mxu0 %v4176_v49  ;;  %v4254_v43 = vld [vmem:[%s6577_s3 + $0x6dc] ss:$48 sps:$4 sm:$0xff]   ;;  %v4249_v49 = vld [vmem:[%s6577_s3 + $0xd8] ss:$48 sps:$4 sm:$0xff]  }
 0x182   :  { %2086 = vmatmul.mubr.bf16.vlgmr.msra.gmra.mxu1 %v4916_v27 }
 0x183   :  { %2095 = vmatprep.mubr.bf16.mxu1 %v4926_v32  ;;  %2207 = vmatpush1.bf16.msra.mxu1 %v4171_v50  ;;  %v4252_v50 = vld [vmem:[%s6577_s3 + $0x6d8] ss:$48 sps:$4 sm:$0xff]  }
 0x184   :  { %2172 = vmatpush2.bf16.msra.mxu0 %v4174_v51  ;;  %2208 = vmatprep.subr.bf16.mxu1 %v4179_v55  ;;  %v4257_v51 = vld [vmem:[%s6577_s3 + $0x7c] ss:$48 sps:$4 sm:$0xff]  }
 0x185   :  { %2173 = vmatprep.subr.bf16.mxu0 %v4182_v56  ;;  %v4260_v55 = vld [vmem:[%s6577_s3 + $0x67c] ss:$48 sps:$4 sm:$0xff]   ;;  %v4255_v56 = vld [vmem:[%s6577_s3 + $0x78] ss:$48 sps:$4 sm:$0xff]  }
 0x187   :  { %2209 = vmatpush1.bf16.msra.mxu1 %v4177_v60  ;;  %v4258_v60 = vld [vmem:[%s6577_s3 + $0x678] ss:$48 sps:$4 sm:$0xff]  }
 0x188   :  { %2174 = vmatpush2.bf16.msra.mxu0 %v4180_v62  ;;  %2210 = vmatprep.subr.bf16.mxu1 %v4185_v63  ;;  %v4263_v62 = vld [vmem:[%s6577_s3 + $0x1c] ss:$48 sps:$4 sm:$0xff]  }
 0x189   :  { %2175 = vmatprep.subr.bf16.mxu0 %v4188_v0  ;;  %v4266_v63 = vld [vmem:[%s6577_s3 + $0x61c] ss:$48 sps:$4 sm:$0xff]   ;;  %v4261_v0 = vld [vmem:[%s6577_s3 + $0x18] ss:$48 sps:$4 sm:$0xff]  }
 0x18a   :  { %2096 = vmatmul.mubr.bf16.gmra.mxu1 %v4951_v45 }
 0x18b   :  { %2211 = vmatpush1.bf16.msra.mxu1 %v4183_v1  ;;  %2238 = vmatprep.mubr.bf16.mxu1 %v4586_v29  ;;  %v4264_v1 = vld [vmem:[%s6577_s3 + $0x618] ss:$48 sps:$4 sm:$0xff]  }
 0x18c   :  { %2176 = vmatpush2.bf16.msra.mxu0 %v4186_v2  ;;  %2212 = vmatprep.subr.bf16.mxu1 %v4191_v3  ;;  %v4269_v2 = vld [vmem:[%s6577_s3 + $0x5bc] ss:$48 sps:$4 sm:$0xff]   ;;  %v4272_v3 = vld [vmem:[%s6577_s3 + $0x2c4] ss:$48 sps:$4 sm:$0xff]  }
 0x18d   :  { %2177 = vmatprep.subr.bf16.mxu0 %v4194_v4  ;;  %v4267_v4 = vld [vmem:[%s6577_s3 + $0x5b8] ss:$48 sps:$4 sm:$0xff]  }
 0x18f   :  { %2213 = vmatpush1.bf16.msra.mxu1 %v4189_v5  ;;  %v4270_v5 = vld [vmem:[%s6577_s3 + $0x2c0] ss:$48 sps:$4 sm:$0xff]  }
 0x190   :  { %2178 = vmatpush2.bf16.msra.mxu0 %v4192_v6  ;;  %2214 = vmatprep.subr.bf16.mxu1 %v4197_v7  ;;  %v4275_v6 = vld [vmem:[%s6577_s3 + $0x55c] ss:$48 sps:$4 sm:$0xff]   ;;  %v4278_v7 = vld [vmem:[%s6577_s3 + $0x264] ss:$48 sps:$4 sm:$0xff]  }
 0x191   :  { %2179 = vmatprep.subr.bf16.mxu0 %v4200_v8  ;;  %v4273_v8 = vld [vmem:[%s6577_s3 + $0x558] ss:$48 sps:$4 sm:$0xff]  }
 0x193   :  { %2215 = vmatpush1.bf16.msra.mxu1 %v4195_v9  ;;  %v4276_v9 = vld [vmem:[%s6577_s3 + $0x260] ss:$48 sps:$4 sm:$0xff]  }
 0x194   :  { %2180 = vmatpush2.bf16.msra.mxu0 %v4198_v10  ;;  %2216 = vmatprep.subr.bf16.mxu1 %v4203_v11  ;;  %v4281_v10 = vld [vmem:[%s6577_s3 + $0x4fc] ss:$48 sps:$4 sm:$0xff]   ;;  %v4284_v11 = vld [vmem:[%s6577_s3 + $0x204] ss:$48 sps:$4 sm:$0xff]  }
 0x195   :  { %2181 = vmatprep.subr.bf16.mxu0 %v4206_v12  ;;  %v4279_v12 = vld [vmem:[%s6577_s3 + $0x4f8] ss:$48 sps:$4 sm:$0xff]  }
 0x197   :  { %2217 = vmatpush1.bf16.msra.mxu1 %v4201_v13  ;;  %v4282_v13 = vld [vmem:[%s6577_s3 + $0x200] ss:$48 sps:$4 sm:$0xff]  }
 0x198   :  { %2182 = vmatpush2.bf16.msra.mxu0 %v4204_v14  ;;  %2218 = vmatprep.subr.bf16.mxu1 %v4209_v42  ;;  %v4287_v14 = vld [vmem:[%s6577_s3 + $0x49c] ss:$48 sps:$4 sm:$0xff]   ;;  %v4290_v42 = vld [vmem:[%s6577_s3 + $0x1a4] ss:$48 sps:$4 sm:$0xff]  }
 0x199   :  { %2183 = vmatprep.subr.bf16.mxu0 %v4212_v15  ;;  %v4285_v15 = vld [vmem:[%s6577_s3 + $0x498] ss:$48 sps:$4 sm:$0xff]  }
 0x19b   :  { %2219 = vmatpush1.bf16.msra.mxu1 %v4207_v44  ;;  %v4288_v44 = vld [vmem:[%s6577_s3 + $0x1a0] ss:$48 sps:$4 sm:$0xff]  }
 0x19c   :  { %2184 = vmatpush2.bf16.msra.mxu0 %v4210_v41  ;;  %2220 = vmatprep.subr.bf16.mxu1 %v4215_v16  ;;  %v4293_v41 = vld [vmem:[%s6577_s3 + $0x43c] ss:$48 sps:$4 sm:$0xff]   ;;  %v4296_v16 = vld [vmem:[%s6577_s3 + $0x144] ss:$48 sps:$4 sm:$0xff]  }
 0x19d   :  { %2185 = vmatprep.subr.bf16.mxu0 %v4218_v17  ;;  %v4291_v17 = vld [vmem:[%s6577_s3 + $0x438] ss:$48 sps:$4 sm:$0xff]  }
 0x19f   :  { %2221 = vmatpush1.bf16.msra.mxu1 %v4213_v18  ;;  %v4294_v18 = vld [vmem:[%s6577_s3 + $0x140] ss:$48 sps:$4 sm:$0xff]  }
 0x1a0   :  { %2186 = vmatpush2.bf16.msra.mxu0 %v4216_v19  ;;  %2257 = vmatprep.subr.bf16.mxu1 %v4221_v20  ;;  %v4299_v19 = vld [vmem:[%s6577_s3 + $0x3dc] ss:$48 sps:$4 sm:$0xff]   ;;  %v4302_v20 = vld [vmem:[%s6577_s3 + $0xe4] ss:$48 sps:$4 sm:$0xff]  }
 0x1a1   :  { %2308 = vmatprep.subr.bf16.mxu0 %v4224_v21  ;;  %v4297_v21 = vld [vmem:[%s6577_s3 + $0x3d8] ss:$48 sps:$4 sm:$0xff]  }
 0x1a2   :  { %2239 = vmatmul.mubr.bf16.vlgmr.msra.gmra.mxu1 %v4911_v26 }
 0x1a3   :  { %2188 = vmatmul.mubr.bf16.vlgmr.msra.gmra.mxu0 %v4916_v27  ;;  %2258 = vmatpush1.bf16.msra.mxu1 %v4219_v22  ;;  %v4300_v22 = vld [vmem:[%s6577_s3 + $0xe0] ss:$48 sps:$4 sm:$0xff]  }
 0x1a4   :  { %2197 = vmatprep.mubr.bf16.mxu0 %v4926_v32  ;;  %2309 = vmatpush1.bf16.msra.mxu0 %v4222_v23  ;;  %v4305_v23 = vld [vmem:[%s6577_s3 + $0x37c] ss:$48 sps:$4 sm:$0xff]  }
 0x1a5   :  { %2259 = vmatprep.subr.bf16.mxu1 %v4227_v24  ;;  %2310 = vmatprep.subr.bf16.mxu0 %v4230_v53  ;;  %v4308_v24 = vld [vmem:[%s6577_s3 + $0x84] ss:$48 sps:$4 sm:$0xff]   ;;  %v4303_v53 = vld [vmem:[%s6577_s3 + $0x378] ss:$48 sps:$4 sm:$0xff]  }
 0x1a6   :  { %2248 = vmatprep.mubr.bf16.mxu1 %v4586_v29 }
 0x1a7   :  { %2260 = vmatpush1.bf16.msra.mxu1 %v4225_v25  ;;  %v4306_v25 = vld [vmem:[%s6577_s3 + $0x80] ss:$48 sps:$4 sm:$0xff]  }
 0x1a8   :  { %2311 = vmatpush1.bf16.msra.mxu0 %v4228_v52  ;;  %2261 = vmatprep.subr.bf16.mxu1 %v4233_v54  ;;  %v4311_v52 = vld [vmem:[%s6577_s3 + $0x31c] ss:$48 sps:$4 sm:$0xff]   ;;  %v4314_v54 = vld [vmem:[%s6577_s3 + $0x24] ss:$48 sps:$4 sm:$0xff]  }
 0x1a9   :  { %2312 = vmatprep.subr.bf16.mxu0 %v4236_v48  ;;  %v4309_v48 = vld [vmem:[%s6577_s3 + $0x318] ss:$48 sps:$4 sm:$0xff]  }
 0x1aa   :  { %2249 = vmatmul.mubr.bf16.gmra.mxu1 %v4946_v40 }
 0x1ab   :  { %2198 = vmatmul.mubr.bf16.gmra.mxu0 %v4951_v45  ;;  %2262 = vmatpush1.bf16.msra.mxu1 %v4231_v46  ;;  %v4312_v46 = vld [vmem:[%s6577_s3 + $0x20] ss:$48 sps:$4 sm:$0xff]  }
 0x1ac   :  { %2289 = vmatprep.mubr.bf16.mxu1 %v4909_v47  ;;  %2313 = vmatpush1.bf16.msra.mxu0 %v4234_v28  ;;  %v4317_v28 = vld [vmem:[%s6577_s3 + $0x8c4] ss:$48 sps:$4 sm:$0xff]  }
 0x1ad   :  { %2263 = vmatprep.subr.bf16.mxu1 %v4239_v30  ;;  %2314 = vmatprep.subr.bf16.mxu0 %v4242_v31  ;;  %v4320_v30 = vld [vmem:[%s6577_s3 + $0x5c4] ss:$48 sps:$4 sm:$0xff]   ;;  %v4315_v31 = vld [vmem:[%s6577_s3 + $0x8c0] ss:$48 sps:$4 sm:$0xff]  }
 0x1ae   :  { %2340 = vmatprep.mubr.bf16.mxu0 %v4586_v29 }
 0x1af   :  { %2264 = vmatpush1.bf16.msra.mxu1 %v4237_v33  ;;  %v4318_v33 = vld [vmem:[%s6577_s3 + $0x5c0] ss:$48 sps:$4 sm:$0xff]  }
 0x1b0   :  { %2315 = vmatpush1.bf16.msra.mxu0 %v4240_v34  ;;  %2265 = vmatprep.subr.bf16.mxu1 %v4245_v35  ;;  %v4323_v34 = vld [vmem:[%s6577_s3 + $0x864] ss:$48 sps:$4 sm:$0xff]  }
 0x1b1   :  { %2316 = vmatprep.subr.bf16.mxu0 %v4248_v36  ;;  %v4326_v35 = vld [vmem:[%s6577_s3 + $0x564] ss:$48 sps:$4 sm:$0xff]   ;;  %v4321_v36 = vld [vmem:[%s6577_s3 + $0x860] ss:$48 sps:$4 sm:$0xff]  }
 0x1b3   :  { %2266 = vmatpush1.bf16.msra.mxu1 %v4243_v37  ;;  %v4324_v37 = vld [vmem:[%s6577_s3 + $0x560] ss:$48 sps:$4 sm:$0xff]  }
 0x1b4   :  { %2317 = vmatpush1.bf16.msra.mxu0 %v4246_v38  ;;  %2267 = vmatprep.subr.bf16.mxu1 %v4251_v39  ;;  %v4329_v38 = vld [vmem:[%s6577_s3 + $0x804] ss:$48 sps:$4 sm:$0xff]  }
 0x1b5   :  { %2318 = vmatprep.subr.bf16.mxu0 %v4254_v43  ;;  %v4332_v39 = vld [vmem:[%s6577_s3 + $0x504] ss:$48 sps:$4 sm:$0xff]   ;;  %v4327_v43 = vld [vmem:[%s6577_s3 + $0x800] ss:$48 sps:$4 sm:$0xff]  }
 0x1b7   :  { %2268 = vmatpush1.bf16.msra.mxu1 %v4249_v49  ;;  %v4330_v49 = vld [vmem:[%s6577_s3 + $0x500] ss:$48 sps:$4 sm:$0xff]  }
 0x1b8   :  { %2319 = vmatpush1.bf16.msra.mxu0 %v4252_v50  ;;  %2269 = vmatprep.subr.bf16.mxu1 %v4257_v51  ;;  %v4335_v50 = vld [vmem:[%s6577_s3 + $0x7a4] ss:$48 sps:$4 sm:$0xff]  }
 0x1b9   :  { %2320 = vmatprep.subr.bf16.mxu0 %v4260_v55  ;;  %v4338_v51 = vld [vmem:[%s6577_s3 + $0x4a4] ss:$48 sps:$4 sm:$0xff]   ;;  %v4333_v55 = vld [vmem:[%s6577_s3 + $0x7a0] ss:$48 sps:$4 sm:$0xff]  }
 0x1bb   :  { %2270 = vmatpush1.bf16.msra.mxu1 %v4255_v56  ;;  %v4336_v56 = vld [vmem:[%s6577_s3 + $0x4a0] ss:$48 sps:$4 sm:$0xff]  }
 0x1bc   :  { %2321 = vmatpush1.bf16.msra.mxu0 %v4258_v60  ;;  %2271 = vmatprep.subr.bf16.mxu1 %v4263_v62  ;;  %v4341_v60 = vld [vmem:[%s6577_s3 + $0x744] ss:$48 sps:$4 sm:$0xff]  }
 0x1bd   :  { %2322 = vmatprep.subr.bf16.mxu0 %v4266_v63  ;;  %v4344_v62 = vld [vmem:[%s6577_s3 + $0x444] ss:$48 sps:$4 sm:$0xff]   ;;  %v4339_v63 = vld [vmem:[%s6577_s3 + $0x740] ss:$48 sps:$4 sm:$0xff]  }
 0x1bf   :  { %2272 = vmatpush1.bf16.msra.mxu1 %v4261_v0  ;;  %v4342_v0 = vld [vmem:[%s6577_s3 + $0x440] ss:$48 sps:$4 sm:$0xff]  }
 0x1c0   :  { %2323 = vmatpush1.bf16.msra.mxu0 %v4264_v1  ;;  %2273 = vmatprep.subr.bf16.mxu1 %v4269_v2  ;;  %v4347_v1 = vld [vmem:[%s6577_s3 + $0x6e4] ss:$48 sps:$4 sm:$0xff]  }
 0x1c1   :  { %2359 = vmatprep.subr.bf16.mxu0 %v4272_v3  ;;  %v4350_v2 = vld [vmem:[%s6577_s3 + $0x3e4] ss:$48 sps:$4 sm:$0xff]   ;;  %v4345_v3 = vld [vmem:[%s6577_s3 + $0x6e0] ss:$48 sps:$4 sm:$0xff]  }
 0x1c3   :  { %2274 = vmatpush2.bf16.msra.mxu1 %v4267_v4  ;;  %2341 = vmatmul.mubr.bf16.vlgmr.msra.gmra.mxu0 %v4911_v26  ;;  %v4348_v4 = vld [vmem:[%s6577_s3 + $0x3e0] ss:$48 sps:$4 sm:$0xff]  }
 0x1c4   :  { %2360 = vmatpush1.bf16.msra.mxu0 %v4270_v5  ;;  %2275 = vmatprep.subr.bf16.mxu1 %v4275_v6  ;;  %v4353_v5 = vld [vmem:[%s6577_s3 + $0x684] ss:$48 sps:$4 sm:$0xff]  }
 0x1c5   :  { %2361 = vmatprep.subr.bf16.mxu0 %v4278_v7  ;;  %2350 = vmatprep.mubr.bf16.mxu0 %v4586_v29  ;;  %v4356_v6 = vld [vmem:[%s6577_s3 + $0x384] ss:$48 sps:$4 sm:$0xff]   ;;  %v4351_v7 = vld [vmem:[%s6577_s3 + $0x680] ss:$48 sps:$4 sm:$0xff]  }
 0x1c7   :  { %2276 = vmatpush2.bf16.msra.mxu1 %v4273_v8  ;;  %v4354_v8 = vld [vmem:[%s6577_s3 + $0x380] ss:$48 sps:$4 sm:$0xff]  }
 0x1c8   :  { %2362 = vmatpush1.bf16.msra.mxu0 %v4276_v9  ;;  %2277 = vmatprep.subr.bf16.mxu1 %v4281_v10  ;;  %v4359_v9 = vld [vmem:[%s6577_s3 + $0x624] ss:$48 sps:$4 sm:$0xff]  }
 0x1c9   :  { %2363 = vmatprep.subr.bf16.mxu0 %v4284_v11  ;;  %v4362_v10 = vld [vmem:[%s6577_s3 + $0x324] ss:$48 sps:$4 sm:$0xff]   ;;  %v4357_v11 = vld [vmem:[%s6577_s3 + $0x620] ss:$48 sps:$4 sm:$0xff]  }
 0x1cb   :  { %2278 = vmatpush2.bf16.msra.mxu1 %v4279_v12  ;;  %2351 = vmatmul.mubr.bf16.gmra.mxu0 %v4946_v40  ;;  %v4360_v12 = vld [vmem:[%s6577_s3 + $0x320] ss:$48 sps:$4 sm:$0xff]  }
 0x1cc   :  { %2364 = vmatpush1.bf16.msra.mxu0 %v4282_v13  ;;  %2391 = vmatprep.mubr.bf16.mxu0 %v4909_v47  ;;  %v4365_v13 = vld [vmem:[%s6577_s3 + $0x2cc] ss:$48 sps:$4 sm:$0xff]  }
 0x1cd   :  { %2279 = vmatprep.subr.bf16.mxu1 %v4287_v14  ;;  %2365 = vmatprep.subr.bf16.mxu0 %v4290_v42  ;;  %v4368_v14 = vld [vmem:[%s6577_s3 + $0x8cc] ss:$48 sps:$4 sm:$0xff]   ;;  %v5530_v42 = vld [vmem:[%s6580_s4] sm:$0xff] }
 0x1cf   :  { %2280 = vmatpush2.bf16.msra.mxu1 %v4285_v15  ;;  %v4363_v15 = vld [vmem:[%s6577_s3 + $0x2c8] ss:$48 sps:$4 sm:$0xff]  }
 0x1d0   :  { %2366 = vmatpush1.bf16.msra.mxu0 %v4288_v44  ;;  %2281 = vmatprep.subr.bf16.mxu1 %v4293_v41  ;;  %v4366_v44 = vld [vmem:[%s6577_s3 + $0x8c8] ss:$48 sps:$4 sm:$0xff]   ;;  %v5540_v41 = vrot.slane %v5530_v42, %v4886_v61 }
 0x1d1   :  { %2367 = vmatprep.subr.bf16.mxu0 %v4296_v16  ;;  %v4371_v16 = vld [vmem:[%s6577_s3 + $0x26c] ss:$48 sps:$4 sm:$0xff]  }
 0x1d3   :  { %2282 = vmatpush2.bf16.msra.mxu1 %v4291_v17  ;;  %v4374_v17 = vld [vmem:[%s6577_s3 + $0x86c] ss:$48 sps:$4 sm:$0xff]  }
 0x1d4   :  { %2368 = vmatpush1.bf16.msra.mxu0 %v4294_v18  ;;  %2283 = vmatprep.subr.bf16.mxu1 %v4299_v19  ;;  %v5551_v19 = vrot.slane %v5530_v42, %v4877_v58 }
 0x1d5   :  { %2369 = vmatprep.subr.bf16.mxu0 %v4302_v20 }
 0x1d7   :  { %2284 = vmatpush2.bf16.msra.mxu1 %v4297_v21  ;;  %v4369_v21 = vld [vmem:[%s6577_s3 + $0x268] ss:$48 sps:$4 sm:$0xff]  }
 0x1d8   :  { %2370 = vmatpush1.bf16.msra.mxu0 %v4300_v22  ;;  %2285 = vmatprep.subr.bf16.mxu1 %v4305_v23 }
 0x1d9   :  { %2371 = vmatprep.subr.bf16.mxu0 %v4308_v24  ;;  %v4372_v24 = vld [vmem:[%s6577_s3 + $0x868] ss:$48 sps:$4 sm:$0xff]  }
 0x1db   :  { %2286 = vmatpush2.bf16.msra.mxu1 %v4303_v53  ;;  %v4377_v53 = vld [vmem:[%s6577_s3 + $0x20c] ss:$48 sps:$4 sm:$0xff]  }
 0x1dc   :  { %2372 = vmatpush1.bf16.msra.mxu0 %v4306_v25  ;;  %2287 = vmatprep.subr.bf16.mxu1 %v4311_v52  ;;  %v4380_v52 = vld [vmem:[%s6577_s3 + $0x80c] ss:$48 sps:$4 sm:$0xff]  }
 0x1dd   :  { %2373 = vmatprep.subr.bf16.mxu0 %v4314_v54 }
 0x1df   :  { %2288 = vmatpush2.bf16.msra.mxu1 %v4309_v48 }
 0x1e0   :  { %2374 = vmatpush1.bf16.msra.mxu0 %v4312_v46  ;;  %2410 = vmatprep.subr.bf16.mxu1 %v4317_v28 }
 0x1e1   :  { %2375 = vmatprep.subr.bf16.mxu0 %v4320_v30  ;;  %v4375_v30 = vld [vmem:[%s6577_s3 + $0x208] ss:$48 sps:$4 sm:$0xff]  }
 0x1e2   :  { %2290 = vmatmul.mubr.bf16.vlgmr.msra.gmra.mxu1 %v4916_v27 }
 0x1e3   :  { %2299 = vmatprep.mubr.bf16.mxu1 %v4926_v32  ;;  %2411 = vmatpush1.bf16.msra.mxu1 %v4315_v31 }
 0x1e4   :  { %2376 = vmatpush2.bf16.msra.mxu0 %v4318_v33  ;;  %2412 = vmatprep.subr.bf16.mxu1 %v4323_v34 }
 0x1e5   :  { %2377 = vmatprep.subr.bf16.mxu0 %v4326_v35 }
 0x1e7   :  { %2413 = vmatpush1.bf16.msra.mxu1 %v4321_v36  ;;  %v4378_v36 = vld [vmem:[%s6577_s3 + $0x808] ss:$48 sps:$4 sm:$0xff]  }
 0x1e8   :  { %2378 = vmatpush2.bf16.msra.mxu0 %v4324_v37  ;;  %2414 = vmatprep.subr.bf16.mxu1 %v4329_v38  ;;  %v4383_v38 = vld [vmem:[%s6577_s3 + $0x1ac] ss:$48 sps:$4 sm:$0xff]  }
 0x1e9   :  { %2379 = vmatprep.subr.bf16.mxu0 %v4332_v39  ;;  %v4386_v39 = vld [vmem:[%s6577_s3 + $0x7ac] ss:$48 sps:$4 sm:$0xff]  }
 0x1ea   :  { %2300 = vmatmul.mubr.bf16.gmra.mxu1 %v4951_v45 }
 0x1eb   :  { %2415 = vmatpush1.bf16.msra.mxu1 %v4327_v43  ;;  %2442 = vmatprep.mubr.bf16.mxu1 %v4586_v29 }
 0x1ec   :  { %2380 = vmatpush2.bf16.msra.mxu0 %v4330_v49  ;;  %2416 = vmatprep.subr.bf16.mxu1 %v4335_v50 }
 0x1ed   :  { %2381 = vmatprep.subr.bf16.mxu0 %v4338_v51 }
 0x1ef   :  { %2417 = vmatpush1.bf16.msra.mxu1 %v4333_v55 }
 0x1f0   :  { %2382 = vmatpush2.bf16.msra.mxu0 %v4336_v56  ;;  %2418 = vmatprep.subr.bf16.mxu1 %v4341_v60  ;;  %v4381_v60 = vld [vmem:[%s6577_s3 + $0x1a8] ss:$48 sps:$4 sm:$0xff]  }
 0x1f1   :  { %2383 = vmatprep.subr.bf16.mxu0 %v4344_v62  ;;  %v4384_v62 = vld [vmem:[%s6577_s3 + $0x7a8] ss:$48 sps:$4 sm:$0xff]  }
 0x1f3   :  { %2419 = vmatpush1.bf16.msra.mxu1 %v4339_v63 }
 0x1f4   :  { %2384 = vmatpush2.bf16.msra.mxu0 %v4342_v0  ;;  %2420 = vmatprep.subr.bf16.mxu1 %v4347_v1 }
 0x1f5   :  { %2385 = vmatprep.subr.bf16.mxu0 %v4350_v2  ;;  %v4389_v2 = vld [vmem:[%s6577_s3 + $0x14c] ss:$48 sps:$4 sm:$0xff]  }
 0x1f7   :  { %2421 = vmatpush1.bf16.msra.mxu1 %v4345_v3 }
 0x1f8   :  { %2386 = vmatpush2.bf16.msra.mxu0 %v4348_v4  ;;  %2422 = vmatprep.subr.bf16.mxu1 %v4353_v5 }
 0x1f9   :  { %2387 = vmatprep.subr.bf16.mxu0 %v4356_v6  ;;  %v4392_v6 = vld [vmem:[%s6577_s3 + $0x74c] ss:$48 sps:$4 sm:$0xff]  }
 0x1fb   :  { %2423 = vmatpush1.bf16.msra.mxu1 %v4351_v7 }
 0x1fc   :  { %2388 = vmatpush2.bf16.msra.mxu0 %v4354_v8  ;;  %2424 = vmatprep.subr.bf16.mxu1 %v4359_v9 }
 0x1fd   :  { %2389 = vmatprep.subr.bf16.mxu0 %v4362_v10 }
 0x1ff   :  { %2425 = vmatpush1.bf16.msra.mxu1 %v4357_v11 }
 0x200   :  { %2390 = vmatpush2.bf16.msra.mxu0 %v4360_v12  ;;  %2461 = vmatprep.subr.bf16.mxu1 %v4365_v13  ;;  %v4387_v12 = vld [vmem:[%s6577_s3 + $0x148] ss:$48 sps:$4 sm:$0xff]  }
 0x201   :  { %2512 = vmatprep.subr.bf16.mxu0 %v4368_v14 }
 0x202   :  { %2443 = vmatmul.mubr.bf16.vlgmr.msra.gmra.mxu1 %v4911_v26  ;;  %v2036_v18 = vpop.f32.mrf.mxu1 }
 0x203   :  { %2392 = vmatmul.mubr.bf16.vlgmr.msra.gmra.mxu0 %v4916_v27  ;;  %2462 = vmatpush1.bf16.msra.mxu1 %v4363_v15  ;;  %v1985_v20 = vpop.f32.mrf.mxu0  ;;  %v4390_v15 = vld [vmem:[%s6577_s3 + $0x748] ss:$48 sps:$4 sm:$0xff]  }
 0x204   :  { %v1986_v22 = vadd.f32 %v1985_v20, %v5540_v41  ;;  %2401 = vmatprep.mubr.bf16.mxu0 %v4926_v32  ;;  %2513 = vmatpush1.bf16.msra.mxu0 %v4366_v44  ;;  %v2038_v23 = vpop.f32.mrf.mxu1  ;;  %v4395_v44 = vld [vmem:[%s6577_s3 + $0xec] ss:$48 sps:$4 sm:$0xff]  }
 0x205   :  { %v1987_v25 = vpop.f32.mrf.mxu0  ;;  %2463 = vmatprep.subr.bf16.mxu1 %v4371_v16  ;;  %2514 = vmatprep.subr.bf16.mxu0 %v4374_v17 }
 0x206   :  { %v5568_v54 = vadd.f32 %v2036_v18, %v1986_v22  ;;  %v1988_v48 = vadd.f32 %v1987_v25, %v5551_v19  ;;  %v2040_v46 = vpop.f32.mrf.mxu1  ;;  %2452 = vmatprep.mubr.bf16.mxu1 %v4586_v29  ;;  %v4398_v18 = vld [vmem:[%s6577_s3 + $0x6ec] ss:$48 sps:$4 sm:$0xff]   ;;  %v4396_v25 = vld [vmem:[%s6577_s3 + $0x6e8] ss:$48 sps:$4 sm:$0xff]  }
 0x207   :  { %2464 = vmatpush1.bf16.msra.mxu1 %v4369_v21  ;;  %v1989_v28 = vpop.f32.mrf.mxu0 }
 0x208   :  { %v5576_v31 = vmul.f32 0.70710677, %v5568_v54  ;;  %v5578_v33 = vadd.f32 %v2038_v23, %v1988_v48  ;;  %v1990_v34 = vadd.f32 %v1989_v28, %v5540_v41  ;;  %2515 = vmatpush1.bf16.msra.mxu0 %v4372_v24  ;;  %v2042_v35 = vpop.f32.mrf.mxu1  ;;  %2465 = vmatprep.subr.bf16.mxu1 %v4377_v53  ;;  %v4393_v23 = vld [vmem:[%s6577_s3 + $0xe8] ss:$48 sps:$4 sm:$0xff]   ;;  %v4404_v48 = vld [vmem:[%s6577_s3 + $0x68c] ss:$48 sps:$4 sm:$0xff]  }
 0x209   :  { %v1991_v37 = vpop.f32.mrf.mxu0  ;;  %2516 = vmatprep.subr.bf16.mxu0 %v4380_v52  ;;  %v4401_v52 = vld [vmem:[%s6577_s3 + $0x8c] ss:$48 sps:$4 sm:$0xff]  }
 0x20a   :  { %v5591_v43 = vand.u32 2147483647, %v5576_v31  ;;  %v5594_v49 = vmul.f32 0.70710677, %v5578_v33  ;;  %2453 = vmatmul.mubr.bf16.gmra.mxu1 %v4946_v40  ;;  %v2046_v50 = vpop.f32.mrf.mxu1  ;;  %v5597_v51 = vadd.f32 %v2040_v46, %v1990_v34  ;;  %v1992_v55 = vadd.f32 %v1991_v37, %v5551_v19  ;;  %v4399_v34 = vld [vmem:[%s6577_s3 + $0x88] ss:$48 sps:$4 sm:$0xff]  }
 0x20b   :  { %2402 = vmatmul.mubr.bf16.gmra.mxu0 %v4951_v45  ;;  %2466 = vmatpush1.bf16.msra.mxu1 %v4375_v30  ;;  %v1995_v56 = vpop.f32.mrf.mxu0  ;;  %v4407_v37 = vld [vmem:[%s6577_s3 + $0x2c] ss:$48 sps:$4 sm:$0xff]   ;;  %vm2635_vm1 = vcmp.ge.f32.partialorder %v5576_v31, 0.0 }
 0x20c   :  { %v2743_v63 = vmul.f32 0.3275911, %v5591_v43  ;;  %v5609_v0 = vand.u32 2147483647, %v5594_v49  ;;  %2493 = vmatprep.mubr.bf16.mxu1 %v4909_v47  ;;  %2517 = vmatpush1.bf16.msra.mxu0 %v4378_v36  ;;  %v2048_v1 = vpop.f32.mrf.mxu1  ;;  %v5616_v3 = vmul.f32 0.70710677, %v5597_v51  ;;  %v5618_v4 = vadd.f32 %v2042_v35, %v1992_v55 }
 0x20d   :  { %v1997_v5 = vpop.f32.mrf.mxu0  ;;  %2467 = vmatprep.subr.bf16.mxu1 %v4383_v38  ;;  %2518 = vmatprep.subr.bf16.mxu0 %v4386_v39  ;;  %v1996_v22 = vadd.f32 %v1995_v56, %v5540_v41  ;;  %v4402_v36 = vld [vmem:[%s6577_s3 + $0x688] ss:$48 sps:$4 sm:$0xff]   ;;  %vm2636_vm2 = vcmp.ge.f32.partialorder %v5594_v49, 0.0 }
 0x20e   :  { %v2779_v7 = vadd.f32 1.0, %v2743_v63  ;;  %v2744_v47 = vmul.f32 0.3275911, %v5609_v0  ;;  %v2050_v8 = vpop.f32.mrf.mxu1  ;;  %2544 = vmatprep.mubr.bf16.mxu0 %v4586_v29  ;;  %v5626_v9 = vand.u32 2147483647, %v5616_v3  ;;  %v1998_v53 = vadd.f32 %v1997_v5, %v5551_v19 }
 0x20f   :  { %v5629_v10 = vmul.f32 0.70710677, %v5618_v4  ;;  %2468 = vmatpush1.bf16.msra.mxu1 %v4381_v60  ;;  %v1999_v11 = vpop.f32.mrf.mxu0  ;;  %v5659_v41 = vadd.f32 %v2046_v50, %v1996_v22  ;;  %v3211_v19 = vsub.f32 0.0, %v5591_v43  ;;  %v3212_v38 = vsub.f32 0.0, %v5609_v0  ;;  %v4410_v50 = vld [vmem:[%s6577_s3 + $0x62c] ss:$48 sps:$4 sm:$0xff]  }
 0x210   :  { %4441 = vrcp.f32 %v2779_v7  ;;  %v2780_v13 = vadd.f32 1.0, %v2744_v47  ;;  %2519 = vmatpush1.bf16.msra.mxu0 %v4384_v62  ;;  %v2051_v14 = vpop.f32.mrf.mxu1  ;;  %2469 = vmatprep.subr.bf16.mxu1 %v4389_v2  ;;  %v2755_v16 = vmul.f32 0.3275911, %v5626_v9  ;;  %v5665_v28 = vadd.f32 %v2048_v1, %v1998_v53  ;;  %v4405_v63 = vld [vmem:[%s6577_s3 + $0x28] ss:$48 sps:$4 sm:$0xff]  }
 0x211   :  { %v2000_v17 = vpop.f32.mrf.mxu0  ;;  %2520 = vmatprep.subr.bf16.mxu0 %v4392_v6  ;;  %v5645_v20 = vand.u32 2147483647, %v5629_v10  ;;  %v5668_v30 = vmul.f32 0.70710677, %v5659_v41  ;;  %v3247_v55 = vmul.f32 %v3211_v19, %v5591_v43  ;;  %v3223_v60 = vsub.f32 0.0, %v5626_v9 }
 0x212   :  { %4443 = vrcp.f32 %v2780_v13  ;;  %v2791_v21 = vadd.f32 1.0, %v2755_v16  ;;  %v5674_v35 = vmul.f32 0.70710677, %v5665_v28  ;;  %v4408_v43 = vld [vmem:[%s6577_s3 + $0x628] ss:$48 sps:$4 sm:$0xff]   ;;  %v3248_v6 = vmul.f32 %v3212_v38, %v5609_v0 }
 0x213   :  { %2470 = vmatpush1.bf16.msra.mxu1 %v4387_v12  ;;  %v2756_v24 = vmul.f32 0.3275911, %v5645_v20  ;;  %v5684_v39 = vand.u32 2147483647, %v5668_v30  ;;  %v4413_v2 = vld [vmem:[%s6577_s3 + $0x5cc] ss:$48 sps:$4 sm:$0xff]   ;;  %v3259_v13 = vmul.f32 %v3223_v60, %v5626_v9 }
 0x214   :  { %2521 = vmatpush1.bf16.msra.mxu0 %v4390_v15  ;;  %2471 = vmatprep.subr.bf16.mxu1 %v4395_v44  ;;  %4445 = vrcp.f32 %v2791_v21  ;;  %v5691_v56 = vand.u32 2147483647, %v5674_v35  ;;  %v3283_v8 = vmul.f32 1.442695, %v3247_v55  ;;  %v3224_v11 = vsub.f32 0.0, %v5645_v20 }
 0x215   :  { %2522 = vmatprep.subr.bf16.mxu0 %v4398_v18  ;;  %v2792_v46 = vadd.f32 1.0, %v2756_v24  ;;  %v2767_v62 = vmul.f32 0.3275911, %v5684_v39  ;;  %v4411_v14 = vld [vmem:[%s6577_s3 + $0x5c8] ss:$48 sps:$4 sm:$0xff]   ;;  %vm2647_vm3 = vcmp.ge.f32.partialorder %v5616_v3, 0.0 }
 0x216   :  { %v2768_v1 = vmul.f32 0.3275911, %v5691_v56  ;;  %v4416_v0 = vld [vmem:[%s6577_s3 + $0x56c] ss:$48 sps:$4 sm:$0xff]   ;;  %v3285_v17 = vmul.f32 1.442695, %v3248_v6  ;;  %v3260_v21 = vmul.f32 %v3224_v11, %v5645_v20 }
 0x217   :  { %2472 = vmatpush1.bf16.msra.mxu1 %v4393_v23  ;;  %4447 = vrcp.f32 %v2792_v46  ;;  %v2803_v7 = vadd.f32 1.0, %v2767_v62  ;;  %v4414_v22 = vld [vmem:[%s6577_s3 + $0x568] ss:$48 sps:$4 sm:$0xff]   ;;  %v3307_v53 = vmul.f32 1.442695, %v3259_v13  ;;  %vm2648_vm4 = vcmp.ge.f32.partialorder %v5629_v10, 0.0 }
 0x218   :  { %2523 = vmatpush1.bf16.msra.mxu0 %v4396_v25  ;;  %2473 = vmatprep.subr.bf16.mxu1 %v4401_v52  ;;  %v2804_v12 = vadd.f32 1.0, %v2768_v1  ;;  %v3309_v38 = vmul.f32 1.442695, %v3260_v21  ;;  %v4417_v62 = vld [vmem:[%s6577_s3 + $0x508] ss:$48 sps:$4 sm:$0xff]   ;;  %vm2659_vm5 = vcmp.ge.f32.partialorder %v5668_v30, 0.0 }
 0x219   :  { %2524 = vmatprep.subr.bf16.mxu0 %v4404_v48  ;;  %4449 = vrcp.f32 %v2803_v7  ;;  %v4419_v48 = vld [vmem:[%s6577_s3 + $0x50c] ss:$48 sps:$4 sm:$0xff]   ;;  %v4429_v3 = vld [vmem:[%s6577_s3 + $0x388] ss:$48 sps:$4 sm:$0xff]   ;;  %vm2660_vm6 = vcmp.ge.f32.partialorder %v5674_v35, 0.0 }
 0x21a   :  { %4451 = vrcp.f32 %v2804_v12 }
 0x21b   :  { %2474 = vmatpush1.bf16.msra.mxu1 %v4399_v34  ;;  %4453 = vpow2.f32 %v3283_v8  ;;  %v3235_v34 = vsub.f32 0.0, %v5684_v39 }
 0x21c   :  { %2525 = vmatpush1.bf16.msra.mxu0 %v4402_v36  ;;  %2475 = vmatprep.subr.bf16.mxu1 %v4407_v37  ;;  %4455 = vpow2.f32 %v3285_v17 }
 0x21d   :  { %v5705_v5 = vpop.eup %4441  ;;  %2526 = vmatprep.subr.bf16.mxu0 %v4410_v50  ;;  %v3236_v50 = vsub.f32 0.0, %v5691_v56  ;;  %4457 = vpow2.f32 %v3307_v53  ;;  %v3271_v7 = vmul.f32 %v3235_v34, %v5684_v39  ;;  %v4420_v39 = vld [vmem:[%s6577_s3 + $0x4a8] ss:$48 sps:$4 sm:$0xff]  }
 0x21e   :  { %v2887_v47 = vmul.f32 1.0614054, %v5705_v5  ;;  %4459 = vpow2.f32 %v3309_v38 }
 0x21f   :  { %2476 = vmatpush1.bf16.msra.mxu1 %v4405_v63  ;;  %v5714_v15 = vpop.eup %4443  ;;  %v3272_v12 = vmul.f32 %v3236_v50, %v5691_v56 }
 0x220   :  { %v2923_v44 = vadd.f32 -1.4531521, %v2887_v47  ;;  %2527 = vmatpush1.bf16.msra.mxu0 %v4408_v43  ;;  %2477 = vmatprep.subr.bf16.mxu1 %v4413_v2  ;;  %v2888_v16 = vmul.f32 1.0614054, %v5714_v15  ;;  %v4422_v43 = vld [vmem:[%s6577_s3 + $0x4ac] ss:$48 sps:$4 sm:$0xff]  }
 0x221   :  { %v5720_v9 = vpop.eup %4445 }
 0x222   :  { %v2959_v18 = vmul.f32 %v5705_v5, %v2923_v44  ;;  %v2924_v23 = vadd.f32 -1.4531521, %v2888_v16  ;;  %v2899_v24 = vmul.f32 1.0614054, %v5720_v9 }
 0x223   :  { %v5728_v25 = vpop.f32.mrf.mxu0  ;;  %2478 = vmatpush2.bf16.msra.mxu1 %v4411_v14  ;;  %2545 = vmatmul.mubr.bf16.vlgmr.msra.gmra.mxu0 %v4911_v26 }
 0x224   :  { %v2995_v52 = vadd.f32 1.4214138, %v2959_v18  ;;  %2479 = vmatprep.subr.bf16.mxu1 %v4416_v0  ;;  %2554 = vmatprep.mubr.bf16.mxu0 %v4586_v29  ;;  %v5735_v20 = vpop.eup %4447  ;;  %v2960_v19 = vmul.f32 %v5714_v15, %v2924_v23  ;;  %v2935_v46 = vadd.f32 -1.4531521, %v2899_v24  ;;  %v4425_v0 = vld [vmem:[%s6577_s3 + $0x44c] ss:$48 sps:$4 sm:$0xff]  }
 0x225   :  { %v5739_v36 = vpop.f32.mrf.mxu0  ;;  %v2900_v37 = vmul.f32 1.0614054, %v5735_v20  ;;  %v3331_v23 = vmul.f32 1.442695, %v3271_v7 }
 0x226   :  { %v3031_v26 = vmul.f32 %v5705_v5, %v2995_v52  ;;  %v2996_v55 = vadd.f32 1.4214138, %v2960_v19  ;;  %v2971_v29 = vmul.f32 %v5720_v9, %v2935_v46  ;;  %v5770_v16 = vpop.eup %4449  ;;  %v3333_v19 = vmul.f32 1.442695, %v3272_v12  ;;  %v4423_v46 = vld [vmem:[%s6577_s3 + $0x448] ss:$48 sps:$4 sm:$0xff]  }
 0x227   :  { %v5745_v60 = vpop.f32.mrf.mxu0  ;;  %2480 = vmatpush2.bf16.msra.mxu1 %v4414_v22  ;;  %v2936_v1 = vadd.f32 -1.4531521, %v2900_v37  ;;  %v5773_v18 = vpop.eup %4451  ;;  %v2911_v22 = vmul.f32 1.0614054, %v5770_v16  ;;  %4461 = vpow2.f32 %v3331_v23 }
 0x228   :  { %v3067_v63 = vadd.f32 -0.28449672, %v3031_v26  ;;  %2481 = vmatprep.subr.bf16.mxu1 %v4419_v48  ;;  %v3032_v2 = vmul.f32 %v5714_v15, %v2996_v55  ;;  %v3007_v6 = vadd.f32 1.4214138, %v2971_v29  ;;  %v2912_v48 = vmul.f32 1.0614054, %v5773_v18  ;;  %v4454_v34 = vpop.eup %4453 }
 0x229   :  { %v5755_v47 = vpop.f32.mrf.mxu0  ;;  %v2972_v11 = vmul.f32 %v5735_v20, %v2936_v1  ;;  %v2947_v38 = vadd.f32 -1.4531521, %v2911_v22  ;;  %v4587_v55 = vmov -1.0   ;;  %4463 = vpow2.f32 %v3333_v19 }
 0x22a   :  { %v3103_v8 = vmul.f32 %v5705_v5, %v3067_v63  ;;  %v3068_v13 = vadd.f32 -0.28449672, %v3032_v2  ;;  %v3043_v14 = vmul.f32 %v5720_v9, %v3007_v6  ;;  %v2671_v29 = vsel %vm2635_vm1, 1.0, %v4587_v55 }
 0x22b   :  { %v5761_v44 = vpop.f32.mrf.mxu0  ;;  %2482 = vmatpush2.bf16.msra.mxu1 %v4417_v62  ;;  %2555 = vmatmul.mubr.bf16.gmra.mxu0 %v4946_v40  ;;  %v3008_v17 = vadd.f32 1.4214138, %v2972_v11  ;;  %v2948_v1 = vadd.f32 -1.4531521, %v2912_v48  ;;  %v2983_v6 = vmul.f32 %v5770_v16, %v2947_v38  ;;  %v2684_v10 = vsel %vm2648_vm4, 1.0, %v4587_v55 }
 0x22c   :  { %v3139_v56 = vadd.f32 0.2548296, %v3103_v8  ;;  %2483 = vmatprep.subr.bf16.mxu1 %v4422_v43  ;;  %v3104_v21 = vmul.f32 %v5714_v15, %v3068_v13  ;;  %v3079_v40 = vadd.f32 -0.28449672, %v3043_v14  ;;  %v4456_v8 = vpop.eup %4455 }
 0x22d   :  { %v5777_v24 = vpop.f32.mrf.mxu0  ;;  %v3044_v52 = vmul.f32 %v5735_v20, %v3008_v17  ;;  %v2984_v13 = vmul.f32 %v5773_v18, %v2948_v1 }
 0x22e   :  { %v3175_v53 = vmul.f32 %v5705_v5, %v3139_v56  ;;  %v3140_v26 = vadd.f32 0.2548296, %v3104_v21  ;;  %v3115_v37 = vmul.f32 %v5720_v9, %v3079_v40  ;;  %v4428_v5 = vld [vmem:[%s6577_s3 + $0x3ec] ss:$48 sps:$4 sm:$0xff]  }
 0x22f   :  { %v2152_v50 = vpop.f32.mrf.mxu0  ;;  %2484 = vmatpush2.bf16.msra.mxu1 %v4420_v39  ;;  %v3080_v63 = vadd.f32 -0.28449672, %v3044_v52  ;;  %v3019_v39 = vadd.f32 1.4214138, %v2983_v6  ;;  %v3020_v21 = vadd.f32 1.4214138, %v2984_v13 }
 0x230   :  { %v3355_v62 = vmul.f32 %v4454_v34, %v3175_v53  ;;  %2485 = vmatprep.subr.bf16.mxu1 %v4425_v0  ;;  %v3176_v43 = vmul.f32 %v5714_v15, %v3140_v26  ;;  %v3151_v2 = vadd.f32 0.2548296, %v3115_v37  ;;  %v4426_v15 = vld [vmem:[%s6577_s3 + $0x3e8] ss:$48 sps:$4 sm:$0xff]   ;;  %v4458_v0 = vpop.eup %4457  ;;  %v4431_v40 = vld [vmem:[%s6577_s3 + $0x38c] ss:$48 sps:$4 sm:$0xff]  }
 0x231   :  { %v2153_v7 = vpop.f32.mrf.mxu0  ;;  %v3116_v12 = vmul.f32 %v5735_v20, %v3080_v63  ;;  %v2563_v53 = vmul.f32 0.5, %v5568_v54  ;;  %v2672_v52 = vsel %vm2636_vm2, 1.0, %v4587_v55  ;;  %v3056_v19 = vmul.f32 %v5773_v18, %v3020_v21 }
 0x232   :  { %v3391_v11 = vsub.f32 1.0, %v3355_v62  ;;  %v3356_v31 = vmul.f32 %v4456_v8, %v3176_v43  ;;  %v3187_v14 = vmul.f32 %v5720_v9, %v3151_v2  ;;  %v3055_v9 = vmul.f32 %v5770_v16, %v3019_v39  ;;  %v4432_v8 = vld [vmem:[%s6577_s3 + $0x328] ss:$48 sps:$4 sm:$0xff]  }
 0x233   :  { %2486 = vmatpush2.bf16.msra.mxu1 %v4423_v46  ;;  %v3152_v17 = vadd.f32 0.2548296, %v3116_v12  ;;  %v4460_v46 = vpop.eup %4459  ;;  %v2683_v54 = vsel %vm2647_vm3, 1.0, %v4587_v55  ;;  %v3092_v50 = vadd.f32 -0.28449672, %v3056_v19  ;;  %v2696_v19 = vsel %vm2660_vm6, 1.0, %v4587_v55 }
 0x234   :  { %v3427_v56 = vmul.f32 %v3391_v11, %v2671_v29  ;;  %2487 = vmatprep.subr.bf16.mxu1 %v4428_v5  ;;  %v3392_v22 = vsub.f32 1.0, %v3356_v31  ;;  %v3367_v23 = vmul.f32 %v4458_v0, %v3187_v14  ;;  %v3091_v38 = vadd.f32 -0.28449672, %v3055_v9  ;;  %v4462_v39 = vpop.eup %4461 }
 0x235   :  { %v3188_v48 = vmul.f32 %v5735_v20, %v3152_v17  ;;  %v4434_v20 = vld [vmem:[%s6577_s3 + $0x32c] ss:$48 sps:$4 sm:$0xff]   ;;  %v2564_v5 = vmul.f32 0.5, %v5578_v33  ;;  %v3128_v43 = vmul.f32 %v5773_v18, %v3092_v50  ;;  %v465_v14 = vsub.s32 3, %v4874_v57 }
 0x236   :  { %v3463_v34 = vadd.f32 1.0, %v3427_v56  ;;  %v3428_v26 = vmul.f32 %v3392_v22, %v2672_v52  ;;  %v3403_v37 = vsub.f32 1.0, %v3367_v23  ;;  %v3127_v63 = vmul.f32 %v5770_v16, %v3091_v38  ;;  %v4464_v21 = vpop.eup %4463 }
 0x237   :  { %2488 = vmatpush2.bf16.msra.mxu1 %v4426_v15  ;;  %v3368_v49 = vmul.f32 %v4460_v46, %v3188_v48  ;;  %v3164_v33 = vadd.f32 0.2548296, %v3128_v43  ;;  %v2575_v15 = vmul.f32 0.5, %v5597_v51  ;;  %v2576_v0 = vmul.f32 0.5, %v5618_v4 }
 0x238   :  { %2489 = vmatprep.subr.bf16.mxu1 %v4431_v40  ;;  %v3464_v29 = vadd.f32 1.0, %v3428_v26  ;;  %v3439_v62 = vmul.f32 %v3403_v37, %v2683_v54  ;;  %v3499_v2 = vmul.f32 %v3463_v34, %v2563_v53  ;;  %v3163_v7 = vadd.f32 0.2548296, %v3127_v63 }
 0x239   :  { %v3404_v1 = vsub.f32 1.0, %v3368_v49  ;;  %v3200_v17 = vmul.f32 %v5773_v18, %v3164_v33  ;;  %v466_v18 = vrot.slane %v5530_v42, %v465_v14  ;;  %v2695_v53 = vsel %vm2659_vm5, 1.0, %v4587_v55 }
 0x23a   :  { %v3500_v6 = vmul.f32 %v3464_v29, %v2564_v5  ;;  %v3475_v11 = vadd.f32 1.0, %v3439_v62  ;;  %v3199_v31 = vmul.f32 %v5770_v16, %v3163_v7  ;;  %v462_v16 = vrot.slane %v5530_v42, %v4880_v59 }
 0x23b   :  { %2490 = vmatpush2.bf16.msra.mxu1 %v4429_v3  ;;  %v3440_v12 = vmul.f32 %v3404_v1, %v2684_v10  ;;  %v3380_v51 = vmul.f32 %v4464_v21, %v3200_v17  ;;  %v2587_v3 = vmul.f32 0.5, %v5659_v41 }
 0x23c   :  { %2491 = vmatprep.subr.bf16.mxu1 %v4434_v20  ;;  %v3983_v13 = vpack.c.bf16 %v3500_v6, %v3499_v2  ;;  %v3379_v40 = vmul.f32 %v4462_v39, %v3199_v31  ;;  %v3511_v22 = vmul.f32 %v3475_v11, %v2575_v15 }
 0x23d   :  { %v3476_v56 = vadd.f32 1.0, %v3440_v12  ;;  %v3416_v52 = vsub.f32 1.0, %v3380_v51 }
 0x23e   :  { %3655 = vst [vmem:[%s6581_s5] sm:$0xff] %v3983_v13  ;;  %v3415_v4 = vsub.f32 1.0, %v3379_v40 }
 0x23f   :  { %2492 = vmatpush2.bf16.msra.mxu1 %v4432_v8  ;;  %v3512_v23 = vmul.f32 %v3476_v56, %v2576_v0  ;;  %v3452_v35 = vmul.f32 %v3416_v52, %v2696_v19 }
 0x240   :  { %v3451_v48 = vmul.f32 %v3415_v4, %v2695_v53 }
 0x241   :  { %v3989_v9 = vpack.c.bf16 %v3512_v23, %v3511_v22  ;;  %v3488_v54 = vadd.f32 1.0, %v3452_v35 }
 0x242   :  { %v2087_v30 = vpop.f32.mrf.mxu1  ;;  %2494 = vmatmul.mubr.bf16.vlgmr.msra.gmra.mxu1 %v4916_v27  ;;  %v3487_v26 = vadd.f32 1.0, %v3451_v48  ;;  %v2588_v27 = vmul.f32 0.5, %v5665_v28 }
 0x243   :  { %v2088_v46 = vadd.f32 %v2087_v30, %v462_v16  ;;  %2503 = vmatprep.mubr.bf16.mxu1 %v4926_v32  ;;  %3661 = vst [vmem:[%s6581_s5 + $0x30] sm:$0xff] %v3989_v9  ;;  %v469_v30 = vsub.s32 4, %v4874_v57 }
 0x244   :  { %v2089_v34 = vpop.f32.mrf.mxu1  ;;  %v3523_v20 = vmul.f32 %v3487_v26, %v2587_v3  ;;  %v3524_v5 = vmul.f32 %v3488_v54, %v2588_v27 }
 0x245   :  { %v5850_v37 = vadd.f32 %v5728_v25, %v2088_v46  ;;  %v2090_v38 = vadd.f32 %v2089_v34, %v466_v18 }
 0x246   :  { %v2091_v49 = vpop.f32.mrf.mxu1  ;;  %v3995_v41 = vpack.c.bf16 %v3524_v5, %v3523_v20 }
 0x247   :  { %v5855_v50 = vmul.f32 0.70710677, %v5850_v37  ;;  %v5858_v32 = vadd.f32 %v5739_v36, %v2090_v38  ;;  %v2092_v29 = vadd.f32 %v2091_v49, %v462_v16  ;;  %v5905_v49 = vrot.slane %v5530_v42, %v469_v30 }
 0x248   :  { %v2093_v62 = vpop.f32.mrf.mxu1  ;;  %3667 = vst [vmem:[%s6581_s5 + $0x60] sm:$0x33] %v3995_v41  ;;  %v5911_v5 = vmul.f32 0.5, %v5850_v37 }
 0x249   :  { %v2709_v25 = vand.u32 2147483647, %v5855_v50  ;;  %v5862_v63 = vmul.f32 0.70710677, %v5858_v32  ;;  %v5865_v28 = vadd.f32 %v5745_v60, %v2092_v29  ;;  %v2094_v1 = vadd.f32 %v2093_v62, %v466_v18 }
 0x24a   :  { %v2097_v43 = vpop.f32.mrf.mxu1  ;;  %2504 = vmatmul.mubr.bf16.gmra.mxu1 %v4951_v45  ;;  %vm2637_vm7 = vcmp.ge.f32.partialorder %v5855_v50, 0.0 }
 0x24b   :  { %v2745_v2 = vmul.f32 0.3275911, %v2709_v25  ;;  %v2710_v36 = vand.u32 2147483647, %v5862_v63  ;;  %v5873_v6 = vmul.f32 0.70710677, %v5865_v28  ;;  %v5876_v10 = vadd.f32 %v5755_v47, %v2094_v1 }
 0x24c   :  { %v2099_v7 = vpop.f32.mrf.mxu1  ;;  %v2098_v0 = vadd.f32 %v2097_v43, %v462_v16  ;;  %v3213_v17 = vsub.f32 0.0, %v2709_v25  ;;  %v5923_v50 = vsel %vm2637_vm7, 1.0, %v4587_v55  ;;  %vm2638_vm8 = vcmp.ge.f32.partialorder %v5862_v63, 0.0 }
 0x24d   :  { %v2781_v60 = vadd.f32 1.0, %v2745_v2  ;;  %v2746_v8 = vmul.f32 0.3275911, %v2710_v36  ;;  %v2721_v11 = vand.u32 2147483647, %v5873_v6  ;;  %v2100_v56 = vadd.f32 %v2099_v7, %v466_v18 }
 0x24e   :  { %v5880_v45 = vmul.f32 0.70710677, %v5876_v10  ;;  %v2101_v12 = vpop.f32.mrf.mxu1  ;;  %v5884_v21 = vadd.f32 %v5761_v44, %v2098_v0  ;;  %v3249_v4 = vmul.f32 %v3213_v17, %v2709_v25  ;;  %v3214_v16 = vsub.f32 0.0, %v2710_v36 }
 0x24f   :  { %4465 = vrcp.f32 %v2781_v60  ;;  %v2782_v33 = vadd.f32 1.0, %v2746_v8  ;;  %v2757_v13 = vmul.f32 0.3275911, %v2721_v11  ;;  %v5887_v22 = vadd.f32 %v5777_v24, %v2100_v56 }
 0x250   :  { %v2102_v31 = vpop.f32.mrf.mxu1  ;;  %v2722_v39 = vand.u32 2147483647, %v5880_v45  ;;  %v5890_v23 = vmul.f32 0.70710677, %v5884_v21  ;;  %v3225_v9 = vsub.f32 0.0, %v2721_v11  ;;  %v473_v24 = vsub.s32 5, %v4874_v57 }
 0x251   :  { %4467 = vrcp.f32 %v2782_v33  ;;  %v2793_v15 = vadd.f32 1.0, %v2757_v13  ;;  %v5893_v51 = vmul.f32 0.70710677, %v5887_v22  ;;  %v3287_v19 = vmul.f32 1.442695, %v3249_v4 }
 0x252   :  { %v2758_v47 = vmul.f32 0.3275911, %v2722_v39  ;;  %v2733_v18 = vand.u32 2147483647, %v5890_v23  ;;  %v3250_v46 = vmul.f32 %v3214_v16, %v2710_v36  ;;  %v3261_v26 = vmul.f32 %v3225_v9, %v2721_v11 }
 0x253   :  { %4469 = vrcp.f32 %v2793_v15  ;;  %v2734_v53 = vand.u32 2147483647, %v5893_v51  ;;  %v3226_v38 = vsub.f32 0.0, %v2722_v39  ;;  %v5908_v20 = vrot.slane %v5530_v42, %v473_v24 }
 0x254   :  { %v2794_v40 = vadd.f32 1.0, %v2758_v47  ;;  %v2769_v44 = vmul.f32 0.3275911, %v2733_v18  ;;  %v3289_v62 = vmul.f32 1.442695, %v3250_v46  ;;  %v5919_v2 = vmul.f32 0.5, %v5858_v32 }
 0x255   :  { %v2770_v52 = vmul.f32 0.3275911, %v2734_v53  ;;  %v3311_v1 = vmul.f32 1.442695, %v3261_v26  ;;  %v3262_v43 = vmul.f32 %v3226_v38, %v2722_v39  ;;  %v3237_v37 = vsub.f32 0.0, %v2733_v18 }
 0x256   :  { %4471 = vrcp.f32 %v2794_v40  ;;  %v2805_v35 = vadd.f32 1.0, %v2769_v44  ;;  %v3238_v8 = vsub.f32 0.0, %v2734_v53  ;;  %v5940_v44 = vsel %vm2638_vm8, 1.0, %v4587_v55 }
 0x257   :  { %v2806_v3 = vadd.f32 1.0, %v2770_v52  ;;  %v3313_v0 = vmul.f32 1.442695, %v3262_v43  ;;  %v3273_v40 = vmul.f32 %v3237_v37, %v2733_v18  ;;  %v5946_v46 = vmul.f32 0.5, %v5865_v28 }
 0x258   :  { %4473 = vrcp.f32 %v2805_v35  ;;  %v3274_v30 = vmul.f32 %v3238_v8, %v2734_v53  ;;  %vm2649_vm9 = vcmp.ge.f32.partialorder %v5873_v6, 0.0  ;;  %vm2650_vm10 = vcmp.ge.f32.partialorder %v5880_v45, 0.0 }
 0x259   :  { %4475 = vrcp.f32 %v2806_v3  ;;  %vm2661_vm11 = vcmp.ge.f32.partialorder %v5890_v23, 0.0  ;;  %vm2662_vm12 = vcmp.ge.f32.partialorder %v5893_v51, 0.0 }
 0x25a   :  { %4477 = vpow2.f32 %v3287_v19 }
 0x25b   :  { %4479 = vpow2.f32 %v3289_v62 }
 0x25c   :  { %v5899_v48 = vpop.eup %4465  ;;  %4481 = vpow2.f32 %v3311_v1 }
 0x25d   :  { %v2889_v34 = vmul.f32 1.0614054, %v5899_v48  ;;  %4483 = vpow2.f32 %v3313_v0 }
 0x25e   :  { %v5902_v27 = vpop.eup %4467 }
 0x25f   :  { %v2925_v54 = vadd.f32 -1.4531521, %v2889_v34  ;;  %v2890_v29 = vmul.f32 1.0614054, %v5902_v27 }
 0x260   :  { %v5915_v25 = vpop.eup %4469 }
 0x261   :  { %v2961_v41 = vmul.f32 %v5899_v48, %v2925_v54  ;;  %v2926_v42 = vadd.f32 -1.4531521, %v2890_v29  ;;  %v2901_v36 = vmul.f32 1.0614054, %v5915_v25  ;;  %v3335_v54 = vmul.f32 1.442695, %v3273_v40 }
 0x262   :  { %v2240_v7 = vpop.f32.mrf.mxu1 }
 0x263   :  { %v2997_v60 = vadd.f32 1.4214138, %v2961_v41  ;;  %v2189_v11 = vpop.f32.mrf.mxu0  ;;  %v5926_v12 = vpop.eup %4471  ;;  %v2962_v33 = vmul.f32 %v5902_v27, %v2926_v42  ;;  %v2937_v32 = vadd.f32 -1.4531521, %v2901_v36  ;;  %v3337_v42 = vmul.f32 1.442695, %v3274_v30 }
 0x264   :  { %v2190_v13 = vadd.f32 %v2189_v11, %v5905_v49  ;;  %v2242_v31 = vpop.f32.mrf.mxu1  ;;  %v2902_v15 = vmul.f32 1.0614054, %v5926_v12  ;;  %4485 = vpow2.f32 %v3335_v54 }
 0x265   :  { %v3033_v39 = vmul.f32 %v5899_v48, %v2997_v60  ;;  %v2191_v47 = vpop.f32.mrf.mxu0  ;;  %v2998_v56 = vadd.f32 1.4214138, %v2962_v33  ;;  %v2973_v17 = vmul.f32 %v5915_v25, %v2937_v32  ;;  %v5966_v41 = vpop.eup %4473 }
 0x266   :  { %v5933_v4 = vadd.f32 %v2240_v7, %v2190_v13  ;;  %v5935_v16 = vpop.f32.mrf.mxu1  ;;  %v2938_v52 = vadd.f32 -1.4531521, %v2902_v15  ;;  %v2192_v53 = vadd.f32 %v2191_v47, %v5908_v20  ;;  %v5970_v37 = vpop.eup %4475  ;;  %v2913_v8 = vmul.f32 1.0614054, %v5966_v41 }
 0x267   :  { %v3069_v9 = vadd.f32 -0.28449672, %v3033_v39  ;;  %v5942_v24 = vpop.f32.mrf.mxu0  ;;  %v3034_v19 = vmul.f32 %v5902_v27, %v2998_v56  ;;  %v3009_v18 = vadd.f32 1.4214138, %v2973_v17  ;;  %v2914_v39 = vmul.f32 1.0614054, %v5970_v37  ;;  %v4478_v47 = vpop.eup %4477 }
 0x268   :  { %v5949_v35 = vmul.f32 0.70710677, %v5933_v4  ;;  %v5951_v34 = vpop.f32.mrf.mxu1  ;;  %v2974_v63 = vmul.f32 %v5926_v12, %v2938_v52  ;;  %v5980_v15 = vadd.f32 %v2242_v31, %v2192_v53  ;;  %v2949_v40 = vadd.f32 -1.4531521, %v2913_v8 }
 0x269   :  { %v3105_v26 = vmul.f32 %v5899_v48, %v3069_v9  ;;  %v5957_v38 = vpop.f32.mrf.mxu0  ;;  %v3070_v3 = vadd.f32 -0.28449672, %v3034_v19  ;;  %v3045_v28 = vmul.f32 %v5915_v25, %v3009_v18  ;;  %v2950_v18 = vadd.f32 -1.4531521, %v2914_v39 }
 0x26a   :  { %v5962_v29 = vand.u32 2147483647, %v5949_v35  ;;  %v5964_v62 = vpop.f32.mrf.mxu1  ;;  %v3010_v43 = vadd.f32 1.4214138, %v2974_v63  ;;  %v2985_v31 = vmul.f32 %v5966_v41, %v2949_v40  ;;  %v2196_v51 = vadd.f32 %v5957_v38, %v5908_v20 }
 0x26b   :  { %v3141_v1 = vadd.f32 0.2548296, %v3105_v26  ;;  %v5968_v36 = vpop.f32.mrf.mxu0  ;;  %v3106_v7 = vmul.f32 %v5902_v27, %v3070_v3  ;;  %v3081_v60 = vadd.f32 -0.28449672, %v3045_v28  ;;  %v4480_v3 = vpop.eup %4479  ;;  %vm2639_vm13 = vcmp.ge.f32.partialorder %v5949_v35, 0.0 }
 0x26c   :  { %v2747_v11 = vmul.f32 0.3275911, %v5962_v29  ;;  %v5975_v33 = vpop.f32.mrf.mxu1  ;;  %v3046_v13 = vmul.f32 %v5926_v12, %v3010_v43  ;;  %v2986_v43 = vmul.f32 %v5970_v37, %v2950_v18 }
 0x26d   :  { %v3177_v32 = vmul.f32 %v5899_v48, %v3141_v1  ;;  %v5982_v0 = vpop.f32.mrf.mxu0  ;;  %v3142_v56 = vadd.f32 0.2548296, %v3106_v7  ;;  %v3117_v17 = vmul.f32 %v5915_v25, %v3081_v60  ;;  %v4482_v60 = vpop.eup %4481 }
 0x26e   :  { %v2783_v9 = vadd.f32 1.0, %v2747_v11  ;;  %v2254_v52 = vpop.f32.mrf.mxu1  ;;  %v3082_v19 = vadd.f32 -0.28449672, %v3046_v13  ;;  %v3021_v11 = vadd.f32 1.4214138, %v2985_v31 }
 0x26f   :  { %v3357_v30 = vmul.f32 %v4478_v47, %v3177_v32  ;;  %v2203_v48 = vpop.f32.mrf.mxu0  ;;  %v3178_v26 = vmul.f32 %v5902_v27, %v3142_v56  ;;  %v3153_v63 = vadd.f32 0.2548296, %v3117_v17  ;;  %v5991_v27 = vmul.f32 0.70710677, %v5980_v15 }
 0x270   :  { %4487 = vrcp.f32 %v2783_v9  ;;  %v2255_v53 = vpop.f32.mrf.mxu1  ;;  %v3118_v1 = vmul.f32 %v5926_v12, %v3082_v19  ;;  %v3022_v39 = vadd.f32 1.4214138, %v2986_v43  ;;  %v2194_v47 = vadd.f32 %v5942_v24, %v5905_v49 }
 0x271   :  { %v3393_v28 = vsub.f32 1.0, %v3357_v30  ;;  %4489 = vpow2.f32 %v3337_v42  ;;  %v2204_v7 = vpop.f32.mrf.mxu0  ;;  %v3358_v8 = vmul.f32 %v4480_v3, %v3178_v26  ;;  %v3189_v54 = vmul.f32 %v5915_v25, %v3153_v63  ;;  %v4484_v30 = vpop.eup %4483 }
 0x272   :  { %v3154_v13 = vadd.f32 0.2548296, %v3118_v1  ;;  %v2685_v42 = vsel %vm2649_vm9, 1.0, %v4587_v55  ;;  %v3057_v40 = vmul.f32 %v5966_v41, %v3021_v11  ;;  %v2686_v9 = vsel %vm2650_vm10, 1.0, %v4587_v55 }
 0x273   :  { %v3429_v32 = vmul.f32 %v3393_v28, %v5923_v50  ;;  %v3394_v56 = vsub.f32 1.0, %v3358_v8  ;;  %v3369_v17 = vmul.f32 %v4482_v60, %v3189_v54  ;;  %v3058_v52 = vmul.f32 %v5970_v37, %v3022_v39 }
 0x274   :  { %v3190_v50 = vmul.f32 %v5926_v12, %v3154_v13  ;;  %v3093_v18 = vadd.f32 -0.28449672, %v3057_v40  ;;  %v6007_v6 = vand.u32 2147483647, %v5991_v27  ;;  %v6011_v63 = vadd.f32 %v5935_v16, %v2194_v47 }
 0x275   :  { %v3465_v25 = vadd.f32 1.0, %v3429_v32  ;;  %v3430_v24 = vmul.f32 %v3394_v56, %v5940_v44  ;;  %v3405_v19 = vsub.f32 1.0, %v3369_v17  ;;  %v3094_v26 = vadd.f32 -0.28449672, %v3058_v52  ;;  %v4486_v32 = vpop.eup %4485 }
 0x276   :  { %v3370_v48 = vmul.f32 %v4484_v30, %v3190_v50  ;;  %v3129_v12 = vmul.f32 %v5966_v41, %v3093_v18  ;;  %v2748_v53 = vmul.f32 0.3275911, %v6007_v6  ;;  %v3215_v28 = vsub.f32 0.0, %v5962_v29 }
 0x277   :  { %v3466_v45 = vadd.f32 1.0, %v3430_v24  ;;  %v3441_v31 = vmul.f32 %v3405_v19, %v2685_v42  ;;  %v3130_v44 = vmul.f32 %v5970_v37, %v3094_v26  ;;  %v3501_v1 = vmul.f32 %v3465_v25, %v5911_v5 }
 0x278   :  { %v3406_v3 = vsub.f32 1.0, %v3370_v48  ;;  %v3165_v7 = vadd.f32 0.2548296, %v3129_v12  ;;  %v2784_v16 = vadd.f32 1.0, %v2748_v53  ;;  %v6021_v11 = vmul.f32 0.70710677, %v6011_v63 }
 0x279   :  { %v3502_v43 = vmul.f32 %v3466_v45, %v5919_v2  ;;  %v3477_v60 = vadd.f32 1.0, %v3441_v31  ;;  %v3166_v54 = vadd.f32 0.2548296, %v3130_v44  ;;  %v2578_v39 = vmul.f32 0.5, %v5876_v10 }
 0x27a   :  { %v3442_v8 = vmul.f32 %v3406_v3, %v2686_v9  ;;  %v3201_v47 = vmul.f32 %v5966_v41, %v3165_v7  ;;  %4491 = vrcp.f32 %v2784_v16  ;;  %v2697_v2 = vsel %vm2661_vm11, 1.0, %v4587_v55 }
 0x27b   :  { %v3984_v13 = vpack.c.bf16 %v3502_v43, %v3501_v1  ;;  %v2698_v42 = vsel %vm2662_vm12, 1.0, %v4587_v55  ;;  %v3202_v17 = vmul.f32 %v5970_v37, %v3166_v54  ;;  %v3251_v25 = vmul.f32 %v3215_v28, %v5962_v29 }
 0x27c   :  { %v3478_v5 = vadd.f32 1.0, %v3442_v8  ;;  %v3381_v10 = vmul.f32 %v4486_v32, %v3201_v47  ;;  %v2723_v9 = vand.u32 2147483647, %v6021_v11  ;;  %v3513_v23 = vmul.f32 %v3477_v60, %v5946_v46 }
 0x27d   :  { %v6025_v56 = vpop.eup %4487  ;;  %3656 = vst [vmem:[%s6581_s5 + $0x8] sm:$0xff] %v3984_v13  ;;  %v3216_v24 = vsub.f32 0.0, %v6007_v6  ;;  %v6045_v26 = vadd.f32 %v5951_v34, %v2196_v51  ;;  %v2200_v29 = vadd.f32 %v5968_v36, %v5905_v49  ;;  %v3291_v31 = vmul.f32 1.442695, %v3251_v25 }
 0x27e   :  { %v4490_v40 = vpop.eup %4489  ;;  %v2891_v41 = vmul.f32 1.0614054, %v6025_v56  ;;  %v3514_v50 = vmul.f32 %v3478_v5, %v2578_v39  ;;  %v3417_v37 = vsub.f32 1.0, %v3381_v10  ;;  %v2759_v19 = vmul.f32 0.3275911, %v2723_v9 }
 0x27f   :  { %v3382_v52 = vmul.f32 %v4490_v40, %v3202_v17  ;;  %v6054_v53 = vmul.f32 0.70710677, %v6045_v26  ;;  %v6057_v3 = vadd.f32 %v5964_v62, %v2200_v29  ;;  %v2589_v49 = vmul.f32 0.5, %v5884_v21 }
 0x280   :  { %v2927_v30 = vadd.f32 -1.4531521, %v2891_v41  ;;  %v3990_v18 = vpack.c.bf16 %v3514_v50, %v3513_v23  ;;  %v3453_v45 = vmul.f32 %v3417_v37, %v2697_v2  ;;  %v2795_v12 = vadd.f32 1.0, %v2759_v19 }
 0x281   :  { %v3418_v48 = vsub.f32 1.0, %v3382_v52  ;;  %v2590_v28 = vmul.f32 0.5, %v5887_v22  ;;  %v3252_v43 = vmul.f32 %v3216_v24, %v6007_v6  ;;  %v2724_v7 = vand.u32 2147483647, %v6054_v53 }
 0x282   :  { %v2963_v46 = vmul.f32 %v6025_v56, %v2927_v30  ;;  %3662 = vst [vmem:[%s6581_s5 + $0x38] sm:$0xff] %v3990_v18  ;;  %v3489_v36 = vadd.f32 1.0, %v3453_v45  ;;  %4493 = vrcp.f32 %v2795_v12  ;;  %v6069_v21 = vmul.f32 0.70710677, %v6057_v3 }
 0x283   :  { %v3454_v38 = vmul.f32 %v3418_v48, %v2698_v42  ;;  %v6059_v34 = vpop.f32.mrf.mxu0  ;;  %4495 = vpow2.f32 %v3291_v31  ;;  %v2760_v54 = vmul.f32 0.3275911, %v2724_v7  ;;  %v2202_v22 = vadd.f32 %v5982_v0, %v5908_v20 }
 0x284   :  { %v2999_v44 = vadd.f32 1.4214138, %v2963_v46  ;;  %v3525_v62 = vmul.f32 %v3489_v36, %v2589_v49  ;;  %v3293_v47 = vmul.f32 1.442695, %v3252_v43  ;;  %v3227_v40 = vsub.f32 0.0, %v2723_v9 }
 0x285   :  { %v3490_v1 = vadd.f32 1.0, %v3454_v38  ;;  %v6065_v16 = vpop.f32.mrf.mxu0  ;;  %v2796_v5 = vadd.f32 1.0, %v2760_v54  ;;  %v2735_v10 = vand.u32 2147483647, %v6069_v21  ;;  %v6083_v41 = vadd.f32 %v5975_v33, %v2202_v22 }
 0x286   :  { %v3035_v60 = vmul.f32 %v6025_v56, %v2999_v44  ;;  %v3263_v37 = vmul.f32 %v3227_v40, %v2723_v9  ;;  %v3228_v29 = vsub.f32 0.0, %v2724_v7  ;;  %v2675_v40 = vsel %vm2639_vm13, 1.0, %v4587_v55 }
 0x287   :  { %v3526_v8 = vmul.f32 %v3490_v1, %v2590_v28  ;;  %v6071_v32 = vpop.f32.mrf.mxu0  ;;  %v4492_v6 = vpop.eup %4491  ;;  %4497 = vrcp.f32 %v2796_v5  ;;  %v2771_v23 = vmul.f32 0.3275911, %v2735_v10  ;;  %v6088_v50 = vmul.f32 0.70710677, %v6083_v41 }
 0x288   :  { %v3071_v13 = vadd.f32 -0.28449672, %v3035_v60  ;;  %v2892_v17 = vmul.f32 1.0614054, %v4492_v6  ;;  %4499 = vpow2.f32 %v3293_v47  ;;  %v3315_v38 = vmul.f32 1.442695, %v3263_v37 }
 0x289   :  { %v3996_v39 = vpack.c.bf16 %v3526_v8, %v3525_v62  ;;  %v6075_v2 = vpop.f32.mrf.mxu0  ;;  %v2807_v30 = vadd.f32 1.0, %v2771_v23  ;;  %v2736_v24 = vand.u32 2147483647, %v6088_v50  ;;  %v3264_v1 = vmul.f32 %v3228_v29, %v2724_v7 }
 0x28a   :  { %v3107_v42 = vmul.f32 %v6025_v56, %v3071_v13  ;;  %v2928_v25 = vadd.f32 -1.4531521, %v2892_v17  ;;  %v3239_v43 = vsub.f32 0.0, %v2735_v10  ;;  %v481_v23 = vsub.s32 7, %v4874_v57 }
 0x28b   :  { %3668 = vst [vmem:[%s6581_s5 + $0x68] sm:$0x33] %v3996_v39  ;;  %v6085_v20 = vpop.f32.mrf.mxu0  ;;  %4501 = vrcp.f32 %v2807_v30  ;;  %v2772_v45 = vmul.f32 0.3275911, %v2736_v24  ;;  %v3317_v39 = vmul.f32 1.442695, %v3264_v1 }
 0x28c   :  { %v3143_v0 = vadd.f32 0.2548296, %v3107_v42  ;;  %v2964_v51 = vmul.f32 %v4492_v6, %v2928_v25  ;;  %v3275_v47 = vmul.f32 %v3239_v43, %v2735_v10  ;;  %v3240_v17 = vsub.f32 0.0, %v2736_v24 }
 0x28d   :  { %v6090_v52 = vpop.f32.mrf.mxu0  ;;  %v2808_v36 = vadd.f32 1.0, %v2772_v45  ;;  %v477_v25 = vsub.s32 6, %v4874_v57  ;;  %vm2640_vm14 = vcmp.ge.f32.partialorder %v5991_v27, 0.0  ;;  %v4585_v27 = vld [vmem:[%s6580_s4] sm:$0xff]  ;;  %vm2651_vm15 = vcmp.ge.f32.partialorder %v6021_v11, 0.0 }
 0x28e   :  { %v3179_v33 = vmul.f32 %v6025_v56, %v3143_v0  ;;  %v3000_v18 = vadd.f32 1.4214138, %v2964_v51  ;;  %v3276_v29 = vmul.f32 %v3240_v17, %v2736_v24  ;;  %v2676_v45 = vsel %vm2640_vm14, 1.0, %v4587_v55 }
 0x28f   :  { %v2356_v19 = vpop.f32.mrf.mxu0  ;;  %v4494_v48 = vpop.eup %4493  ;;  %4503 = vrcp.f32 %v2808_v36  ;;  %vm2652_vm0 = vcmp.ge.f32.partialorder %v6054_v53, 0.0  ;;  %vm2663_vm1 = vcmp.ge.f32.partialorder %v6069_v21, 0.0  ;;  %vm2664_vm2 = vcmp.ge.f32.partialorder %v6088_v50, 0.0 }
 0x290   :  { %v3036_v31 = vmul.f32 %v4492_v6, %v3000_v18  ;;  %v2903_v12 = vmul.f32 1.0614054, %v4494_v48  ;;  %v4496_v49 = vpop.eup %4495  ;;  %4505 = vpow2.f32 %v3315_v38 }
 0x291   :  { %v2357_v46 = vpop.f32.mrf.mxu0  ;;  %v3359_v44 = vmul.f32 %v4496_v49, %v3179_v33  ;;  %4507 = vpow2.f32 %v3317_v39 }
 0x292   :  { %v3072_v28 = vadd.f32 -0.28449672, %v3036_v31  ;;  %v2939_v9 = vadd.f32 -1.4531521, %v2903_v12  ;;  %v6110_v31 = vrot.slane %v4585_v27, %v477_v25  ;;  %v6112_v12 = vrot.slane %v4585_v27, %v481_v23 }
 0x293   :  { %v3395_v8 = vsub.f32 1.0, %v3359_v44 }
 0x294   :  { %v3108_v60 = vmul.f32 %v4492_v6, %v3072_v28  ;;  %v2975_v62 = vmul.f32 %v4494_v48, %v2939_v9  ;;  %v6094_v56 = vpop.eup %4497  ;;  %v2567_v28 = vmul.f32 0.5, %v5933_v4  ;;  %v2568_v9 = vmul.f32 0.5, %v5980_v15 }
 0x295   :  { %v2904_v22 = vmul.f32 1.0614054, %v6094_v56  ;;  %v4500_v7 = vpop.eup %4499  ;;  %v3431_v51 = vmul.f32 %v3395_v8, %v2675_v40  ;;  %v3341_v8 = vmul.f32 1.442695, %v3276_v29 }
 0x296   :  { %v3144_v54 = vadd.f32 0.2548296, %v3108_v60  ;;  %v3011_v13 = vadd.f32 1.4214138, %v2975_v62 }
 0x297   :  { %v2940_v0 = vadd.f32 -1.4531521, %v2904_v22  ;;  %v3467_v38 = vadd.f32 1.0, %v3431_v51 }
 0x298   :  { %v3180_v5 = vmul.f32 %v4492_v6, %v3144_v54  ;;  %v3047_v42 = vmul.f32 %v4494_v48, %v3011_v13  ;;  %v6102_v30 = vpop.eup %4501  ;;  %v3339_v6 = vmul.f32 1.442695, %v3275_v47 }
 0x299   :  { %v2976_v10 = vmul.f32 %v6094_v56, %v2940_v0  ;;  %v2915_v18 = vmul.f32 1.0614054, %v6102_v30  ;;  %v3503_v4 = vmul.f32 %v3467_v38, %v2567_v28  ;;  %v2687_v38 = vsel %vm2651_vm15, 1.0, %v4587_v55 }
 0x29a   :  { %v3360_v35 = vmul.f32 %v4500_v7, %v3180_v5  ;;  %v3083_v37 = vadd.f32 -0.28449672, %v3047_v42  ;;  %4509 = vpow2.f32 %v3339_v6 }
 0x29b   :  { %v3012_v46 = vadd.f32 1.4214138, %v2976_v10  ;;  %v2951_v44 = vadd.f32 -1.4531521, %v2915_v18  ;;  %4511 = vpow2.f32 %v3341_v8 }
 0x29c   :  { %v3396_v19 = vsub.f32 1.0, %v3360_v35  ;;  %v3119_v33 = vmul.f32 %v4494_v48, %v3083_v37  ;;  %v6117_v1 = vpop.eup %4503 }
 0x29d   :  { %v3048_v24 = vmul.f32 %v6094_v56, %v3012_v46  ;;  %v2987_v62 = vmul.f32 %v6102_v30, %v2951_v44  ;;  %v4506_v13 = vpop.eup %4505  ;;  %v2916_v39 = vmul.f32 1.0614054, %v6117_v1 }
 0x29e   :  { %v3432_v49 = vmul.f32 %v3396_v19, %v2676_v45  ;;  %v3155_v36 = vadd.f32 0.2548296, %v3119_v33  ;;  %v4508_v27 = vpop.eup %4507 }
 0x29f   :  { %v3084_v22 = vadd.f32 -0.28449672, %v3048_v24  ;;  %v3023_v42 = vadd.f32 1.4214138, %v2987_v62  ;;  %v2952_v40 = vadd.f32 -1.4531521, %v2916_v39 }
 0x2a0   :  { %v3468_v43 = vadd.f32 1.0, %v3432_v49  ;;  %v3191_v60 = vmul.f32 %v4494_v48, %v3155_v36 }
 0x2a1   :  { %v3120_v7 = vmul.f32 %v6094_v56, %v3084_v22  ;;  %v3059_v23 = vmul.f32 %v6102_v30, %v3023_v42  ;;  %v2988_v10 = vmul.f32 %v6117_v1, %v2952_v40  ;;  %v2580_v42 = vmul.f32 0.5, %v6045_v26 }
 0x2a2   :  { %v2291_v54 = vpop.f32.mrf.mxu1  ;;  %v3504_v5 = vmul.f32 %v3468_v43, %v2568_v9  ;;  %v3371_v15 = vmul.f32 %v4506_v13, %v3191_v60 }
 0x2a3   :  { %v2292_v47 = vadd.f32 %v2291_v54, %v6110_v31  ;;  %v3156_v37 = vadd.f32 0.2548296, %v3120_v7  ;;  %v3024_v29 = vadd.f32 1.4214138, %v2988_v10  ;;  %v2688_v54 = vsel %vm2652_vm0, 1.0, %v4587_v55 }
 0x2a4   :  { %v2293_v17 = vpop.f32.mrf.mxu1  ;;  %v3985_v25 = vpack.c.bf16 %v3504_v5, %v3503_v4  ;;  %v3407_v35 = vsub.f32 1.0, %v3371_v15  ;;  %v2579_v15 = vmul.f32 0.5, %v6011_v63 }
 0x2a5   :  { %v6124_v48 = vadd.f32 %v6059_v34, %v2292_v47  ;;  %v2294_v0 = vadd.f32 %v2293_v17, %v6112_v12  ;;  %v3095_v34 = vadd.f32 -0.28449672, %v3059_v23  ;;  %v3192_v18 = vmul.f32 %v6094_v56, %v3156_v37 }
 0x2a6   :  { %v2295_v51 = vpop.f32.mrf.mxu1  ;;  %3657 = vst [vmem:[%s6581_s5 + $0x10] sm:$0xff] %v3985_v25  ;;  %v3060_v28 = vmul.f32 %v6117_v1, %v3024_v29 }
 0x2a7   :  { %v6131_v6 = vmul.f32 0.70710677, %v6124_v48  ;;  %v6137_v19 = vadd.f32 %v6065_v16, %v2294_v0  ;;  %v2296_v46 = vadd.f32 %v2295_v51, %v6110_v31  ;;  %v3131_v49 = vmul.f32 %v6102_v30, %v3095_v34  ;;  %v4510_v53 = vpop.eup %4509 }
 0x2a8   :  { %v2297_v33 = vpop.f32.mrf.mxu1  ;;  %v3443_v16 = vmul.f32 %v3407_v35, %v2687_v38  ;;  %v3372_v44 = vmul.f32 %v4508_v27, %v3192_v18  ;;  %v3096_v62 = vadd.f32 -0.28449672, %v3060_v28  ;;  %v4512_v35 = vpop.eup %4511  ;;  %v2699_v34 = vsel %vm2663_vm1, 1.0, %v4587_v55 }
 0x2a9   :  { %v2713_v45 = vand.u32 2147483647, %v6131_v6  ;;  %v3167_v9 = vadd.f32 0.2548296, %v3131_v49  ;;  %v6149_v24 = vmul.f32 0.70710677, %v6137_v19  ;;  %v6152_v11 = vadd.f32 %v6071_v32, %v2296_v46 }
 0x2aa   :  { %v2301_v36 = vpop.f32.mrf.mxu1  ;;  %v3408_v60 = vsub.f32 1.0, %v3372_v44  ;;  %v3479_v47 = vadd.f32 1.0, %v3443_v16  ;;  %v3132_v5 = vmul.f32 %v6117_v1, %v3096_v62  ;;  %v2298_v51 = vadd.f32 %v2297_v33, %v6112_v12 }
 0x2ab   :  { %v2749_v56 = vmul.f32 0.3275911, %v2713_v45  ;;  %v3203_v13 = vmul.f32 %v6102_v30, %v3167_v9  ;;  %v2714_v22 = vand.u32 2147483647, %v6149_v24  ;;  %v6162_v30 = vmul.f32 0.70710677, %v6152_v11 }
 0x2ac   :  { %v2303_v43 = vpop.f32.mrf.mxu1  ;;  %v3444_v4 = vmul.f32 %v3408_v60, %v2688_v54  ;;  %v3168_v0 = vadd.f32 0.2548296, %v3132_v5  ;;  %v3515_v37 = vmul.f32 %v3479_v47, %v2579_v15  ;;  %v3217_v21 = vsub.f32 0.0, %v2713_v45 }
 0x2ad   :  { %v2785_v8 = vadd.f32 1.0, %v2749_v56  ;;  %v3383_v17 = vmul.f32 %v4510_v53, %v3203_v13  ;;  %v2750_v32 = vmul.f32 0.3275911, %v2714_v22  ;;  %v2725_v26 = vand.u32 2147483647, %v6162_v30 }
 0x2ae   :  { %v2305_v39 = vpop.f32.mrf.mxu1  ;;  %v3480_v40 = vadd.f32 1.0, %v3444_v4  ;;  %v3204_v63 = vmul.f32 %v6117_v1, %v3168_v0  ;;  %v6170_v38 = vadd.f32 %v6075_v2, %v2298_v51  ;;  %v2302_v33 = vadd.f32 %v2301_v36, %v6110_v31  ;;  %v6187_v31 = vld [vmem:[%s6580_s4 + $0x8] sm:$0xf] }
 0x2af   :  { %4513 = vrcp.f32 %v2785_v8  ;;  %v3419_v25 = vsub.f32 1.0, %v3383_v17  ;;  %v2786_v23 = vadd.f32 1.0, %v2750_v32  ;;  %v2761_v27 = vmul.f32 0.3275911, %v2725_v26 }
 0x2b0   :  { %v2306_v7 = vpop.f32.mrf.mxu1  ;;  %v3516_v10 = vmul.f32 %v3480_v40, %v2580_v42  ;;  %v3384_v46 = vmul.f32 %v4512_v35, %v3204_v63  ;;  %v2700_v1 = vsel %vm2664_vm2, 1.0, %v4587_v55  ;;  %v2304_v50 = vadd.f32 %v2303_v43, %v6112_v12 }
 0x2b1   :  { %4515 = vrcp.f32 %v2786_v23  ;;  %v3455_v29 = vmul.f32 %v3419_v25, %v2699_v34  ;;  %v2797_v16 = vadd.f32 1.0, %v2761_v27  ;;  %v3253_v44 = vmul.f32 %v3217_v21, %v2713_v45 }
 0x2b2   :  { %v3991_v18 = vpack.c.bf16 %v3516_v10, %v3515_v37  ;;  %v3420_v49 = vsub.f32 1.0, %v3384_v46  ;;  %v3218_v28 = vsub.f32 0.0, %v2714_v22  ;;  %v6179_v56 = vmul.f32 0.70710677, %v6170_v38 }
 0x2b3   :  { %v6182_v2 = vadd.f32 %v6085_v20, %v2302_v33  ;;  %v3491_v36 = vadd.f32 1.0, %v3455_v29  ;;  %4517 = vrcp.f32 %v2797_v16  ;;  %v6190_v60 = vadd.f32 %v6090_v52, %v2304_v50 }
 0x2b4   :  { %3663 = vst [vmem:[%s6581_s5 + $0x40] sm:$0xff] %v3991_v18  ;;  %v3456_v9 = vmul.f32 %v3420_v49, %v2700_v1  ;;  %v2726_v12 = vand.u32 2147483647, %v6179_v56  ;;  %v2591_v43 = vmul.f32 0.5, %v6057_v3  ;;  %v2592_v20 = vmul.f32 0.5, %v6083_v41 }
 0x2b5   :  { %v6194_v45 = vmul.f32 0.70710677, %v6182_v2  ;;  %v6200_v8 = vrot.slane %v6187_v31, %v4886_v61  ;;  %v3295_v54 = vmul.f32 1.442695, %v3253_v44  ;;  %v3254_v13 = vmul.f32 %v3218_v28, %v2714_v22 }
 0x2b6   :  { %v3492_v62 = vadd.f32 1.0, %v3456_v9  ;;  %v2762_v52 = vmul.f32 0.3275911, %v2726_v12  ;;  %v3527_v47 = vmul.f32 %v3491_v36, %v2591_v43  ;;  %v6209_v3 = vmul.f32 0.70710677, %v6190_v60 }
 0x2b7   :  { %v6205_v39 = vand.u32 2147483647, %v6194_v45  ;;  %v3229_v41 = vsub.f32 0.0, %v2725_v26  ;;  %v6214_v42 = vrot.slane %v6187_v31, %v4877_v58  ;;  %vm2641_vm3 = vcmp.ge.f32.partialorder %v6131_v6, 0.0 }
 0x2b8   :  { %v3528_v4 = vmul.f32 %v3492_v62, %v2592_v20  ;;  %v2798_v15 = vadd.f32 1.0, %v2762_v52  ;;  %v6218_v32 = vand.u32 2147483647, %v6209_v3  ;;  %v6221_v7 = vmul.f32 0.5, %v6124_v48 }
 0x2b9   :  { %v2773_v61 = vmul.f32 0.3275911, %v6205_v39  ;;  %v3297_v40 = vmul.f32 1.442695, %v3254_v13  ;;  %v3230_v6 = vsub.f32 0.0, %v2726_v12  ;;  %v6231_v51 = vsel %vm2641_vm3, 1.0, %v4587_v55 }
 0x2ba   :  { %v3997_v22 = vpack.c.bf16 %v3528_v4, %v3527_v47  ;;  %4519 = vrcp.f32 %v2798_v15  ;;  %v2774_v23 = vmul.f32 0.3275911, %v6218_v32  ;;  %v6234_v48 = vmul.f32 0.5, %v6137_v19 }
 0x2bb   :  { %v2809_v0 = vadd.f32 1.0, %v2773_v61  ;;  %4521 = vpow2.f32 %v3295_v54  ;;  %v3265_v37 = vmul.f32 %v3229_v41, %v2725_v26  ;;  %vm2642_vm4 = vcmp.ge.f32.partialorder %v6149_v24, 0.0 }
 0x2bc   :  { %v6202_v53 = vpop.eup %4513  ;;  %3669 = vst [vmem:[%s6581_s5 + $0x70] sm:$0x33] %v3997_v22  ;;  %v2810_v34 = vadd.f32 1.0, %v2774_v23  ;;  %v6239_v29 = vmul.f32 0.5, %v6152_v11  ;;  %vm2653_vm5 = vcmp.ge.f32.partialorder %v6162_v30, 0.0  ;;  %v3266_v26 = vmul.f32 %v3230_v6, %v2726_v12 }
 0x2bd   :  { %v2893_v5 = vmul.f32 1.0614054, %v6202_v53  ;;  %4523 = vrcp.f32 %v2809_v0  ;;  %v3319_v16 = vmul.f32 1.442695, %v3265_v37  ;;  %v6255_v36 = vsel %vm2642_vm4, 1.0, %v4587_v55 }
 0x2be   :  { %v6223_v25 = vpop.eup %4515  ;;  %4525 = vpow2.f32 %v3297_v40  ;;  %v3241_v12 = vsub.f32 0.0, %v6205_v39  ;;  %v6262_v62 = vsel %vm2653_vm5, 1.0, %v4587_v55  ;;  %vm2654_vm6 = vcmp.ge.f32.partialorder %v6179_v56, 0.0 }
 0x2bf   :  { %v2929_v17 = vadd.f32 -1.4531521, %v2893_v5  ;;  %v2894_v35 = vmul.f32 1.0614054, %v6223_v25  ;;  %4527 = vrcp.f32 %v2810_v34  ;;  %v3321_v4 = vmul.f32 1.442695, %v3266_v26 }
 0x2c0   :  { %v6244_v1 = vpop.eup %4517  ;;  %4529 = vpow2.f32 %v3319_v16  ;;  %v3242_v30 = vsub.f32 0.0, %v6218_v32  ;;  %v3277_v40 = vmul.f32 %v3241_v12, %v6205_v39  ;;  %v6288_v6 = vmul.f32 0.5, %v6170_v38 }
 0x2c1   :  { %v2965_v58 = vmul.f32 %v6202_v53, %v2929_v17  ;;  %v2930_v18 = vadd.f32 -1.4531521, %v2894_v35  ;;  %v2905_v9 = vmul.f32 1.0614054, %v6244_v1  ;;  %v6291_v23 = vsel %vm2654_vm6, 1.0, %v4587_v55 }
 0x2c2   :  { %v2444_v10 = vpop.f32.mrf.mxu1  ;;  %4531 = vpow2.f32 %v3321_v4  ;;  %vm2665_vm7 = vcmp.ge.f32.partialorder %v6194_v45, 0.0  ;;  %vm2666_vm8 = vcmp.ge.f32.partialorder %v6209_v3, 0.0 }
 0x2c3   :  { %v3001_v63 = vadd.f32 1.4214138, %v2965_v58  ;;  %v2393_v21 = vpop.f32.mrf.mxu0  ;;  %v2966_v49 = vmul.f32 %v6223_v25, %v2930_v18  ;;  %v2941_v47 = vadd.f32 -1.4531521, %v2905_v9 }
 0x2c4   :  { %v2394_v46 = vadd.f32 %v2393_v21, %v6200_v8  ;;  %v2446_v27 = vpop.f32.mrf.mxu1 }
 0x2c5   :  { %v3037_v19 = vmul.f32 %v6202_v53, %v3001_v63  ;;  %v2395_v33 = vpop.f32.mrf.mxu0  ;;  %v3002_v20 = vadd.f32 1.4214138, %v2966_v49  ;;  %v2977_v17 = vmul.f32 %v6244_v1, %v2941_v47 }
 0x2c6   :  { %v6247_v50 = vadd.f32 %v2444_v10, %v2394_v46  ;;  %v2396_v11 = vadd.f32 %v2395_v33, %v6214_v42  ;;  %v6250_v44 = vpop.f32.mrf.mxu1 }
 0x2c7   :  { %v3073_v28 = vadd.f32 -0.28449672, %v3037_v19  ;;  %v2397_v43 = vpop.f32.mrf.mxu0  ;;  %v3038_v41 = vmul.f32 %v6223_v25, %v3002_v20  ;;  %v6295_v10 = vpop.eup %4519  ;;  %v3013_v39 = vadd.f32 1.4214138, %v2977_v17 }
 0x2c8   :  { %v6265_v54 = vmul.f32 0.70710677, %v6247_v50  ;;  %v6267_v13 = vadd.f32 %v2446_v27, %v2396_v11  ;;  %v6269_v52 = vpop.f32.mrf.mxu1  ;;  %v4522_v18 = vpop.eup %4521  ;;  %v2906_v46 = vmul.f32 1.0614054, %v6295_v10  ;;  %v3278_v27 = vmul.f32 %v3242_v30, %v6218_v32 }
 0x2c9   :  { %v3109_v24 = vmul.f32 %v6202_v53, %v3073_v28  ;;  %v6273_v5 = vpop.f32.mrf.mxu0  ;;  %v3074_v58 = vadd.f32 -0.28449672, %v3038_v41  ;;  %v3049_v49 = vmul.f32 %v6244_v1, %v3013_v39  ;;  %v2398_v20 = vadd.f32 %v2397_v43, %v6200_v8 }
 0x2ca   :  { %v2715_v15 = vand.u32 2147483647, %v6265_v54  ;;  %v6278_v61 = vpop.f32.mrf.mxu1  ;;  %v6283_v0 = vmul.f32 0.70710677, %v6267_v13  ;;  %v6308_v28 = vpop.eup %4523  ;;  %v2942_v12 = vadd.f32 -1.4531521, %v2906_v46 }
 0x2cb   :  { %v3145_v22 = vadd.f32 0.2548296, %v3109_v24  ;;  %v6285_v56 = vpop.f32.mrf.mxu0  ;;  %v3110_v38 = vmul.f32 %v6223_v25, %v3074_v58  ;;  %v4526_v47 = vpop.eup %4525  ;;  %v3085_v32 = vadd.f32 -0.28449672, %v3049_v49  ;;  %v2917_v41 = vmul.f32 1.0614054, %v6308_v28 }
 0x2cc   :  { %v2751_v35 = vmul.f32 0.3275911, %v2715_v15  ;;  %v6293_v37 = vpop.f32.mrf.mxu1  ;;  %v6299_v34 = vand.u32 2147483647, %v6283_v0  ;;  %v6312_v17 = vpop.eup %4527  ;;  %v2978_v58 = vmul.f32 %v6295_v10, %v2942_v12  ;;  %vm2643_vm9 = vcmp.ge.f32.partialorder %v6265_v54, 0.0 }
 0x2cd   :  { %v3181_v63 = vmul.f32 %v6202_v53, %v3145_v22  ;;  %v6301_v21 = vpop.f32.mrf.mxu0  ;;  %v3343_v53 = vmul.f32 1.442695, %v3277_v40  ;;  %v3146_v9 = vadd.f32 0.2548296, %v3110_v38  ;;  %v3121_v43 = vmul.f32 %v6244_v1, %v3085_v32 }
 0x2ce   :  { %v2787_v19 = vadd.f32 1.0, %v2751_v35  ;;  %v2458_v26 = vpop.f32.mrf.mxu1  ;;  %v2752_v16 = vmul.f32 0.3275911, %v6299_v34  ;;  %v3345_v35 = vmul.f32 1.442695, %v3278_v27  ;;  %vm2644_vm10 = vcmp.ge.f32.partialorder %v6283_v0, 0.0 }
 0x2cf   :  { %v3361_v33 = vmul.f32 %v4522_v18, %v3181_v63  ;;  %v2407_v11 = vpop.f32.mrf.mxu0  ;;  %v3182_v40 = vmul.f32 %v6223_v25, %v3146_v9  ;;  %v3219_v63 = vsub.f32 0.0, %v2715_v15  ;;  %v2953_v18 = vadd.f32 -1.4531521, %v2917_v41 }
 0x2d0   :  { %4533 = vrcp.f32 %v2787_v19  ;;  %v2459_v24 = vpop.f32.mrf.mxu1  ;;  %v2788_v30 = vadd.f32 1.0, %v2752_v16  ;;  %v2918_v38 = vmul.f32 1.0614054, %v6312_v17  ;;  %v3014_v19 = vadd.f32 1.4214138, %v2978_v58  ;;  %v4530_v11 = vpop.eup %4529 }
 0x2d1   :  { %v3397_v4 = vsub.f32 1.0, %v3361_v33  ;;  %v2408_v22 = vpop.f32.mrf.mxu0  ;;  %v3362_v46 = vmul.f32 %v4526_v47, %v3182_v40  ;;  %v6320_v26 = vadd.f32 %v6250_v44, %v2398_v20  ;;  %v3157_v33 = vadd.f32 0.2548296, %v3121_v43 }
 0x2d2   :  { %4535 = vrcp.f32 %v2788_v30  ;;  %v2989_v25 = vmul.f32 %v6308_v28, %v2953_v18  ;;  %v2954_v49 = vadd.f32 -1.4531521, %v2918_v38  ;;  %v3050_v16 = vmul.f32 %v6295_v10, %v3014_v19  ;;  %v4532_v22 = vpop.eup %4531 }
 0x2d3   :  { %v3433_v39 = vmul.f32 %v3397_v4, %v6231_v51  ;;  %4537 = vpow2.f32 %v3343_v53  ;;  %v3398_v27 = vsub.f32 1.0, %v3362_v46  ;;  %v3255_v51 = vmul.f32 %v3219_v63, %v2715_v15 }
 0x2d4   :  { %4539 = vpow2.f32 %v3345_v35  ;;  %v3193_v12 = vmul.f32 %v6244_v1, %v3157_v33  ;;  %v3025_v24 = vadd.f32 1.4214138, %v2989_v25  ;;  %v2990_v47 = vmul.f32 %v6312_v17, %v2954_v49 }
 0x2d5   :  { %v3469_v9 = vadd.f32 1.0, %v3433_v39  ;;  %v3434_v44 = vmul.f32 %v3398_v27, %v6255_v36  ;;  %v3086_v20 = vadd.f32 -0.28449672, %v3050_v16  ;;  %v3220_v4 = vsub.f32 0.0, %v6299_v34 }
 0x2d6   :  { %v6329_v53 = vmul.f32 0.70710677, %v6320_v26  ;;  %v3373_v32 = vmul.f32 %v4530_v11, %v3193_v12  ;;  %v3061_v41 = vmul.f32 %v6308_v28, %v3025_v24  ;;  %v3026_v30 = vadd.f32 1.4214138, %v2990_v47 }
 0x2d7   :  { %v2400_v15 = vadd.f32 %v6273_v5, %v6214_v42  ;;  %v3470_v1 = vadd.f32 1.0, %v3434_v44  ;;  %v3122_v40 = vmul.f32 %v6295_v10, %v3086_v20  ;;  %v3505_v58 = vmul.f32 %v3469_v9, %v6221_v7 }
 0x2d8   :  { %v6337_v36 = vand.u32 2147483647, %v6329_v53  ;;  %v3097_v35 = vadd.f32 -0.28449672, %v3061_v41  ;;  %v3062_v63 = vmul.f32 %v6312_v17, %v3026_v30  ;;  %v3299_v39 = vmul.f32 1.442695, %v3255_v51 }
 0x2d9   :  { %v3506_v43 = vmul.f32 %v3470_v1, %v6234_v48  ;;  %v3409_v18 = vsub.f32 1.0, %v3373_v32  ;;  %v3158_v38 = vadd.f32 0.2548296, %v3122_v40  ;;  %v3256_v25 = vmul.f32 %v3220_v4, %v6299_v34 }
 0x2da   :  { %v2763_v5 = vmul.f32 0.3275911, %v6337_v36  ;;  %v3133_v19 = vmul.f32 %v6308_v28, %v3097_v35  ;;  %v3098_v33 = vadd.f32 -0.28449672, %v3062_v63  ;;  %v6348_v49 = vadd.f32 %v6269_v52, %v2400_v15 }
 0x2db   :  { %v3986_v7 = vpack.c.bf16 %v3506_v43, %v3505_v58  ;;  %v3194_v27 = vmul.f32 %v6295_v10, %v3158_v38  ;;  %v2701_v51 = vsel %vm2665_vm7, 1.0, %v4587_v55  ;;  %v3445_v52 = vmul.f32 %v3409_v18, %v6262_v62 }
 0x2dc   :  { %v2799_v48 = vadd.f32 1.0, %v2763_v5  ;;  %v3169_v11 = vadd.f32 0.2548296, %v3133_v19  ;;  %v3134_v9 = vmul.f32 %v6312_v17, %v3098_v33  ;;  %v3301_v47 = vmul.f32 1.442695, %v3256_v25 }
 0x2dd   :  { %v6343_v46 = vpop.eup %4533  ;;  %3658 = vst [vmem:[%s6581_s5 + $0x18] sm:$0xff] %v3986_v7  ;;  %v3374_v34 = vmul.f32 %v4532_v22, %v3194_v27  ;;  %v6367_v41 = vmul.f32 0.70710677, %v6348_v49  ;;  %v2702_v15 = vsel %vm2666_vm8, 1.0, %v4587_v55  ;;  %v2404_v22 = vadd.f32 %v6285_v56, %v6200_v8 }
 0x2de   :  { %v2895_v16 = vmul.f32 1.0614054, %v6343_v46  ;;  %4541 = vrcp.f32 %v2799_v48  ;;  %v3205_v24 = vmul.f32 %v6308_v28, %v3169_v11  ;;  %v3170_v45 = vadd.f32 0.2548296, %v3134_v9 }
 0x2df   :  { %v6361_v12 = vpop.eup %4535  ;;  %4543 = vpow2.f32 %v3299_v39  ;;  %v3410_v20 = vsub.f32 1.0, %v3374_v34  ;;  %v3481_v40 = vadd.f32 1.0, %v3445_v52  ;;  %v6379_v18 = vand.u32 2147483647, %v6367_v41 }
 0x2e0   :  { %v2931_v10 = vadd.f32 -1.4531521, %v2895_v16  ;;  %v4538_v44 = vpop.eup %4537  ;;  %v2896_v32 = vmul.f32 1.0614054, %v6361_v12  ;;  %v3206_v28 = vmul.f32 %v6312_v17, %v3170_v45  ;;  %4545 = vpow2.f32 %v3301_v47 }
 0x2e1   :  { %v4540_v62 = vpop.eup %4539  ;;  %v3385_v30 = vmul.f32 %v4538_v44, %v3205_v24  ;;  %v3446_v58 = vmul.f32 %v3410_v20, %v6291_v23  ;;  %v6386_v56 = vadd.f32 %v6278_v61, %v2404_v22  ;;  %v3231_v19 = vsub.f32 0.0, %v6337_v36 }
 0x2e2   :  { %v2967_v4 = vmul.f32 %v6343_v46, %v2931_v10  ;;  %v2932_v63 = vadd.f32 -1.4531521, %v2896_v32  ;;  %v3386_v43 = vmul.f32 %v4540_v62, %v3206_v28  ;;  %v2764_v33 = vmul.f32 0.3275911, %v6379_v18 }
 0x2e3   :  { %v6375_v1 = vpop.f32.mrf.mxu0  ;;  %v3421_v39 = vsub.f32 1.0, %v3385_v30  ;;  %v3482_v38 = vadd.f32 1.0, %v3446_v58  ;;  %v3517_v7 = vmul.f32 %v3481_v40, %v6239_v29  ;;  %v6399_v24 = vmul.f32 0.70710677, %v6386_v56 }
 0x2e4   :  { %v3003_v35 = vadd.f32 1.4214138, %v2967_v4  ;;  %v2968_v8 = vmul.f32 %v6361_v12, %v2932_v63  ;;  %v3422_v23 = vsub.f32 1.0, %v3386_v43  ;;  %v2800_v52 = vadd.f32 1.0, %v2764_v33 }
 0x2e5   :  { %v6381_v3 = vpop.f32.mrf.mxu0  ;;  %v3457_v5 = vmul.f32 %v3421_v39, %v2701_v51  ;;  %v3518_v27 = vmul.f32 %v3482_v38, %v6288_v6  ;;  %v2593_v45 = vmul.f32 0.5, %v6182_v2  ;;  %v2594_v29 = vmul.f32 0.5, %v6190_v60 }
 0x2e6   :  { %v3039_v17 = vmul.f32 %v6343_v46, %v3003_v35  ;;  %v3004_v48 = vadd.f32 1.4214138, %v2968_v8  ;;  %v3458_v9 = vmul.f32 %v3422_v23, %v2702_v15  ;;  %4547 = vrcp.f32 %v2800_v52 }
 0x2e7   :  { %v6390_v25 = vpop.f32.mrf.mxu0  ;;  %v3493_v11 = vadd.f32 1.0, %v3457_v5  ;;  %v3992_v61 = vpack.c.bf16 %v3518_v27, %v3517_v7  ;;  %v3267_v4 = vmul.f32 %v3231_v19, %v6337_v36  ;;  %v2406_v32 = vadd.f32 %v6301_v21, %v6214_v42 }
 0x2e8   :  { %v3075_v16 = vadd.f32 -0.28449672, %v3039_v17  ;;  %v3040_v10 = vmul.f32 %v6361_v12, %v3004_v48  ;;  %v3494_v6 = vadd.f32 1.0, %v3458_v9  ;;  %v2739_v60 = vand.u32 2147483647, %v6399_v24 }
 0x2e9   :  { %v6394_v34 = vpop.f32.mrf.mxu0  ;;  %3664 = vst [vmem:[%s6581_s5 + $0x48] sm:$0xff] %v3992_v61  ;;  %v3529_v30 = vmul.f32 %v3493_v11, %v2593_v45  ;;  %v6417_v35 = vadd.f32 %v6293_v37, %v2406_v32  ;;  %v3323_v38 = vmul.f32 1.442695, %v3267_v4  ;;  %v2679_v7 = vsel %vm2643_vm9, 1.0, %v4587_v55 }
 0x2ea   :  { %v3111_v51 = vmul.f32 %v6343_v46, %v3075_v16  ;;  %v3076_v20 = vadd.f32 -0.28449672, %v3040_v10  ;;  %v3530_v2 = vmul.f32 %v3494_v6, %v2594_v29  ;;  %v2775_v42 = vmul.f32 0.3275911, %v2739_v60 }
 0x2eb   :  { %v6403_v47 = vpop.f32.mrf.mxu0  ;;  %v4542_v62 = vpop.eup %4541  ;;  %v6425_v8 = vmul.f32 0.70710677, %v6417_v35  ;;  %v3243_v0 = vsub.f32 0.0, %v2739_v60  ;;  %v2571_v4 = vmul.f32 0.5, %v6247_v50  ;;  %v2572_v32 = vmul.f32 0.5, %v6267_v13 }
 0x2ec   :  { %v3147_v44 = vadd.f32 0.2548296, %v3111_v51  ;;  %v4544_v28 = vpop.eup %4543  ;;  %v3112_v40 = vmul.f32 %v6361_v12, %v3076_v20  ;;  %v2907_v58 = vmul.f32 1.0614054, %v4542_v62  ;;  %v3998_v36 = vpack.c.bf16 %v3530_v2, %v3529_v30 }
 0x2ed   :  { %v6412_v15 = vpop.f32.mrf.mxu0  ;;  %v2811_v17 = vadd.f32 1.0, %v2775_v42  ;;  %v4546_v5 = vpop.eup %4545  ;;  %v2740_v27 = vand.u32 2147483647, %v6425_v8  ;;  %vm2655_vm11 = vcmp.ge.f32.partialorder %v6329_v53, 0.0  ;;  %vm2656_vm12 = vcmp.ge.f32.partialorder %v6367_v41, 0.0 }
 0x2ee   :  { %v3183_v22 = vmul.f32 %v6343_v46, %v3147_v44  ;;  %v3148_v39 = vadd.f32 0.2548296, %v3112_v40  ;;  %v2943_v43 = vadd.f32 -1.4531521, %v2907_v58  ;;  %3670 = vst [vmem:[%s6581_s5 + $0x78] sm:$0x33] %v3998_v36  ;;  %v3279_v58 = vmul.f32 %v3243_v0, %v2739_v60 }
 0x2ef   :  { %v2560_v21 = vpop.f32.mrf.mxu0  ;;  %v3232_v46 = vsub.f32 0.0, %v6379_v18  ;;  %4549 = vrcp.f32 %v2811_v17  ;;  %v2776_v52 = vmul.f32 0.3275911, %v2740_v27  ;;  %vm2667_vm13 = vcmp.ge.f32.partialorder %v6399_v24, 0.0 }
 0x2f0   :  { %v3363_v63 = vmul.f32 %v4544_v28, %v3183_v22  ;;  %v3184_v19 = vmul.f32 %v6361_v12, %v3148_v39  ;;  %v2979_v33 = vmul.f32 %v4542_v62, %v2943_v43  ;;  %4551 = vpow2.f32 %v3323_v38 }
 0x2f1   :  { %v2561_v37 = vpop.f32.mrf.mxu0  ;;  %v3268_v9 = vmul.f32 %v3232_v46, %v6379_v18  ;;  %v2680_v12 = vsel %vm2644_vm10, 1.0, %v4587_v55  ;;  %v2812_v10 = vadd.f32 1.0, %v2776_v52  ;;  %v6439_v43 = vrot.slane %v6187_v31, %v4880_v59 }
 0x2f2   :  { %v3399_v23 = vsub.f32 1.0, %v3363_v63  ;;  %v3364_v48 = vmul.f32 %v4546_v5, %v3184_v19  ;;  %v3015_v11 = vadd.f32 1.4214138, %v2979_v33  ;;  %v3244_v63 = vsub.f32 0.0, %v2740_v27 }
 0x2f3   :  { %v4548_v45 = vpop.eup %4547  ;;  %v3325_v20 = vmul.f32 1.442695, %v3268_v9  ;;  %4553 = vrcp.f32 %v2812_v10  ;;  %v3347_v13 = vmul.f32 1.442695, %v3279_v58  ;;  %v2703_v24 = vsel %vm2667_vm13, 1.0, %v4587_v55 }
 0x2f4   :  { %v3435_v16 = vmul.f32 %v3399_v23, %v2679_v7  ;;  %v3400_v61 = vsub.f32 1.0, %v3364_v48  ;;  %v3051_v51 = vmul.f32 %v4542_v62, %v3015_v11  ;;  %v2908_v44 = vmul.f32 1.0614054, %v4548_v45 }
 0x2f5   :  { %4555 = vpow2.f32 %v3325_v20  ;;  %v3280_v37 = vmul.f32 %v3244_v63, %v2740_v27  ;;  %vm2668_vm14 = vcmp.ge.f32.partialorder %v6425_v8, 0.0 }
 0x2f6   :  { %v3471_v54 = vadd.f32 1.0, %v3435_v16  ;;  %v3436_v29 = vmul.f32 %v3400_v61, %v2680_v12  ;;  %v3087_v6 = vadd.f32 -0.28449672, %v3051_v51  ;;  %v2944_v2 = vadd.f32 -1.4531521, %v2908_v44 }
 0x2f7   :  { %4557 = vpow2.f32 %v3347_v13  ;;  %v3349_v27 = vmul.f32 1.442695, %v3280_v37  ;;  %v2691_v51 = vsel %vm2655_vm11, 1.0, %v4587_v55  ;;  %v2584_v37 = vmul.f32 0.5, %v6348_v49 }
 0x2f8   :  { %v3472_v30 = vadd.f32 1.0, %v3436_v29  ;;  %v3123_v18 = vmul.f32 %v4542_v62, %v3087_v6  ;;  %v3507_v28 = vmul.f32 %v3471_v54, %v2571_v4  ;;  %v2980_v36 = vmul.f32 %v4548_v45, %v2944_v2 }
 0x2f9   :  { %4559 = vpow2.f32 %v3349_v27 }
 0x2fa   :  { %v3508_v22 = vmul.f32 %v3472_v30, %v2572_v32  ;;  %v3159_v40 = vadd.f32 0.2548296, %v3123_v18  ;;  %v3016_v39 = vadd.f32 1.4214138, %v2980_v36 }
 0x2fc   :  { %v3987_v42 = vpack.c.bf16 %v3508_v22, %v3507_v28  ;;  %v3195_v21 = vmul.f32 %v4542_v62, %v3159_v40  ;;  %v6441_v50 = vpop.eup %4549  ;;  %v3052_v46 = vmul.f32 %v4548_v45, %v3016_v39  ;;  %v6450_v62 = vrot.slane %v6187_v31, %v465_v14 }
 0x2fd   :  { %v4552_v38 = vpop.eup %4551  ;;  %v2919_v60 = vmul.f32 1.0614054, %v6441_v50 }
 0x2fe   :  { %3659 = vst [vmem:[%s6581_s5 + $0x20] sm:$0xff] %v3987_v42  ;;  %v3375_v17 = vmul.f32 %v4552_v38, %v3195_v21  ;;  %v3088_v5 = vadd.f32 -0.28449672, %v3052_v46  ;;  %v2692_v21 = vsel %vm2656_vm12, 1.0, %v4587_v55 }
 0x2ff   :  { %v2955_v23 = vadd.f32 -1.4531521, %v2919_v60 }
 0x300   :  { %v3124_v7 = vmul.f32 %v4548_v45, %v3088_v5  ;;  %v6459_v14 = vpop.eup %4553  ;;  %v3411_v31 = vsub.f32 1.0, %v3375_v17  ;;  %v2583_v17 = vmul.f32 0.5, %v6320_v26 }
 0x301   :  { %v2991_v16 = vmul.f32 %v6441_v50, %v2955_v23  ;;  %v2920_v61 = vmul.f32 1.0614054, %v6459_v14 }
 0x302   :  { %v2495_v59 = vpop.f32.mrf.mxu1  ;;  %v3160_v9 = vadd.f32 0.2548296, %v3124_v7  ;;  %v4556_v0 = vpop.eup %4555  ;;  %v3447_v44 = vmul.f32 %v3411_v31, %v2691_v51 }
 0x303   :  { %v2496_v19 = vadd.f32 %v2495_v59, %v6439_v43  ;;  %v3027_v52 = vadd.f32 1.4214138, %v2991_v16  ;;  %v2956_v29 = vadd.f32 -1.4531521, %v2920_v61 }
 0x304   :  { %v2497_v33 = vpop.f32.mrf.mxu1  ;;  %v3196_v10 = vmul.f32 %v4548_v45, %v3160_v9  ;;  %v3483_v42 = vadd.f32 1.0, %v3447_v44  ;;  %v4558_v5 = vpop.eup %4557 }
 0x305   :  { %v6456_v48 = vadd.f32 %v6375_v1, %v2496_v19  ;;  %v2498_v57 = vadd.f32 %v2497_v33, %v6450_v62  ;;  %v3063_v54 = vmul.f32 %v6441_v50, %v3027_v52  ;;  %v2992_v18 = vmul.f32 %v6459_v14, %v2956_v29 }
 0x306   :  { %v2499_v11 = vpop.f32.mrf.mxu1  ;;  %v3376_v32 = vmul.f32 %v4556_v0, %v3196_v10  ;;  %v3519_v7 = vmul.f32 %v3483_v42, %v2583_v17  ;;  %v2596_v42 = vmul.f32 0.5, %v6417_v35 }
 0x307   :  { %v6463_v53 = vadd.f32 %v6381_v3, %v2498_v57  ;;  %v6467_v12 = vmul.f32 0.70710677, %v6456_v48  ;;  %v2500_v6 = vadd.f32 %v2499_v11, %v6439_v43  ;;  %v3099_v30 = vadd.f32 -0.28449672, %v3063_v54  ;;  %v4560_v54 = vpop.eup %4559 }
 0x308   :  { %v2501_v1 = vpop.f32.mrf.mxu1  ;;  %v3412_v22 = vsub.f32 1.0, %v3376_v32  ;;  %v3028_v58 = vadd.f32 1.4214138, %v2992_v18  ;;  %v2704_v18 = vsel %vm2668_vm14, 1.0, %v4587_v55 }
 0x309   :  { %v2717_v20 = vand.u32 2147483647, %v6467_v12  ;;  %v6474_v3 = vmul.f32 0.70710677, %v6463_v53  ;;  %v3135_v40 = vmul.f32 %v6441_v50, %v3099_v30  ;;  %v6480_v36 = vadd.f32 %v6390_v25, %v2500_v6 }
 0x30a   :  { %v2505_v4 = vpop.f32.mrf.mxu1  ;;  %v3448_v38 = vmul.f32 %v3412_v22, %v2692_v21  ;;  %v3064_v60 = vmul.f32 %v6459_v14, %v3028_v58  ;;  %v2502_v16 = vadd.f32 %v2501_v1, %v6450_v62  ;;  %vm2645_vm15 = vcmp.ge.f32.partialorder %v6467_v12, 0.0 }
 0x30b   :  { %v2753_v45 = vmul.f32 0.3275911, %v2717_v20  ;;  %v2718_v2 = vand.u32 2147483647, %v6474_v3  ;;  %v3171_v46 = vadd.f32 0.2548296, %v3135_v40  ;;  %v2506_v57 = vadd.f32 %v2505_v4, %v6439_v43 }
 0x30c   :  { %v2507_v28 = vpop.f32.mrf.mxu1  ;;  %v3484_v23 = vadd.f32 1.0, %v3448_v38  ;;  %v3100_v41 = vadd.f32 -0.28449672, %v3064_v60  ;;  %v6490_v33 = vmul.f32 0.70710677, %v6480_v36  ;;  %v6497_v11 = vadd.f32 %v6394_v34, %v2502_v16 }
 0x30d   :  { %v2789_v63 = vadd.f32 1.0, %v2753_v45  ;;  %v2754_v39 = vmul.f32 0.3275911, %v2718_v2  ;;  %v3207_v19 = vmul.f32 %v6441_v50, %v3171_v46  ;;  %v3221_v61 = vsub.f32 0.0, %v2717_v20 }
 0x30e   :  { %v2509_v13 = vpop.f32.mrf.mxu1  ;;  %v3520_v31 = vmul.f32 %v3484_v23, %v2584_v37  ;;  %v3136_v49 = vmul.f32 %v6459_v14, %v3100_v41  ;;  %v2729_v27 = vand.u32 2147483647, %v6490_v33  ;;  %v6501_v1 = vmul.f32 0.70710677, %v6497_v11 }
 0x30f   :  { %4561 = vrcp.f32 %v2789_v63  ;;  %v2790_v59 = vadd.f32 1.0, %v2754_v39  ;;  %v3387_v26 = vmul.f32 %v4558_v5, %v3207_v19  ;;  %v6508_v10 = vadd.f32 %v6403_v47, %v2506_v57 }
 0x310   :  { %v2510_v25 = vpop.f32.mrf.mxu1  ;;  %v3993_v50 = vpack.c.bf16 %v3520_v31, %v3519_v7  ;;  %v3172_v52 = vadd.f32 0.2548296, %v3136_v49  ;;  %v2765_v51 = vmul.f32 0.3275911, %v2729_v27  ;;  %v2508_v34 = vadd.f32 %v2507_v28, %v6450_v62 }
 0x311   :  { %4563 = vrcp.f32 %v2790_v59  ;;  %v3423_v9 = vsub.f32 1.0, %v3387_v26  ;;  %v3222_v29 = vsub.f32 0.0, %v2718_v2  ;;  %v2730_v0 = vand.u32 2147483647, %v6501_v1 }
 0x312   :  { %3665 = vst [vmem:[%s6581_s5 + $0x50] sm:$0xff] %v3993_v50  ;;  %v3208_v43 = vmul.f32 %v6459_v14, %v3172_v52  ;;  %v2801_v6 = vadd.f32 1.0, %v2765_v51  ;;  %v3257_v32 = vmul.f32 %v3221_v61, %v2717_v20  ;;  %v6515_v47 = vmul.f32 0.70710677, %v6508_v10 }
 0x313   :  { %v3459_v44 = vmul.f32 %v3423_v9, %v2703_v24  ;;  %v2766_v30 = vmul.f32 0.3275911, %v2730_v0  ;;  %v6518_v62 = vadd.f32 %v6412_v15, %v2508_v34  ;;  %v3258_v45 = vmul.f32 %v3222_v29, %v2718_v2 }
 0x314   :  { %v3388_v4 = vmul.f32 %v4560_v54, %v3208_v43  ;;  %4565 = vrcp.f32 %v2801_v6  ;;  %v2595_v40 = vmul.f32 0.5, %v6386_v56  ;;  %v2741_v20 = vand.u32 2147483647, %v6515_v47 }
 0x315   :  { %v2802_v28 = vadd.f32 1.0, %v2766_v30  ;;  %v3495_v58 = vadd.f32 1.0, %v3459_v44  ;;  %v3303_v63 = vmul.f32 1.442695, %v3257_v32  ;;  %v3233_v13 = vsub.f32 0.0, %v2729_v27 }
 0x316   :  { %v3424_v14 = vsub.f32 1.0, %v3388_v4  ;;  %v2777_v15 = vmul.f32 0.3275911, %v2741_v20  ;;  %v6525_v38 = vmul.f32 0.70710677, %v6518_v62  ;;  %v3234_v7 = vsub.f32 0.0, %v2730_v0 }
 0x317   :  { %4567 = vrcp.f32 %v2802_v28  ;;  %v3305_v60 = vmul.f32 1.442695, %v3258_v45  ;;  %v3531_v17 = vmul.f32 %v3495_v58, %v2595_v40  ;;  %v3269_v19 = vmul.f32 %v3233_v13, %v2729_v27 }
 0x318   :  { %v3460_v8 = vmul.f32 %v3424_v14, %v2704_v18  ;;  %v2813_v59 = vadd.f32 1.0, %v2777_v15  ;;  %4569 = vpow2.f32 %v3303_v63  ;;  %v2742_v35 = vand.u32 2147483647, %v6525_v38 }
 0x319   :  { %v3327_v9 = vmul.f32 1.442695, %v3269_v19  ;;  %v3270_v51 = vmul.f32 %v3234_v7, %v2730_v0  ;;  %v3245_v43 = vsub.f32 0.0, %v2741_v20  ;;  %vm2646_vm0 = vcmp.ge.f32.partialorder %v6474_v3, 0.0 }
 0x31a   :  { %v3496_v39 = vadd.f32 1.0, %v3460_v8  ;;  %4571 = vrcp.f32 %v2813_v59  ;;  %v2778_v16 = vmul.f32 0.3275911, %v2742_v35  ;;  %v3246_v0 = vsub.f32 0.0, %v2742_v35 }
 0x31b   :  { %4573 = vpow2.f32 %v3305_v60  ;;  %v3329_v32 = vmul.f32 1.442695, %v3270_v51  ;;  %v3281_v14 = vmul.f32 %v3245_v43, %v2741_v20  ;;  %v2574_v3 = vmul.f32 0.5, %v6463_v53 }
 0x31c   :  { %v4562_v22 = vpop.eup %4561  ;;  %v3532_v56 = vmul.f32 %v3496_v39, %v2596_v42  ;;  %v2814_v26 = vadd.f32 1.0, %v2778_v16  ;;  %vm2657_vm1 = vcmp.ge.f32.partialorder %v6490_v33, 0.0  ;;  %vm2658_vm2 = vcmp.ge.f32.partialorder %v6501_v1, 0.0 }
 0x31d   :  { %v2897_v21 = vmul.f32 1.0614054, %v4562_v22  ;;  %v2693_v53 = vsel %vm2657_vm1, 1.0, %v4587_v55  ;;  %v2585_v1 = vmul.f32 0.5, %v6480_v36  ;;  %vm2669_vm3 = vcmp.ge.f32.partialorder %v6515_v47, 0.0 }
 0x31e   :  { %v4564_v2 = vpop.eup %4563  ;;  %v3999_v5 = vpack.c.bf16 %v3532_v56, %v3531_v17  ;;  %4575 = vrcp.f32 %v2814_v26  ;;  %v3282_v17 = vmul.f32 %v3246_v0, %v2742_v35  ;;  %v2681_v56 = vsel %vm2645_vm15, 1.0, %v4587_v55 }
 0x31f   :  { %v2933_v46 = vadd.f32 -1.4531521, %v2897_v21  ;;  %v2898_v37 = vmul.f32 1.0614054, %v4564_v2  ;;  %4577 = vpow2.f32 %v3327_v9  ;;  %vm2670_vm4 = vcmp.ge.f32.partialorder %v6525_v38, 0.0 }
 0x320   :  { %3671 = vst [vmem:[%s6581_s5 + $0x80] sm:$0x33] %v3999_v5  ;;  %4579 = vpow2.f32 %v3329_v32 }
 0x321   :  { %v2969_v25 = vmul.f32 %v4562_v22, %v2933_v46  ;;  %v2934_v23 = vadd.f32 -1.4531521, %v2898_v37  ;;  %v4566_v49 = vpop.eup %4565 }
 0x322   :  { %v2909_v61 = vmul.f32 1.0614054, %v4566_v49 }
 0x323   :  { %v3005_v41 = vadd.f32 1.4214138, %v2969_v25  ;;  %v2970_v57 = vmul.f32 %v4564_v2, %v2934_v23 }
 0x324   :  { %v2945_v54 = vadd.f32 -1.4531521, %v2909_v61  ;;  %v6531_v24 = vpop.eup %4567 }
 0x325   :  { %v3041_v31 = vmul.f32 %v4562_v22, %v3005_v41  ;;  %v3006_v50 = vadd.f32 1.4214138, %v2970_v57  ;;  %v2910_v4 = vmul.f32 1.0614054, %v6531_v24  ;;  %v4570_v40 = vpop.eup %4569  ;;  %v3353_v57 = vmul.f32 1.442695, %v3282_v17 }
 0x326   :  { %v2981_v44 = vmul.f32 %v4566_v49, %v2945_v54 }
 0x327   :  { %v3077_v52 = vadd.f32 -0.28449672, %v3041_v31  ;;  %v3042_v27 = vmul.f32 %v4564_v2, %v3006_v50  ;;  %v2946_v28 = vadd.f32 -1.4531521, %v2910_v4  ;;  %v6535_v8 = vpop.eup %4571 }
 0x328   :  { %v3017_v45 = vadd.f32 1.4214138, %v2981_v44  ;;  %v2921_v20 = vmul.f32 1.0614054, %v6535_v8  ;;  %v4574_v13 = vpop.eup %4573 }
 0x329   :  { %v3113_v34 = vmul.f32 %v4562_v22, %v3077_v52  ;;  %v3078_v29 = vadd.f32 -0.28449672, %v3042_v27  ;;  %v2982_v63 = vmul.f32 %v6531_v24, %v2946_v28  ;;  %v2573_v52 = vmul.f32 0.5, %v6456_v48 }
 0x32a   :  { %v3053_v21 = vmul.f32 %v4566_v49, %v3017_v45  ;;  %v2957_v59 = vadd.f32 -1.4531521, %v2921_v20 }
 0x32b   :  { %v3149_v6 = vadd.f32 0.2548296, %v3113_v34  ;;  %v3114_v30 = vmul.f32 %v4564_v2, %v3078_v29  ;;  %v3018_v60 = vadd.f32 1.4214138, %v2982_v63  ;;  %v4576_v19 = vpop.eup %4575 }
 0x32c   :  { %v3089_v46 = vadd.f32 -0.28449672, %v3053_v21  ;;  %v2993_v7 = vmul.f32 %v6535_v8, %v2957_v59  ;;  %v2922_v50 = vmul.f32 1.0614054, %v4576_v19  ;;  %v4578_v9 = vpop.eup %4577 }
 0x32d   :  { %v3185_v18 = vmul.f32 %v4562_v22, %v3149_v6  ;;  %v3150_v58 = vadd.f32 0.2548296, %v3114_v30  ;;  %v3351_v22 = vmul.f32 1.442695, %v3281_v14  ;;  %v3054_v23 = vmul.f32 %v6531_v24, %v3018_v60 }
 0x32e   :  { %v3125_v5 = vmul.f32 %v4566_v49, %v3089_v46  ;;  %v3029_v26 = vadd.f32 1.4214138, %v2993_v7  ;;  %v2958_v34 = vadd.f32 -1.4531521, %v2922_v50  ;;  %v2597_v7 = vmul.f32 0.5, %v6508_v10 }
 0x32f   :  { %v3365_v42 = vmul.f32 %v4570_v40, %v3185_v18  ;;  %v3186_v39 = vmul.f32 %v4564_v2, %v3150_v58  ;;  %v2682_v2 = vsel %vm2646_vm0, 1.0, %v4587_v55  ;;  %4581 = vpow2.f32 %v3351_v22 }
 0x330   :  { %v3161_v35 = vadd.f32 0.2548296, %v3125_v5  ;;  %v3090_v16 = vadd.f32 -0.28449672, %v3054_v23  ;;  %v3065_v43 = vmul.f32 %v6535_v8, %v3029_v26  ;;  %4583 = vpow2.f32 %v3353_v57 }
 0x331   :  { %v3401_v15 = vsub.f32 1.0, %v3365_v42  ;;  %v3366_v37 = vmul.f32 %v4574_v13, %v3186_v39  ;;  %v2994_v32 = vmul.f32 %v4576_v19, %v2958_v34  ;;  %v2705_v5 = vsel %vm2669_vm3, 1.0, %v4587_v55 }
 0x332   :  { %v3197_v61 = vmul.f32 %v4566_v49, %v3161_v35  ;;  %v3126_v51 = vmul.f32 %v6531_v24, %v3090_v16  ;;  %v3101_v4 = vadd.f32 -0.28449672, %v3065_v43  ;;  %v4580_v49 = vpop.eup %4579 }
 0x333   :  { %v3437_v25 = vmul.f32 %v3401_v15, %v2681_v56  ;;  %v3402_v41 = vsub.f32 1.0, %v3366_v37  ;;  %v3030_v45 = vadd.f32 1.4214138, %v2994_v32  ;;  %v2586_v15 = vmul.f32 0.5, %v6497_v11 }
 0x334   :  { %v3377_v54 = vmul.f32 %v4578_v9, %v3197_v61  ;;  %v3162_v29 = vadd.f32 0.2548296, %v3126_v51  ;;  %v3137_v18 = vmul.f32 %v6535_v8, %v3101_v4  ;;  %v2706_v11 = vsel %vm2670_vm4, 1.0, %v4587_v55 }
 0x335   :  { %v3473_v12 = vadd.f32 1.0, %v3437_v25  ;;  %v3438_v31 = vmul.f32 %v3402_v41, %v2682_v2  ;;  %v3066_v40 = vmul.f32 %v4576_v19, %v3030_v45 }
 0x336   :  { %v3413_v30 = vsub.f32 1.0, %v3377_v54  ;;  %v3198_v48 = vmul.f32 %v6531_v24, %v3162_v29  ;;  %v3173_v0 = vadd.f32 0.2548296, %v3137_v18  ;;  %v2694_v24 = vsel %vm2658_vm2, 1.0, %v4587_v55 }
 0x337   :  { %v3474_v27 = vadd.f32 1.0, %v3438_v31  ;;  %v3509_v6 = vmul.f32 %v3473_v12, %v2573_v52  ;;  %v3102_v21 = vadd.f32 -0.28449672, %v3066_v40 }
 0x338   :  { %v3449_v28 = vmul.f32 %v3413_v30, %v2693_v53  ;;  %v3378_v33 = vmul.f32 %v4580_v49, %v3198_v48  ;;  %v3209_v42 = vmul.f32 %v6535_v8, %v3173_v0 }
 0x339   :  { %v3510_v44 = vmul.f32 %v3474_v27, %v2574_v3  ;;  %v3138_v13 = vmul.f32 %v4576_v19, %v3102_v21 }
 0x33a   :  { %v3414_v58 = vsub.f32 1.0, %v3378_v33  ;;  %v3485_v39 = vadd.f32 1.0, %v3449_v28 }
 0x33b   :  { %v3988_v14 = vpack.c.bf16 %v3510_v44, %v3509_v6  ;;  %v3174_v17 = vadd.f32 0.2548296, %v3138_v13 }
 0x33c   :  { %v4582_v63 = vpop.eup %4581  ;;  %v3450_v20 = vmul.f32 %v3414_v58, %v2694_v24  ;;  %v3521_v56 = vmul.f32 %v3485_v39, %v2585_v1 }
 0x33d   :  { %3660 = vst [vmem:[%s6581_s5 + $0x28] sm:$0xff] %v3988_v14  ;;  %v3389_v22 = vmul.f32 %v4582_v63, %v3209_v42  ;;  %v4584_v59 = vpop.eup %4583  ;;  %v3210_v25 = vmul.f32 %v4576_v19, %v3174_v17  ;;  %v2598_v19 = vmul.f32 0.5, %v6518_v62 }
 0x33e   :  { %v3486_v46 = vadd.f32 1.0, %v3450_v20 }
 0x33f   :  { %v3425_v60 = vsub.f32 1.0, %v3389_v22  ;;  %v3390_v2 = vmul.f32 %v4584_v59, %v3210_v25 }
 0x340   :  { %v3522_v37 = vmul.f32 %v3486_v46, %v2586_v15 }
 0x341   :  { %v3461_v23 = vmul.f32 %v3425_v60, %v2705_v5  ;;  %v3426_v36 = vsub.f32 1.0, %v3390_v2 }
 0x342   :  { %v3994_v8 = vpack.c.bf16 %v3522_v37, %v3521_v56 }
 0x343   :  { %v3497_v47 = vadd.f32 1.0, %v3461_v23  ;;  %v3462_v41 = vmul.f32 %v3426_v36, %v2706_v11 }
 0x344   :  { %3666 = vst [vmem:[%s6581_s5 + $0x58] sm:$0xff] %v3994_v8 }
 0x345   :  { %v3498_v35 = vadd.f32 1.0, %v3462_v41  ;;  %v3533_v16 = vmul.f32 %v3497_v47, %v2597_v7 }
 0x347   :  { %v3534_v57 = vmul.f32 %v3498_v35, %v2598_v19 }
 0x349   :  { %v4000_v12 = vpack.c.bf16 %v3534_v57, %v3533_v16 }
 0x34b   :  { %3672 = vst [vmem:[%s6581_s5 + $0x88] sm:$0x33] %v4000_v12 }

</bundles_post_ra>
